<compile_context>
chip_gen: v5e
topology: v5e:2x2
jax: 0.10.0
libtpu: 0.0.40
codegen_flags: <defaults>
</compile_context>

<pallas_src>
import numpy as np
import jax
import jax.numpy as jnp
from jax.experimental import pallas as pl
from jax.experimental.pallas import tpu as pltpu


# --------------------------------------------------------------------------- #
# Kernel
# --------------------------------------------------------------------------- #
def _make_window_attention_kernel(num_heads, scale, has_mask_in):
    """Builds the fused window-attention kernel (one tile = `bw` whole windows)."""

    def kernel(x_ref, wqkv_ref, bqkv_ref, wo_ref, bo_ref, bias_ref, *rest):
        if has_mask_in:
            mi_ref, o_ref = rest
        else:
            (o_ref,) = rest

        bw, N, C = x_ref.shape
        H = num_heads
        Dh = C // H
        cdt = x_ref.dtype  # MXU operand dtype (bf16 stays bf16 - no upcast)

        # ---- fused qkv projection: one (bw*N, C) x (C, 3C) matmul, f32 acc ----
        x2 = x_ref[...].reshape(bw * N, C)
        qkv = jnp.dot(x2, wqkv_ref[...], preferred_element_type=jnp.float32) \
            + bqkv_ref[...].astype(jnp.float32)                     # (bw*N, 3C)
        q = qkv[:, 0:C] * scale          # PyTorch: q = q * self.scale (f32)
        k = qkv[:, C:2 * C]
        v = qkv[:, 2 * C:3 * C]

        bias = bias_ref[...].astype(jnp.float32)     # (1 or bw, H, N, N)
        if has_mask_in:
            mi_zero = (mi_ref[...] == 0)             # (bw, N, N), hoisted

        # ---- per-head attention (H small -> unrolled Python loop) ----
        heads = []
        for h in range(H):
            sl = slice(h * Dh, (h + 1) * Dh)
            qh = q[:, sl].astype(cdt).reshape(bw, N, Dh)
            kh = k[:, sl].astype(cdt).reshape(bw, N, Dh)
            vh = v[:, sl].astype(cdt).reshape(bw, N, Dh)

            s = jnp.einsum('bnd,bmd->bnm', qh, kh,
                           preferred_element_type=jnp.float32)       # (bw, N, N)
            s = s + bias[:, h]                                        # rel-pos bias (+ window mask)
            if has_mask_in:
                s = jnp.where(mi_zero, -1e10, s)                      # masked_fill(mask_in==0, -1e10)

            # numerically-stable softmax with deferred normalisation
            s = s - jnp.max(s, axis=-1, keepdims=True)
            p = jnp.exp(s)
            denom = jnp.sum(p, axis=-1, keepdims=True)                # (bw, N, 1)

            oh = jnp.einsum('bnm,bmd->bnd', p.astype(cdt), vh,
                            preferred_element_type=jnp.float32)       # (bw, N, Dh)
            oh = oh * pl.reciprocal(denom, approx=True)               # normalise on EUP
            heads.append(oh.reshape(bw * N, Dh))

        # ---- concat heads -> single proj matmul with full-C contraction ----
        o_cat = jnp.concatenate(heads, axis=-1).astype(cdt)           # (bw*N, C)
        o = jnp.dot(o_cat, wo_ref[...], preferred_element_type=jnp.float32) \
            + bo_ref[...].astype(jnp.float32)
        o_ref[...] = o.reshape(bw, N, C).astype(o_ref.dtype)

    return kernel


# --------------------------------------------------------------------------- #
# Wrapper
# --------------------------------------------------------------------------- #
def _largest_divisor_leq(n, upper):
    upper = max(1, min(n, upper))
    for d in range(upper, 0, -1):
        if n % d == 0:
            return d
    return 1


def window_attention_pallas(x, params, mask=None, mask_in=None, *, target_rows=512):
    """Swin WindowAttention forward.

    x:       (num_windows*B, N, C)
    mask:    optional (nW, N, N) additive shifted-window mask (0 / -inf style)
    mask_in: optional (num_windows*B, N, N); entries with mask_in == 0 are filled
             with -1e10 (only applied when `mask` is given, as in PyTorch).
    """
    B_, N, C = x.shape
    H = int(params["num_heads"])
    scale = float(params["scale"])
    assert C % H == 0

    # Relative-position-bias gather (parameter preprocessing, outside the kernel).
    table = params["rel_bias_table"]                      # ((2Wh-1)*(2Ww-1), H)
    rel_index = params["rel_index"].reshape(-1)           # (N*N,)
    rel_bias = table[rel_index].reshape(N, N, H).transpose(2, 0, 1)  # (H, N, N)

    if mask is not None:
        nW = mask.shape[0]
        assert B_ % nW == 0, "B_ must be a multiple of the number of windows"
        # Fold the shifted-window mask into a per-window additive bias.
        bias = rel_bias[None] + mask[:, None].astype(rel_bias.dtype)  # (nW, H, N, N)
    else:
        nW = 1
        bias = rel_bias[None]                                         # (1, H, N, N)

    has_mask_in = (mask is not None) and (mask_in is not None)

    # ---- tile selection: `bw` whole windows per grid step -> bw*N MXU rows ----
    bw = max(1, min(target_rows // max(N, 1), B_))
    if B_ >= 2:
        bw = min(bw, max(1, B_ // 2))       # keep >= 2 grid steps (megacore / 2 TCs)
    if mask is not None:
        bw = _largest_divisor_leq(nW, bw)   # tiles must align with per-window masks
        n_inner = nW // bw
        n_outer = B_ // (bw * n_inner)
    else:
        bw = _largest_divisor_leq(B_, bw)   # no partial tiles
        n_inner = 1
        n_outer = B_ // bw
    grid = (n_outer, n_inner)

    bqkv = params["bqkv"].reshape(1, 3 * C)
    bo = params["bo"].reshape(1, C)

    def tok_map(b, w):
        return (b * n_inner + w, 0, 0)

    wqkv_spec = pl.BlockSpec((C, 3 * C), lambda b, w: (0, 0))   # resident weights
    bqkv_spec = pl.BlockSpec((1, 3 * C), lambda b, w: (0, 0))
    wo_spec = pl.BlockSpec((C, C), lambda b, w: (0, 0))
    bo_spec = pl.BlockSpec((1, C), lambda b, w: (0, 0))
    x_spec = pl.BlockSpec((bw, N, C), tok_map)
    bias_spec = pl.BlockSpec((bw if mask is not None else 1, H, N, N),
                             lambda b, w: (w, 0, 0, 0))

    in_specs = [x_spec, wqkv_spec, bqkv_spec, wo_spec, bo_spec, bias_spec]
    inputs = [x, params["wqkv"], bqkv, params["wo"], bo, bias]
    if has_mask_in:
        in_specs.append(pl.BlockSpec((bw, N, N), tok_map))
        inputs.append(mask_in.astype(x.dtype))

    kernel = _make_window_attention_kernel(H, scale, has_mask_in)

    return pl.pallas_call(
        kernel,
        out_shape=jax.ShapeDtypeStruct((B_, N, C), x.dtype),
        grid_spec=pltpu.PrefetchScalarGridSpec(
            num_scalar_prefetch=0,
            grid=grid,
            in_specs=in_specs,
            out_specs=pl.BlockSpec((bw, N, C), tok_map),
        ),
        compiler_params=pltpu.CompilerParams(
            dimension_semantics=("parallel", "parallel"),
            vmem_limit_bytes=48 * 1024 * 1024,  # > 32 MiB scoped default, < v7x 64 MiB physical
        ),
    )(*inputs)


# --------------------------------------------------------------------------- #
# Parameters (mimic the PyTorch module) and a pure-JAX reference
# --------------------------------------------------------------------------- #
def init_window_attention_params(key, dim, window_size, num_heads, dtype=jnp.float32):
    Wh, Ww = window_size
    C = dim
    k1, k2, k3, k4, k5 = jax.random.split(key, 5)
    lim = 1.0 / (C ** 0.5)
    w_qkv = jax.random.uniform(k1, (3 * C, C), dtype, -lim, lim)  # PyTorch (out, in)
    b_qkv = jax.random.uniform(k2, (3 * C,), dtype, -lim, lim)
    w_proj = jax.random.uniform(k3, (C, C), dtype, -lim, lim)
    b_proj = jax.random.uniform(k4, (C,), dtype, -lim, lim)
    n_rel = (2 * Wh - 1) * (2 * Ww - 1)
    table = (0.02 * jax.random.truncated_normal(k5, -2.0, 2.0, (n_rel, num_heads))).astype(dtype)

    # relative_position_index exactly as in the PyTorch __init__
    coords = np.stack(np.meshgrid(np.arange(Wh), np.arange(Ww), indexing="ij"))  # (2, Wh, Ww)
    coords_flatten = coords.reshape(2, -1)                                       # (2, N)
    rel = coords_flatten[:, :, None] - coords_flatten[:, None, :]                # (2, N, N)
    rel = rel.transpose(1, 2, 0).copy()                                          # (N, N, 2)
    rel[:, :, 0] += Wh - 1
    rel[:, :, 1] += Ww - 1
    rel[:, :, 0] *= 2 * Ww - 1
    rel_index = rel.sum(-1)                                                      # (N, N)

    return dict(
        num_heads=num_heads,
        scale=(C // num_heads) ** (-0.5),
        wqkv=w_qkv.T,                 # (C, 3C): columns [0:C]=q, [C:2C]=k, [2C:3C]=v
        bqkv=b_qkv,                   # (3C,)
        wo=w_proj.T, bo=b_proj,
        rel_bias_table=table,
        rel_index=jnp.asarray(rel_index, dtype=jnp.int32),
    )


def window_attention_ref(x, params, mask=None, mask_in=None):
    B_, N, C = x.shape
    H = int(params["num_heads"])
    Dh = C // H
    scale = float(params["scale"])
    table = params["rel_bias_table"]
    rel_index = params["rel_index"].reshape(-1)
    rel_bias = table[rel_index].reshape(N, N, H).transpose(2, 0, 1)

    qkv = x @ params["wqkv"] + params["bqkv"]            # (B_, N, 3C)
    q, k, v = jnp.split(qkv, 3, axis=-1)
    q = q.reshape(B_, N, H, Dh).transpose(0, 2, 1, 3) * scale
    k = k.reshape(B_, N, H, Dh).transpose(0, 2, 1, 3)
    v = v.reshape(B_, N, H, Dh).transpose(0, 2, 1, 3)
    attn = jnp.einsum('bhnd,bhmd->bhnm', q, k) + rel_bias[None]
    if mask is not None:
        nW = mask.shape[0]
        attn = attn.reshape(B_ // nW, nW, H, N, N) + mask[None, :, None]
        attn = attn.reshape(B_, H, N, N)
        if mask_in is not None:
            attn = jnp.where(mask_in[:, None] == 0, -1e10, attn)
    attn = jax.nn.softmax(attn, axis=-1)
    out = jnp.einsum('bhnm,bhmd->bhnd', attn, v).transpose(0, 2, 1, 3).reshape(B_, N, C)
    return out @ params["wo"] + params["bo"]


# --------------------------------------------------------------------------- #
# Demo / self-check
# --------------------------------------------------------------------------- #
if __name__ == "__main__":
    key = jax.random.PRNGKey(0)
    kx, kp = jax.random.split(key)

    # Small but lane-friendly shapes: dim=128 (multiple of 128 -> dense vregs),
    # 8x8 window -> N=64, 4 heads -> head_dim=32, B=2 images x nW=4 windows.
    dim, window_size, num_heads = 128, (8, 8), 4
    B, nW = 2, 4
    N = window_size[0] * window_size[1]
    B_ = B * nW

    params = init_window_attention_params(kp, dim, window_size, num_heads)
    x = jax.random.normal(kx, (B_, N, dim), dtype=jnp.float32)

    # --- path 1: mask=None (regular W-MSA) ---
    y = jax.block_until_ready(window_attention_pallas(x, params))
    y_ref = window_attention_ref(x, params)
    assert y.shape == (B_, N, dim)
    err = float(jnp.max(jnp.abs(y - y_ref)))
    assert err < 2e-2, f"mask=None mismatch: max abs err {err}"

    # --- path 2: shifted-window mask + mask_in (SW-MSA) ---
    grp = jnp.arange(N) // (N // 2)
    blocky = jnp.where(grp[:, None] == grp[None, :], 0.0, -100.0).astype(jnp.float32)
    mask = jnp.stack([jnp.zeros((N, N), jnp.float32), blocky,
                      blocky, jnp.zeros((N, N), jnp.float32)])        # (nW, N, N)
    mask_in = jnp.ones((B_, N, N), jnp.float32).at[:, :, N - 8:].set(0.0)

    y2 = jax.block_until_ready(
        window_attention_pallas(x, params, mask=mask, mask_in=mask_in))
    y2_ref = window_attention_ref(x, params, mask=mask, mask_in=mask_in)
    err2 = float(jnp.max(jnp.abs(y2 - y2_ref)))
    assert err2 < 2e-2, f"masked path mismatch: max abs err {err2}"

    print("KERNEL_OK")
</pallas_src>

<mosaic_0001>
module attributes {stable_mosaic.version = 11 : i64} {
  func.func @kernel(%arg0: i32, %arg1: i32, %arg2: memref<4x64x128xf32, #tpu.memory_space<vmem>>, %arg3: memref<128x384xf32, #tpu.memory_space<vmem>>, %arg4: memref<1x384xf32, #tpu.memory_space<vmem>>, %arg5: memref<128x128xf32, #tpu.memory_space<vmem>>, %arg6: memref<1x128xf32, #tpu.memory_space<vmem>>, %arg7: memref<1x4x64x64xf32, #tpu.memory_space<vmem>>, %arg8: memref<4x64x128xf32, #tpu.memory_space<vmem>>) attributes {dimension_semantics = [#tpu.dimension_semantics<parallel>, #tpu.dimension_semantics<parallel>], iteration_bounds = array<i64: 2, 1>, scalar_prefetch = 0 : i64, scratch_operands = 0 : i64, tpu.core_type = #tpu.core_type<tc>, window_params = [{transform_indices = @transform_0, window_bounds = array<i64: 4, 64, 128>}, {pipeline_mode = #tpu.pipeline_mode<synchronous>, transform_indices = @transform_1, window_bounds = array<i64: 128, 384>}, {pipeline_mode = #tpu.pipeline_mode<synchronous>, transform_indices = @transform_2, window_bounds = array<i64: 1, 384>}, {pipeline_mode = #tpu.pipeline_mode<synchronous>, transform_indices = @transform_3, window_bounds = array<i64: 128, 128>}, {pipeline_mode = #tpu.pipeline_mode<synchronous>, transform_indices = @transform_4, window_bounds = array<i64: 1, 128>}, {transform_indices = @transform_5, window_bounds = array<i64: 1, 4, 64, 64>}, {transform_indices = @transform_6, window_bounds = array<i64: 4, 64, 128>}]} {
    %c0 = arith.constant 0 : index
    %c0_0 = arith.constant 0 : index
    %c0_1 = arith.constant 0 : index
    %0 = vector.load %arg2[%c0, %c0_0, %c0_1] : memref<4x64x128xf32, #tpu.memory_space<vmem>>, vector<4x64x128xf32>
    %1 = vector.shape_cast %0 : vector<4x64x128xf32> to vector<256x128xf32>
    %c0_2 = arith.constant 0 : index
    %c0_3 = arith.constant 0 : index
    %2 = vector.load %arg3[%c0_2, %c0_3] : memref<128x384xf32, #tpu.memory_space<vmem>>, vector<128x384xf32>
    %cst = arith.constant dense<0.000000e+00> : vector<256x384xf32>
    %3 = tpu.matmul %1, %2, %cst {dimension_numbers = #tpu.dot_dimension_numbers<[1], [0], [0], [1], [0, 0, 1, 1], [], []>} : vector<256x128xf32>, vector<128x384xf32>, vector<256x384xf32> -> vector<256x384xf32>
    %c0_4 = arith.constant 0 : index
    %c0_5 = arith.constant 0 : index
    %4 = vector.load %arg4[%c0_4, %c0_5] : memref<1x384xf32, #tpu.memory_space<vmem>>, vector<1x384xf32>
    %5 = vector.broadcast %4 : vector<1x384xf32> to vector<256x384xf32>
    %6 = arith.addf %3, %5 : vector<256x384xf32>
    %7 = vector.extract_strided_slice %6 {offsets = [0, 0], sizes = [256, 128], strides = [1, 1]} : vector<256x384xf32> to vector<256x128xf32>
    %cst_6 = arith.constant 0.176776692 : f32
    %8 = vector.broadcast %cst_6 : f32 to vector<256x128xf32>
    %9 = arith.mulf %7, %8 : vector<256x128xf32>
    %10 = vector.extract_strided_slice %6 {offsets = [0, 128], sizes = [256, 128], strides = [1, 1]} : vector<256x384xf32> to vector<256x128xf32>
    %11 = vector.extract_strided_slice %6 {offsets = [0, 256], sizes = [256, 128], strides = [1, 1]} : vector<256x384xf32> to vector<256x128xf32>
    %c0_7 = arith.constant 0 : index
    %c0_8 = arith.constant 0 : index
    %c0_9 = arith.constant 0 : index
    %c0_10 = arith.constant 0 : index
    %12 = vector.load %arg7[%c0_7, %c0_8, %c0_9, %c0_10] : memref<1x4x64x64xf32, #tpu.memory_space<vmem>>, vector<1x4x64x64xf32>
    %13 = vector.extract_strided_slice %9 {offsets = [0, 0], sizes = [256, 32], strides = [1, 1]} : vector<256x128xf32> to vector<256x32xf32>
    %14 = vector.shape_cast %13 : vector<256x32xf32> to vector<4x64x32xf32>
    %15 = vector.extract_strided_slice %10 {offsets = [0, 0], sizes = [256, 32], strides = [1, 1]} : vector<256x128xf32> to vector<256x32xf32>
    %16 = vector.shape_cast %15 : vector<256x32xf32> to vector<4x64x32xf32>
    %17 = vector.extract_strided_slice %11 {offsets = [0, 0], sizes = [256, 32], strides = [1, 1]} : vector<256x128xf32> to vector<256x32xf32>
    %18 = vector.shape_cast %17 : vector<256x32xf32> to vector<4x64x32xf32>
    "tpu.trace_start"() <{level = 10 : i32, message = "bnd,bmd->bnm"}> : () -> ()
    %cst_11 = arith.constant dense<0.000000e+00> : vector<4x64x64xf32>
    %19 = tpu.matmul %14, %16, %cst_11 {dimension_numbers = #tpu.dot_dimension_numbers<[2], [2], [1], [1], [0, 0, 0, 1, 1, 1], [0], [0]>} : vector<4x64x32xf32>, vector<4x64x32xf32>, vector<4x64x64xf32> -> vector<4x64x64xf32>
    "tpu.trace_stop"() : () -> ()
    %20 = vector.extract_strided_slice %12 {offsets = [0, 0, 0, 0], sizes = [1, 1, 64, 64], strides = [1, 1, 1, 1]} : vector<1x4x64x64xf32> to vector<1x1x64x64xf32>
    %21 = vector.shape_cast %20 : vector<1x1x64x64xf32> to vector<1x64x64xf32>
    %22 = vector.broadcast %21 : vector<1x64x64xf32> to vector<4x64x64xf32>
    %23 = arith.addf %19, %22 : vector<4x64x64xf32>
    %cst_12 = arith.constant dense<0xFF800000> : vector<4x64xf32>
    %24 = vector.multi_reduction <maximumf>, %23, %cst_12 [2] : vector<4x64x64xf32> to vector<4x64xf32>
    %25 = vector.shape_cast %24 : vector<4x64xf32> to vector<4x64x1xf32>
    %26 = vector.broadcast %25 : vector<4x64x1xf32> to vector<4x64x64xf32>
    %27 = arith.subf %23, %26 : vector<4x64x64xf32>
    %28 = math.exp %27 : vector<4x64x64xf32>
    %cst_13 = arith.constant dense<0.000000e+00> : vector<4x64xf32>
    %29 = vector.multi_reduction <add>, %28, %cst_13 [2] : vector<4x64x64xf32> to vector<4x64xf32>
    %30 = vector.shape_cast %29 : vector<4x64xf32> to vector<4x64x1xf32>
    "tpu.trace_start"() <{level = 10 : i32, message = "bnm,bmd->bnd"}> : () -> ()
    %cst_14 = arith.constant dense<0.000000e+00> : vector<4x64x32xf32>
    %31 = tpu.matmul %28, %18, %cst_14 {dimension_numbers = #tpu.dot_dimension_numbers<[2], [1], [1], [2], [0, 0, 0, 1, 1, 2], [0], [0]>} : vector<4x64x64xf32>, vector<4x64x32xf32>, vector<4x64x32xf32> -> vector<4x64x32xf32>
    "tpu.trace_stop"() : () -> ()
    %32 = tpu.reciprocal %30 {approx = true} : vector<4x64x1xf32> -> vector<4x64x1xf32>
    %33 = vector.broadcast %32 : vector<4x64x1xf32> to vector<4x64x32xf32>
    %34 = arith.mulf %31, %33 : vector<4x64x32xf32>
    %35 = vector.shape_cast %34 : vector<4x64x32xf32> to vector<256x32xf32>
    %36 = vector.extract_strided_slice %9 {offsets = [0, 32], sizes = [256, 32], strides = [1, 1]} : vector<256x128xf32> to vector<256x32xf32>
    %37 = vector.shape_cast %36 : vector<256x32xf32> to vector<4x64x32xf32>
    %38 = vector.extract_strided_slice %10 {offsets = [0, 32], sizes = [256, 32], strides = [1, 1]} : vector<256x128xf32> to vector<256x32xf32>
    %39 = vector.shape_cast %38 : vector<256x32xf32> to vector<4x64x32xf32>
    %40 = vector.extract_strided_slice %11 {offsets = [0, 32], sizes = [256, 32], strides = [1, 1]} : vector<256x128xf32> to vector<256x32xf32>
    %41 = vector.shape_cast %40 : vector<256x32xf32> to vector<4x64x32xf32>
    "tpu.trace_start"() <{level = 10 : i32, message = "bnd,bmd->bnm"}> : () -> ()
    %cst_15 = arith.constant dense<0.000000e+00> : vector<4x64x64xf32>
    %42 = tpu.matmul %37, %39, %cst_15 {dimension_numbers = #tpu.dot_dimension_numbers<[2], [2], [1], [1], [0, 0, 0, 1, 1, 1], [0], [0]>} : vector<4x64x32xf32>, vector<4x64x32xf32>, vector<4x64x64xf32> -> vector<4x64x64xf32>
    "tpu.trace_stop"() : () -> ()
    %43 = vector.extract_strided_slice %12 {offsets = [0, 1, 0, 0], sizes = [1, 1, 64, 64], strides = [1, 1, 1, 1]} : vector<1x4x64x64xf32> to vector<1x1x64x64xf32>
    %44 = vector.shape_cast %43 : vector<1x1x64x64xf32> to vector<1x64x64xf32>
    %45 = vector.broadcast %44 : vector<1x64x64xf32> to vector<4x64x64xf32>
    %46 = arith.addf %42, %45 : vector<4x64x64xf32>
    %cst_16 = arith.constant dense<0xFF800000> : vector<4x64xf32>
    %47 = vector.multi_reduction <maximumf>, %46, %cst_16 [2] : vector<4x64x64xf32> to vector<4x64xf32>
    %48 = vector.shape_cast %47 : vector<4x64xf32> to vector<4x64x1xf32>
    %49 = vector.broadcast %48 : vector<4x64x1xf32> to vector<4x64x64xf32>
    %50 = arith.subf %46, %49 : vector<4x64x64xf32>
    %51 = math.exp %50 : vector<4x64x64xf32>
    %cst_17 = arith.constant dense<0.000000e+00> : vector<4x64xf32>
    %52 = vector.multi_reduction <add>, %51, %cst_17 [2] : vector<4x64x64xf32> to vector<4x64xf32>
    %53 = vector.shape_cast %52 : vector<4x64xf32> to vector<4x64x1xf32>
    "tpu.trace_start"() <{level = 10 : i32, message = "bnm,bmd->bnd"}> : () -> ()
    %cst_18 = arith.constant dense<0.000000e+00> : vector<4x64x32xf32>
    %54 = tpu.matmul %51, %41, %cst_18 {dimension_numbers = #tpu.dot_dimension_numbers<[2], [1], [1], [2], [0, 0, 0, 1, 1, 2], [0], [0]>} : vector<4x64x64xf32>, vector<4x64x32xf32>, vector<4x64x32xf32> -> vector<4x64x32xf32>
    "tpu.trace_stop"() : () -> ()
    %55 = tpu.reciprocal %53 {approx = true} : vector<4x64x1xf32> -> vector<4x64x1xf32>
    %56 = vector.broadcast %55 : vector<4x64x1xf32> to vector<4x64x32xf32>
    %57 = arith.mulf %54, %56 : vector<4x64x32xf32>
    %58 = vector.shape_cast %57 : vector<4x64x32xf32> to vector<256x32xf32>
    %59 = vector.extract_strided_slice %9 {offsets = [0, 64], sizes = [256, 32], strides = [1, 1]} : vector<256x128xf32> to vector<256x32xf32>
    %60 = vector.shape_cast %59 : vector<256x32xf32> to vector<4x64x32xf32>
    %61 = vector.extract_strided_slice %10 {offsets = [0, 64], sizes = [256, 32], strides = [1, 1]} : vector<256x128xf32> to vector<256x32xf32>
    %62 = vector.shape_cast %61 : vector<256x32xf32> to vector<4x64x32xf32>
    %63 = vector.extract_strided_slice %11 {offsets = [0, 64], sizes = [256, 32], strides = [1, 1]} : vector<256x128xf32> to vector<256x32xf32>
    %64 = vector.shape_cast %63 : vector<256x32xf32> to vector<4x64x32xf32>
    "tpu.trace_start"() <{level = 10 : i32, message = "bnd,bmd->bnm"}> : () -> ()
    %cst_19 = arith.constant dense<0.000000e+00> : vector<4x64x64xf32>
    %65 = tpu.matmul %60, %62, %cst_19 {dimension_numbers = #tpu.dot_dimension_numbers<[2], [2], [1], [1], [0, 0, 0, 1, 1, 1], [0], [0]>} : vector<4x64x32xf32>, vector<4x64x32xf32>, vector<4x64x64xf32> -> vector<4x64x64xf32>
    "tpu.trace_stop"() : () -> ()
    %66 = vector.extract_strided_slice %12 {offsets = [0, 2, 0, 0], sizes = [1, 1, 64, 64], strides = [1, 1, 1, 1]} : vector<1x4x64x64xf32> to vector<1x1x64x64xf32>
    %67 = vector.shape_cast %66 : vector<1x1x64x64xf32> to vector<1x64x64xf32>
    %68 = vector.broadcast %67 : vector<1x64x64xf32> to vector<4x64x64xf32>
    %69 = arith.addf %65, %68 : vector<4x64x64xf32>
    %cst_20 = arith.constant dense<0xFF800000> : vector<4x64xf32>
    %70 = vector.multi_reduction <maximumf>, %69, %cst_20 [2] : vector<4x64x64xf32> to vector<4x64xf32>
    %71 = vector.shape_cast %70 : vector<4x64xf32> to vector<4x64x1xf32>
    %72 = vector.broadcast %71 : vector<4x64x1xf32> to vector<4x64x64xf32>
    %73 = arith.subf %69, %72 : vector<4x64x64xf32>
    %74 = math.exp %73 : vector<4x64x64xf32>
    %cst_21 = arith.constant dense<0.000000e+00> : vector<4x64xf32>
    %75 = vector.multi_reduction <add>, %74, %cst_21 [2] : vector<4x64x64xf32> to vector<4x64xf32>
    %76 = vector.shape_cast %75 : vector<4x64xf32> to vector<4x64x1xf32>
    "tpu.trace_start"() <{level = 10 : i32, message = "bnm,bmd->bnd"}> : () -> ()
    %cst_22 = arith.constant dense<0.000000e+00> : vector<4x64x32xf32>
    %77 = tpu.matmul %74, %64, %cst_22 {dimension_numbers = #tpu.dot_dimension_numbers<[2], [1], [1], [2], [0, 0, 0, 1, 1, 2], [0], [0]>} : vector<4x64x64xf32>, vector<4x64x32xf32>, vector<4x64x32xf32> -> vector<4x64x32xf32>
    "tpu.trace_stop"() : () -> ()
    %78 = tpu.reciprocal %76 {approx = true} : vector<4x64x1xf32> -> vector<4x64x1xf32>
    %79 = vector.broadcast %78 : vector<4x64x1xf32> to vector<4x64x32xf32>
    %80 = arith.mulf %77, %79 : vector<4x64x32xf32>
    %81 = vector.shape_cast %80 : vector<4x64x32xf32> to vector<256x32xf32>
    %82 = vector.extract_strided_slice %9 {offsets = [0, 96], sizes = [256, 32], strides = [1, 1]} : vector<256x128xf32> to vector<256x32xf32>
    %83 = vector.shape_cast %82 : vector<256x32xf32> to vector<4x64x32xf32>
    %84 = vector.extract_strided_slice %10 {offsets = [0, 96], sizes = [256, 32], strides = [1, 1]} : vector<256x128xf32> to vector<256x32xf32>
    %85 = vector.shape_cast %84 : vector<256x32xf32> to vector<4x64x32xf32>
    %86 = vector.extract_strided_slice %11 {offsets = [0, 96], sizes = [256, 32], strides = [1, 1]} : vector<256x128xf32> to vector<256x32xf32>
    %87 = vector.shape_cast %86 : vector<256x32xf32> to vector<4x64x32xf32>
    "tpu.trace_start"() <{level = 10 : i32, message = "bnd,bmd->bnm"}> : () -> ()
    %cst_23 = arith.constant dense<0.000000e+00> : vector<4x64x64xf32>
    %88 = tpu.matmul %83, %85, %cst_23 {dimension_numbers = #tpu.dot_dimension_numbers<[2], [2], [1], [1], [0, 0, 0, 1, 1, 1], [0], [0]>} : vector<4x64x32xf32>, vector<4x64x32xf32>, vector<4x64x64xf32> -> vector<4x64x64xf32>
    "tpu.trace_stop"() : () -> ()
    %89 = vector.extract_strided_slice %12 {offsets = [0, 3, 0, 0], sizes = [1, 1, 64, 64], strides = [1, 1, 1, 1]} : vector<1x4x64x64xf32> to vector<1x1x64x64xf32>
    %90 = vector.shape_cast %89 : vector<1x1x64x64xf32> to vector<1x64x64xf32>
    %91 = vector.broadcast %90 : vector<1x64x64xf32> to vector<4x64x64xf32>
    %92 = arith.addf %88, %91 : vector<4x64x64xf32>
    %cst_24 = arith.constant dense<0xFF800000> : vector<4x64xf32>
    %93 = vector.multi_reduction <maximumf>, %92, %cst_24 [2] : vector<4x64x64xf32> to vector<4x64xf32>
    %94 = vector.shape_cast %93 : vector<4x64xf32> to vector<4x64x1xf32>
    %95 = vector.broadcast %94 : vector<4x64x1xf32> to vector<4x64x64xf32>
    %96 = arith.subf %92, %95 : vector<4x64x64xf32>
    %97 = math.exp %96 : vector<4x64x64xf32>
    %cst_25 = arith.constant dense<0.000000e+00> : vector<4x64xf32>
    %98 = vector.multi_reduction <add>, %97, %cst_25 [2] : vector<4x64x64xf32> to vector<4x64xf32>
    %99 = vector.shape_cast %98 : vector<4x64xf32> to vector<4x64x1xf32>
    "tpu.trace_start"() <{level = 10 : i32, message = "bnm,bmd->bnd"}> : () -> ()
    %cst_26 = arith.constant dense<0.000000e+00> : vector<4x64x32xf32>
    %100 = tpu.matmul %97, %87, %cst_26 {dimension_numbers = #tpu.dot_dimension_numbers<[2], [1], [1], [2], [0, 0, 0, 1, 1, 2], [0], [0]>} : vector<4x64x64xf32>, vector<4x64x32xf32>, vector<4x64x32xf32> -> vector<4x64x32xf32>
    "tpu.trace_stop"() : () -> ()
    %101 = tpu.reciprocal %99 {approx = true} : vector<4x64x1xf32> -> vector<4x64x1xf32>
    %102 = vector.broadcast %101 : vector<4x64x1xf32> to vector<4x64x32xf32>
    %103 = arith.mulf %100, %102 : vector<4x64x32xf32>
    %104 = vector.shape_cast %103 : vector<4x64x32xf32> to vector<256x32xf32>
    %105 = tpu.concatenate %35, %58, %81, %104 in 1 : vector<256x32xf32>, vector<256x32xf32>, vector<256x32xf32>, vector<256x32xf32> -> vector<256x128xf32>
    %c0_27 = arith.constant 0 : index
    %c0_28 = arith.constant 0 : index
    %106 = vector.load %arg5[%c0_27, %c0_28] : memref<128x128xf32, #tpu.memory_space<vmem>>, vector<128x128xf32>
    %cst_29 = arith.constant dense<0.000000e+00> : vector<256x128xf32>
    %107 = tpu.matmul %105, %106, %cst_29 {dimension_numbers = #tpu.dot_dimension_numbers<[1], [0], [0], [1], [0, 0, 1, 1], [], []>} : vector<256x128xf32>, vector<128x128xf32>, vector<256x128xf32> -> vector<256x128xf32>
    %c0_30 = arith.constant 0 : index
    %c0_31 = arith.constant 0 : index
    %108 = vector.load %arg6[%c0_30, %c0_31] : memref<1x128xf32, #tpu.memory_space<vmem>>, vector<1x128xf32>
    %109 = vector.broadcast %108 : vector<1x128xf32> to vector<256x128xf32>
    %110 = arith.addf %107, %109 : vector<256x128xf32>
    %111 = vector.shape_cast %110 : vector<256x128xf32> to vector<4x64x128xf32>
    %c0_32 = arith.constant 0 : index
    %c0_33 = arith.constant 0 : index
    %c0_34 = arith.constant 0 : index
    %112 = vector.load %arg8[%c0_32, %c0_33, %c0_34] : memref<4x64x128xf32, #tpu.memory_space<vmem>>, vector<4x64x128xf32>
    tpu.vector_store %arg8[%c0_32, %c0_33, %c0_34], %111 {strides = array<i32>} : memref<4x64x128xf32, #tpu.memory_space<vmem>>, vector<4x64x128xf32>,
    return
  }
  func.func @transform_0(%arg0: i32, %arg1: i32) -> (i32, i32, i32) {
    %c1_i32 = arith.constant 1 : i32
    %0 = arith.muli %arg0, %c1_i32 : i32
    %1 = arith.addi %0, %arg1 : i32
    %c0_i32 = arith.constant 0 : i32
    %c0_i32_0 = arith.constant 0 : i32
    %c0_i32_1 = arith.constant 0 : i32
    return %1, %c0_i32, %c0_i32_0 : i32, i32, i32
  }
  func.func @transform_1(%arg0: i32, %arg1: i32) -> (i32, i32) {
    %c0_i32 = arith.constant 0 : i32
    %c0_i32_0 = arith.constant 0 : i32
    %c0_i32_1 = arith.constant 0 : i32
    return %c0_i32, %c0_i32_0 : i32, i32
  }
  func.func @transform_2(%arg0: i32, %arg1: i32) -> (i32, i32) {
    %c0_i32 = arith.constant 0 : i32
    %c0_i32_0 = arith.constant 0 : i32
    %c0_i32_1 = arith.constant 0 : i32
    return %c0_i32, %c0_i32_0 : i32, i32
  }
  func.func @transform_3(%arg0: i32, %arg1: i32) -> (i32, i32) {
    %c0_i32 = arith.constant 0 : i32
    %c0_i32_0 = arith.constant 0 : i32
    %c0_i32_1 = arith.constant 0 : i32
    return %c0_i32, %c0_i32_0 : i32, i32
  }
  func.func @transform_4(%arg0: i32, %arg1: i32) -> (i32, i32) {
    %c0_i32 = arith.constant 0 : i32
    %c0_i32_0 = arith.constant 0 : i32
    %c0_i32_1 = arith.constant 0 : i32
    return %c0_i32, %c0_i32_0 : i32, i32
  }
  func.func @transform_5(%arg0: i32, %arg1: i32) -> (i32, i32, i32, i32) {
    %c0_i32 = arith.constant 0 : i32
    %c0_i32_0 = arith.constant 0 : i32
    %c0_i32_1 = arith.constant 0 : i32
    %c0_i32_2 = arith.constant 0 : i32
    return %arg1, %c0_i32, %c0_i32_0, %c0_i32_1 : i32, i32, i32, i32
  }
  func.func @transform_6(%arg0: i32, %arg1: i32) -> (i32, i32, i32) {
    %c1_i32 = arith.constant 1 : i32
    %0 = arith.muli %arg0, %c1_i32 : i32
    %1 = arith.addi %0, %arg1 : i32
    %c0_i32 = arith.constant 0 : i32
    %c0_i32_0 = arith.constant 0 : i32
    %c0_i32_1 = arith.constant 0 : i32
    return %1, %c0_i32, %c0_i32_0 : i32, i32, i32
  }
}

</mosaic_0001>

<bundles_post_ra>
// kernel: tpu_custom_call.1
= control target key start
LH: loop header
LB: loop body
LE: loop exit
PB: predicated region body
PF: predicated region fallthrough
CT: control target
= control target key end

     0   :  { %s12579_s0 = inlined_call_operand.hbm [shape: f32[8,64,128], index: 0, kind: input, shape index: {}]   ;;  %s12580_s1 = inlined_call_operand.hbm [shape: f32[128,384], index: 1, kind: input, shape index: {}]   ;;  %s12581_s2 = inlined_call_operand.hbm [shape: f32[1,384], index: 2, kind: input, shape index: {}]   ;;  %s12582_s3 = inlined_call_operand.hbm [shape: f32[128,128], index: 3, kind: input, shape index: {}]   ;;  %s12583_s4 = inlined_call_operand.vmem [shape: f32[1,128], index: 4, kind: input, shape index: {}]   ;;  %s12584_s5 = inlined_call_operand.hbm [shape: f32[1,4,64,64], index: 5, kind: input, shape index: {}]   ;;  %s12585_s6 = inlined_call_operand.hbm [shape: f32[8,64,128], index: 6, kind: output, shape index: {}]  }
   0x1   :  { %12710 = sst [smem:[#allocation193_spill]] %s12580_s1 }
   0x2   :  { %12711 = sst [smem:[#allocation194_spill]] %s12581_s2 }
   0x3   :  { %12712 = sst [smem:[#allocation195_spill]] %s12582_s3 }
   0x4   :  { %11 = vsyncpa [#allocation3], 0 }
   0x5   :  { %13 = vsyncpa [#allocation3 + $0x1], 0 }
   0x6   :  { %14 = vsyncpa [#allocation6], 0 }
   0x7   :  { %15 = vsyncpa [#allocation9], 0 }
   0x8   :  { %16 = vsyncpa [#allocation4], 0 }
   0x9   :  { %18 = vsyncpa [#allocation4 + $0x1], 0  ;;  %s7857_s21 = smov 0   ;;  %s7859_s22 = smov 0  }
   0xa   :  { %s7861_s23 = smov 0   ;;  %s7863_s24 = smov 0  }
   0xb   :  { %s7865_s25 = smov 0   ;;  %s7867_s26 = smov 0  }
   0xc LB: > { %s6030_s27 = sadd.s32 4294967295, %s7807_s26   ;;  %s6031_s28 = sadd.s32 4294967294, %s7807_s26   ;;  %s7807_s26 = sphi %s7867_s26, %s24_s26   ;;  %s7803_s25 = sphi %s7865_s25, %s13447_s25   ;;  %s7799_s24 = sphi %s7863_s24, %s13446_s24   ;;  %s7795_s23 = sphi %s7861_s23, %s13445_s23   ;;  %s7791_s22 = sphi %s7859_s22, %s13444_s22   ;;  %s7787_s21 = sphi %s7857_s21, %s13443_s21  }
   0xd   : > { %p58_p0 = scmp.ne.s32.totalorder %s7791_s22, %s7787_s21  ;;  %p7893_p1 = scmp.eq.s32.totalorder %s6030_s27, 0 }
   0xe   : > { %p200_p2 = scmp.eq.s32.totalorder %s6031_s28, 1  ;;  %p6032_p4 = scmp.ge.s32.totalorder %s7807_s26, 1 }
   0xf   : > { %p7899_p3 = por %p7893_p1, %p58_p0  ;;  %p207_p6 = scmp.lt.s32.totalorder %s7807_s26, 3 }
  0x10   : > { %p7904_p5 = por %p200_p2, %p58_p0  ;;  %s12716_s1 = sld [smem:[#allocation193_spill]] }
  0x11   : > { %p7912_p7 = pnand %p6032_p4, %p207_p6  ;;  %s7809_s12 = smov [#allocation5]  }
  0x12   : > { %s220_s13 = sshll.u32 %s7809_s12, 4  ;;  %p6037_p10 = scmp.ge.s32.totalorder %s7807_s26, 2  ;;  %s221_s13 = int_to_ptr.vmem [resolvable:$true] %s220_s13 }
  0x13   : > { %p6511_p8 = pneg %p7912_p7  ;;  %s12719_s3 = sld [smem:[#allocation195_spill]] }
  0x14   : > { %s7810_s18 = smov 384   ;;  %s7811_s19 = smov 24  }
  0x15   : > { %p7920_p9 = pnand %p6511_p8, %p7893_p1  ;;  %s7812_s20 = smov [#allocation8]  }
  0x16   : > { %s218_s10 = sshll.u32 %s12716_s1, 4  ;;  %s246_s28 = sshll.u32 %s7812_s20, 4  ;;  %s219_s10 = int_to_ptr.hbm [resolvable:$true] %s218_s10  ;;  %s247_s28 = int_to_ptr.vmem [resolvable:$true] %s246_s28 }
  0x17   : > { %6514 = dma.hbm_to_vmem [thread:$0]  (!%p7920_p9), %s219_s10, 6144, %s221_s13, [#allocation6], %s7810_s18, %s7810_s18, %s7811_s19  }
  0x18   : > { %s12586_s8 = smov 128   ;;  %s12587_s9 = smov 8  }
  0x19   : > { %s244_s17 = sshll.u32 %s12719_s3, 4  ;;  %s12720_s2 = sld [smem:[#allocation194_spill]]  ;;  %s245_s17 = int_to_ptr.hbm [resolvable:$true] %s244_s17 }
  0x1a   : > { %6520 = dma.hbm_to_vmem [thread:$0]  (!%p7920_p9), %s245_s17, 2048, %s247_s28, [#allocation9], %s12586_s8, %s12586_s8, %s12587_s9  }
  0x1b   : > { %s7815_s10 = smov [#allocation7]   ;;  %s264_s20 = sshll.u32 %s12584_s5, 4  ;;  %s265_s20 = int_to_ptr.hbm [resolvable:$true] %s264_s20 }
  0x1c   : > { %s235_s13 = sshll.u32 %s7815_s10, 4  ;;  %s7816_s17 = smov [#allocation10]   ;;  %s236_s13 = int_to_ptr.vmem [resolvable:$true] %s235_s13 }
  0x1d   : > { %s266_s28 = sshll.u32 %s7816_s17, 4  ;;  %p194_p11 = scmp.eq.s32.totalorder %s6030_s27, 1  ;;  %s267_s28 = int_to_ptr.vmem [resolvable:$true] %s266_s28 }
  0x1e   : > { %6523 = dma.hbm_to_vmem [thread:$0]  (!%p7920_p9), %s265_s20, 4096, %s267_s28, [#allocation9], %s12586_s8, %s12586_s8, %s12587_s9  }
  0x1f   : > { %s233_s16 = sshll.u32 %s12720_s2, 4  ;;  %s36_s12 = sadd.s32 1, %s7803_s25  ;;  %s234_s16 = int_to_ptr.hbm [resolvable:$true] %s233_s16 }
  0x20   : > { %6517 = dma.hbm_to_vmem [thread:$0]  (!%p7920_p9), %s234_s16, 48, %s236_s13, [#allocation6]  }
  0x21   : > { %p38_p12 = scmp.ge.s32.totalorder %s36_s12, 2  ;;  %s45_s15 = sadd.s32 1, %s7795_s23 }
  0x22   : > { %p52_p13 = scmp.ne.s32.totalorder %s7795_s23, %s7791_s22  ;;  %p53_p0 = scmp.eq.s32.totalorder %s7807_s26, 0 }
  0x23   : > { %s13449_s12 = smov (%p38_p12, %s36_s12), 0  ;;  %p6536_p4 = scmp.lt.s32.totalorder %s7807_s26, 2 }
  0x24   : > { %p7957_p2 = por %p194_p11, %p52_p13  ;;  %s42_s14 = ssub.s32 %s7803_s25, %s13449_s12 }
  0x25   : > { %s280_s10 = sand.u32 1, %s7795_s23   ;;  %p43_p6 = scmp.eq.s32.totalorder %s42_s14, 0 }
  0x26   : > { %p54_p8 = por %p53_p0, %p52_p13  ;;  %s6038_s13 = sshll.u32 %s280_s10, 8 }
  0x27   : > { %s6440_s27 = sshll.u32 %s7803_s25, 8  ;;  %s284_s8 = scalar_lea.vmem [#allocation2], %s6038_s13 }
  0x28   : > { %s7967_s18 = scalar_select %p43_p6, %s7795_s23, %s45_s15  }
  0x29   : > { %s291_s17 = scalar_lea.hbm %s12579_s0, %s6440_s27  ;;  %s294_s9 = sshll.u32 %s284_s8, 4  ;;  %s295_s9 = int_to_ptr.vmem [resolvable:$true] %s294_s9 }
  0x2a   : > { %s292_s28 = sshll.u32 %s291_s17, 4  ;;  %p6525_p9 = pnand %p6536_p4, %p54_p8  ;;  %s293_s28 = int_to_ptr.hbm [resolvable:$true] %s292_s28 }
  0x2b   : > { %s281_s1 = scalar_lea.sflag [#allocation3], %s280_s10  ;;  %s12722_s2 = smov 8  }
  0x2c   : > { %s12723_s3 = smov 128   ;;  %306 = sbr.rel (%p7912_p7) target bundleno = 3769 (0xeb9), region = 44 }
  0x2d   : > { %6527 = dma.hbm_to_vmem [thread:$0]  (!%p6525_p9), %s293_s28, 4096, %s295_s9, %s281_s1, %s12723_s3, %s12723_s3, %s12722_s2  }
  0x31   : > { %s7980_s15 = sand.u32 1, %s7791_s22  }
  0x32   : > { %s6043_s8 = sshll.u32 %s7980_s15, 8  ;;  %s309_s14 = scalar_lea.sflag [#allocation3], %s7980_s15 }
  0x33   : > { %s7986_s13 = scalar_lea.vmem [#allocation2], %s6043_s8 }
  0x34   : > { %7770 = dma.done.wait (%p7899_p3), %s309_s14, 4096  }
  0x35   : > { %7772 = vsyncadd (%p7899_p3), %s309_s14, 4294963200 }
  0x36   : > { %7774 = dma.done.wait (%p7893_p1), [#allocation6], 6192  }
  0x37   : > { %7776 = vsyncadd (%p7893_p1), [#allocation6], 4294961104 }
  0x38   : > { %7778 = dma.done.wait (%p7893_p1), [#allocation9], 6144  }
  0x39   : > { %7780 = vsyncadd (%p7893_p1), [#allocation9], 4294961152  ;;  %v443_v0 = vld [vmem:[#allocation5 + $0x168] sm:$0xff]  ;;  %v440_v1 = vld [vmem:[#allocation5 + $0x150] sm:$0xff]  ;;  %s7817_s1 = smov 64   ;;  %s7818_s2 = smov 96  }
  0x3a   : > { %454 = vmatpush.msra.mxu0 %v443_v0  ;;  %6443 = vmatpush.msra.mxu1 %v443_v0  ;;  %v437_v2 = vld [vmem:[#allocation5 + $0x138] sm:$0xff]  ;;  %v434_v3 = vld [vmem:[#allocation5 + $0x120] sm:$0xff]  ;;  %v431_v4 = vld [vmem:[#allocation5 + $0x108] sm:$0xff]  ;;  %vm857_vm0 = vcmask 261120   ;;  %vm1214_vm1 = vcmask 523264   ;;  %s7819_s3 = smov 32  }
  0x3b   : > { %6444 = vmatpush.msra.mxu2 %v443_v0  ;;  %6445 = vmatpush.msra.mxu3 %v443_v0  ;;  %v428_v5 = vld [vmem:[#allocation5 + $0xf0] sm:$0xff]  ;;  %v425_v6 = vld [vmem:[#allocation5 + $0xd8] sm:$0xff]  ;;  %v422_v7 = vld [vmem:[#allocation5 + $0xc0] sm:$0xff]  ;;  %vm5691_vm2 = vcmask 785408   ;;  %s12281_s11 = scalar_lea.vmem [#allocation11], %s6043_s8  ;;  %s6442_s9 = sshll.u32 %s7799_s24, 8 }
  0x3c   : > { %455 = vmatpush.msra.mxu0 %v440_v1  ;;  %6446 = vmatpush.msra.mxu1 %v440_v1  ;;  %v419_v8 = vld [vmem:[#allocation5 + $0xa8] sm:$0xff]  ;;  %v416_v9 = vld [vmem:[#allocation5 + $0x90] sm:$0xff]  ;;  %v413_v10 = vld [vmem:[#allocation5 + $0x78] sm:$0xff]  ;;  %s5903_s19 = scalar_lea.hbm %s12585_s6, %s6442_s9  ;;  %s5904_s20 = sshll.u32 %s12281_s11, 4  ;;  %s5905_s20 = int_to_ptr.vmem [resolvable:$true] %s5904_s20 }
  0x3d   : > { %6447 = vmatpush.msra.mxu2 %v440_v1  ;;  %6448 = vmatpush.msra.mxu3 %v440_v1  ;;  %v410_v11 = vld [vmem:[#allocation5 + $0x60] sm:$0xff]  ;;  %v407_v12 = vld [vmem:[#allocation5 + $0x48] sm:$0xff]  ;;  %v404_v13 = vld [vmem:[#allocation5 + $0x30] sm:$0xff]  ;;  %s5906_s17 = sshll.u32 %s5903_s19, 4  ;;  %s5890_s28 = scalar_lea.sflag [#allocation4], %s7980_s15  ;;  %s5907_s17 = int_to_ptr.hbm [resolvable:$true] %s5906_s17 }
  0x3e   : > { %456 = vmatpush.msra.mxu0 %v437_v2  ;;  %6449 = vmatpush.msra.mxu1 %v437_v2  ;;  %v401_v14 = vld [vmem:[#allocation5 + $0x18] sm:$0xff]  ;;  %v398_v15 = vld [vmem:[#allocation5] sm:$0xff]  ;;  %v444_v20 = vld [vmem:[#allocation5 + $0x170] sm:$0xff]  ;;  %s7731_s8 = sshra.s32 %s5907_s17, 4  ;;  %s7732_s8 = int_to_ptr.hbm [resolvable:$true] %s7731_s8 }
  0x3f   : > { %6450 = vmatpush.msra.mxu2 %v437_v2  ;;  %6451 = vmatpush.msra.mxu3 %v437_v2  ;;  %v8001_v16 = vld [vmem:[%s7986_s13] sm:$0xff]  ;;  %v441_v21 = vld [vmem:[#allocation5 + $0x158] sm:$0xff]  ;;  %v8017_v23 = vld [vmem:[%s7986_s13 + $0x48] sm:$0xff]  ;;  %s7733_s24 = scalar_lea.hbm %s7732_s8, 256  ;;  %p7738_p11 = scmp.lt.s32.totalorder %s7732_s8, %s12585_s6 }
  0x40   : > { %457 = vmatpush.msra.mxu0 %v434_v3  ;;  %6452 = vmatpush.msra.mxu1 %v434_v3  ;;  %v8004_v17 = vld [vmem:[%s7986_s13 + $0x40] sm:$0xff]  ;;  %v8020_v24 = vld [vmem:[%s7986_s13 + $0x8] sm:$0xff]  ;;  %v432_v28 = vld [vmem:[#allocation5 + $0x110] sm:$0xff]  ;;  %p7734_p1 = scmp.ne.s32.totalorder %s7732_s8, %s7733_s24 }
  0x41   : > { %6453 = vmatpush.msra.mxu2 %v434_v3  ;;  %6454 = vmatpush.msra.mxu3 %v434_v3  ;;  %v8007_v18 = vld [vmem:[%s7986_s13 + $0x80] sm:$0xff]  ;;  %v435_v25 = vld [vmem:[#allocation5 + $0x128] sm:$0xff]  ;;  %v445_v29 = vld [vmem:[#allocation5 + $0x178] sm:$0xff] }
  0x42   : > { %458 = vmatpush.msra.mxu0 %v431_v4  ;;  %6455 = vmatpush.msra.mxu1 %v431_v4  ;;  %v8010_v19 = vld [vmem:[%s7986_s13 + $0xc0] sm:$0xff]  ;;  %v8023_v26 = vld [vmem:[%s7986_s13 + $0x88] sm:$0xff]  ;;  %v429_v30 = vld [vmem:[#allocation5 + $0xf8] sm:$0xff]  ;;  %p7735_p3 = pnand %p7734_p1, %p7957_p2 }
  0x43   : > { %6456 = vmatpush.msra.mxu2 %v431_v4  ;;  %6457 = vmatpush.msra.mxu3 %v431_v4  ;;  %v438_v22 = vld [vmem:[#allocation5 + $0x140] sm:$0xff]  ;;  %v8026_v27 = vld [vmem:[%s7986_s13 + $0xc8] sm:$0xff]  ;;  %v8033_v33 = vld [vmem:[%s7986_s13 + $0x50] sm:$0xff] }
  0x44   : > { %459 = vmatpush.msra.mxu0 %v428_v5  ;;  %6458 = vmatpush.msra.mxu1 %v428_v5  ;;  %v442_v31 = vld [vmem:[#allocation5 + $0x160] sm:$0xff]  ;;  %v8036_v34 = vld [vmem:[%s7986_s13 + $0x10] sm:$0xff]  ;;  %v423_v35 = vld [vmem:[#allocation5 + $0xc8] sm:$0xff]  ;;  %p7736_p7 = pneg %p7735_p3 }
  0x45   : > { %6459 = vmatpush.msra.mxu2 %v428_v5  ;;  %6460 = vmatpush.msra.mxu3 %v428_v5  ;;  %v426_v32 = vld [vmem:[#allocation5 + $0xe0] sm:$0xff]  ;;  %v8039_v36 = vld [vmem:[%s7986_s13 + $0x90] sm:$0xff]  ;;  %v439_v39 = vld [vmem:[#allocation5 + $0x148] sm:$0xff] }
  0x46   : > { %460 = vmatpush.msra.mxu0 %v425_v6  ;;  %6461 = vmatpush.msra.mxu1 %v425_v6  ;;  %v8042_v37 = vld [vmem:[%s7986_s13 + $0xd0] sm:$0xff]  ;;  %v417_v41 = vld [vmem:[#allocation5 + $0x98] sm:$0xff]  ;;  %v414_v43 = vld [vmem:[#allocation5 + $0x80] sm:$0xff] }
  0x47   : > { %6462 = vmatpush.msra.mxu2 %v425_v6  ;;  %6463 = vmatpush.msra.mxu3 %v425_v6  ;;  %v420_v38 = vld [vmem:[#allocation5 + $0xb0] sm:$0xff]  ;;  %v433_v42 = vld [vmem:[#allocation5 + $0x118] sm:$0xff]  ;;  %v430_v44 = vld [vmem:[#allocation5 + $0x100] sm:$0xff] }
  0x48   : > { %461 = vmatpush.msra.mxu0 %v422_v7  ;;  %6464 = vmatpush.msra.mxu1 %v422_v7  ;;  %v436_v40 = vld [vmem:[#allocation5 + $0x130] sm:$0xff]  ;;  %v8049_v45 = vld [vmem:[%s7986_s13 + $0x58] sm:$0xff]  ;;  %v411_v46 = vld [vmem:[#allocation5 + $0x68] sm:$0xff] }
  0x49   : > { %6465 = vmatpush.msra.mxu2 %v422_v7  ;;  %6466 = vmatpush.msra.mxu3 %v422_v7  ;;  %v8052_v47 = vld [vmem:[%s7986_s13 + $0x98] sm:$0xff]  ;;  %v408_v48 = vld [vmem:[#allocation5 + $0x50] sm:$0xff]  ;;  %v427_v49 = vld [vmem:[#allocation5 + $0xe8] sm:$0xff] }
  0x4a   : > { %462 = vmatpush.msra.mxu0 %v419_v8  ;;  %6467 = vmatpush.msra.mxu1 %v419_v8  ;;  %v424_v50 = vld [vmem:[#allocation5 + $0xd0] sm:$0xff]  ;;  %v405_v51 = vld [vmem:[#allocation5 + $0x38] sm:$0xff]  ;;  %v402_v54 = vld [vmem:[#allocation5 + $0x20] sm:$0xff] }
  0x4b   : > { %6468 = vmatpush.msra.mxu2 %v419_v8  ;;  %6469 = vmatpush.msra.mxu3 %v419_v8  ;;  %v421_v52 = vld [vmem:[#allocation5 + $0xb8] sm:$0xff]  ;;  %v418_v55 = vld [vmem:[#allocation5 + $0xa0] sm:$0xff]  ;;  %v399_v57 = vld [vmem:[#allocation5 + $0x8] sm:$0xff] }
  0x4c   : > { %463 = vmatpush.msra.mxu0 %v416_v9  ;;  %6470 = vmatpush.msra.mxu1 %v416_v9  ;;  %v369_v53 = vld [vmem:[%s7986_s13 + $0x18] sm:$0xff]  ;;  %v8058_v56 = vld [vmem:[%s7986_s13 + $0x60] sm:$0xff]  ;;  %v415_v59 = vld [vmem:[#allocation5 + $0x88] sm:$0xff] }
  0x4d   : > { %6471 = vmatpush.msra.mxu2 %v416_v9  ;;  %6472 = vmatpush.msra.mxu3 %v416_v9  ;;  %v8061_v58 = vld [vmem:[%s7986_s13 + $0xa0] sm:$0xff]  ;;  %v412_v60 = vld [vmem:[#allocation5 + $0x70] sm:$0xff]  ;;  %v409_v61 = vld [vmem:[#allocation5 + $0x58] sm:$0xff] }
  0x4e   : > { %464 = vmatpush.msra.mxu0 %v413_v10  ;;  %6473 = vmatpush.msra.mxu1 %v413_v10  ;;  %v406_v62 = vld [vmem:[#allocation5 + $0x40] sm:$0xff]  ;;  %v8066_v63 = vld [vmem:[%s7986_s13 + $0x68] sm:$0xff]  ;;  %v8073_v2 = vld [vmem:[%s7986_s13 + $0xd8] sm:$0xff] }
  0x4f   : > { %6474 = vmatpush.msra.mxu2 %v413_v10  ;;  %6475 = vmatpush.msra.mxu3 %v413_v10  ;;  %v8069_v0 = vld [vmem:[%s7986_s13 + $0xa8] sm:$0xff]  ;;  %v400_v3 = vld [vmem:[#allocation5 + $0x10] sm:$0xff]  ;;  %v370_v4 = vld [vmem:[%s7986_s13 + $0x20] sm:$0xff] }
  0x50   : > { %465 = vmatpush.msra.mxu0 %v410_v11  ;;  %6476 = vmatpush.msra.mxu1 %v410_v11  ;;  %v403_v1 = vld [vmem:[#allocation5 + $0x28] sm:$0xff]  ;;  %v8079_v5 = vld [vmem:[%s7986_s13 + $0x70] sm:$0xff]  ;;  %v8087_v7 = vld [vmem:[%s7986_s13 + $0x78] sm:$0xff] }
  0x51   : > { %6477 = vmatpush.msra.mxu2 %v410_v11  ;;  %6478 = vmatpush.msra.mxu3 %v410_v11  ;;  %v8082_v6 = vld [vmem:[%s7986_s13 + $0xb0] sm:$0xff]  ;;  %v8090_v8 = vld [vmem:[%s7986_s13 + $0xb8] sm:$0xff]  ;;  %v8094_v9 = vld [vmem:[%s7986_s13 + $0xe0] sm:$0xff] }
  0x52   : > { %466 = vmatpush.msra.mxu0 %v407_v12  ;;  %6479 = vmatpush.msra.mxu1 %v407_v12  ;;  %v371_v10 = vld [vmem:[%s7986_s13 + $0x28] sm:$0xff] }
  0x53   : > { %6480 = vmatpush.msra.mxu2 %v407_v12  ;;  %6481 = vmatpush.msra.mxu3 %v407_v12  ;;  %v8103_v11 = vld [vmem:[%s7986_s13 + $0xe8] sm:$0xff]  ;;  %v372_v12 = vld [vmem:[%s7986_s13 + $0x30] sm:$0xff] }
  0x54   : > { %467 = vmatpush.msra.mxu0 %v404_v13  ;;  %6482 = vmatpush.msra.mxu1 %v404_v13 }
  0x55   : > { %6483 = vmatpush.msra.mxu2 %v404_v13  ;;  %6484 = vmatpush.msra.mxu3 %v404_v13  ;;  %v373_v13 = vld [vmem:[%s7986_s13 + $0x38] sm:$0xff] }
  0x56   : > { %468 = vmatpush.msra.mxu0 %v401_v14  ;;  %6485 = vmatpush.msra.mxu1 %v401_v14 }
  0x57   : > { %6486 = vmatpush.msra.mxu2 %v401_v14  ;;  %6487 = vmatpush.msra.mxu3 %v401_v14  ;;  %v8112_v14 = vld [vmem:[%s7986_s13 + $0xf0] sm:$0xff] }
  0x58   : > { %469 = vmatpush.msra.mxu0 %v398_v15  ;;  %6488 = vmatpush.msra.mxu1 %v398_v15 }
  0x59   : > { %470 = vmatmul.f32.vlgmr.msra.gmra.mxu0 %v8001_v16  ;;  %494 = vmatmul.f32.vlgmr.msra.gmra.mxu1 %v8004_v17 }
  0x5a   : > { %6489 = vmatpush.msra.mxu2 %v398_v15  ;;  %6490 = vmatpush.msra.mxu3 %v398_v15  ;;  %v8115_v15 = vld [vmem:[#allocation7] sm:$0x7] }
  0x5b   : > { %518 = vmatmul.f32.vlgmr.msra.gmra.mxu2 %v8007_v18  ;;  %542 = vmatmul.f32.vlgmr.msra.gmra.mxu3 %v8010_v19 }
  0x5c   : > { %567 = vmatpush.msrb.mxu1 %v444_v20  ;;  %680 = vmatpush.msrb.mxu2 %v445_v29  ;;  %v8122_v20 = vperm.slane %v8115_v15, 0 }
  0x5e   : > { %568 = vmatpush.msrb.mxu1 %v441_v21  ;;  %681 = vmatpush.msrb.mxu2 %v442_v31 }
  0x60   : > { %569 = vmatpush.msrb.mxu1 %v438_v22  ;;  %682 = vmatpush.msrb.mxu2 %v439_v39 }
  0x61   : > { %497 = vmatmul.f32.gmra.mxu1 %v8017_v23  ;;  %473 = vmatmul.f32.gmra.mxu0 %v8020_v24 }
  0x62   : > { %570 = vmatpush.msrb.mxu1 %v435_v25  ;;  %683 = vmatpush.msrb.mxu2 %v436_v40 }
  0x63   : > { %521 = vmatmul.f32.gmra.mxu2 %v8023_v26  ;;  %545 = vmatmul.f32.gmra.mxu3 %v8026_v27 }
  0x64   : > { %571 = vmatpush.msrb.mxu1 %v432_v28  ;;  %684 = vmatpush.msrb.mxu2 %v433_v42 }
  0x66   : > { %572 = vmatpush.msrb.mxu1 %v429_v30  ;;  %685 = vmatpush.msrb.mxu2 %v430_v44 }
  0x68   : > { %573 = vmatpush.msrb.mxu1 %v426_v32  ;;  %686 = vmatpush.msrb.mxu2 %v427_v49 }
  0x69   : > { %500 = vmatmul.f32.gmra.mxu1 %v8033_v33  ;;  %476 = vmatmul.f32.gmra.mxu0 %v8036_v34 }
  0x6a   : > { %574 = vmatpush.msrb.mxu1 %v423_v35  ;;  %687 = vmatpush.msrb.mxu2 %v424_v50 }
  0x6b   : > { %524 = vmatmul.f32.gmra.mxu2 %v8039_v36  ;;  %548 = vmatmul.f32.gmra.mxu3 %v8042_v37 }
  0x6c   : > { %575 = vmatpush.msrb.mxu1 %v420_v38  ;;  %688 = vmatpush.msrb.mxu2 %v421_v52 }
  0x6e   : > { %576 = vmatpush.msrb.mxu1 %v417_v41  ;;  %689 = vmatpush.msrb.mxu2 %v418_v55 }
  0x70   : > { %577 = vmatpush.msrb.mxu1 %v414_v43  ;;  %690 = vmatpush.msrb.mxu2 %v415_v59 }
  0x71   : > { %503 = vmatmul.f32.gmra.mxu1 %v8049_v45  ;;  %479 = vmatmul.f32.gmra.mxu0 %v369_v53 }
  0x72   : > { %578 = vmatpush.msrb.mxu1 %v411_v46  ;;  %691 = vmatpush.msrb.mxu2 %v412_v60 }
  0x73   : > { %527 = vmatmul.f32.gmra.mxu2 %v8052_v47  ;;  %551 = vmatmul.f32.gmra.mxu3 %v8073_v2 }
  0x74   : > { %579 = vmatpush.msrb.mxu1 %v408_v48  ;;  %692 = vmatpush.msrb.mxu2 %v409_v61 }
  0x76   : > { %580 = vmatpush.msrb.mxu1 %v405_v51  ;;  %693 = vmatpush.msrb.mxu2 %v406_v62 }
  0x78   : > { %581 = vmatpush.msrb.mxu1 %v402_v54  ;;  %694 = vmatpush.msrb.mxu2 %v403_v1 }
  0x79   : > { %506 = vmatmul.f32.gmra.mxu1 %v8058_v56  ;;  %482 = vmatmul.f32.gmra.mxu0 %v370_v4 }
  0x7a   : > { %582 = vmatpush.msrb.mxu1 %v399_v57  ;;  %695 = vmatpush.msrb.mxu2 %v400_v3 }
  0x7b   : > { %530 = vmatmul.f32.gmra.mxu2 %v8061_v58  ;;  %554 = vmatmul.f32.gmra.mxu3 %v8094_v9 }
  0x81   : > { %509 = vmatmul.f32.gmra.mxu1 %v8066_v63  ;;  %485 = vmatmul.f32.gmra.mxu0 %v371_v10 }
  0x83   : > { %533 = vmatmul.f32.gmra.mxu2 %v8069_v0  ;;  %557 = vmatmul.f32.gmra.mxu3 %v8103_v11 }
  0x89   : > { %512 = vmatmul.f32.gmra.mxu1 %v8079_v5  ;;  %488 = vmatmul.f32.gmra.mxu0 %v372_v12 }
  0x8b   : > { %536 = vmatmul.f32.gmra.mxu2 %v8082_v6  ;;  %560 = vmatmul.f32.gmra.mxu3 %v8112_v14 }
  0x91   : > { %515 = vmatmul.f32.gmra.mxu1 %v8087_v7  ;;  %491 = vmatmul.f32.gmra.mxu0 %v373_v13 }
  0x93   : > { %539 = vmatmul.f32.gmra.mxu2 %v8090_v8 }
  0x99   : > { %583 = vmatmul.f32.vlgmr.msrb.gmra.mxu1 %v8001_v16 }
  0x9b   : > { %696 = vmatmul.f32.vlgmr.msrb.gmra.mxu2 %v8001_v16  ;;  %v8118_v16 = vld [vmem:[%s7986_s13 + $0xf8] sm:$0xff] }
  0x9c   : > { %563 = vmatmul.f32.gmra.mxu3 %v8118_v16 }
  0xa1   : > { %586 = vmatmul.f32.gmra.mxu1 %v8020_v24 }
  0xa3   : > { %699 = vmatmul.f32.gmra.mxu2 %v8020_v24 }
  0xa9   : > { %589 = vmatmul.f32.gmra.mxu1 %v8036_v34 }
  0xab   : > { %702 = vmatmul.f32.gmra.mxu2 %v8036_v34 }
  0xb1   : > { %592 = vmatmul.f32.gmra.mxu1 %v369_v53 }
  0xb3   : > { %705 = vmatmul.f32.gmra.mxu2 %v369_v53 }
  0xb9   : > { %595 = vmatmul.f32.gmra.mxu1 %v370_v4 }
  0xbb   : > { %708 = vmatmul.f32.gmra.mxu2 %v370_v4 }
  0xc1   : > { %598 = vmatmul.f32.gmra.mxu1 %v371_v10 }
  0xc3   : > { %711 = vmatmul.f32.gmra.mxu2 %v371_v10 }
  0xc9   : > { %601 = vmatmul.f32.gmra.mxu1 %v372_v12 }
  0xcb   : > { %714 = vmatmul.f32.gmra.mxu2 %v372_v12 }
  0xd1   : > { %604 = vmatmul.f32.gmra.mxu1 %v373_v13 }
  0xd3   : > { %717 = vmatmul.f32.gmra.mxu2 %v373_v13 }
  0xd6   : > { %v471_v21 = vpop.f32.mrf.mxu0  ;;  %v495_v22 = vpop.f32.mrf.mxu1 }
  0xd7   : > { %v472_v24 = vadd.f32 %v471_v21, %v8122_v20  ;;  %v496_v25 = vadd.f32 %v495_v22, %v8122_v20 }
  0xd9   : > { %v8126_v28 = vmul.f32 0.17677669, %v472_v24  ;;  %v8128_v29 = vmul.f32 0.17677669, %v496_v25  ;;  %607 = vmatmul.f32.gmra.mxu1 %v8004_v17 }
  0xdb   : > { %12724 = vst [vmem:[#allocation16_spill] sm:$0xff] %v8126_v28  ;;  %3092 = vrot.lane.b32.xlu0 %v8128_v29, %s7817_s1  ;;  %2987 = vrot.lane.b32.xlu2 %v8126_v28, %s7817_s1 }
  0xdc   : > { %1827 = vrot.lane.b32.xlu1 %v8126_v28, %s7818_s2  ;;  %720 = vmatmul.f32.gmra.mxu2 %v8004_v17 }
  0xde   : > { %v498_v30 = vpop.f32.mrf.mxu1  ;;  %v519_v31 = vpop.f32.mrf.mxu2 }
  0xdf   : > { %v520_v32 = vadd.f32 %v519_v31, %v8122_v20  ;;  %v543_v34 = vpop.f32.mrf.mxu3  ;;  %v499_v40 = vadd.f32 %v498_v30, %v8122_v20  ;;  %v474_v43 = vpop.f32.mrf.mxu0 }
  0xe0   : > { %v544_v35 = vadd.f32 %v543_v34, %v8122_v20  ;;  %v475_v44 = vadd.f32 %v474_v43, %v8122_v20 }
  0xe1   : > { %v8140_v38 = vmul.f32 0.17677669, %v520_v32  ;;  %610 = vmatmul.f32.gmra.mxu1 %v8017_v23  ;;  %v8153_v42 = vmul.f32 0.17677669, %v499_v40 }
  0xe2   : > { %v8143_v39 = vmul.f32 0.17677669, %v544_v35  ;;  %v8164_v48 = vmul.f32 0.17677669, %v475_v44 }
  0xe3   : > { %12725 = vst [vmem:[#allocation17_spill] sm:$0xff] %v8140_v38  ;;  %2037 = vrot.lane.b32.xlu0 %v8140_v38, %s7818_s2 }
  0xe4   : > { %12726 = vst [vmem:[#allocation18_spill] sm:$0xff] %v8143_v39  ;;  %2142 = vrot.lane.b32.xlu2 %v8143_v39, %s7818_s2  ;;  %1932 = vrot.lane.b32.xlu1 %v8128_v29, %s7818_s2 }
  0xe5   : > { %723 = vmatmul.f32.gmra.mxu2 %v8017_v23  ;;  %12727 = vst [vmem:[#allocation19_spill] sm:$0xff] %v8153_v42 }
  0xe6   : > { %v501_v17 = vpop.f32.mrf.mxu1  ;;  %v522_v41 = vpop.f32.mrf.mxu2 }
  0xe7   : > { %v546_v49 = vpop.f32.mrf.mxu3  ;;  %v523_v51 = vadd.f32 %v522_v41, %v8122_v20  ;;  %v477_v55 = vpop.f32.mrf.mxu0  ;;  %v502_v1 = vadd.f32 %v501_v17, %v8122_v20 }
  0xe8   : > { %v547_v50 = vadd.f32 %v546_v49, %v8122_v20  ;;  %v478_v57 = vadd.f32 %v477_v55, %v8122_v20 }
  0xe9   : > { %613 = vmatmul.f32.gmra.mxu1 %v8033_v33  ;;  %v8178_v54 = vmul.f32 0.17677669, %v523_v51  ;;  %v8212_v12 = vmul.f32 0.17677669, %v502_v1 }
  0xea   : > { %v8176_v53 = vmul.f32 0.17677669, %v547_v50  ;;  %v8193_v60 = vmul.f32 0.17677669, %v478_v57 }
  0xeb   : > { %1934 = vrot.lane.b32.xlu0 %v8153_v42, %s7818_s2  ;;  %12729 = vst [vmem:[#allocation21_spill] sm:$0xff] %v8178_v54 }
  0xec   : > { %3302 = vrot.lane.b32.xlu2 %v8143_v39, %s7817_s1  ;;  %3197 = vrot.lane.b32.xlu1 %v8140_v38, %s7817_s1  ;;  %12728 = vst [vmem:[#allocation20_spill] sm:$0xff] %v8176_v53 }
  0xed   : > { %726 = vmatmul.f32.gmra.mxu2 %v8033_v33  ;;  %12731 = vst [vmem:[#allocation23_spill] sm:$0xff] %v8212_v12 }
  0xee   : > { %v504_v23 = vpop.f32.mrf.mxu1  ;;  %v525_v46 = vpop.f32.mrf.mxu2 }
  0xef   : > { %v549_v61 = vpop.f32.mrf.mxu3  ;;  %v526_v3 = vadd.f32 %v525_v46, %v8122_v20  ;;  %v480_v22 = vpop.f32.mrf.mxu0  ;;  %v505_v24 = vadd.f32 %v504_v23, %v8122_v20 }
  0xf0   : > { %v550_v62 = vadd.f32 %v549_v61, %v8122_v20 }
  0xf1   : > { %616 = vmatmul.f32.gmra.mxu1 %v8049_v45  ;;  %v8214_v13 = vmul.f32 0.17677669, %v526_v3  ;;  %v8242_v31 = vmul.f32 0.17677669, %v505_v24 }
  0xf2   : > { %v8210_v10 = vmul.f32 0.17677669, %v550_v62 }
  0xf3   : > { %2989 = vrot.lane.b32.xlu0 %v8164_v48, %s7817_s1  ;;  %12732 = vst [vmem:[#allocation24_spill] sm:$0xff] %v8214_v13 }
  0xf4   : > { %1829 = vrot.lane.b32.xlu2 %v8164_v48, %s7818_s2  ;;  %3094 = vrot.lane.b32.xlu1 %v8153_v42, %s7817_s1  ;;  %12730 = vst [vmem:[#allocation22_spill] sm:$0xff] %v8210_v10 }
  0xf5   : > { %729 = vmatmul.f32.gmra.mxu2 %v8049_v45  ;;  %12733 = vst [vmem:[#allocation25_spill] sm:$0xff] %v8242_v31 }
  0xf6   : > { %v507_v33 = vpop.f32.mrf.mxu1  ;;  %v528_v52 = vpop.f32.mrf.mxu2 }
  0xf7   : > { %v529_v34 = vadd.f32 %v528_v52, %v8122_v20  ;;  %v483_v17 = vpop.f32.mrf.mxu0  ;;  %v552_v41 = vpop.f32.mrf.mxu3  ;;  %v508_v43 = vadd.f32 %v507_v33, %v8122_v20 }
  0xf8   : > { %v553_v44 = vadd.f32 %v552_v41, %v8122_v20 }
  0xf9   : > { %619 = vmatmul.f32.gmra.mxu1 %v8058_v56  ;;  %v8259_v40 = vmul.f32 0.17677669, %v529_v34  ;;  %v8276_v49 = vmul.f32 0.17677669, %v508_v43 }
  0xfa   : > { %v8280_v51 = vmul.f32 0.17677669, %v553_v44 }
  0xfb   : > { %3304 = vrot.lane.b32.xlu0 %v8176_v53, %s7817_s1  ;;  %12734 = vst [vmem:[#allocation26_spill] sm:$0xff] %v8259_v40 }
  0xfc   : > { %2039 = vrot.lane.b32.xlu2 %v8178_v54, %s7818_s2  ;;  %2144 = vrot.lane.b32.xlu1 %v8176_v53, %s7818_s2  ;;  %12735 = vst [vmem:[#allocation27_spill] sm:$0xff] %v8276_v49 }
  0xfd   : > { %732 = vmatmul.f32.gmra.mxu2 %v8058_v56  ;;  %12736 = vst [vmem:[#allocation28_spill] sm:$0xff] %v8280_v51 }
  0xfe   : > { %v8189_v45 = vpop.f32.mrf.mxu1  ;;  %v8191_v59 = vpop.f32.mrf.mxu2 }
  0xff   : > { %v555_v52 = vpop.f32.mrf.mxu3  ;;  %v532_v57 = vadd.f32 %v8191_v59, %v8122_v20  ;;  %v511_v43 = vadd.f32 %v8189_v45, %v8122_v20 }
 0x100   : > { %v556_v55 = vadd.f32 %v555_v52, %v8122_v20 }
 0x101   : > { %622 = vmatmul.f32.gmra.mxu1 %v8066_v63  ;;  %v8313_v3 = vmul.f32 0.17677669, %v532_v57  ;;  %v8347_v57 = vmul.f32 0.17677669, %v511_v43 }
 0x102   : > { %v8311_v1 = vmul.f32 0.17677669, %v556_v55 }
 0x103   : > { %1831 = vrot.lane.b32.xlu0 %v8193_v60, %s7818_s2  ;;  %12739 = vst [vmem:[#allocation31_spill] sm:$0xff] %v8313_v3 }
 0x104   : > { %3199 = vrot.lane.b32.xlu2 %v8178_v54, %s7817_s1  ;;  %2991 = vrot.lane.b32.xlu1 %v8193_v60, %s7817_s1  ;;  %12738 = vst [vmem:[#allocation30_spill] sm:$0xff] %v8311_v1 }
 0x105   : > { %735 = vmatmul.f32.gmra.mxu2 %v8066_v63  ;;  %12743 = vst [vmem:[#allocation35_spill] sm:$0xff] %v8347_v57 }
 0x106   : > { %v8206_v56 = vpop.f32.mrf.mxu1  ;;  %v8208_v4 = vpop.f32.mrf.mxu2 }
 0x109   : > { %625 = vmatmul.f32.gmra.mxu1 %v8079_v5 }
 0x10b   : > { %2146 = vrot.lane.b32.xlu0 %v8210_v10, %s7818_s2 }
 0x10c   : > { %1936 = vrot.lane.b32.xlu2 %v8212_v12, %s7818_s2  ;;  %2041 = vrot.lane.b32.xlu1 %v8214_v13, %s7818_s2 }
 0x10d   : > { %738 = vmatmul.f32.gmra.mxu2 %v8079_v5  ;;  %v481_v5 = vadd.f32 %v480_v22, %v8122_v20  ;;  %v486_v22 = vpop.f32.mrf.mxu0 }
 0x10e   : > { %v8224_v63 = vpop.f32.mrf.mxu1  ;;  %v8226_v21 = vpop.f32.mrf.mxu2  ;;  %v487_v59 = vadd.f32 %v486_v22, %v8122_v20  ;;  %v8365_v22 = vperm.slane %v8115_v15, 2 }
 0x10f   : > { %v8244_v32 = vmul.f32 0.17677669, %v481_v5 }
 0x110   : > { %v8326_v5 = vmul.f32 0.17677669, %v487_v59 }
 0x111   : > { %628 = vmatmul.f32.gmra.mxu1 %v8087_v7 }
 0x113   : > { %3201 = vrot.lane.b32.xlu0 %v8214_v13, %s7817_s1 }
 0x114   : > { %3096 = vrot.lane.b32.xlu2 %v8212_v12, %s7817_s1  ;;  %3306 = vrot.lane.b32.xlu1 %v8210_v10, %s7817_s1 }
 0x115   : > { %741 = vmatmul.f32.gmra.mxu2 %v8087_v7 }
 0x116   : > { %v8238_v25 = vpop.f32.mrf.mxu1  ;;  %v8240_v30 = vpop.f32.mrf.mxu2 }
 0x119   : > { %631 = vmatmul.f32.gmra.mxu1 %v8007_v18 }
 0x11b   : > { %3098 = vrot.lane.b32.xlu0 %v8242_v31, %s7817_s1 }
 0x11c   : > { %1833 = vrot.lane.b32.xlu2 %v8244_v32, %s7818_s2  ;;  %1938 = vrot.lane.b32.xlu1 %v8242_v31, %s7818_s2 }
 0x11d   : > { %744 = vmatmul.f32.gmra.mxu2 %v8007_v18  ;;  %v484_v18 = vadd.f32 %v483_v17, %v8122_v20  ;;  %v558_v17 = vpop.f32.mrf.mxu3 }
 0x11e   : > { %v8255_v7 = vpop.f32.mrf.mxu1  ;;  %v8257_v35 = vpop.f32.mrf.mxu2  ;;  %v559_v41 = vadd.f32 %v558_v17, %v8122_v20 }
 0x11f   : > { %v8278_v50 = vmul.f32 0.17677669, %v484_v18 }
 0x120   : > { %v8345_v52 = vmul.f32 0.17677669, %v559_v41 }
 0x121   : > { %634 = vmatmul.f32.gmra.mxu1 %v8023_v26 }
 0x122   : > { %12742 = vst [vmem:[#allocation34_spill] sm:$0xff] %v8345_v52 }
 0x123   : > { %2043 = vrot.lane.b32.xlu0 %v8259_v40, %s7818_s2 }
 0x124   : > { %2993 = vrot.lane.b32.xlu2 %v8244_v32, %s7817_s1  ;;  %3203 = vrot.lane.b32.xlu1 %v8259_v40, %s7817_s1 }
 0x125   : > { %747 = vmatmul.f32.gmra.mxu2 %v8023_v26 }
 0x126   : > { %v8272_v23 = vpop.f32.mrf.mxu1  ;;  %v8274_v46 = vpop.f32.mrf.mxu2 }
 0x129   : > { %637 = vmatmul.f32.gmra.mxu1 %v8039_v36 }
 0x12b   : > { %1940 = vrot.lane.b32.xlu0 %v8276_v49, %s7818_s2 }
 0x12c   : > { %2148 = vrot.lane.b32.xlu2 %v8280_v51, %s7818_s2  ;;  %1835 = vrot.lane.b32.xlu1 %v8278_v50, %s7818_s2 }
 0x12d   : > { %750 = vmatmul.f32.gmra.mxu2 %v8039_v36 }
 0x12e   : > { %v8290_v26 = vpop.f32.mrf.mxu1  ;;  %v8292_v33 = vpop.f32.mrf.mxu2 }
 0x131   : > { %640 = vmatmul.f32.gmra.mxu1 %v8052_v47 }
 0x133   : > { %2995 = vrot.lane.b32.xlu0 %v8278_v50, %s7817_s1 }
 0x134   : > { %3308 = vrot.lane.b32.xlu2 %v8280_v51, %s7817_s1  ;;  %3100 = vrot.lane.b32.xlu1 %v8276_v49, %s7817_s1 }
 0x135   : > { %v8304_v36 = vpop.permute.xlu2 %2987  ;;  %753 = vmatmul.f32.gmra.mxu2 %v8052_v47 }
 0x136   : > { %12737 = vst [vmem:[#allocation29_spill] sm:$0xff] %v8304_v36  ;;  %v8307_v61 = vpop.f32.mrf.mxu1  ;;  %v8309_v62 = vpop.f32.mrf.mxu2 }
 0x139   : > { %643 = vmatmul.f32.gmra.mxu1 %v8061_v58 }
 0x13b   : > { %3310 = vrot.lane.b32.xlu0 %v8311_v1, %s7817_s1 }
 0x13c   : > { %2045 = vrot.lane.b32.xlu2 %v8313_v3, %s7818_s2  ;;  %2150 = vrot.lane.b32.xlu1 %v8311_v1, %s7818_s2 }
 0x13d   : > { %756 = vmatmul.f32.gmra.mxu2 %v8061_v58  ;;  %v535_v58 = vadd.f32 %v8208_v4, %v8122_v20  ;;  %v8355_v4 = vperm.slane %v8115_v15, 1  ;;  %v8381_v15 = vadd.f32 %v8274_v46, %v8365_v22 }
 0x13e   : > { %v8324_v47 = vpop.permute.xlu2 %2142  ;;  %v599_v24 = vpop.f32.mrf.mxu1 }
 0x13f   : > { %12740 = vst [vmem:[#allocation32_spill] sm:$0xff] %v8324_v47  ;;  %v8328_v34 = vpop.f32.mrf.mxu2  ;;  %v8349_v45 = vmul.f32 0.17677669, %v535_v58  ;;  %v8373_v58 = vadd.f32 %v8257_v35, %v8365_v22  ;;  %v514_v35 = vadd.f32 %v8206_v56, %v8122_v20  ;;  %v8403_v56 = vadd.f32 %v599_v24, %v8355_v4 }
 0x140   : > { %12749 = vst [vmem:[#allocation41_spill] sm:$0xff] %v8381_v15  ;;  %v8426_v24 = vadd.f32 %v8307_v61, %v8355_v4  ;;  %v8444_v61 = vadd.f32 %v8328_v34, %v8365_v22  ;;  %v8464_v34 = vadd.f32 %v8309_v62, %v8365_v22  ;;  %v8479_v62 = vadd.f32 %v8272_v23, %v8355_v4 }
 0x141   : > { %646 = vmatmul.f32.gmra.mxu1 %v8069_v0  ;;  %12744 = vst [vmem:[#allocation36_spill] sm:$0xff] %v8349_v45  ;;  %v8506_v51 = vadd.f32 %v8255_v7, %v8355_v4  ;;  %v8533_v7 = vadd.f32 %v8238_v25, %v8355_v4 }
 0x142   : > { %12748 = vst [vmem:[#allocation40_spill] sm:$0xff] %v8373_v58 }
 0x143   : > { %1837 = vrot.lane.b32.xlu0 %v8326_v5, %s7818_s2  ;;  %12758 = vst [vmem:[#allocation50_spill] sm:$0xff] %v8444_v61 }
 0x144   : > { %3205 = vrot.lane.b32.xlu2 %v8313_v3, %s7817_s1  ;;  %2997 = vrot.lane.b32.xlu1 %v8326_v5, %s7817_s1  ;;  %12763 = vst [vmem:[#allocation55_spill] sm:$0xff] %v8464_v34 }
 0x145   : > { %759 = vmatmul.f32.gmra.mxu2 %v8069_v0 }
 0x146   : > { %v8343_v18 = vpop.permute.xlu2 %3302  ;;  %v602_v44 = vpop.f32.mrf.mxu1 }
 0x147   : > { %12741 = vst [vmem:[#allocation33_spill] sm:$0xff] %v8343_v18  ;;  %v712_v55 = vpop.f32.mrf.mxu2 }
 0x149   : > { %649 = vmatmul.f32.gmra.mxu1 %v8082_v6 }
 0x14b   : > { %2152 = vrot.lane.b32.xlu0 %v8345_v52, %s7818_s2 }
 0x14c   : > { %1942 = vrot.lane.b32.xlu2 %v8347_v57, %s7818_s2  ;;  %2047 = vrot.lane.b32.xlu1 %v8349_v45, %s7818_s2 }
 0x14d   : > { %v8361_v0 = vpop.permute.xlu0 %3092  ;;  %762 = vmatmul.f32.gmra.mxu2 %v8082_v6  ;;  %v489_v6 = vpop.f32.mrf.mxu0 }
 0x14e   : > { %12745 = vst [vmem:[#allocation37_spill] sm:$0xff] %v8361_v0  ;;  %v8367_v59 = vpop.permute.xlu2 %1829  ;;  %v8369_v17 = vpop.permute.xlu1 %1827  ;;  %v8384_v0 = vadd.f32 %v602_v44, %v8355_v4  ;;  %v490_v46 = vadd.f32 %v489_v6, %v8122_v20 }
 0x14f   : > { %12746 = vst [vmem:[#allocation38_spill] sm:$0xff] %v8367_v59  ;;  %v605_v41 = vpop.f32.mrf.mxu1  ;;  %v715_v43 = vpop.f32.mrf.mxu2  ;;  %v8411_v59 = vmul.f32 0.17677669, %v514_v35  ;;  %v538_v35 = vadd.f32 %v8226_v21, %v8122_v20  ;;  %v8452_v21 = vadd.f32 %v8290_v26, %v8355_v4  ;;  %v8473_v26 = vadd.f32 %v8292_v33, %v8365_v22 }
 0x150   : > { %12747 = vst [vmem:[#allocation39_spill] sm:$0xff] %v8369_v17  ;;  %v8376_v18 = vadd.f32 %v605_v41, %v8355_v4  ;;  %v8415_v44 = vmul.f32 0.17677669, %v490_v46 }
 0x151   : > { %652 = vmatmul.f32.gmra.mxu1 %v8090_v8  ;;  %12753 = vst [vmem:[#allocation45_spill] sm:$0xff] %v8411_v59 }
 0x152   : > { %6049 = vmatpush.xpose.msk.msrb.mxu3 %vm857_vm0, %v8376_v18  ;;  %12754 = vst [vmem:[#allocation46_spill] sm:$0xff] %v8415_v44 }
 0x153   : > { %3207 = vrot.lane.b32.xlu0 %v8349_v45, %s7817_s1  ;;  %12764 = vst [vmem:[#allocation56_spill] sm:$0xff] %v8473_v26 }
 0x154   : > { %3102 = vrot.lane.b32.xlu2 %v8347_v57, %s7817_s1  ;;  %3312 = vrot.lane.b32.xlu1 %v8345_v52, %s7817_s1  ;;  %v517_v52 = vadd.f32 %v8224_v63, %v8122_v20 }
 0x155   : > { %v8399_v41 = vpop.permute.xlu0 %2037  ;;  %765 = vmatmul.f32.gmra.mxu2 %v8090_v8  ;;  %v8421_v8 = vadd.f32 %v715_v43, %v8365_v22 }
 0x156   : > { %12750 = vst [vmem:[#allocation42_spill] sm:$0xff] %v8399_v41  ;;  %6050 = vmatpush.xpose.msk.msrb.mxu3 %vm857_vm0, %v8384_v0  ;;  %v8407_v36 = vpop.permute.xlu2 %2039  ;;  %v8409_v47 = vpop.permute.xlu1 %1932 }
 0x157   : > { %12751 = vst [vmem:[#allocation43_spill] sm:$0xff] %v8407_v36  ;;  %v8413_v6 = vpop.f32.mrf.mxu1  ;;  %v718_v17 = vpop.f32.mrf.mxu2  ;;  %v8460_v36 = vmul.f32 0.17677669, %v538_v35  ;;  %v8485_v35 = vpack.i.bf16 %v8464_v34, %v8473_v26 }
 0x158   : > { %12752 = vst [vmem:[#allocation44_spill] sm:$0xff] %v8409_v47  ;;  %v8418_v41 = vadd.f32 %v718_v17, %v8365_v22  ;;  %v8434_v17 = vadd.f32 %v712_v55, %v8365_v22 }
 0x159   : > { %12756 = vst [vmem:[#allocation48_spill] sm:$0xff] %v8421_v8  ;;  %655 = vmatmul.f32.gmra.mxu1 %v8010_v19 }
 0x15a   : > { %12755 = vst [vmem:[#allocation47_spill] sm:$0xff] %v8418_v41  ;;  %6051 = vmatpush.xpose.msk.msrb.mxu3 %vm857_vm0, %v8403_v56  ;;  %1535 = vmatpush.msrb.mxu0 %v8418_v41 }
 0x15b   : > { %12757 = vst [vmem:[#allocation49_spill] sm:$0xff] %v8434_v17  ;;  %3104 = vrot.lane.b32.xlu0 %v8411_v59, %s7817_s1 }
 0x15c   : > { %1839 = vrot.lane.b32.xlu2 %v8415_v44, %s7818_s2  ;;  %1944 = vrot.lane.b32.xlu1 %v8411_v59, %s7818_s2  ;;  %12762 = vst [vmem:[#allocation54_spill] sm:$0xff] %v8460_v36 }
 0x15d   : > { %v8446_v43 = vpop.permute.xlu0 %1934  ;;  %1536 = vmatpush.msrb.mxu0 %v8421_v8  ;;  %768 = vmatmul.f32.gmra.mxu2 %v8010_v19 }
 0x15e   : > { %12759 = vst [vmem:[#allocation51_spill] sm:$0xff] %v8446_v43  ;;  %6052 = vmatpush.xpose.msk.msrb.mxu3 %vm857_vm0, %v8426_v24  ;;  %v8456_v55 = vpop.permute.xlu2 %3199  ;;  %v8458_v46 = vpop.permute.xlu1 %3197 }
 0x15f   : > { %12760 = vst [vmem:[#allocation52_spill] sm:$0xff] %v8456_v55  ;;  %v8466_v43 = vpop.f32.mrf.mxu1  ;;  %1537 = vmatpush.msrb.mxu0 %v8434_v17  ;;  %v8469_v19 = vpop.f32.mrf.mxu2 }
 0x160   : > { %12761 = vst [vmem:[#allocation53_spill] sm:$0xff] %v8458_v46  ;;  %v492_v55 = vpop.f32.mrf.mxu0  ;;  %v561_v46 = vpop.f32.mrf.mxu3 }
 0x161   : > { %658 = vmatmul.f32.gmra.mxu1 %v8026_v27  ;;  %1538 = vmatpush.msrb.mxu0 %v8444_v61  ;;  %v493_v23 = vadd.f32 %v492_v55, %v8122_v20  ;;  %v562_v33 = vadd.f32 %v561_v46, %v8122_v20 }
 0x162   : > { %6053 = vmatpush.xpose.msk.msrb.mxu3 %vm857_vm0, %v8452_v21 }
 0x163   : > { %2049 = vrot.lane.b32.xlu0 %v8460_v36, %s7818_s2  ;;  %1539 = vmatpush.msrb.mxu0 %v8464_v34  ;;  %v8517_v63 = vmul.f32 0.17677669, %v493_v23  ;;  %v8519_v34 = vmul.f32 0.17677669, %v562_v33 }
 0x164   : > { %2999 = vrot.lane.b32.xlu2 %v8415_v44, %s7817_s1  ;;  %3209 = vrot.lane.b32.xlu1 %v8460_v36, %s7817_s1 }
 0x165   : > { %v8500_v1 = vpop.permute.xlu0 %2989  ;;  %1540 = vmatpush.msrb.mxu0 %v8473_v26  ;;  %771 = vmatmul.f32.gmra.mxu2 %v8026_v27  ;;  %12768 = vst [vmem:[#allocation60_spill] sm:$0xff] %v8517_v63  ;;  %v8523_v26 = vmul.f32 0.17677669, %v517_v52 }
 0x166   : > { %12765 = vst [vmem:[#allocation57_spill] sm:$0xff] %v8500_v1  ;;  %6054 = vmatpush.xpose.msk.msrb.mxu3 %vm857_vm0, %v8479_v62  ;;  %v8510_v55 = vpop.permute.xlu2 %1936  ;;  %v8512_v46 = vpop.permute.xlu1 %3094 }
 0x167   : > { %12766 = vst [vmem:[#allocation58_spill] sm:$0xff] %v8510_v55  ;;  %v8514_v47 = vpop.f32.mrf.mxu1  ;;  %1541 = vmatpush.msrb.mxu0 %v8381_v15  ;;  %v541_v55 = vadd.f32 %v8240_v30, %v8122_v20 }
 0x168   : > { %12767 = vst [vmem:[#allocation59_spill] sm:$0xff] %v8512_v46  ;;  %v8521_v27 = vpop.f32.mrf.mxu2  ;;  %v564_v1 = vpop.f32.mrf.mxu3 }
 0x169   : > { %12769 = vst [vmem:[#allocation61_spill] sm:$0xff] %v8519_v34  ;;  %661 = vmatmul.f32.gmra.mxu1 %v8042_v37  ;;  %1542 = vmatpush.msrb.mxu0 %v8373_v58 }
 0x16a   : > { %12770 = vst [vmem:[#allocation62_spill] sm:$0xff] %v8523_v26  ;;  %6055 = vmatpush.xpose.msk.msrb.mxu3 %vm857_vm0, %v8506_v51 }
 0x16b   : > { %1946 = vrot.lane.b32.xlu0 %v8523_v26, %s7818_s2 }
 0x16c   : > { %2154 = vrot.lane.b32.xlu2 %v8519_v34, %s7818_s2  ;;  %1841 = vrot.lane.b32.xlu1 %v8517_v63, %s7818_s2 }
 0x16d   : > { %v8539_v52 = vpop.permute.xlu0 %3304  ;;  %774 = vmatmul.f32.gmra.mxu2 %v8042_v37  ;;  %v8557_v37 = vpack.i.bf16 %v8434_v17, %v8444_v61 }
 0x16e   : > { %12771 = vst [vmem:[#allocation63_spill] sm:$0xff] %v8539_v52  ;;  %6056 = vmatpush.xpose.msk.msrb.mxu3 %vm857_vm0, %v8533_v7  ;;  %v8544_v23 = vpop.permute.xlu2 %3096  ;;  %v8546_v33 = vpop.permute.xlu1 %2144  ;;  %v565_v52 = vadd.f32 %v564_v1, %v8122_v20  ;;  %v8586_v1 = vmul.f32 0.17677669, %v541_v55 }
 0x16f   : > { %12772 = vst [vmem:[#allocation64_spill] sm:$0xff] %v8544_v23  ;;  %v8548_v46 = vpop.f32.mrf.mxu1  ;;  %v8606_v23 = vpack.i.bf16 %v8418_v41, %v8421_v8 }
 0x170   : > { %12773 = vst [vmem:[#allocation65_spill] sm:$0xff] %v8546_v33  ;;  %v8550_v25 = vpop.f32.mrf.mxu2  ;;  %v8579_v53 = vmul.f32 0.17677669, %v565_v52 }
 0x171   : > { %6057 = vmatmul.msk.f32.vlgmr.msrb.gmra.mxu3 %vm857_vm0, %v8126_v28  ;;  %664 = vmatmul.f32.gmra.mxu1 %v8073_v2  ;;  %12778 = vst [vmem:[#allocation70_spill] sm:$0xff] %v8586_v1 }
 0x172   : > { %12777 = vst [vmem:[#allocation69_spill] sm:$0xff] %v8579_v53 }
 0x173   : > { %3001 = vrot.lane.b32.xlu0 %v8517_v63, %s7817_s1 }
 0x174   : > { %3314 = vrot.lane.b32.xlu2 %v8519_v34, %s7817_s1  ;;  %3106 = vrot.lane.b32.xlu1 %v8523_v26, %s7817_s1 }
 0x175   : > { %v8568_v33 = vpop.permute.xlu0 %1831  ;;  %777 = vmatmul.f32.gmra.mxu2 %v8073_v2 }
 0x176   : > { %12774 = vst [vmem:[#allocation66_spill] sm:$0xff] %v8568_v33  ;;  %v8573_v28 = vpop.permute.xlu2 %1833  ;;  %v8575_v10 = vpop.permute.xlu1 %2991 }
 0x177   : > { %12775 = vst [vmem:[#allocation67_spill] sm:$0xff] %v8573_v28  ;;  %v8577_v34 = vpop.f32.mrf.mxu1 }
 0x178   : > { %12776 = vst [vmem:[#allocation68_spill] sm:$0xff] %v8575_v10  ;;  %v8581_v39 = vpop.f32.mrf.mxu2 }
 0x179   : > { %6058 = vmatmul.msk.f32.gmra.mxu3 %vm857_vm0, %v8164_v48  ;;  %667 = vmatmul.f32.gmra.mxu1 %v8094_v9 }
 0x17b   : > { %1843 = vrot.lane.b32.xlu0 %v8533_v7, %s7818_s2 }
 0x17c   : > { %2051 = vrot.lane.b32.xlu2 %v8586_v1, %s7818_s2  ;;  %2156 = vrot.lane.b32.xlu1 %v8579_v53, %s7818_s2 }
 0x17d   : > { %v8594_v2 = vpop.permute.xlu0 %2146  ;;  %780 = vmatmul.f32.gmra.mxu2 %v8094_v9  ;;  %v8637_v9 = vadd.f32 %v8469_v19, %v8365_v22 }
 0x17e   : > { %12779 = vst [vmem:[#allocation71_spill] sm:$0xff] %v8594_v2  ;;  %v8597_v20 = vpop.permute.xlu2 %2993  ;;  %v8599_v30 = vpop.permute.xlu1 %2041 }
 0x17f   : > { %12780 = vst [vmem:[#allocation72_spill] sm:$0xff] %v8597_v20  ;;  %v623_v52 = vpop.f32.mrf.mxu1 }
 0x180   : > { %12781 = vst [vmem:[#allocation73_spill] sm:$0xff] %v8599_v30  ;;  %v733_v55 = vpop.f32.mrf.mxu2  ;;  %v6603_v30 = vpack.i.bf16 %v8381_v15, %v8373_v58  ;;  %v8645_v58 = vadd.f32 %v8521_v27, %v8365_v22  ;;  %v8674_v27 = vadd.f32 %v623_v52, %v8355_v4  ;;  %v8694_v52 = vadd.f32 %v8577_v34, %v8355_v4 }
 0x181   : > { %6059 = vmatmul.msk.f32.gmra.mxu3 %vm857_vm0, %v8193_v60  ;;  %670 = vmatmul.f32.gmra.mxu1 %v8103_v11  ;;  %12786 = vst [vmem:[#allocation78_spill] sm:$0xff] %v8637_v9 }
 0x182   : > { %12789 = vst [vmem:[#allocation81_spill] sm:$0xff] %v8645_v58  ;;  %v8660_v19 = vpack.i.bf16 %v8645_v58, %v8637_v9 }
 0x183   : > { %3316 = vrot.lane.b32.xlu0 %v8579_v53, %s7817_s1  ;;  %12791 = vst [vmem:[#allocation83_spill] sm:$0xff] %v8674_v27 }
 0x184   : > { %3211 = vrot.lane.b32.xlu2 %v8586_v1, %s7817_s1  ;;  %3003 = vrot.lane.b32.xlu1 %v8533_v7, %s7817_s1  ;;  %12796 = vst [vmem:[#allocation88_spill] sm:$0xff] %v8694_v52 }
 0x185   : > { %v8616_v20 = vpop.permute.xlu0 %3201  ;;  %783 = vmatmul.f32.gmra.mxu2 %v8103_v11 }
 0x186   : > { %12782 = vst [vmem:[#allocation74_spill] sm:$0xff] %v8616_v20  ;;  %v8619_v10 = vpop.permute.xlu2 %2148  ;;  %v8621_v17 = vpop.permute.xlu1 %3306 }
 0x187   : > { %12783 = vst [vmem:[#allocation75_spill] sm:$0xff] %v8619_v10  ;;  %v626_v61 = vpop.f32.mrf.mxu1 }
 0x188   : > { %12784 = vst [vmem:[#allocation76_spill] sm:$0xff] %v8621_v17  ;;  %v736_v2 = vpop.f32.mrf.mxu2 }
 0x189   : > { %6060 = vmatmul.msk.f32.gmra.mxu3 %vm857_vm0, %v8244_v32  ;;  %673 = vmatmul.f32.gmra.mxu1 %v8112_v14 }
 0x18b   : > { %6604 = vrot.lane.b32.xlu0 %v6603_v30, %s7818_s2 }
 0x18c   : > { %1845 = vrot.lane.b32.xlu2 %v8506_v51, %s7818_s2  ;;  %6609 = vrot.lane.b32.xlu1 %v6603_v30, %s7817_s1 }
 0x18d   : > { %v8632_v11 = vpop.permute.xlu0 %3098  ;;  %786 = vmatmul.f32.gmra.mxu2 %v8112_v14  ;;  %v8654_v14 = vadd.f32 %v626_v61, %v8355_v4 }
 0x18e   : > { %12785 = vst [vmem:[#allocation77_spill] sm:$0xff] %v8632_v11  ;;  %v8639_v17 = vpop.permute.xlu2 %3308  ;;  %v8641_v20 = vpop.permute.xlu1 %1938 }
 0x18f   : > { %12787 = vst [vmem:[#allocation79_spill] sm:$0xff] %v8639_v17  ;;  %v629_v15 = vpop.f32.mrf.mxu1 }
 0x190   : > { %12788 = vst [vmem:[#allocation80_spill] sm:$0xff] %v8641_v20  ;;  %v8648_v41 = vadd.f32 %v629_v15, %v8355_v4  ;;  %v739_v30 = vpop.f32.mrf.mxu2  ;;  %v8699_v15 = vadd.f32 %v736_v2, %v8365_v22  ;;  %v8716_v2 = vadd.f32 %v8548_v46, %v8355_v4 }
 0x191   : > { %6061 = vmatmul.msk.f32.gmra.mxu3 %vm857_vm0, %v8278_v50  ;;  %676 = vmatmul.f32.gmra.mxu1 %v8118_v16  ;;  %v8685_v20 = vadd.f32 %v739_v30, %v8365_v22 }
 0x192   : > { %6065 = vmatpush.xpose.msk.msra.mxu3 %vm857_vm0, %v8648_v41  ;;  %12797 = vst [vmem:[#allocation89_spill] sm:$0xff] %v8699_v15 }
 0x193   : > { %3007 = vrot.lane.b32.xlu0 %v8479_v62, %s7817_s1  ;;  %12794 = vst [vmem:[#allocation86_spill] sm:$0xff] %v8685_v20 }
 0x194   : > { %3005 = vrot.lane.b32.xlu2 %v8506_v51, %s7817_s1  ;;  %1847 = vrot.lane.b32.xlu1 %v8479_v62, %s7818_s2  ;;  %12800 = vst [vmem:[#allocation92_spill] sm:$0xff] %v8716_v2 }
 0x195   : > { %v8670_v61 = vpop.permute.xlu0 %2043  ;;  %789 = vmatmul.f32.gmra.mxu2 %v8118_v16 }
 0x196   : > { %12790 = vst [vmem:[#allocation82_spill] sm:$0xff] %v8670_v61  ;;  %6066 = vmatpush.xpose.msk.msra.mxu3 %vm857_vm0, %v8654_v14  ;;  %v8678_v17 = vpop.permute.xlu2 %2045  ;;  %v8680_v11 = vpop.permute.xlu1 %3203  ;;  %v8733_v61 = vadd.f32 %v8550_v25, %v8365_v22 }
 0x197   : > { %12792 = vst [vmem:[#allocation84_spill] sm:$0xff] %v8678_v17  ;;  %v8682_v8 = vpop.f32.mrf.mxu1  ;;  %v8726_v17 = vadd.f32 %v8581_v39, %v8365_v22 }
 0x198   : > { %12793 = vst [vmem:[#allocation85_spill] sm:$0xff] %v8680_v11  ;;  %v742_v10 = vpop.f32.mrf.mxu2 }
 0x199   : > { %6062 = vmatmul.msk.f32.gmra.mxu3 %vm857_vm0, %v8326_v5  ;;  %v8690_v16 = vadd.f32 %v742_v10, %v8365_v22  ;;  %v8709_v10 = vadd.f32 %v733_v55, %v8365_v22  ;;  %12803 = vst [vmem:[#allocation95_spill] sm:$0xff] %v8726_v17  ;;  %v8748_v39 = vpack.i.bf16 %v8726_v17, %v8733_v61 }
 0x19a   : > { %6067 = vmatpush.xpose.msk.msra.mxu3 %vm857_vm0, %v8674_v27  ;;  %12804 = vst [vmem:[#allocation96_spill] sm:$0xff] %v8733_v61 }
 0x19b   : > { %12795 = vst [vmem:[#allocation87_spill] sm:$0xff] %v8690_v16  ;;  %1849 = vrot.lane.b32.xlu0 %v8452_v21, %s7818_s2  ;;  %1600 = vmatpush.msra.mxu1 %v8690_v16 }
 0x19c   : > { %6614 = vrot.lane.b32.xlu2 %v8485_v35, %s7818_s2  ;;  %3009 = vrot.lane.b32.xlu1 %v8452_v21, %s7817_s1  ;;  %12798 = vst [vmem:[#allocation90_spill] sm:$0xff] %v8709_v10 }
 0x19d   : > { %v8711_v34 = vpop.permute.xlu0 %1940  ;;  %1601 = vmatpush.msra.mxu1 %v8685_v20 }
 0x19e   : > { %12799 = vst [vmem:[#allocation91_spill] sm:$0xff] %v8711_v34  ;;  %6068 = vmatpush.xpose.msk.msra.mxu3 %vm857_vm0, %v8694_v52  ;;  %v8720_v30 = vpop.permute.xlu2 %3205  ;;  %v8722_v11 = vpop.permute.xlu1 %1835  ;;  %v8764_v34 = vadd.f32 %v8466_v43, %v8355_v4  ;;  %v8786_v43 = vadd.f32 %v8413_v6, %v8355_v4  ;;  %v8808_v6 = vpack.i.bf16 %v8699_v15, %v8709_v10 }
 0x19f   : > { %12801 = vst [vmem:[#allocation93_spill] sm:$0xff] %v8720_v30  ;;  %v8728_v55 = vpop.f32.mrf.mxu1  ;;  %1602 = vmatpush.msra.mxu1 %v8699_v15  ;;  %v8742_v30 = vadd.f32 %v8514_v47, %v8355_v4 }
 0x1a0   : > { %12802 = vst [vmem:[#allocation94_spill] sm:$0xff] %v8722_v11  ;;  %v8735_v46 = vpop.f32.mrf.mxu2 }
 0x1a1   : > { %6063 = vmatmul.msk.f32.gmra.mxu3 %vm857_vm0, %v8415_v44  ;;  %1603 = vmatpush.msra.mxu1 %v8709_v10  ;;  %12805 = vst [vmem:[#allocation97_spill] sm:$0xff] %v8742_v30 }
 0x1a2   : > { %6069 = vmatpush.xpose.msk.msra.mxu3 %vm857_vm0, %v8716_v2  ;;  %12807 = vst [vmem:[#allocation99_spill] sm:$0xff] %v8764_v34 }
 0x1a3   : > { %3013 = vrot.lane.b32.xlu0 %v8403_v56, %s7817_s1  ;;  %1604 = vmatpush.msra.mxu1 %v8726_v17  ;;  %12810 = vst [vmem:[#allocation102_spill] sm:$0xff] %v8786_v43 }
 0x1a4   : > { %1851 = vrot.lane.b32.xlu2 %v8426_v24, %s7818_s2  ;;  %1853 = vrot.lane.b32.xlu1 %v8403_v56, %s7818_s2 }
 0x1a5   : > { %v8759_v25 = vpop.permute.xlu0 %2995  ;;  %1605 = vmatpush.msra.mxu1 %v8733_v61 }
 0x1a6   : > { %12806 = vst [vmem:[#allocation98_spill] sm:$0xff] %v8759_v25  ;;  %6070 = vmatpush.xpose.msk.msra.mxu3 %vm857_vm0, %v8742_v30  ;;  %v8768_v11 = vpop.permute.xlu2 %1942  ;;  %v8770_v28 = vpop.permute.xlu1 %3100 }
 0x1a7   : > { %12808 = vst [vmem:[#allocation100_spill] sm:$0xff] %v8768_v11  ;;  %v8772_v33 = vpop.f32.mrf.mxu1  ;;  %1606 = vmatpush.msra.mxu1 %v8645_v58 }
 0x1a8   : > { %12809 = vst [vmem:[#allocation101_spill] sm:$0xff] %v8770_v28  ;;  %v8775_v47 = vpop.f32.mrf.mxu2 }
 0x1a9   : > { %6064 = vmatmul.msk.f32.gmra.mxu3 %vm857_vm0, %v8517_v63  ;;  %1607 = vmatpush.msra.mxu1 %v8637_v9 }
 0x1aa   : > { %6071 = vmatpush.xpose.msk.msra.mxu3 %vm857_vm0, %v8764_v34 }
 0x1ab   : > { %1855 = vrot.lane.b32.xlu0 %v8384_v0, %s7818_s2 }
 0x1ac   : > { %3011 = vrot.lane.b32.xlu2 %v8426_v24, %s7817_s1  ;;  %6619 = vrot.lane.b32.xlu1 %v8557_v37, %s7818_s2 }
 0x1ad   : > { %v8792_v17 = vpop.permute.xlu0 %3310 }
 0x1ae   : > { %12811 = vst [vmem:[#allocation103_spill] sm:$0xff] %v8792_v17  ;;  %6072 = vmatpush.xpose.msk.msra.mxu3 %vm857_vm0, %v8786_v43  ;;  %v8796_v61 = vpop.permute.xlu2 %3102  ;;  %v8798_v28 = vpop.permute.xlu1 %2150 }
 0x1af   : > { %12812 = vst [vmem:[#allocation104_spill] sm:$0xff] %v8796_v61  ;;  %v8800_v58 = vpop.f32.mrf.mxu1 }
 0x1b0   : > { %12813 = vst [vmem:[#allocation105_spill] sm:$0xff] %v8798_v28  ;;  %v8802_v9 = vpop.f32.mrf.mxu2 }
 0x1b1   : > { %6073 = vmatmul.msk.f32.vlgmr.msra.gmra.mxu3 %vm857_vm0, %v8128_v29 }
 0x1b3   : > { %6624 = vrot.lane.b32.xlu0 %v8606_v23, %s7818_s2 }
 0x1b4   : > { %1857 = vrot.lane.b32.xlu2 %v8376_v18, %s7818_s2  ;;  %3015 = vrot.lane.b32.xlu1 %v8384_v0, %s7817_s1 }
 0x1b5   : > { %v8818_v61 = vpop.permute.xlu0 %1837 }
 0x1b6   : > { %12814 = vst [vmem:[#allocation106_spill] sm:$0xff] %v8818_v61  ;;  %v8820_v25 = vpop.permute.xlu2 %1839  ;;  %v8822_v28 = vpop.permute.xlu1 %2997 }
 0x1b7   : > { %12815 = vst [vmem:[#allocation107_spill] sm:$0xff] %v8820_v25  ;;  %v644_v11 = vpop.f32.mrf.mxu1 }
 0x1b8   : > { %12816 = vst [vmem:[#allocation108_spill] sm:$0xff] %v8822_v28  ;;  %v8824_v44 = vpop.f32.mrf.mxu2 }
 0x1b9   : > { %6074 = vmatmul.msk.f32.gmra.mxu3 %vm857_vm0, %v8153_v42 }
 0x1bb   : > { %3110 = vrot.lane.b32.xlu0 %v8764_v34, %s7817_s1 }
 0x1bc   : > { %3017 = vrot.lane.b32.xlu2 %v8376_v18, %s7817_s1  ;;  %1950 = vrot.lane.b32.xlu1 %v8764_v34, %s7818_s2 }
 0x1bd   : > { %v8834_v17 = vpop.permute.xlu0 %2152 }
 0x1be   : > { %12817 = vst [vmem:[#allocation109_spill] sm:$0xff] %v8834_v17  ;;  %v8836_v15 = vpop.permute.xlu2 %2999  ;;  %v8838_v10 = vpop.permute.xlu1 %2047 }
 0x1bf   : > { %12818 = vst [vmem:[#allocation110_spill] sm:$0xff] %v8836_v15  ;;  %v647_v28 = vpop.f32.mrf.mxu1 }
 0x1c0   : > { %12819 = vst [vmem:[#allocation111_spill] sm:$0xff] %v8838_v10  ;;  %v757_v25 = vpop.f32.mrf.mxu2 }
 0x1c1   : > { %6075 = vmatmul.msk.f32.gmra.mxu3 %vm857_vm0, %v8212_v12  ;;  %v8858_v12 = vpack.i.bf16 %v8690_v16, %v8685_v20 }
 0x1c3   : > { %1952 = vrot.lane.b32.xlu0 %v8742_v30, %s7818_s2 }
 0x1c4   : > { %1948 = vrot.lane.b32.xlu2 %v8786_v43, %s7818_s2  ;;  %3112 = vrot.lane.b32.xlu1 %v8742_v30, %s7817_s1 }
 0x1c5   : > { %v8848_v34 = vpop.permute.xlu0 %3207 }
 0x1c6   : > { %12820 = vst [vmem:[#allocation112_spill] sm:$0xff] %v8848_v34  ;;  %v8850_v17 = vpop.permute.xlu2 %2154  ;;  %v8852_v15 = vpop.permute.xlu1 %3312 }
 0x1c7   : > { %12821 = vst [vmem:[#allocation113_spill] sm:$0xff] %v8850_v17  ;;  %v650_v10 = vpop.f32.mrf.mxu1 }
 0x1c8   : > { %12822 = vst [vmem:[#allocation114_spill] sm:$0xff] %v8852_v15  ;;  %v760_v61 = vpop.f32.mrf.mxu2  ;;  %v8893_v15 = vadd.f32 %v647_v28, %v8355_v4 }
 0x1c9   : > { %6076 = vmatmul.msk.f32.gmra.mxu3 %vm857_vm0, %v8242_v31 }
 0x1ca   : > { %12829 = vst [vmem:[#allocation121_spill] sm:$0xff] %v8893_v15 }
 0x1cb   : > { %6634 = vrot.lane.b32.xlu0 %v8748_v39, %s7818_s2 }
 0x1cc   : > { %3108 = vrot.lane.b32.xlu2 %v8786_v43, %s7817_s1  ;;  %1956 = vrot.lane.b32.xlu1 %v8694_v52, %s7818_s2  ;;  %v8880_v43 = vadd.f32 %v650_v10, %v8355_v4 }
 0x1cd   : > { %v8868_v34 = vpop.permute.xlu0 %3104 }
 0x1ce   : > { %12823 = vst [vmem:[#allocation115_spill] sm:$0xff] %v8868_v34  ;;  %v8870_v17 = vpop.permute.xlu2 %3314  ;;  %v8872_v31 = vpop.permute.xlu1 %1944  ;;  %v8903_v34 = vadd.f32 %v8735_v46, %v8365_v22  ;;  %v8925_v46 = vadd.f32 %v760_v61, %v8365_v22 }
 0x1cf   : > { %12824 = vst [vmem:[#allocation116_spill] sm:$0xff] %v8870_v17  ;;  %v653_v30 = vpop.f32.mrf.mxu1 }
 0x1d0   : > { %12825 = vst [vmem:[#allocation117_spill] sm:$0xff] %v8872_v31  ;;  %v8875_v42 = vadd.f32 %v653_v30, %v8355_v4  ;;  %v763_v63 = vpop.f32.mrf.mxu2 }
 0x1d1   : > { %6077 = vmatmul.msk.f32.gmra.mxu3 %vm857_vm0, %v8276_v49  ;;  %12827 = vst [vmem:[#allocation119_spill] sm:$0xff] %v8880_v43  ;;  %v8914_v28 = vadd.f32 %v763_v63, %v8365_v22 }
 0x1d2   : > { %12826 = vst [vmem:[#allocation118_spill] sm:$0xff] %v8875_v42  ;;  %6081 = vmatpush.xpose.msk.msrb.mxu3 %vm857_vm0, %v8875_v42 }
 0x1d3   : > { %3116 = vrot.lane.b32.xlu0 %v8694_v52, %s7817_s1  ;;  %12832 = vst [vmem:[#allocation124_spill] sm:$0xff] %v8903_v34 }
 0x1d4   : > { %6629 = vrot.lane.b32.xlu2 %v8660_v19, %s7818_s2  ;;  %3118 = vrot.lane.b32.xlu1 %v8674_v27, %s7817_s1  ;;  %12834 = vst [vmem:[#allocation126_spill] sm:$0xff] %v8914_v28 }
 0x1d5   : > { %v8890_v30 = vpop.permute.xlu0 %2049  ;;  %12837 = vst [vmem:[#allocation129_spill] sm:$0xff] %v8925_v46 }
 0x1d6   : > { %12828 = vst [vmem:[#allocation120_spill] sm:$0xff] %v8890_v30  ;;  %v8895_v17 = vpop.permute.xlu2 %2051  ;;  %v8897_v10 = vpop.permute.xlu1 %3209  ;;  %6082 = vmatpush.xpose.msk.msrb.mxu3 %vm857_vm0, %v8880_v43  ;;  %v8909_v30 = vadd.f32 %v8775_v47, %v8365_v22  ;;  %v8948_v47 = vadd.f32 %v8800_v58, %v8355_v4 }
 0x1d7   : > { %12830 = vst [vmem:[#allocation122_spill] sm:$0xff] %v8895_v17  ;;  %v8905_v16 = vpop.f32.mrf.mxu1  ;;  %v8920_v17 = vadd.f32 %v644_v11, %v8355_v4  ;;  %v8941_v11 = vadd.f32 %v757_v25, %v8365_v22 }
 0x1d8   : > { %12831 = vst [vmem:[#allocation123_spill] sm:$0xff] %v8897_v10  ;;  %v766_v20 = vpop.f32.mrf.mxu2  ;;  %v8932_v63 = vpack.i.bf16 %v8909_v30, %v8903_v34 }
 0x1d9   : > { %12833 = vst [vmem:[#allocation125_spill] sm:$0xff] %v8909_v30  ;;  %6078 = vmatmul.msk.f32.gmra.mxu3 %vm857_vm0, %v8347_v57  ;;  %v8917_v10 = vadd.f32 %v766_v20, %v8365_v22  ;;  %v8958_v20 = vadd.f32 %v8824_v44, %v8365_v22 }
 0x1da   : > { %12836 = vst [vmem:[#allocation128_spill] sm:$0xff] %v8920_v17  ;;  %6083 = vmatpush.xpose.msk.msrb.mxu3 %vm857_vm0, %v8893_v15 }
 0x1db   : > { %12835 = vst [vmem:[#allocation127_spill] sm:$0xff] %v8917_v10  ;;  %1958 = vrot.lane.b32.xlu0 %v8674_v27, %s7818_s2  ;;  %1665 = vmatpush.msra.mxu2 %v8917_v10 }
 0x1dc   : > { %1954 = vrot.lane.b32.xlu2 %v8716_v2, %s7818_s2  ;;  %6639 = vrot.lane.b32.xlu1 %v8808_v6, %s7818_s2  ;;  %12838 = vst [vmem:[#allocation130_spill] sm:$0xff] %v8941_v11 }
 0x1dd   : > { %v8943_v61 = vpop.permute.xlu0 %1946  ;;  %1666 = vmatpush.msra.mxu2 %v8914_v28  ;;  %12840 = vst [vmem:[#allocation132_spill] sm:$0xff] %v8948_v47 }
 0x1de   : > { %12839 = vst [vmem:[#allocation131_spill] sm:$0xff] %v8943_v61  ;;  %v8950_v57 = vpop.permute.xlu2 %3211  ;;  %v8952_v31 = vpop.permute.xlu1 %1841  ;;  %6084 = vmatpush.xpose.msk.msrb.mxu3 %vm857_vm0, %v8920_v17  ;;  %v8965_v61 = vadd.f32 %v8802_v9, %v8365_v22 }
 0x1df   : > { %12841 = vst [vmem:[#allocation133_spill] sm:$0xff] %v8950_v57  ;;  %v8960_v25 = vpop.f32.mrf.mxu1  ;;  %1667 = vmatpush.msra.mxu2 %v8925_v46  ;;  %v8974_v57 = vadd.f32 %v8772_v33, %v8355_v4  ;;  %v8990_v33 = vadd.f32 %v8728_v55, %v8355_v4 }
 0x1e0   : > { %12842 = vst [vmem:[#allocation134_spill] sm:$0xff] %v8952_v31  ;;  %v8970_v58 = vpop.f32.mrf.mxu2 }
 0x1e1   : > { %12843 = vst [vmem:[#allocation135_spill] sm:$0xff] %v8958_v20  ;;  %6079 = vmatmul.msk.f32.gmra.mxu3 %vm857_vm0, %v8411_v59  ;;  %1668 = vmatpush.msra.mxu2 %v8941_v11 }
 0x1e2   : > { %12844 = vst [vmem:[#allocation136_spill] sm:$0xff] %v8965_v61  ;;  %6085 = vmatpush.xpose.msk.msrb.mxu3 %vm857_vm0, %v8948_v47 }
 0x1e3   : > { %12845 = vst [vmem:[#allocation137_spill] sm:$0xff] %v8974_v57  ;;  %6649 = vrot.lane.b32.xlu0 %v8557_v37, %s7817_s1  ;;  %1669 = vmatpush.msra.mxu2 %v8958_v20 }
 0x1e4   : > { %3114 = vrot.lane.b32.xlu2 %v8716_v2, %s7817_s1  ;;  %6654 = vrot.lane.b32.xlu1 %v8606_v23, %s7817_s1  ;;  %12847 = vst [vmem:[#allocation139_spill] sm:$0xff] %v8990_v33  ;;  %v9006_v23 = vadd.f32 %v8682_v8, %v8355_v4 }
 0x1e5   : > { %v8985_v44 = vpop.permute.xlu0 %3001  ;;  %1670 = vmatpush.msra.mxu2 %v8965_v61 }
 0x1e6   : > { %12846 = vst [vmem:[#allocation138_spill] sm:$0xff] %v8985_v44  ;;  %v8992_v9 = vpop.permute.xlu2 %1845  ;;  %v8994_v59 = vpop.permute.xlu1 %3106  ;;  %6086 = vmatpush.xpose.msk.msrb.mxu3 %vm857_vm0, %v8974_v57 }
 0x1e7   : > { %12848 = vst [vmem:[#allocation140_spill] sm:$0xff] %v8994_v59  ;;  %v8998_v37 = vpop.f32.mrf.mxu1  ;;  %1671 = vmatpush.msra.mxu2 %v8909_v30 }
 0x1e8   : > { %12849 = vst [vmem:[#allocation141_spill] sm:$0xff] %v9006_v23  ;;  %v9012_v55 = vpop.f32.mrf.mxu2 }
 0x1e9   : > { %6080 = vmatmul.msk.f32.gmra.mxu3 %vm857_vm0, %v8523_v26  ;;  %1672 = vmatpush.msra.mxu2 %v8903_v34 }
 0x1ea   : > { %6087 = vmatpush.xpose.msk.msrb.mxu3 %vm857_vm0, %v8990_v33 }
 0x1eb   : > { %6659 = vrot.lane.b32.xlu0 %v8660_v19, %s7817_s1 }
 0x1ec   : > { %1960 = vrot.lane.b32.xlu2 %v8654_v14, %s7818_s2  ;;  %1962 = vrot.lane.b32.xlu1 %v8648_v41, %s7818_s2 }
 0x1ed   : > { %v9020_v34 = vpop.permute.xlu0 %1843 }
 0x1ee   : > { %v9022_v8 = vpop.permute.xlu2 %3005  ;;  %v9024_v59 = vpop.permute.xlu1 %2156  ;;  %6088 = vmatpush.xpose.msk.msrb.mxu3 %vm857_vm0, %v9006_v23 }
 0x1ef   : > { %12850 = vst [vmem:[#allocation142_spill] sm:$0xff] %v9022_v8  ;;  %v9028_v19 = vpop.f32.mrf.mxu1 }
 0x1f0   : > { %12851 = vst [vmem:[#allocation143_spill] sm:$0xff] %v9024_v59  ;;  %v9040_v44 = vpop.f32.mrf.mxu2 }
 0x1f1   : > { %6089 = vmatmul.msk.f32.vlgmr.msrb.gmra.mxu3 %vm857_vm0, %v8140_v38  ;;  %v9050_v38 = vpack.i.bf16 %v8925_v46, %v8941_v11 }
 0x1f3   : > { %3122 = vrot.lane.b32.xlu0 %v8648_v41, %s7817_s1 }
 0x1f4   : > { %3120 = vrot.lane.b32.xlu2 %v8654_v14, %s7817_s1  ;;  %2053 = vrot.lane.b32.xlu1 %v9006_v23, %s7818_s2 }
 0x1f5   : > { %v9038_v30 = vpop.permute.xlu0 %3316 }
 0x1f6   : > { %12852 = vst [vmem:[#allocation144_spill] sm:$0xff] %v9038_v30  ;;  %v9042_v59 = vpop.permute.xlu2 %6614  ;;  %v9044_v26 = vpop.permute.xlu1 %3003 }
 0x1f7   : > { %12853 = vst [vmem:[#allocation145_spill] sm:$0xff] %v9044_v26  ;;  %v668_v49 = vpop.f32.mrf.mxu1 }
 0x1f8   : > { %v9066_v27 = vpop.f32.mrf.mxu2 }
 0x1f9   : > { %6090 = vmatmul.msk.f32.gmra.mxu3 %vm857_vm0, %v8178_v54 }
 0x1fb   : > { %3213 = vrot.lane.b32.xlu0 %v9006_v23, %s7817_s1  ;;  %v9090_v23 = vpack.i.bf16 %v8917_v10, %v8914_v28 }
 0x1fc   : > { %6644 = vrot.lane.b32.xlu2 %v8485_v35, %s7817_s1  ;;  %3215 = vrot.lane.b32.xlu1 %v8990_v33, %s7817_s1 }
 0x1fd   : > { %v9060_v2 = vpop.permute.xlu0 %6604 }
 0x1fe   : > { %v9062_v52 = vpop.permute.xlu2 %1851  ;;  %v9064_v54 = vpop.permute.xlu1 %6609 }
 0x1ff   : > { %12854 = vst [vmem:[#allocation146_spill] sm:$0xff] %v9064_v54  ;;  %v671_v31 = vpop.f32.mrf.mxu1 }
 0x200   : > { %v9084_v54 = vpop.f32.mrf.mxu2 }
 0x201   : > { %6091 = vmatmul.msk.f32.gmra.mxu3 %vm857_vm0, %v8214_v13 }
 0x203   : > { %2055 = vrot.lane.b32.xlu0 %v8990_v33, %s7818_s2 }
 0x204   : > { %6664 = vrot.lane.b32.xlu2 %v8858_v12, %s7818_s2  ;;  %6679 = vrot.lane.b32.xlu1 %v8808_v6, %s7817_s1  ;;  %v6688_v6 = vpack.i.bf16 %v8958_v20, %v8965_v61  ;;  %v9142_v61 = vadd.f32 %v9028_v19, %v8355_v4  ;;  %v9160_v19 = vpop.f32.mrf.mxu3 }
 0x205   : > { %v9076_v35 = vpop.permute.xlu0 %3007 }
 0x206   : > { %12855 = vst [vmem:[#allocation147_spill] sm:$0xff] %v9076_v35  ;;  %v9078_v30 = vpop.permute.xlu2 %3011  ;;  %v9080_v46 = vpop.permute.xlu1 %1847 }
 0x207   : > { %v674_v11 = vpop.f32.mrf.mxu1  ;;  %12860 = vst [vmem:[#allocation152_spill] sm:$0xff] %v9142_v61 }
 0x208   : > { %v9107_v35 = vadd.f32 %v674_v11, %v8355_v4  ;;  %v784_v10 = vpop.f32.mrf.mxu2 }
 0x209   : > { %6092 = vmatmul.msk.f32.gmra.mxu3 %vm857_vm0, %v8259_v40 }
 0x20a   : > { %12857 = vst [vmem:[#allocation149_spill] sm:$0xff] %v9107_v35 }
 0x20b   : > { %6669 = vrot.lane.b32.xlu0 %v8932_v63, %s7818_s2 }
 0x20c   : > { %2057 = vrot.lane.b32.xlu2 %v8974_v57, %s7818_s2  ;;  %2059 = vrot.lane.b32.xlu1 %v8948_v47, %s7818_s2 }
 0x20d   : > { %v1850_v33 = vpop.permute.xlu0 %1849 }
 0x20e   : > { %v1858_v40 = vpop.permute.xlu2 %1857  ;;  %v9098_v13 = vpop.permute.xlu1 %3009 }
 0x20f   : > { %v677_v26 = vpop.f32.mrf.mxu1  ;;  %6145 = vmatpush.xpose.msk.msra.mxu0 %vm857_vm0, %v1858_v40 }
 0x210   : > { %v9102_v8 = vadd.f32 %v677_v26, %v8355_v4  ;;  %v9121_v26 = vadd.f32 %v671_v31, %v8355_v4  ;;  %v787_v20 = vpop.f32.mrf.mxu2 }
 0x211   : > { %6093 = vmatmul.msk.f32.gmra.mxu3 %vm857_vm0, %v8313_v3 }
 0x212   : > { %12856 = vst [vmem:[#allocation148_spill] sm:$0xff] %v9102_v8  ;;  %6097 = vmatpush.xpose.msk.msra.mxu3 %vm857_vm0, %v9102_v8 }
 0x213   : > { %6684 = vrot.lane.b32.xlu0 %v8858_v12, %s7817_s1  ;;  %12858 = vst [vmem:[#allocation150_spill] sm:$0xff] %v9121_v26  ;;  %v9130_v12 = vadd.f32 %v668_v49, %v8355_v4 }
 0x214   : > { %3217 = vrot.lane.b32.xlu2 %v8974_v57, %s7817_s1  ;;  %6689 = vrot.lane.b32.xlu1 %v6688_v6, %s7818_s2  ;;  %v12875_v57 = vld [vmem:[#allocation20_spill] sm:$0xff] }
 0x215   : > { %v9118_v40 = vpop.permute.xlu0 %3013  ;;  %12859 = vst [vmem:[#allocation151_spill] sm:$0xff] %v9130_v12 }
 0x216   : > { %v9123_v11 = vpop.permute.xlu2 %3017  ;;  %v1854_v28 = vpop.permute.xlu1 %1853  ;;  %6098 = vmatpush.xpose.msk.msra.mxu3 %vm857_vm0, %v9107_v35 }
 0x219   : > { %6094 = vmatmul.msk.f32.gmra.mxu3 %vm857_vm0, %v8349_v45 }
 0x21a   : > { %6099 = vmatpush.xpose.msk.msra.mxu3 %vm857_vm0, %v9121_v26 }
 0x21b   : > { %3219 = vrot.lane.b32.xlu0 %v8948_v47, %s7817_s1  ;;  %v12878_v47 = vld [vmem:[#allocation22_spill] sm:$0xff] }
 0x21c   : > { %6674 = vrot.lane.b32.xlu2 %v8748_v39, %s7817_s1  ;;  %3221 = vrot.lane.b32.xlu1 %v8920_v17, %s7817_s1  ;;  %v9155_v39 = vadd.f32 %v8998_v37, %v8355_v4  ;;  %v9171_v37 = vadd.f32 %v8960_v25, %v8355_v4 }
 0x21d   : > { %v1856_v31 = vpop.permute.xlu0 %1855 }
 0x21e   : > { %v9144_v49 = vpop.permute.xlu2 %1948  ;;  %v9146_v45 = vpop.permute.xlu1 %6619  ;;  %6100 = vmatpush.xpose.msk.msra.mxu3 %vm857_vm0, %v9130_v12  ;;  %6146 = vmatpush.xpose.msk.msra.mxu0 %vm857_vm0, %v1856_v31  ;;  %12861 = vst [vmem:[#allocation153_spill] sm:$0xff] %v9155_v39 }
 0x21f   : > { %12862 = vst [vmem:[#allocation154_spill] sm:$0xff] %v9171_v37 }
 0x221   : > { %6095 = vmatmul.msk.f32.gmra.mxu3 %vm857_vm0, %v8460_v36 }
 0x222   : > { %6101 = vmatpush.xpose.msk.msra.mxu3 %vm857_vm0, %v9142_v61  ;;  %6147 = vmatpush.xpose.msk.msra.mxu0 %vm857_vm0, %v1854_v28  ;;  %v790_v28 = vpop.f32.mrf.mxu2 }
 0x223   : > { %2061 = vrot.lane.b32.xlu0 %v8920_v17, %s7818_s2  ;;  %v9191_v25 = vadd.f32 %v790_v28, %v8365_v22 }
 0x224   : > { %2063 = vrot.lane.b32.xlu2 %v8893_v15, %s7818_s2  ;;  %6704 = vrot.lane.b32.xlu1 %v6688_v6, %s7817_s1  ;;  %v9185_v6 = vadd.f32 %v8905_v16, %v8355_v4  ;;  %v9204_v16 = vadd.f32 %v787_v20, %v8365_v22  ;;  %v9222_v20 = vadd.f32 %v9084_v54, %v8365_v22 }
 0x225   : > { %v9167_v31 = vpop.permute.xlu0 %6624  ;;  %12865 = vst [vmem:[#allocation157_spill] sm:$0xff] %v9191_v25 }
 0x226   : > { %v9173_v36 = vpop.permute.xlu2 %3108  ;;  %v9175_v3 = vpop.permute.xlu1 %3015  ;;  %6102 = vmatpush.xpose.msk.msra.mxu3 %vm857_vm0, %v9155_v39  ;;  %6148 = vmatpush.xpose.msk.msra.mxu0 %vm857_vm0, %v9062_v52  ;;  %12864 = vst [vmem:[#allocation156_spill] sm:$0xff] %v9185_v6 }
 0x227   : > { %12863 = vst [vmem:[#allocation155_spill] sm:$0xff] %v9173_v36  ;;  %v9199_v52 = vpop.f32.mrf.mxu3 }
 0x228   : > { %12867 = vst [vmem:[#allocation159_spill] sm:$0xff] %v9204_v16 }
 0x229   : > { %6096 = vmatmul.msk.f32.gmra.mxu3 %vm857_vm0, %v8586_v1  ;;  %v9216_v1 = vadd.f32 %v784_v10, %v8365_v22  ;;  %12870 = vst [vmem:[#allocation161_spill] sm:$0xff] %v9222_v20  ;;  %v9242_v10 = vadd.f32 %v9040_v44, %v8365_v22  ;;  %v9265_v44 = vadd.f32 %v8970_v58, %v8365_v22 }
 0x22a   : > { %6103 = vmatpush.xpose.msk.msra.mxu3 %vm857_vm0, %v9171_v37  ;;  %6149 = vmatpush.xpose.msk.msra.mxu0 %vm857_vm0, %v1850_v33 }
 0x22b   : > { %6709 = vrot.lane.b32.xlu0 %v9050_v38, %s7817_s1  ;;  %12868 = vst [vmem:[#allocation160_spill] sm:$0xff] %v9216_v1 }
 0x22c   : > { %3223 = vrot.lane.b32.xlu2 %v8893_v15, %s7817_s1  ;;  %2065 = vrot.lane.b32.xlu1 %v8880_v43, %s7818_s2  ;;  %v12869_v15 = vld [vmem:[#allocation18_spill] sm:$0xff]  ;;  %12872 = vst [vmem:[#allocation163_spill] sm:$0xff] %v9242_v10 }
 0x22d   : > { %v9201_v4 = vpop.permute.xlu0 %3110  ;;  %12876 = vst [vmem:[#allocation166_spill] sm:$0xff] %v9265_v44 }
 0x22e   : > { %12866 = vst [vmem:[#allocation158_spill] sm:$0xff] %v9201_v4  ;;  %v9206_v33 = vpop.permute.xlu2 %6629  ;;  %v9208_v28 = vpop.permute.xlu1 %1950  ;;  %6104 = vmatpush.xpose.msk.msra.mxu3 %vm857_vm0, %v9185_v6  ;;  %6150 = vmatpush.xpose.msk.msra.mxu0 %vm857_vm0, %v9080_v46  ;;  %v9231_v46 = vadd.f32 %v9066_v27, %v8365_v22 }
 0x230   : > { %12871 = vst [vmem:[#allocation162_spill] sm:$0xff] %v9231_v46  ;;  %v6723_v4 = vpack.i.bf16 %v9231_v46, %v9242_v10 }
 0x231   : > { %6105 = vmatmul.msk.f32.vlgmr.msra.gmra.mxu3 %vm857_vm0, %v12869_v15  ;;  %v9251_v15 = vpop.f32.mrf.mxu3 }
 0x232   : > { %1730 = vmatpush.msrb.mxu3 %v9191_v25  ;;  %6151 = vmatpush.xpose.msk.msra.mxu0 %vm857_vm0, %v8992_v9 }
 0x233   : > { %3225 = vrot.lane.b32.xlu0 %v8880_v43, %s7817_s1  ;;  %v12879_v43 = vld [vmem:[#allocation28_spill] sm:$0xff] }
 0x234   : > { %1731 = vmatpush.msrb.mxu3 %v9204_v16  ;;  %6694 = vrot.lane.b32.xlu2 %v9050_v38, %s7818_s2  ;;  %v9255_v38 = vadd.f32 %v9012_v55, %v8365_v22 }
 0x235   : > { %3227 = vrot.lane.b32.xlu1 %v8875_v42, %s7817_s1  ;;  %v9238_v54 = vpop.permute.xlu0 %1952 }
 0x236   : > { %1732 = vmatpush.msrb.mxu3 %v9216_v1  ;;  %v9245_v9 = vpop.permute.xlu2 %1954  ;;  %v9247_v27 = vpop.permute.xlu1 %3112  ;;  %6152 = vmatpush.xpose.msk.msra.mxu0 %vm857_vm0, %v9020_v34  ;;  %12874 = vst [vmem:[#allocation165_spill] sm:$0xff] %v9255_v38  ;;  %v6718_v22 = vpack.i.bf16 %v9255_v38, %v9265_v44 }
 0x237   : > { %12873 = vst [vmem:[#allocation164_spill] sm:$0xff] %v9247_v27 }
 0x238   : > { %1733 = vmatpush.msrb.mxu3 %v9222_v20 }
 0x239   : > { %6106 = vmatmul.msk.f32.gmra.mxu3 %vm857_vm0, %v12875_v57  ;;  %v9277_v17 = vpop.f32.mrf.mxu3 }
 0x23a   : > { %1734 = vmatpush.msrb.mxu3 %v9231_v46 }
 0x23b   : > { %2067 = vrot.lane.b32.xlu0 %v8875_v42, %s7818_s2 }
 0x23c   : > { %1735 = vmatpush.msrb.mxu3 %v9242_v10  ;;  %6699 = vrot.lane.b32.xlu2 %v8932_v63, %s7817_s1  ;;  %v12884_v10 = vld [vmem:[#allocation34_spill] sm:$0xff] }
 0x23d   : > { %3318 = vrot.lane.b32.xlu1 %v9185_v6, %s7817_s1  ;;  %v9272_v34 = vpop.permute.xlu0 %6634 }
 0x23e   : > { %1736 = vmatpush.msrb.mxu3 %v9255_v38  ;;  %v9275_v55 = vpop.permute.xlu2 %3114  ;;  %v1957_v57 = vpop.permute.xlu1 %1956 }
 0x23f   : > { %12877 = vst [vmem:[#allocation167_spill] sm:$0xff] %v9275_v55 }
 0x240   : > { %1737 = vmatpush.msrb.mxu3 %v9265_v44 }
 0x241   : > { %6107 = vmatmul.msk.f32.gmra.mxu3 %vm857_vm0, %v12878_v47  ;;  %v9294_v47 = vpop.f32.mrf.mxu3 }
 0x243   : > { %6714 = vrot.lane.b32.xlu0 %v9090_v23, %s7818_s2 }
 0x244   : > { %2160 = vrot.lane.b32.xlu2 %v9171_v37, %s7818_s2 }
 0x245   : > { %6719 = vrot.lane.b32.xlu1 %v6718_v22, %s7818_s2  ;;  %v9288_v63 = vpop.permute.xlu0 %3116 }
 0x246   : > { %v1961_v58 = vpop.permute.xlu2 %1960  ;;  %v9290_v42 = vpop.permute.xlu1 %3118 }
 0x249   : > { %6108 = vmatmul.msk.f32.gmra.mxu3 %vm857_vm0, %v12879_v43  ;;  %v12880_v43 = vld [vmem:[#allocation30_spill] sm:$0xff] }
 0x24b   : > { %2158 = vrot.lane.b32.xlu0 %v9185_v6, %s7818_s2 }
 0x24c   : > { %3320 = vrot.lane.b32.xlu2 %v9171_v37, %s7817_s1  ;;  %v9313_v37 = vpop.f32.mrf.mxu3 }
 0x24d   : > { %2162 = vrot.lane.b32.xlu1 %v9155_v39, %s7818_s2  ;;  %v1959_v38 = vpop.permute.xlu0 %1958 }
 0x24e   : > { %v9302_v44 = vpop.permute.xlu2 %3120  ;;  %v9304_v36 = vpop.permute.xlu1 %6639 }
 0x251   : > { %6109 = vmatmul.msk.f32.gmra.mxu3 %vm857_vm0, %v12880_v43 }
 0x253   : > { %3322 = vrot.lane.b32.xlu0 %v9155_v39, %s7817_s1 }
 0x254   : > { %6724 = vrot.lane.b32.xlu2 %v6723_v4, %s7818_s2 }
 0x255   : > { %3324 = vrot.lane.b32.xlu1 %v9142_v61, %s7817_s1  ;;  %v9317_v6 = vpop.permute.xlu0 %6649 }
 0x256   : > { %12881 = vst [vmem:[#allocation168_spill] sm:$0xff] %v9317_v6  ;;  %v9319_v27 = vpop.permute.xlu2 %6644  ;;  %v9321_v55 = vpop.permute.xlu1 %6654 }
 0x257   : > { %12882 = vst [vmem:[#allocation169_spill] sm:$0xff] %v9319_v27  ;;  %v9334_v6 = vpop.f32.mrf.mxu3  ;;  %v12886_v27 = vld [vmem:[#allocation61_spill] sm:$0xff] }
 0x258   : > { %12883 = vst [vmem:[#allocation170_spill] sm:$0xff] %v9321_v55 }
 0x259   : > { %6110 = vmatmul.msk.f32.gmra.mxu3 %vm857_vm0, %v12884_v10 }
 0x25b   : > { %2164 = vrot.lane.b32.xlu0 %v9142_v61, %s7818_s2 }
 0x25c   : > { %2166 = vrot.lane.b32.xlu2 %v9130_v12, %s7818_s2 }
 0x25d   : > { %6734 = vrot.lane.b32.xlu1 %v6718_v22, %s7817_s1  ;;  %v9330_v46 = vpop.permute.xlu0 %6659 }
 0x25e   : > { %12885 = vst [vmem:[#allocation171_spill] sm:$0xff] %v9330_v46  ;;  %v9332_v39 = vpop.permute.xlu2 %6664  ;;  %v1963_v43 = vpop.permute.xlu1 %1962 }
 0x25f   : > { %6161 = vmatpush.xpose.msk.msrb.mxu1 %vm857_vm0, %v1963_v43  ;;  %v9349_v46 = vpop.f32.mrf.mxu3 }
 0x261   : > { %6111 = vmatmul.msk.f32.gmra.mxu3 %vm857_vm0, %v12886_v27 }
 0x263   : > { %6162 = vmatpush.xpose.msk.msrb.mxu1 %vm857_vm0, %v1961_v58 }
 0x264   : > { %3326 = vrot.lane.b32.xlu2 %v9130_v12, %s7817_s1 }
 0x265   : > { %2168 = vrot.lane.b32.xlu1 %v9121_v26, %s7818_s2  ;;  %v9344_v22 = vpop.permute.xlu0 %3122 }
 0x266   : > { %v9346_v61 = vpop.permute.xlu2 %2057  ;;  %v9353_v43 = vpop.permute.xlu1 %2053 }
 0x267   : > { %6163 = vmatpush.xpose.msk.msrb.mxu1 %vm857_vm0, %v1959_v38 }
 0x269   : > { %6112 = vmatmul.msk.f32.gmra.mxu3 %vm857_vm0, %v8579_v53 }
 0x26b   : > { %6164 = vmatpush.xpose.msk.msrb.mxu1 %vm857_vm0, %v1957_v57 }
 0x26c   : > { %6729 = vrot.lane.b32.xlu2 %v9090_v23, %s7817_s1  ;;  %v9378_v23 = vld [vmem:[#allocation10] sm:$0xff] }
 0x26d   : > { %v9358_v58 = vpop.permute.xlu0 %3213  ;;  %v9386_v27 = vadd.f32 %v9160_v19, %v9378_v23 }
 0x26e   : > { %12887 = vst [vmem:[#allocation172_spill] sm:$0xff] %v9358_v58  ;;  %v9360_v12 = vpop.permute.xlu2 %3217  ;;  %v9368_v38 = vpop.permute.xlu1 %3215 }
 0x26f   : > { %12888 = vst [vmem:[#allocation173_spill] sm:$0xff] %v9360_v12  ;;  %6165 = vmatpush.xpose.msk.msrb.mxu1 %vm857_vm0, %v9245_v9 }
 0x270   : > { %12889 = vst [vmem:[#allocation174_spill] sm:$0xff] %v9368_v38 }
 0x273   : > { %6166 = vmatpush.xpose.msk.msrb.mxu1 %vm857_vm0, %v9238_v54 }
 0x274   : > { %2172 = vrot.lane.b32.xlu2 %v9102_v8, %s7818_s2 }
 0x275   : > { %v2056_v10 = vpop.permute.xlu0 %2055 }
 0x276   : > { %v9370_v57 = vpop.permute.xlu2 %6674  ;;  %v9382_v53 = vpop.permute.xlu1 %6679 }
 0x277   : > { %12890 = vst [vmem:[#allocation175_spill] sm:$0xff] %v9370_v57  ;;  %6167 = vmatpush.xpose.msk.msrb.mxu1 %vm857_vm0, %v9208_v28 }
 0x278   : > { %12892 = vst [vmem:[#allocation177_spill] sm:$0xff] %v9382_v53 }
 0x27b   : > { %6168 = vmatpush.xpose.msk.msrb.mxu1 %vm857_vm0, %v9144_v49  ;;  %v1215_v49 = vsel %vm1214_vm1, %v9386_v27, -inf }
 0x27c   : > { %3332 = vrot.lane.b32.xlu2 %v9102_v8, %s7817_s1  ;;  %v9396_v8 = vld [vmem:[#allocation10 + $0x10] sm:$0xff] }
 0x27d   : > { %v9380_v54 = vpop.permute.xlu0 %6669  ;;  %v9400_v19 = vadd.f32 %v9251_v15, %v9396_v8 }
 0x27e   : > { %12891 = vst [vmem:[#allocation176_spill] sm:$0xff] %v9380_v54  ;;  %v2064_v9 = vpop.permute.xlu2 %2063  ;;  %v2060_v53 = vpop.permute.xlu1 %2059 }
 0x284   : > { %4145 = vrot.lane.b32.xlu2 %v8376_v18, %s7819_s3  ;;  %v1221_v18 = vsel %vm1214_vm1, %v9400_v19, -inf }
 0x285   : > { %v9392_v28 = vpop.permute.xlu0 %6684  ;;  %1216 = vmax.xlane.f32.xlu0 %v1215_v49 }
 0x286   : > { %12893 = vst [vmem:[#allocation178_spill] sm:$0xff] %v9392_v28  ;;  %v9394_v57 = vpop.permute.xlu2 %3223  ;;  %v9408_v38 = vpop.permute.xlu1 %6689 }
 0x287   : > { %12894 = vst [vmem:[#allocation179_spill] sm:$0xff] %v9394_v57 }
 0x288   : > { %12897 = vst [vmem:[#allocation182_spill] sm:$0xff] %v9408_v38 }
 0x28d   : > { %v9402_v55 = vpop.permute.xlu0 %3219 }
 0x28e   : > { %12895 = vst [vmem:[#allocation180_spill] sm:$0xff] %v9402_v55  ;;  %v9404_v58 = vpop.permute.xlu2 %6694  ;;  %v9413_v12 = vpop.permute.xlu1 %3221  ;;  %v9419_v55 = vld [vmem:[#allocation10 + $0x20] sm:$0xff] }
 0x28f   : > { %12896 = vst [vmem:[#allocation181_spill] sm:$0xff] %v9404_v58  ;;  %1222 = vmax.xlane.f32.xlu1 %v1221_v18  ;;  %v9429_v38 = vadd.f32 %v9294_v47, %v9419_v55 }
 0x290   : > { %12899 = vst [vmem:[#allocation184_spill] sm:$0xff] %v9413_v12 }
 0x295   : > { %v2062_v49 = vpop.permute.xlu0 %2061 }
 0x296   : > { %v9410_v28 = vpop.permute.xlu2 %6699  ;;  %v9425_v18 = vpop.permute.xlu1 %6704 }
 0x297   : > { %12898 = vst [vmem:[#allocation183_spill] sm:$0xff] %v9410_v28  ;;  %v9435_v28 = vld [vmem:[#allocation10 + $0x28] sm:$0xff] }
 0x298   : > { %12903 = vst [vmem:[#allocation188_spill] sm:$0xff] %v9425_v18  ;;  %v9442_v18 = vadd.f32 %v9313_v37, %v9435_v28 }
 0x299   : > { %6739 = vrot.lane.b32.xlu0 %v6723_v4, %s7817_s1  ;;  %v1227_v4 = vsel %vm1214_vm1, %v9429_v38, -inf }
 0x29d   : > { %v9415_v57 = vpop.permute.xlu0 %6709 }
 0x29e   : > { %12900 = vst [vmem:[#allocation185_spill] sm:$0xff] %v9415_v57  ;;  %v9417_v15 = vpop.permute.xlu2 %2160  ;;  %v2066_v47 = vpop.permute.xlu1 %2065 }
 0x2a5   : > { %v9421_v54 = vpop.permute.xlu0 %3225 }
 0x2a6   : > { %12901 = vst [vmem:[#allocation186_spill] sm:$0xff] %v9421_v54  ;;  %v9423_v58 = vpop.permute.xlu2 %3320 }
 0x2a7   : > { %12902 = vst [vmem:[#allocation187_spill] sm:$0xff] %v9423_v58  ;;  %v1230_v58 = vsel %vm1214_vm1, %v9442_v18, -inf }
 0x2a8   : > { %3330 = vrot.lane.b32.xlu1 %v9107_v35, %s7817_s1 }
 0x2ad   : > { %1228 = vmax.xlane.f32.xlu2 %v1227_v4  ;;  %v2068_v57 = vpop.permute.xlu0 %2067  ;;  %v9451_v4 = vld [vmem:[#allocation10 + $0x8] sm:$0xff] }
 0x2ae   : > { %v9437_v12 = vpop.permute.xlu2 %6724  ;;  %6177 = vmatpush.xpose.msk.msrb.mxu2 %vm857_vm0, %v2068_v57  ;;  %v9455_v57 = vadd.f32 %v9199_v52, %v9451_v4 }
 0x2b2   : > { %6178 = vmatpush.xpose.msk.msrb.mxu2 %vm857_vm0, %v2066_v47 }
 0x2b5   : > { %1231 = vmax.xlane.f32.xlu2 %v1230_v58  ;;  %v1218_v58 = vsel %vm1214_vm1, %v9455_v57, -inf  ;;  %v9480_v47 = vpop.permute.xlu0 %6714 }
 0x2b6   : > { %v9447_v54 = vpop.permute.xlu2 %2166  ;;  %6179 = vmatpush.xpose.msk.msrb.mxu2 %vm857_vm0, %v2064_v9 }
 0x2ba   : > { %6180 = vmatpush.xpose.msk.msrb.mxu2 %vm857_vm0, %v2062_v49  ;;  %v9467_v49 = vld [vmem:[#allocation10 + $0x18] sm:$0xff] }
 0x2bb   : > { %v9473_v52 = vadd.f32 %v9277_v17, %v9467_v49 }
 0x2bd   : > { %v9486_v17 = vpop.permute.xlu0 %2158 }
 0x2be   : > { %v9457_v37 = vpop.permute.xlu2 %3326  ;;  %6181 = vmatpush.xpose.msk.msrb.mxu2 %vm857_vm0, %v2060_v53 }
 0x2c2   : > { %6182 = vmatpush.xpose.msk.msrb.mxu2 %vm857_vm0, %v9346_v61  ;;  %v1224_v61 = vsel %vm1214_vm1, %v9473_v52, -inf }
 0x2c3   : > { %1219 = vmax.xlane.f32.xlu0 %v1218_v58  ;;  %v6753_v58 = vpack.i.bf16 %v9191_v25, %v9204_v16 }
 0x2c6   : > { %v9464_v9 = vpop.permute.xlu2 %6729  ;;  %6183 = vmatpush.xpose.msk.msrb.mxu2 %vm857_vm0, %v2056_v10  ;;  %v9491_v10 = vpop.permute.xlu0 %3322 }
 0x2c7   : > { %12904 = vst [vmem:[#allocation189_spill] sm:$0xff] %v9464_v9 }
 0x2ca   : > { %6184 = vmatpush.xpose.msk.msrb.mxu2 %vm857_vm0, %v9353_v43  ;;  %v9500_v43 = vpop.permute.xlu1 %3227 }
 0x2cd   : > { %4141 = vrot.lane.b32.xlu2 %v8403_v56, %s7819_s3  ;;  %v6743_v56 = vpack.i.bf16 %v9216_v1, %v9222_v20 }
 0x2ce   : > { %v2173_v53 = vpop.permute.xlu2 %2172 }
 0x2cf   : > { %6193 = vmatpush.xpose.msk.msra.mxu3 %vm857_vm0, %v2173_v53  ;;  %v1012_v53 = vpop.f32.mrf.mxu3 }
 0x2d0   : > { %v9508_v20 = vadd.f32 %v1012_v53, %v9378_v23  ;;  %v6627_v53 = vunpack.i.h.bf16 %v9167_v31 }
 0x2d2   : > { %1225 = vmax.xlane.f32.xlu1 %v1224_v61  ;;  %v1239_v16 = vsel %vm1214_vm1, %v9508_v20, -inf }
 0x2d5   : > { %4135 = vrot.lane.b32.xlu2 %v8479_v62, %s7819_s3  ;;  %v9498_v62 = vpop.permute.xlu0 %2164 }
 0x2d7   : > { %3328 = vrot.lane.b32.xlu0 %v9121_v26, %s7817_s1 }
 0x2df   : > { %6744 = vrot.lane.b32.xlu0 %v6743_v56, %s7818_s2 }
 0x2e7   : > { %2170 = vrot.lane.b32.xlu0 %v9107_v35, %s7818_s2 }
 0x2eb   : > { %6749 = vrot.lane.b32.xlu1 %v6743_v56, %s7817_s1 }
 0x2ef   : > { %4143 = vrot.lane.b32.xlu0 %v8384_v0, %s7819_s3  ;;  %v9511_v0 = vpop.permute.xlu1 %3318 }
 0x2f0   : > { %12905 = vst [vmem:[#allocation190_spill] sm:$0xff] %v9511_v0 }
 0x2f3   : > { %6754 = vrot.lane.b32.xlu1 %v6753_v58, %s7818_s2 }
 0x2f7   : > { %4137 = vrot.lane.b32.xlu0 %v8452_v21, %s7819_s3 }
 0x2f8   : > { %v1217_v61 = vpop.xlane.xlu0 %1216 }
 0x2f9   : > { %v1311_v56 = vsub.f32 %v9386_v27, %v1217_v61  ;;  %v6626_v27 = vunpack.i.l.bf16 %v9167_v31  ;;  %v6616_v61 = vunpack.i.l.bf16 %v9042_v59  ;;  %v6606_v31 = vunpack.i.l.bf16 %v9060_v2 }
 0x2fb   : > { %v1343_v1 = vmul.f32 1.442695, %v1311_v56  ;;  %4139 = vrot.lane.b32.xlu1 %v8426_v24, %s7819_s3  ;;  %v9526_v24 = vpop.permute.xlu1 %6719 }
 0x2fd   : > { %7054 = vpow2.f32 %v1343_v1  ;;  %v6622_v1 = vunpack.i.h.bf16 %v9146_v45 }
 0x2fe   : > { %1240 = vmax.xlane.f32.xlu2 %v1239_v16  ;;  %v6621_v16 = vunpack.i.l.bf16 %v9146_v45 }
 0x2ff   : > { %6759 = vrot.lane.b32.xlu0 %v6753_v58, %s7817_s1  ;;  %v6617_v58 = vunpack.i.h.bf16 %v9042_v59 }
 0x303   : > { %v9518_v21 = vpop.eup %7054  ;;  %4133 = vrot.lane.b32.xlu1 %v8506_v51, %s7819_s3  ;;  %v6607_v51 = vunpack.i.h.bf16 %v9060_v2  ;;  %v9533_v56 = vpop.permute.xlu1 %2162 }
 0x304   : > { %6113 = vmatmul.msk.f32.vlgmr.msrb.gmra.mxu0 %vm1214_vm1, %v9518_v21 }
 0x305   : > { %2599 = vmatpush.msrb.mxu0 %v6627_v53  ;;  %v9542_v53 = vld [vmem:[#allocation10 + $0x30] sm:$0xff] }
 0x307   : > { %2600 = vmatpush.msrb.mxu0 %v6626_v27  ;;  %v9548_v27 = vadd.f32 %v9334_v6, %v9542_v53  ;;  %v9562_v6 = vpop.permute.xlu2 %3332 }
 0x309   : > { %2601 = vmatpush.msrb.mxu0 %v6622_v1  ;;  %v9550_v1 = vld [vmem:[#allocation10 + $0x38] sm:$0xff] }
 0x30a   : > { %v9554_v2 = vadd.f32 %v9349_v46, %v9550_v1 }
 0x30b   : > { %2602 = vmatpush.msrb.mxu0 %v6621_v16  ;;  %v9538_v45 = vpop.permute.xlu1 %3324  ;;  %v1015_v16 = vpop.f32.mrf.mxu3 }
 0x30d   : > { %2603 = vmatpush.msrb.mxu0 %v6617_v58  ;;  %v9560_v58 = vpop.permute.xlu0 %6739 }
 0x30e   : > { %12907 = vst [vmem:[#allocation192_spill] sm:$0xff] %v9560_v58 }
 0x30f   : > { %2604 = vmatpush.msrb.mxu0 %v6616_v61  ;;  %v9570_v26 = vpop.permute.xlu2 %4145 }
 0x311   : > { %2605 = vmatpush.msrb.mxu0 %v6607_v51 }
 0x313   : > { %2606 = vmatpush.msrb.mxu0 %v6606_v31  ;;  %v9544_v59 = vpop.permute.xlu1 %6734  ;;  %v1018_v51 = vpop.f32.mrf.mxu3 }
 0x314   : > { %12906 = vst [vmem:[#allocation191_spill] sm:$0xff] %v9544_v59 }
 0x316   : > { %4131 = vrot.lane.b32.xlu2 %v8533_v7, %s7819_s3  ;;  %v1233_v7 = vsel %vm1214_vm1, %v9548_v27, -inf }
 0x31b   : > { %v2169_v61 = vpop.permute.xlu1 %2168  ;;  %v1021_v58 = vpop.f32.mrf.mxu3 }
 0x31c   : > { %v9575_v0 = vadd.f32 %v1021_v58, %v9467_v49 }
 0x31e   : > { %4119 = vrot.lane.b32.xlu2 %v8193_v60, %s7819_s3  ;;  %v1236_v60 = vsel %vm1214_vm1, %v9554_v2, -inf }
 0x323   : > { %v1223_v31 = vpop.xlane.xlu1 %1222 }
 0x324   : > { %v1313_v9 = vsub.f32 %v9400_v19, %v1223_v31  ;;  %v1229_v19 = vpop.xlane.xlu2 %1228 }
 0x329   : > { %1234 = vmax.xlane.f32.xlu0 %v1233_v7 }
 0x32b   : > { %v9566_v7 = vpop.permute.xlu1 %3330 }
 0x32d   : > { %1237 = vmax.xlane.f32.xlu1 %v1236_v60  ;;  %v1347_v60 = vmul.f32 1.442695, %v1313_v9  ;;  %v1248_v9 = vsel %vm1214_vm1, %v9575_v0, -inf }
 0x336   : > { %v1220_v25 = vpop.xlane.xlu0 %1219 }
 0x337   : > { %v1312_v46 = vsub.f32 %v9455_v57, %v1220_v25  ;;  %v12908_v57 = vld [vmem:[#allocation16_spill] sm:$0xff] }
 0x339   : > { %v1345_v59 = vmul.f32 1.442695, %v1312_v46  ;;  %v1232_v46 = vpop.xlane.xlu2 %1231 }
 0x33b   : > { %7056 = vpow2.f32 %v1345_v59 }
 0x33c   : > { %7058 = vpow2.f32 %v1347_v60 }
 0x33d   : > { %4117 = vrot.lane.b32.xlu0 %v8164_v48, %s7819_s3 }
 0x341   : > { %v9572_v35 = vpop.eup %7056 }
 0x342   : > { %6114 = vmatmul.msk.f32.gmra.mxu0 %vm1214_vm1, %v9572_v35  ;;  %v9586_v58 = vpop.eup %7058 }
 0x345   : > { %v1226_v25 = vpop.xlane.xlu1 %1225  ;;  %4123 = vrot.lane.b32.xlu0 %v8278_v50, %s7819_s3  ;;  %v1315_v50 = vsub.f32 %v9429_v38, %v1229_v19 }
 0x346   : > { %v1314_v48 = vsub.f32 %v9473_v52, %v1226_v25  ;;  %4115 = vrot.lane.b32.xlu1 %v12908_v57, %s7819_s3 }
 0x347   : > { %1249 = vmax.xlane.f32.xlu2 %v1248_v9  ;;  %v1351_v52 = vmul.f32 1.442695, %v1315_v50 }
 0x348   : > { %v1349_v59 = vmul.f32 1.442695, %v1314_v48  ;;  %v1316_v48 = vsub.f32 %v9442_v18, %v1232_v46 }
 0x349   : > { %v9588_v31 = vpop.permute.xlu0 %3328 }
 0x34a   : > { %6115 = vmatmul.msk.f32.gmra.mxu0 %vm1214_vm1, %v9586_v58  ;;  %7060 = vpow2.f32 %v1349_v59  ;;  %v1353_v57 = vmul.f32 1.442695, %v1316_v48  ;;  %v6641_v48 = vunpack.i.l.bf16 %v9304_v36 }
 0x34b   : > { %7062 = vpow2.f32 %v1351_v52  ;;  %v6667_v52 = vunpack.i.h.bf16 %v9332_v39 }
 0x34c   : > { %7064 = vpow2.f32 %v1353_v57  ;;  %v12909_v57 = vld [vmem:[#allocation60_spill] sm:$0xff] }
 0x34e   : > { %4121 = vrot.lane.b32.xlu1 %v8244_v32, %s7819_s3  ;;  %v9608_v32 = vpop.permute.xlu2 %4141 }
 0x350   : > { %v9595_v60 = vpop.eup %7060 }
 0x351   : > { %v9597_v25 = vpop.permute.xlu0 %6744  ;;  %v9602_v9 = vpop.eup %7062 }
 0x352   : > { %6116 = vmatmul.msk.f32.gmra.mxu0 %vm1214_vm1, %v9595_v60  ;;  %v9612_v19 = vpop.eup %7064 }
 0x356   : > { %v9622_v18 = vpop.permute.xlu2 %4135 }
 0x359   : > { %v2171_v38 = vpop.permute.xlu0 %2170 }
 0x35a   : > { %6117 = vmatmul.msk.f32.gmra.mxu0 %vm1214_vm1, %v9602_v9  ;;  %6194 = vmatpush.xpose.msk.msra.mxu3 %vm857_vm0, %v2171_v38  ;;  %v6637_v38 = vunpack.i.h.bf16 %v9272_v34 }
 0x35e   : > { %6195 = vmatpush.xpose.msk.msra.mxu3 %vm857_vm0, %v2169_v61  ;;  %v9625_v61 = vadd.f32 %v1015_v16, %v9451_v4  ;;  %v1024_v16 = vpop.f32.mrf.mxu3 }
 0x35f   : > { %4125 = vrot.lane.b32.xlu2 %v8326_v5, %s7819_s3 }
 0x360   : > { %v1242_v5 = vsel %vm1214_vm1, %v9625_v61, -inf }
 0x361   : > { %v9650_v46 = vpop.permute.xlu0 %4143 }
 0x362   : > { %6118 = vmatmul.msk.f32.gmra.mxu0 %vm1214_vm1, %v9612_v19  ;;  %6196 = vmatpush.xpose.msk.msra.mxu3 %vm857_vm0, %v9447_v54 }
 0x366   : > { %6197 = vmatpush.xpose.msk.msra.mxu3 %vm857_vm0, %v9498_v62 }
 0x367   : > { %4220 = vrot.lane.b32.xlu2 %v8128_v29, %s7819_s3  ;;  %v9637_v29 = vadd.f32 %v1018_v51, %v9396_v8  ;;  %v6642_v51 = vunpack.i.h.bf16 %v9304_v36 }
 0x36a   : > { %6198 = vmatpush.xpose.msk.msra.mxu3 %vm857_vm0, %v9533_v56  ;;  %v1245_v56 = vsel %vm1214_vm1, %v9637_v29, -inf }
 0x36e   : > { %6199 = vmatpush.xpose.msk.msra.mxu3 %vm857_vm0, %v9417_v15  ;;  %v9641_v15 = vpop.permute.xlu1 %6749 }
 0x36f   : > { %1243 = vmax.xlane.f32.xlu0 %v1242_v5 }
 0x371   : > { %v1241_v54 = vpop.xlane.xlu2 %1240 }
 0x372   : > { %v1319_v62 = vsub.f32 %v9508_v20, %v1241_v54  ;;  %6200 = vmatpush.xpose.msk.msra.mxu3 %vm857_vm0, %v9486_v17  ;;  %v1027_v20 = vpop.f32.mrf.mxu3  ;;  %v6666_v17 = vunpack.i.l.bf16 %v9332_v39  ;;  %v6636_v54 = vunpack.i.l.bf16 %v9272_v34  ;;  %v6632_v39 = vunpack.i.h.bf16 %v9206_v33 }
 0x374   : > { %v1359_v59 = vmul.f32 1.442695, %v1319_v62 }
 0x376   : > { %7066 = vpow2.f32 %v1359_v59  ;;  %v9656_v5 = vpop.permute.xlu1 %6754  ;;  %v6631_v59 = vunpack.i.l.bf16 %v9206_v33 }
 0x378   : > { %1246 = vmax.xlane.f32.xlu1 %v1245_v56  ;;  %v9661_v56 = vpop.permute.xlu0 %4137 }
 0x37a   : > { %v1030_v62 = vpop.f32.mrf.mxu3 }
 0x37b   : > { %v9664_v36 = vadd.f32 %v1030_v62, %v9542_v53 }
 0x37c   : > { %v9643_v50 = vpop.eup %7066 }
 0x37d   : > { %6121 = vmatmul.msk.f32.vlgmr.msra.gmra.mxu1 %vm1214_vm1, %v9643_v50  ;;  %v1257_v34 = vsel %vm1214_vm1, %v9664_v36, -inf }
 0x37e   : > { %2696 = vmatpush.msra.mxu1 %v6667_v52  ;;  %v9668_v52 = vpop.permute.xlu1 %4139 }
 0x380   : > { %2697 = vmatpush.msra.mxu1 %v6666_v17  ;;  %v12910_v17 = vld [vmem:[#allocation46_spill] sm:$0xff]  ;;  %v9674_v33 = vpop.permute.xlu0 %6759 }
 0x382   : > { %2698 = vmatpush.msra.mxu1 %v6642_v51 }
 0x383   : > { %4129 = vrot.lane.b32.xlu0 %v12909_v57, %s7819_s3 }
 0x384   : > { %2699 = vmatpush.msra.mxu1 %v6641_v48  ;;  %v12911_v48 = vld [vmem:[#allocation19_spill] sm:$0xff] }
 0x386   : > { %2700 = vmatpush.msra.mxu1 %v6637_v38  ;;  %v9676_v51 = vpop.permute.xlu1 %4133 }
 0x388   : > { %2701 = vmatpush.msra.mxu1 %v6636_v54 }
 0x38a   : > { %2702 = vmatpush.msra.mxu1 %v6632_v39 }
 0x38b   : > { %4250 = vrot.lane.b32.xlu0 %v8648_v41, %s7819_s3 }
 0x38c   : > { %2703 = vmatpush.msra.mxu1 %v6631_v59 }
 0x390   : > { %1258 = vmax.xlane.f32.xlu2 %v1257_v34 }
 0x391   : > { %4127 = vrot.lane.b32.xlu1 %v12910_v17, %s7819_s3  ;;  %v9691_v17 = vadd.f32 %v1024_v16, %v9419_v55  ;;  %v9704_v16 = vadd.f32 %v1027_v20, %v9435_v28  ;;  %v12916_v20 = vld [vmem:[#allocation147_spill] sm:$0xff] }
 0x399   : > { %4222 = vrot.lane.b32.xlu1 %v12911_v48, %s7819_s3  ;;  %v12913_v48 = vld [vmem:[#allocation38_spill] sm:$0xff] }
 0x39c   : > { %v1235_v57 = vpop.xlane.xlu0 %1234 }
 0x39d   : > { %v1317_v41 = vsub.f32 %v9548_v27, %v1235_v57  ;;  %v1251_v27 = vsel %vm1214_vm1, %v9691_v17, -inf  ;;  %v1254_v57 = vsel %vm1214_vm1, %v9704_v16, -inf }
 0x39f   : > { %v1355_v38 = vmul.f32 1.442695, %v1317_v41  ;;  %v12914_v41 = vld [vmem:[#allocation66_spill] sm:$0xff] }
 0x3a0   : > { %v1238_v54 = vpop.xlane.xlu1 %1237 }
 0x3a1   : > { %7068 = vpow2.f32 %v1355_v38  ;;  %v1318_v39 = vsub.f32 %v9554_v2, %v1238_v54  ;;  %v12912_v2 = vld [vmem:[#allocation39_spill] sm:$0xff]  ;;  %v1407_v38 = vsel %vm1214_vm1, %v9518_v21, 0.0 }
 0x3a2   : > { %v12918_v54 = vld [vmem:[#allocation67_spill] sm:$0xff] }
 0x3a3   : > { %v1357_v62 = vmul.f32 1.442695, %v1318_v39  ;;  %v12919_v39 = vld [vmem:[#allocation142_spill] sm:$0xff] }
 0x3a5   : > { %7070 = vpow2.f32 %v1357_v62  ;;  %v12920_v62 = vld [vmem:[#allocation145_spill] sm:$0xff] }
 0x3a7   : > { %v9682_v59 = vpop.eup %7068 }
 0x3a8   : > { %4248 = vrot.lane.b32.xlu2 %v8654_v14, %s7819_s3  ;;  %6119 = vmatmul.msk.f32.gmra.mxu0 %vm1214_vm1, %v9682_v59  ;;  %v1033_v14 = vpop.f32.mrf.mxu3 }
 0x3ab   : > { %v9688_v34 = vpop.eup %7070 }
 0x3b0   : > { %6120 = vmatmul.msk.f32.gmra.mxu0 %vm1214_vm1, %v9688_v34 }
 0x3b5   : > { %1252 = vmax.xlane.f32.xlu0 %v1251_v27 }
 0x3b8   : > { %6153 = vmatmul.msk.f32.vlgmr.msra.gmra.mxu0 %vm857_vm0, %v12912_v2  ;;  %v12921_v2 = vld [vmem:[#allocation94_spill] sm:$0xff]  ;;  %v9739_v21 = vpop.permute.xlu1 %4115 }
 0x3b9   : > { %6241 = vmatpush.xpose.msk.msra.mxu0 %vm857_vm0, %v9123_v11  ;;  %v1101_v11 = vpop.f32.mrf.mxu3  ;;  %12922 = vst [vmem:[#allocation60_spill] sm:$0xff] %v9739_v21 }
 0x3bd   : > { %6242 = vmatpush.xpose.msk.msra.mxu0 %vm857_vm0, %v9175_v3  ;;  %v12915_v3 = vld [vmem:[#allocation23_spill] sm:$0xff] }
 0x3c0   : > { %6154 = vmatmul.msk.f32.gmra.mxu0 %vm857_vm0, %v12913_v48 }
 0x3c1   : > { %6243 = vmatpush.xpose.msk.msra.mxu0 %vm857_vm0, %v9118_v40  ;;  %v9722_v40 = vpop.permute.xlu0 %4117 }
 0x3c2   : > { %12917 = vst [vmem:[#allocation16_spill] sm:$0xff] %v9722_v40 }
 0x3c3   : > { %1255 = vmax.xlane.f32.xlu1 %v1254_v57  ;;  %v9743_v57 = vpop.permute.xlu2 %4131 }
 0x3c5   : > { %6244 = vmatpush.xpose.msk.msra.mxu0 %vm857_vm0, %v9078_v30  ;;  %v1104_v30 = vpop.f32.mrf.mxu3 }
 0x3c8   : > { %6155 = vmatmul.msk.f32.gmra.mxu0 %vm857_vm0, %v12914_v41  ;;  %v12924_v41 = vld [vmem:[#allocation83_spill] sm:$0xff] }
 0x3c9   : > { %6245 = vmatpush.xpose.msk.msra.mxu0 %vm857_vm0, %v9098_v13  ;;  %4224 = vrot.lane.b32.xlu0 %v12915_v3, %s7819_s3  ;;  %v9731_v13 = vadd.f32 %v1104_v30, %v9451_v4  ;;  %v9741_v48 = vpop.permute.xlu0 %4123  ;;  %v12925_v3 = vld [vmem:[#allocation106_spill] sm:$0xff] }
 0x3ca   : > { %12923 = vst [vmem:[#allocation46_spill] sm:$0xff] %v9741_v48 }
 0x3cb   : > { %v1266_v27 = vsel %vm1214_vm1, %v9731_v13, -inf  ;;  %v9752_v30 = vpop.permute.xlu2 %4119 }
 0x3cc   : > { %12927 = vst [vmem:[#allocation39_spill] sm:$0xff] %v9752_v30 }
 0x3cd   : > { %6246 = vmatpush.xpose.msk.msra.mxu0 %vm857_vm0, %v12916_v20 }
 0x3d0   : > { %6156 = vmatmul.msk.f32.gmra.mxu0 %vm857_vm0, %v12918_v54 }
 0x3d1   : > { %1408 = vadd.xlane.f32.xlu2 %v1407_v38  ;;  %6247 = vmatpush.xpose.msk.msra.mxu0 %vm857_vm0, %v12919_v39  ;;  %v9749_v38 = vpop.permute.xlu1 %4121 }
 0x3d2   : > { %12926 = vst [vmem:[#allocation19_spill] sm:$0xff] %v9749_v38 }
 0x3d5   : > { %6248 = vmatpush.xpose.msk.msra.mxu0 %vm857_vm0, %v12920_v62  ;;  %v12928_v62 = vld [vmem:[#allocation107_spill] sm:$0xff] }
 0x3d8   : > { %6157 = vmatmul.msk.f32.gmra.mxu0 %vm857_vm0, %v12921_v2 }
 0x3d9   : > { %1267 = vmax.xlane.f32.xlu2 %v1266_v27 }
 0x3dc   : > { %4246 = vrot.lane.b32.xlu1 %v12924_v41, %s7819_s3  ;;  %v1250_v41 = vpop.xlane.xlu2 %1249 }
 0x3e0   : > { %6158 = vmatmul.msk.f32.gmra.mxu0 %vm857_vm0, %v12925_v3  ;;  %v9760_v3 = vadd.f32 %v1033_v14, %v9550_v1 }
 0x3e2   : > { %v1244_v20 = vpop.xlane.xlu0 %1243 }
 0x3e3   : > { %v1320_v54 = vsub.f32 %v9625_v61, %v1244_v20  ;;  %v1322_v61 = vsub.f32 %v9575_v0, %v1250_v41  ;;  %v12929_v20 = vld [vmem:[#allocation134_spill] sm:$0xff]  ;;  %v9780_v0 = vadd.f32 %v1101_v11, %v9378_v23  ;;  %v12933_v11 = vld [vmem:[#allocation92_spill] sm:$0xff] }
 0x3e5   : > { %v1361_v39 = vmul.f32 1.442695, %v1320_v54  ;;  %v12930_v54 = vld [vmem:[#allocation88_spill] sm:$0xff] }
 0x3e7   : > { %7072 = vpow2.f32 %v1361_v39  ;;  %v1365_v39 = vmul.f32 1.442695, %v1322_v61 }
 0x3e8   : > { %6159 = vmatmul.msk.f32.gmra.mxu0 %vm857_vm0, %v12928_v62 }
 0x3eb   : > { %v1247_v27 = vpop.xlane.xlu1 %1246 }
 0x3ec   : > { %v1321_v2 = vsub.f32 %v9637_v29, %v1247_v27  ;;  %v1260_v29 = vsel %vm1214_vm1, %v9760_v3, -inf  ;;  %v1107_v27 = vpop.f32.mrf.mxu3 }
 0x3ed   : > { %v9757_v48 = vpop.eup %7072 }
 0x3ee   : > { %v1363_v40 = vmul.f32 1.442695, %v1321_v2  ;;  %6122 = vmatmul.msk.f32.gmra.mxu1 %vm1214_vm1, %v9757_v48  ;;  %v12931_v2 = vld [vmem:[#allocation97_spill] sm:$0xff] }
 0x3f0   : > { %7074 = vpow2.f32 %v1363_v40  ;;  %6160 = vmatmul.msk.f32.gmra.mxu0 %vm857_vm0, %v12929_v20  ;;  %v1263_v40 = vsel %vm1214_vm1, %v9780_v0, -inf  ;;  %v1416_v20 = vsel %vm1214_vm1, %v9595_v60, 0.0 }
 0x3f1   : > { %4244 = vrot.lane.b32.xlu2 %v12930_v54, %s7819_s3  ;;  %7076 = vpow2.f32 %v1365_v39 }
 0x3f3   : > { %1261 = vmax.xlane.f32.xlu0 %v1260_v29 }
 0x3f4   : > { %v1110_v41 = vpop.f32.mrf.mxu3 }
 0x3f5   : > { %v9786_v61 = vpop.permute.xlu0 %4129 }
 0x3f6   : > { %v9771_v14 = vpop.eup %7074  ;;  %12932 = vst [vmem:[#allocation38_spill] sm:$0xff] %v9786_v61  ;;  %v9801_v61 = vpop.permute.xlu2 %4125 }
 0x3f7   : > { %6123 = vmatmul.msk.f32.gmra.mxu1 %vm1214_vm1, %v9771_v14  ;;  %v9775_v62 = vpop.eup %7076  ;;  %12935 = vst [vmem:[#allocation23_spill] sm:$0xff] %v9801_v61 }
 0x3fc   : > { %v1113_v54 = vpop.f32.mrf.mxu3 }
 0x3fd   : > { %v9791_v29 = vadd.f32 %v1113_v54, %v9419_v55  ;;  %v9795_v39 = vpop.permute.xlu0 %4250 }
 0x3fe   : > { %v9806_v30 = vpop.permute.xlu2 %4220 }
 0x3ff   : > { %6124 = vmatmul.msk.f32.gmra.mxu1 %vm1214_vm1, %v9775_v62  ;;  %12937 = vst [vmem:[#allocation67_spill] sm:$0xff] %v9806_v30 }
 0x406   : > { %1264 = vmax.xlane.f32.xlu1 %v1263_v40  ;;  %v1275_v40 = vsel %vm1214_vm1, %v9791_v29, -inf }
 0x407   : > { %4240 = vrot.lane.b32.xlu0 %v12931_v2, %s7819_s3  ;;  %v9799_v2 = vpop.permute.xlu1 %4127 }
 0x408   : > { %12934 = vst [vmem:[#allocation66_spill] sm:$0xff] %v9799_v2 }
 0x40f   : > { %v9804_v54 = vpop.permute.xlu1 %4222 }
 0x410   : > { %12936 = vst [vmem:[#allocation147_spill] sm:$0xff] %v9804_v54 }
 0x41a   : > { %1417 = vadd.xlane.f32.xlu2 %v1416_v20 }
 0x41f   : > { %4242 = vrot.lane.b32.xlu1 %v12933_v11, %s7819_s3  ;;  %v1410_v11 = vsel %vm1214_vm1, %v9572_v35, 0.0  ;;  %v12938_v35 = vld [vmem:[#allocation25_spill] sm:$0xff] }
 0x422   : > { %1276 = vmax.xlane.f32.xlu2 %v1275_v40  ;;  %v9813_v40 = vadd.f32 %v1107_v27, %v9396_v8 }
 0x428   : > { %v1253_v38 = vpop.xlane.xlu0 %1252 }
 0x429   : > { %v1323_v60 = vsub.f32 %v9691_v17, %v1253_v38  ;;  %v1259_v38 = vpop.xlane.xlu2 %1258 }
 0x42b   : > { %v1367_v20 = vmul.f32 1.442695, %v1323_v60  ;;  %v1269_v60 = vsel %vm1214_vm1, %v9813_v40, -inf }
 0x42d   : > { %7078 = vpow2.f32 %v1367_v20 }
 0x431   : > { %1411 = vadd.xlane.f32.xlu0 %v1410_v11  ;;  %v1325_v11 = vsub.f32 %v9664_v36, %v1259_v38  ;;  %v12939_v36 = vld [vmem:[#allocation102_spill] sm:$0xff]  ;;  %v1116_v38 = vpop.f32.mrf.mxu3 }
 0x433   : > { %v9810_v21 = vpop.eup %7078  ;;  %v1371_v27 = vmul.f32 1.442695, %v1325_v11 }
 0x434   : > { %6125 = vmatmul.msk.f32.gmra.mxu1 %vm1214_vm1, %v9810_v21 }
 0x436   : > { %v1256_v2 = vpop.xlane.xlu1 %1255 }
 0x437   : > { %v1324_v17 = vsub.f32 %v9704_v16, %v1256_v2  ;;  %v1413_v16 = vsel %vm1214_vm1, %v9586_v58, 0.0 }
 0x439   : > { %v1369_v20 = vmul.f32 1.442695, %v1324_v17  ;;  %1270 = vmax.xlane.f32.xlu0 %v1269_v60  ;;  %v9834_v17 = vadd.f32 %v1110_v41, %v9467_v49 }
 0x43a   : > { %4226 = vrot.lane.b32.xlu2 %v12938_v35, %s7819_s3  ;;  %v1425_v35 = vsel %vm1214_vm1, %v9682_v59, 0.0 }
 0x43b   : > { %7080 = vpow2.f32 %v1369_v20  ;;  %v1272_v60 = vsel %vm1214_vm1, %v9834_v17, -inf  ;;  %v9840_v20 = vpop.f32.mrf.mxu3  ;;  %v9842_v58 = vpop.permute.xlu0 %4224 }
 0x43c   : > { %7082 = vpow2.f32 %v1371_v27  ;;  %12940 = vst [vmem:[#allocation142_spill] sm:$0xff] %v9842_v58 }
 0x441   : > { %v9823_v54 = vpop.eup %7080 }
 0x442   : > { %6126 = vmatmul.msk.f32.gmra.mxu1 %vm1214_vm1, %v9823_v54  ;;  %v9829_v2 = vpop.eup %7082 }
 0x443   : > { %v1122_v11 = vpop.f32.mrf.mxu3 }
 0x444   : > { %v9847_v41 = vadd.f32 %v1122_v11, %v9550_v1 }
 0x446   : > { %v1284_v58 = vsel %vm1214_vm1, %v9847_v41, -inf }
 0x449   : > { %1414 = vadd.xlane.f32.xlu1 %v1413_v16 }
 0x44a   : > { %6127 = vmatmul.msk.f32.gmra.mxu1 %vm1214_vm1, %v9829_v2 }
 0x44d   : > { %4236 = vrot.lane.b32.xlu0 %v12939_v36, %s7819_s3  ;;  %v9850_v36 = vpop.permute.xlu2 %4248 }
 0x44e   : > { %v9860_v11 = vpop.permute.xlu1 %4246 }
 0x451   : > { %1273 = vmax.xlane.f32.xlu1 %v1272_v60  ;;  %v12941_v60 = vld [vmem:[#allocation99_spill] sm:$0xff] }
 0x463   : > { %1426 = vadd.xlane.f32.xlu2 %v1425_v35  ;;  %v9858_v35 = vpop.xlane.xlu2 %1408 }
 0x464   : > { %12942 = vst [vmem:[#allocation145_spill] sm:$0xff] %v9858_v35 }
 0x466   : > { %v1262_v27 = vpop.xlane.xlu0 %1261 }
 0x467   : > { %v1326_v16 = vsub.f32 %v9760_v3, %v1262_v27  ;;  %v1419_v3 = vsel %vm1214_vm1, %v9602_v9, 0.0 }
 0x469   : > { %v1373_v30 = vmul.f32 1.442695, %v1326_v16  ;;  %v9867_v16 = vadd.f32 %v1116_v38, %v9435_v28 }
 0x46a   : > { %4238 = vrot.lane.b32.xlu1 %v12941_v60, %s7819_s3 }
 0x46b   : > { %7084 = vpow2.f32 %v1373_v30  ;;  %1285 = vmax.xlane.f32.xlu2 %v1284_v58  ;;  %v12943_v58 = vld [vmem:[#allocation44_spill] sm:$0xff]  ;;  %v1268_v60 = vpop.xlane.xlu2 %1267  ;;  %v1278_v9 = vsel %vm1214_vm1, %v9867_v16, -inf }
 0x46c   : > { %v1328_v61 = vsub.f32 %v9731_v13, %v1268_v60  ;;  %v6717_v13 = vunpack.i.h.bf16 %v9480_v47 }
 0x46e   : > { %v1377_v38 = vmul.f32 1.442695, %v1328_v61  ;;  %v12946_v61 = vld [vmem:[#allocation181_spill] sm:$0xff] }
 0x471   : > { %v9856_v59 = vpop.eup %7084 }
 0x472   : > { %6128 = vmatmul.msk.f32.gmra.mxu1 %vm1214_vm1, %v9856_v59 }
 0x477   : > { %1420 = vadd.xlane.f32.xlu0 %v1419_v3  ;;  %v12945_v3 = vld [vmem:[#allocation27_spill] sm:$0xff] }
 0x479   : > { %v1265_v27 = vpop.xlane.xlu1 %1264 }
 0x47a   : > { %v1327_v30 = vsub.f32 %v9780_v0, %v1265_v27  ;;  %6169 = vmatmul.msk.f32.vlgmr.msrb.gmra.mxu1 %vm857_vm0, %v12943_v58  ;;  %v12944_v0 = vld [vmem:[#allocation51_spill] sm:$0xff]  ;;  %v6696_v27 = vunpack.i.l.bf16 %v12946_v61 }
 0x47b   : > { %6257 = vmatpush.xpose.msk.msrb.mxu1 %vm857_vm0, %v9344_v22 }
 0x47c   : > { %v1375_v35 = vmul.f32 1.442695, %v1327_v30  ;;  %v12948_v30 = vld [vmem:[#allocation167_spill] sm:$0xff] }
 0x47e   : > { %7086 = vpow2.f32 %v1375_v35  ;;  %v6697_v35 = vunpack.i.h.bf16 %v12946_v61  ;;  %v12953_v61 = vld [vmem:[#allocation158_spill] sm:$0xff] }
 0x47f   : > { %6258 = vmatpush.xpose.msk.msrb.mxu1 %vm857_vm0, %v9302_v44  ;;  %1279 = vmax.xlane.f32.xlu0 %v1278_v9  ;;  %v6716_v44 = vunpack.i.l.bf16 %v9480_v47  ;;  %7088 = vpow2.f32 %v1377_v38  ;;  %v12949_v47 = vld [vmem:[#allocation182_spill] sm:$0xff]  ;;  %v12950_v9 = vld [vmem:[#allocation164_spill] sm:$0xff] }
 0x480   : > { %v6692_v60 = vunpack.i.h.bf16 %v12949_v47  ;;  %v12951_v38 = vld [vmem:[#allocation176_spill] sm:$0xff] }
 0x482   : > { %6170 = vmatmul.msk.f32.gmra.mxu1 %vm857_vm0, %v12944_v0  ;;  %v6672_v0 = vunpack.i.h.bf16 %v12951_v38 }
 0x483   : > { %4228 = vrot.lane.b32.xlu2 %v12945_v3, %s7819_s3  ;;  %6259 = vmatpush.xpose.msk.msrb.mxu1 %vm857_vm0, %v9290_v42  ;;  %v12947_v42 = vld [vmem:[#allocation58_spill] sm:$0xff]  ;;  %v6671_v3 = vunpack.i.l.bf16 %v12951_v38 }
 0x484   : > { %v9885_v22 = vpop.eup %7086 }
 0x485   : > { %6129 = vmatmul.msk.f32.vlgmr.msra.gmra.mxu2 %vm1214_vm1, %v9885_v22  ;;  %v9899_v58 = vpop.eup %7088 }
 0x486   : > { %2793 = vmatpush.msra.mxu2 %v6717_v13  ;;  %v12952_v13 = vld [vmem:[#allocation80_spill] sm:$0xff] }
 0x487   : > { %6260 = vmatpush.xpose.msk.msrb.mxu1 %vm857_vm0, %v9288_v63  ;;  %v6691_v63 = vunpack.i.l.bf16 %v12949_v47  ;;  %v12956_v47 = vld [vmem:[#allocation91_spill] sm:$0xff] }
 0x488   : > { %2794 = vmatpush.msra.mxu2 %v6716_v44  ;;  %v1422_v44 = vsel %vm1214_vm1, %v9612_v19, 0.0 }
 0x48a   : > { %2795 = vmatpush.msra.mxu2 %v6697_v35  ;;  %6171 = vmatmul.msk.f32.gmra.mxu1 %vm857_vm0, %v12947_v42  ;;  %v12954_v35 = vld [vmem:[#allocation45_spill] sm:$0xff]  ;;  %v12955_v42 = vld [vmem:[#allocation155_spill] sm:$0xff] }
 0x48b   : > { %6261 = vmatpush.xpose.msk.msrb.mxu1 %vm857_vm0, %v12948_v30  ;;  %v1190_v30 = vpop.f32.mrf.mxu3 }
 0x48c   : > { %2796 = vmatpush.msra.mxu2 %v6696_v27  ;;  %v9919_v27 = vadd.f32 %v9840_v20, %v9542_v53  ;;  %v12959_v20 = vld [vmem:[#allocation117_spill] sm:$0xff] }
 0x48d   : > { %6130 = vmatmul.msk.f32.gmra.mxu2 %vm1214_vm1, %v9899_v58 }
 0x48e   : > { %2797 = vmatpush.msra.mxu2 %v6692_v60  ;;  %v1281_v19 = vsel %vm1214_vm1, %v9919_v27, -inf  ;;  %v9927_v60 = vpop.permute.xlu0 %4240 }
 0x48f   : > { %6262 = vmatpush.xpose.msk.msrb.mxu1 %vm857_vm0, %v12950_v9  ;;  %v12957_v9 = vld [vmem:[#allocation100_spill] sm:$0xff] }
 0x490   : > { %2798 = vmatpush.msra.mxu2 %v6691_v63 }
 0x492   : > { %2799 = vmatpush.msra.mxu2 %v6672_v0  ;;  %6172 = vmatmul.msk.f32.gmra.mxu1 %vm857_vm0, %v12952_v13  ;;  %v1434_v0 = vsel %vm1214_vm1, %v9757_v48, 0.0  ;;  %v12961_v48 = vld [vmem:[#allocation35_spill] sm:$0xff] }
 0x493   : > { %6263 = vmatpush.xpose.msk.msrb.mxu1 %vm857_vm0, %v12953_v61  ;;  %4232 = vrot.lane.b32.xlu0 %v12954_v35, %s7819_s3  ;;  %v1193_v63 = vpop.f32.mrf.mxu3 }
 0x494   : > { %2800 = vmatpush.msra.mxu2 %v6671_v3  ;;  %1423 = vadd.xlane.f32.xlu1 %v1422_v44 }
 0x497   : > { %6264 = vmatpush.xpose.msk.msrb.mxu1 %vm857_vm0, %v12955_v42  ;;  %v12960_v42 = vld [vmem:[#allocation131_spill] sm:$0xff] }
 0x49a   : > { %6173 = vmatmul.msk.f32.gmra.mxu1 %vm857_vm0, %v12956_v47 }
 0x49b   : > { %v1196_v3 = vpop.f32.mrf.mxu3 }
 0x49c   : > { %1282 = vmax.xlane.f32.xlu1 %v1281_v19  ;;  %v9939_v61 = vadd.f32 %v1196_v3, %v9396_v8  ;;  %v9945_v19 = vpop.permute.xlu2 %4244  ;;  %v9962_v3 = vadd.f32 %v1190_v30, %v9378_v23 }
 0x49e   : > { %v1293_v47 = vsel %vm1214_vm1, %v9939_v61, -inf }
 0x4a2   : > { %6174 = vmatmul.msk.f32.gmra.mxu1 %vm857_vm0, %v12957_v9  ;;  %v9947_v9 = vpop.permute.xlu1 %4242 }
 0x4a3   : > { %v1199_v30 = vpop.f32.mrf.mxu3 }
 0x4a4   : > { %v9931_v38 = vpop.xlane.xlu0 %1411  ;;  %v9955_v8 = vpop.xlane.xlu2 %1417 }
 0x4a5   : > { %12958 = vst [vmem:[#allocation94_spill] sm:$0xff] %v9931_v38 }
 0x4a6   : > { %12962 = vst [vmem:[#allocation83_spill] sm:$0xff] %v9955_v8  ;;  %v12964_v8 = vld [vmem:[#allocation62_spill] sm:$0xff] }
 0x4aa   : > { %6175 = vmatmul.msk.f32.gmra.mxu1 %vm857_vm0, %v12959_v20 }
 0x4ac   : > { %1435 = vadd.xlane.f32.xlu2 %v1434_v0  ;;  %v1271_v13 = vpop.xlane.xlu0 %1270  ;;  %v1428_v0 = vsel %vm1214_vm1, %v9688_v34, 0.0 }
 0x4ad   : > { %v1329_v44 = vsub.f32 %v9813_v40, %v1271_v13 }
 0x4af   : > { %v1379_v35 = vmul.f32 1.442695, %v1329_v44  ;;  %v1287_v44 = vsel %vm1214_vm1, %v9962_v3, -inf }
 0x4b1   : > { %7090 = vpow2.f32 %v1379_v35 }
 0x4b2   : > { %6176 = vmatmul.msk.f32.gmra.mxu1 %vm857_vm0, %v12960_v42  ;;  %v1277_v42 = vpop.xlane.xlu2 %1276 }
 0x4b4   : > { %1294 = vmax.xlane.f32.xlu2 %v1293_v47 }
 0x4b5   : > { %4230 = vrot.lane.b32.xlu1 %v12961_v48, %s7819_s3  ;;  %v1331_v48 = vsub.f32 %v9791_v29, %v1277_v42  ;;  %v1431_v29 = vsel %vm1214_vm1, %v9643_v50, 0.0  ;;  %v1202_v42 = vpop.f32.mrf.mxu3  ;;  %v1443_v50 = vsel %vm1214_vm1, %v9810_v21, 0.0  ;;  %v12968_v21 = vld [vmem:[#allocation17_spill] sm:$0xff] }
 0x4b7   : > { %v9951_v40 = vpop.eup %7090  ;;  %v1383_v34 = vmul.f32 1.442695, %v1331_v48 }
 0x4b8   : > { %6131 = vmatmul.msk.f32.gmra.mxu2 %vm1214_vm1, %v9951_v40 }
 0x4bc   : > { %v9957_v20 = vpop.xlane.xlu1 %1414 }
 0x4bd   : > { %12963 = vst [vmem:[#allocation106_spill] sm:$0xff] %v9957_v20  ;;  %1429 = vadd.xlane.f32.xlu0 %v1428_v0 }
 0x4c4   : > { %v1274_v13 = vpop.xlane.xlu1 %1273 }
 0x4c5   : > { %v1330_v35 = vsub.f32 %v9834_v17, %v1274_v13  ;;  %1288 = vmax.xlane.f32.xlu0 %v1287_v44  ;;  %v12965_v17 = vld [vmem:[#allocation21_spill] sm:$0xff]  ;;  %v9985_v13 = vpop.permute.xlu0 %4236 }
 0x4c7   : > { %v1381_v47 = vmul.f32 1.442695, %v1330_v35 }
 0x4c9   : > { %7092 = vpow2.f32 %v1381_v47 }
 0x4ca   : > { %7094 = vpow2.f32 %v1383_v34  ;;  %v1205_v34 = vpop.f32.mrf.mxu3 }
 0x4cc   : > { %4234 = vrot.lane.b32.xlu2 %v12964_v8, %s7819_s3  ;;  %v9983_v8 = vadd.f32 %v1193_v63, %v9451_v4  ;;  %v9995_v4 = vadd.f32 %v1205_v34, %v9435_v28  ;;  %v1437_v28 = vsel %vm1214_vm1, %v9771_v14, 0.0  ;;  %v12971_v14 = vld [vmem:[#allocation24_spill] sm:$0xff] }
 0x4ce   : > { %v1290_v44 = vsel %vm1214_vm1, %v9983_v8, -inf  ;;  %v1302_v63 = vsel %vm1214_vm1, %v9995_v4, -inf }
 0x4cf   : > { %v9970_v0 = vpop.eup %7092 }
 0x4d0   : > { %6132 = vmatmul.msk.f32.gmra.mxu2 %vm1214_vm1, %v9970_v0  ;;  %v9974_v23 = vpop.eup %7094 }
 0x4d8   : > { %6133 = vmatmul.msk.f32.gmra.mxu2 %vm1214_vm1, %v9974_v23 }
 0x4d9   : > { %4327 = vrot.lane.b32.xlu0 %v12965_v17, %s7819_s3 }
 0x4df   : > { %1432 = vadd.xlane.f32.xlu1 %v1431_v29 }
 0x4e7   : > { %1291 = vmax.xlane.f32.xlu1 %v1290_v44  ;;  %v10005_v44 = vpop.permute.xlu1 %4238 }
 0x4ea   : > { %v9989_v35 = vpop.xlane.xlu0 %1420 }
 0x4eb   : > { %12966 = vst [vmem:[#allocation107_spill] sm:$0xff] %v9989_v35 }
 0x4f2   : > { %v1280_v47 = vpop.xlane.xlu0 %1279 }
 0x4f3   : > { %v1332_v48 = vsub.f32 %v9867_v16, %v1280_v47  ;;  %v10003_v16 = vpop.permute.xlu2 %4226  ;;  %v10012_v47 = vadd.f32 %v1199_v30, %v9467_v49 }
 0x4f4   : > { %12967 = vst [vmem:[#allocation134_spill] sm:$0xff] %v10003_v16 }
 0x4f5   : > { %v1385_v17 = vmul.f32 1.442695, %v1332_v48  ;;  %1444 = vadd.xlane.f32.xlu2 %v1443_v50  ;;  %v1296_v34 = vsel %vm1214_vm1, %v10012_v47, -inf }
 0x4f7   : > { %7096 = vpow2.f32 %v1385_v17 }
 0x4fb   : > { %v10014_v48 = vpop.xlane.xlu2 %1426 }
 0x4fc   : > { %12969 = vst [vmem:[#allocation88_spill] sm:$0xff] %v10014_v48  ;;  %v10181_v48 = vld [vmem:[#allocation10 + $0x48] sm:$0xff] }
 0x4fd   : > { %v9999_v29 = vpop.eup %7096  ;;  %1303 = vmax.xlane.f32.xlu2 %v1302_v63 }
 0x4fe   : > { %6134 = vmatmul.msk.f32.gmra.mxu2 %vm1214_vm1, %v9999_v29 }
 0x500   : > { %4325 = vrot.lane.b32.xlu1 %v12968_v21, %s7819_s3 }
 0x503   : > { %1438 = vadd.xlane.f32.xlu0 %v1437_v28  ;;  %v1286_v35 = vpop.xlane.xlu2 %1285  ;;  %v12972_v28 = vld [vmem:[#allocation119_spill] sm:$0xff] }
 0x504   : > { %v1334_v20 = vsub.f32 %v9847_v41, %v1286_v35  ;;  %v10043_v35 = vadd.f32 %v1202_v42, %v9419_v55 }
 0x505   : > { %v10034_v41 = vpop.permute.xlu0 %4232 }
 0x506   : > { %v1389_v49 = vmul.f32 1.442695, %v1334_v20  ;;  %12973 = vst [vmem:[#allocation92_spill] sm:$0xff] %v10034_v41  ;;  %v12974_v20 = vld [vmem:[#allocation42_spill] sm:$0xff] }
 0x507   : > { %v10016_v50 = vpop.xlane.xlu1 %1423 }
 0x508   : > { %12970 = vst [vmem:[#allocation97_spill] sm:$0xff] %v10016_v50  ;;  %v13043_v50 = vld [vmem:[#allocation143_spill] sm:$0xff] }
 0x50b   : > { %1297 = vmax.xlane.f32.xlu0 %v1296_v34 }
 0x50f   : > { %v1283_v17 = vpop.xlane.xlu1 %1282 }
 0x510   : > { %v1333_v63 = vsub.f32 %v9919_v27, %v1283_v17  ;;  %v1440_v27 = vsel %vm1214_vm1, %v9775_v62, 0.0  ;;  %v12975_v17 = vld [vmem:[#allocation186_spill] sm:$0xff]  ;;  %v12977_v62 = vld [vmem:[#allocation43_spill] sm:$0xff] }
 0x512   : > { %v1387_v21 = vmul.f32 1.442695, %v1333_v63 }
 0x514   : > { %7098 = vpow2.f32 %v1387_v21  ;;  %v1299_v21 = vsel %vm1214_vm1, %v10043_v35, -inf }
 0x515   : > { %4329 = vrot.lane.b32.xlu2 %v12971_v14, %s7819_s3  ;;  %7100 = vpow2.f32 %v1389_v49  ;;  %v12978_v14 = vld [vmem:[#allocation179_spill] sm:$0xff]  ;;  %v12979_v49 = vld [vmem:[#allocation184_spill] sm:$0xff] }
 0x51a   : > { %v10024_v30 = vpop.eup %7098 }
 0x51b   : > { %6135 = vmatmul.msk.f32.gmra.mxu2 %vm1214_vm1, %v10024_v30  ;;  %v10030_v34 = vpop.eup %7100 }
 0x51f   : > { %4353 = vrot.lane.b32.xlu0 %v12972_v28, %s7819_s3  ;;  %v12980_v28 = vld [vmem:[#allocation73_spill] sm:$0xff] }
 0x523   : > { %6136 = vmatmul.msk.f32.gmra.mxu2 %vm1214_vm1, %v10030_v34 }
 0x52a   : > { %1441 = vadd.xlane.f32.xlu1 %v1440_v27  ;;  %v12981_v27 = vld [vmem:[#allocation180_spill] sm:$0xff] }
 0x52b   : > { %6185 = vmatmul.msk.f32.vlgmr.msrb.gmra.mxu2 %vm857_vm0, %v12974_v20  ;;  %v1452_v20 = vsel %vm1214_vm1, %v9856_v59, 0.0  ;;  %v6747_v59 = vunpack.i.h.bf16 %v9597_v25 }
 0x52c   : > { %6273 = vmatpush.xpose.msk.msrb.mxu2 %vm857_vm0, %v9500_v43 }
 0x530   : > { %6274 = vmatpush.xpose.msk.msrb.mxu2 %vm857_vm0, %v12975_v17  ;;  %v10047_v63 = vpop.xlane.xlu0 %1429  ;;  %v12982_v17 = vld [vmem:[#allocation173_spill] sm:$0xff] }
 0x531   : > { %12976 = vst [vmem:[#allocation25_spill] sm:$0xff] %v10047_v63 }
 0x532   : > { %1300 = vmax.xlane.f32.xlu1 %v1299_v21 }
 0x533   : > { %6186 = vmatmul.msk.f32.gmra.mxu2 %vm857_vm0, %v12977_v62  ;;  %v6757_v62 = vunpack.i.h.bf16 %v9656_v5 }
 0x534   : > { %6275 = vmatpush.xpose.msk.msrb.mxu2 %vm857_vm0, %v12978_v14  ;;  %v12984_v14 = vld [vmem:[#allocation174_spill] sm:$0xff] }
 0x538   : > { %6276 = vmatpush.xpose.msk.msrb.mxu2 %vm857_vm0, %v12979_v49  ;;  %v1289_v55 = vpop.xlane.xlu0 %1288  ;;  %v6756_v49 = vunpack.i.l.bf16 %v9656_v5  ;;  %v12988_v5 = vld [vmem:[#allocation118_spill] sm:$0xff] }
 0x539   : > { %v1335_v43 = vsub.f32 %v9962_v3, %v1289_v55  ;;  %v12983_v3 = vld [vmem:[#allocation82_spill] sm:$0xff]  ;;  %v12985_v55 = vld [vmem:[#allocation172_spill] sm:$0xff] }
 0x53b   : > { %v1391_v42 = vmul.f32 1.442695, %v1335_v43  ;;  %6187 = vmatmul.msk.f32.gmra.mxu2 %vm857_vm0, %v12980_v28  ;;  %v1446_v43 = vsel %vm1214_vm1, %v9823_v54, 0.0  ;;  %v6746_v28 = vunpack.i.l.bf16 %v9597_v25  ;;  %v6726_v54 = vunpack.i.l.bf16 %v9437_v12 }
 0x53c   : > { %6277 = vmatpush.xpose.msk.msrb.mxu2 %vm857_vm0, %v12981_v27  ;;  %v10082_v27 = vpop.permute.xlu2 %4228  ;;  %v6722_v25 = vunpack.i.h.bf16 %v9526_v24 }
 0x53d   : > { %7102 = vpow2.f32 %v1391_v42  ;;  %v1208_v42 = vpop.f32.mrf.mxu3  ;;  %12986 = vst [vmem:[#allocation102_spill] sm:$0xff] %v10082_v27 }
 0x53e   : > { %1453 = vadd.xlane.f32.xlu2 %v1452_v20  ;;  %v10084_v20 = vpop.permute.xlu1 %4230 }
 0x53f   : > { %12987 = vst [vmem:[#allocation99_spill] sm:$0xff] %v10084_v20 }
 0x540   : > { %6278 = vmatpush.xpose.msk.msrb.mxu2 %vm857_vm0, %v12982_v17  ;;  %v12989_v17 = vld [vmem:[#allocation84_spill] sm:$0xff] }
 0x543   : > { %v10066_v21 = vpop.eup %7102  ;;  %6188 = vmatmul.msk.f32.gmra.mxu2 %vm857_vm0, %v12983_v3  ;;  %v10092_v3 = vadd.f32 %v1208_v42, %v9542_v53  ;;  %v12992_v53 = vld [vmem:[#allocation111_spill] sm:$0xff] }
 0x544   : > { %6279 = vmatpush.xpose.msk.msrb.mxu2 %vm857_vm0, %v12984_v14  ;;  %6137 = vmatmul.msk.f32.vlgmr.msrb.gmra.mxu3 %vm1214_vm1, %v10066_v21 }
 0x545   : > { %2890 = vmatpush.msrb.mxu3 %v6757_v62  ;;  %v6727_v62 = vunpack.i.h.bf16 %v9437_v12  ;;  %v1305_v14 = vsel %vm1214_vm1, %v10092_v3, -inf  ;;  %v12993_v12 = vld [vmem:[#allocation26_spill] sm:$0xff] }
 0x547   : > { %2891 = vmatpush.msrb.mxu3 %v6756_v49  ;;  %v6721_v49 = vunpack.i.l.bf16 %v9526_v24 }
 0x548   : > { %6280 = vmatpush.xpose.msk.msrb.mxu2 %vm857_vm0, %v12985_v55 }
 0x549   : > { %2892 = vmatpush.msrb.mxu3 %v6747_v59  ;;  %1447 = vadd.xlane.f32.xlu0 %v1446_v43  ;;  %v10099_v59 = vpop.xlane.xlu2 %1435  ;;  %v10107_v43 = vpop.f32.mrf.mxu0 }
 0x54a   : > { %12990 = vst [vmem:[#allocation44_spill] sm:$0xff] %v10099_v59 }
 0x54b   : > { %4355 = vrot.lane.b32.xlu1 %v12988_v5, %s7819_s3  ;;  %6189 = vmatmul.msk.f32.gmra.mxu2 %vm857_vm0, %v12989_v17  ;;  %12994 = vst [vmem:[#allocation27_spill] sm:$0xff] %v10107_v43  ;;  %v12995_v5 = vld [vmem:[#allocation120_spill] sm:$0xff] }
 0x54c   : > { %2893 = vmatpush.msrb.mxu3 %v6746_v28  ;;  %v13055_v43 = vld [vmem:[#allocation28_spill] sm:$0xff] }
 0x54e   : > { %2894 = vmatpush.msrb.mxu3 %v6727_v62  ;;  %v12996_v62 = vld [vmem:[#allocation132_spill] sm:$0xff] }
 0x550   : > { %2895 = vmatpush.msrb.mxu3 %v6726_v54 }
 0x551   : > { %1306 = vmax.xlane.f32.xlu0 %v1305_v14  ;;  %v1295_v24 = vpop.xlane.xlu2 %1294 }
 0x552   : > { %v10101_v55 = vpop.xlane.xlu1 %1432  ;;  %2896 = vmatpush.msrb.mxu3 %v6722_v25  ;;  %v1337_v54 = vsub.f32 %v9939_v61, %v1295_v24  ;;  %v10115_v25 = vpop.f32.mrf.mxu0  ;;  %v13001_v61 = vld [vmem:[#allocation137_spill] sm:$0xff] }
 0x553   : > { %12991 = vst [vmem:[#allocation51_spill] sm:$0xff] %v10101_v55  ;;  %6190 = vmatmul.msk.f32.gmra.mxu2 %vm857_vm0, %v12992_v53  ;;  %v1211_v24 = vpop.f32.mrf.mxu3  ;;  %v1464_v55 = vsel %vm1214_vm1, %v9970_v0, 0.0 }
 0x554   : > { %2897 = vmatpush.msrb.mxu3 %v6721_v49  ;;  %12997 = vst [vmem:[#allocation181_spill] sm:$0xff] %v10115_v25  ;;  %v1395_v14 = vmul.f32 1.442695, %v1337_v54  ;;  %v12998_v49 = vld [vmem:[#allocation122_spill] sm:$0xff]  ;;  %v10139_v54 = vadd.f32 %v1211_v24, %v9550_v1 }
 0x556   : > { %4331 = vrot.lane.b32.xlu2 %v12993_v12, %s7819_s3 }
 0x559   : > { %v10156_v24 = vpop.permute.xlu2 %4234 }
 0x55a   : > { %v1292_v42 = vpop.xlane.xlu1 %1291  ;;  %v10122_v12 = vpop.f32.mrf.mxu0  ;;  %13008 = vst [vmem:[#allocation45_spill] sm:$0xff] %v10156_v24 }
 0x55b   : > { %v1336_v28 = vsub.f32 %v9983_v8, %v1292_v42  ;;  %6191 = vmatmul.msk.f32.gmra.mxu2 %vm857_vm0, %v12995_v5  ;;  %v12999_v8 = vld [vmem:[#allocation128_spill] sm:$0xff]  ;;  %13000 = vst [vmem:[#allocation58_spill] sm:$0xff] %v10122_v12  ;;  %v1449_v5 = vsel %vm1214_vm1, %v9829_v2, 0.0  ;;  %v1461_v2 = vsel %vm1214_vm1, %v9951_v40, 0.0  ;;  %v1455_v40 = vsel %vm1214_vm1, %v9885_v22, 0.0 }
 0x55d   : > { %v1393_v17 = vmul.f32 1.442695, %v1336_v28  ;;  %v10128_v28 = vpop.permute.xlu0 %4327 }
 0x55e   : > { %4347 = vrot.lane.b32.xlu2 %v12996_v62, %s7819_s3  ;;  %13002 = vst [vmem:[#allocation167_spill] sm:$0xff] %v10128_v28 }
 0x55f   : > { %7104 = vpow2.f32 %v1393_v17 }
 0x560   : > { %7106 = vpow2.f32 %v1395_v14  ;;  %v1308_v14 = vsel %vm1214_vm1, %v10139_v54, -inf }
 0x562   : > { %v10134_v17 = vpop.f32.mrf.mxu0 }
 0x563   : > { %6192 = vmatmul.msk.f32.gmra.mxu2 %vm857_vm0, %v12998_v49  ;;  %13003 = vst [vmem:[#allocation182_spill] sm:$0xff] %v10134_v17 }
 0x565   : > { %v7105_v53 = vpop.eup %7104  ;;  %4349 = vrot.lane.b32.xlu0 %v12999_v8, %s7819_s3 }
 0x566   : > { %6138 = vmatmul.msk.f32.gmra.mxu3 %vm1214_vm1, %v7105_v53  ;;  %v10124_v42 = vpop.eup %7106  ;;  %v1482_v0 = vsel %vm1214_vm1, %v7105_v53, 0.0 }
 0x56a   : > { %v10143_v8 = vpop.f32.mrf.mxu0 }
 0x56b   : > { %13005 = vst [vmem:[#allocation176_spill] sm:$0xff] %v10143_v8 }
 0x56d   : > { %4345 = vrot.lane.b32.xlu0 %v13001_v61, %s7819_s3 }
 0x56e   : > { %6139 = vmatmul.msk.f32.gmra.mxu3 %vm1214_vm1, %v10124_v42 }
 0x575   : > { %1450 = vadd.xlane.f32.xlu1 %v1449_v5 }
 0x576   : > { %v10136_v62 = vpop.xlane.xlu0 %1438 }
 0x577   : > { %13004 = vst [vmem:[#allocation164_spill] sm:$0xff] %v10136_v62  ;;  %v10150_v62 = vpop.f32.mrf.mxu0 }
 0x578   : > { %13006 = vst [vmem:[#allocation80_spill] sm:$0xff] %v10150_v62 }
 0x57d   : > { %1309 = vmax.xlane.f32.xlu1 %v1308_v14  ;;  %v10158_v14 = vpop.permute.xlu1 %4325 }
 0x57e   : > { %v1298_v49 = vpop.xlane.xlu0 %1297  ;;  %13009 = vst [vmem:[#allocation155_spill] sm:$0xff] %v10158_v14 }
 0x57f   : > { %v1338_v61 = vsub.f32 %v10012_v47, %v1298_v49  ;;  %v10154_v1 = vpop.f32.mrf.mxu0  ;;  %v13010_v47 = vld [vmem:[#allocation121_spill] sm:$0xff]  ;;  %v10166_v49 = vpop.xlane.xlu2 %1444 }
 0x580   : > { %13007 = vst [vmem:[#allocation158_spill] sm:$0xff] %v10154_v1  ;;  %v13015_v1 = vld [vmem:[#allocation139_spill] sm:$0xff] }
 0x581   : > { %v1397_v59 = vmul.f32 1.442695, %v1338_v61  ;;  %13012 = vst [vmem:[#allocation100_spill] sm:$0xff] %v10166_v49 }
 0x583   : > { %7108 = vpow2.f32 %v1397_v59 }
 0x587   : > { %1462 = vadd.xlane.f32.xlu2 %v1461_v2  ;;  %v10164_v59 = vpop.f32.mrf.mxu0  ;;  %v13014_v2 = vld [vmem:[#allocation31_spill] sm:$0xff]  ;;  %v1304_v49 = vpop.xlane.xlu2 %1303 }
 0x588   : > { %13011 = vst [vmem:[#allocation91_spill] sm:$0xff] %v10164_v59  ;;  %v1340_v59 = vsub.f32 %v9995_v4, %v1304_v49 }
 0x589   : > { %v10148_v5 = vpop.eup %7108 }
 0x58a   : > { %6140 = vmatmul.msk.f32.gmra.mxu3 %vm1214_vm1, %v10148_v5 }
 0x596   : > { %4351 = vrot.lane.b32.xlu1 %v13010_v47, %s7819_s3  ;;  %v1908_v47 = vpop.f32.mrf.mxu0 }
 0x597   : > { %1456 = vadd.xlane.f32.xlu0 %v1455_v40  ;;  %v1473_v40 = vsel %vm1214_vm1, %v10024_v30, 0.0  ;;  %v10187_v30 = vpop.permute.xlu0 %4353 }
 0x59d   : > { %v10168_v61 = vpop.xlane.xlu1 %1441 }
 0x59e   : > { %13013 = vst [vmem:[#allocation117_spill] sm:$0xff] %v10168_v61  ;;  %4333 = vrot.lane.b32.xlu1 %v13014_v2, %s7819_s3  ;;  %v1401_v2 = vmul.f32 1.442695, %v1340_v59 }
 0x59f   : > { %4343 = vrot.lane.b32.xlu2 %v13015_v1, %s7819_s3  ;;  %1465 = vadd.xlane.f32.xlu0 %v1464_v55  ;;  %v1911_v1 = vpop.f32.mrf.mxu0 }
 0x5a5   : > { %v1301_v63 = vpop.xlane.xlu1 %1300 }
 0x5a6   : > { %v1339_v22 = vsub.f32 %v10043_v35, %v1301_v63  ;;  %v10185_v35 = vadd.f32 %v1911_v1, %v10181_v48  ;;  %v1467_v1 = vsel %vm1214_vm1, %v9974_v23, 0.0 }
 0x5a7   : > { %1474 = vadd.xlane.f32.xlu0 %v1473_v40  ;;  %v1470_v40 = vsel %vm1214_vm1, %v9999_v29, 0.0 }
 0x5a8   : > { %v1399_v61 = vmul.f32 1.442695, %v1339_v22  ;;  %v2250_v4 = vsel %vm1214_vm1, %v10185_v35, -inf  ;;  %v1458_v22 = vsel %vm1214_vm1, %v9899_v58, 0.0  ;;  %v1914_v58 = vpop.f32.mrf.mxu0 }
 0x5aa   : > { %7110 = vpow2.f32 %v1399_v61 }
 0x5ab   : > { %7112 = vpow2.f32 %v1401_v2  ;;  %v13017_v2 = vld [vmem:[#allocation36_spill] sm:$0xff] }
 0x5af   : > { %1483 = vadd.xlane.f32.xlu0 %v1482_v0 }
 0x5b0   : > { %v7111_v55 = vpop.eup %7110 }
 0x5b1   : > { %6141 = vmatmul.msk.f32.gmra.mxu3 %vm1214_vm1, %v7111_v55  ;;  %v10191_v63 = vpop.eup %7112 }
 0x5b7   : > { %2251 = vmax.xlane.f32.xlu0 %v2250_v4  ;;  %v10210_v4 = vld [vmem:[#allocation10 + $0x50] sm:$0xff] }
 0x5b8   : > { %v10215_v29 = vadd.f32 %v1914_v58, %v10210_v4 }
 0x5b9   : > { %6142 = vmatmul.msk.f32.gmra.mxu3 %vm1214_vm1, %v10191_v63 }
 0x5ba   : > { %v2253_v23 = vsel %vm1214_vm1, %v10215_v29, -inf }
 0x5bc   : > { %v10195_v53 = vpop.xlane.xlu0 %1447 }
 0x5bd   : > { %13016 = vst [vmem:[#allocation131_spill] sm:$0xff] %v10195_v53 }
 0x5c4   : > { %v1307_v59 = vpop.xlane.xlu0 %1306 }
 0x5c5   : > { %v1341_v49 = vsub.f32 %v10092_v3, %v1307_v59  ;;  %v1479_v3 = vsel %vm1214_vm1, %v10066_v21, 0.0  ;;  %v1476_v59 = vsel %vm1214_vm1, %v10030_v34, 0.0 }
 0x5c7   : > { %v1403_v61 = vmul.f32 1.442695, %v1341_v49  ;;  %v10221_v49 = vld [vmem:[#allocation10 + $0x40] sm:$0xff] }
 0x5c8   : > { %1459 = vadd.xlane.f32.xlu1 %v1458_v22  ;;  %1471 = vadd.xlane.f32.xlu2 %v1470_v40  ;;  %v10224_v21 = vadd.f32 %v1908_v47, %v10221_v49  ;;  %v1488_v22 = vsel %vm1214_vm1, %v10148_v5, 0.0  ;;  %v10230_v40 = vpop.permute.xlu1 %4355  ;;  %v1491_v47 = vsel %vm1214_vm1, %v7111_v55, 0.0  ;;  %v13021_v55 = vld [vmem:[#allocation32_spill] sm:$0xff] }
 0x5c9   : > { %7114 = vpow2.f32 %v1403_v61 }
 0x5ca   : > { %v2247_v61 = vsel %vm1214_vm1, %v10224_v21, -inf }
 0x5cb   : > { %4335 = vrot.lane.b32.xlu0 %v13017_v2, %s7819_s3  ;;  %v1917_v2 = vpop.f32.mrf.mxu0 }
 0x5cf   : > { %v10204_v0 = vpop.eup %7114 }
 0x5d0   : > { %1468 = vadd.xlane.f32.xlu1 %v1467_v1  ;;  %1480 = vadd.xlane.f32.xlu2 %v1479_v3 }
 0x5d1   : > { %6143 = vmatmul.msk.f32.gmra.mxu3 %vm1214_vm1, %v10204_v0 }
 0x5d8   : > { %1477 = vadd.xlane.f32.xlu1 %v1476_v59  ;;  %2254 = vmax.xlane.f32.xlu2 %v2253_v23  ;;  %v10236_v59 = vld [vmem:[#allocation10 + $0x60] sm:$0xff]  ;;  %v1920_v23 = vpop.f32.mrf.mxu0 }
 0x5d9   : > { %v10239_v5 = vadd.f32 %v1920_v23, %v10236_v59  ;;  %v10276_v23 = vpop.permute.xlu0 %4349 }
 0x5e0   : > { %2248 = vmax.xlane.f32.xlu1 %v2247_v61  ;;  %1489 = vadd.xlane.f32.xlu2 %v1488_v22  ;;  %v13019_v61 = vld [vmem:[#allocation54_spill] sm:$0xff]  ;;  %v13020_v22 = vld [vmem:[#allocation141_spill] sm:$0xff] }
 0x5e8   : > { %v10232_v34 = vpop.xlane.xlu1 %1450 }
 0x5e9   : > { %13018 = vst [vmem:[#allocation35_spill] sm:$0xff] %v10232_v34 }
 0x5f0   : > { %v1310_v1 = vpop.xlane.xlu1 %1309 }
 0x5f1   : > { %v1342_v3 = vsub.f32 %v10139_v54, %v1310_v1  ;;  %v2259_v54 = vsel %vm1214_vm1, %v10239_v5, -inf  ;;  %v13022_v1 = vld [vmem:[#allocation65_spill] sm:$0xff] }
 0x5f3   : > { %v1405_v58 = vmul.f32 1.442695, %v1342_v3  ;;  %v13023_v3 = vld [vmem:[#allocation18_spill] sm:$0xff] }
 0x5f5   : > { %7116 = vpow2.f32 %v1405_v58  ;;  %1492 = vadd.xlane.f32.xlu0 %v1491_v47  ;;  %v10262_v58 = vpop.permute.xlu2 %4329  ;;  %v13025_v47 = vld [vmem:[#allocation71_spill] sm:$0xff] }
 0x5f6   : > { %13024 = vst [vmem:[#allocation62_spill] sm:$0xff] %v10262_v58 }
 0x5f8   : > { %4337 = vrot.lane.b32.xlu2 %v13019_v61, %s7819_s3 }
 0x5f9   : > { %4341 = vrot.lane.b32.xlu1 %v13020_v22, %s7819_s3  ;;  %v13028_v22 = vld [vmem:[#allocation75_spill] sm:$0xff] }
 0x5fb   : > { %v7117_v34 = vpop.eup %7116 }
 0x5fc   : > { %6144 = vmatmul.msk.f32.gmra.mxu3 %vm1214_vm1, %v7117_v34 }
 0x5fd   : > { %2260 = vmax.xlane.f32.xlu0 %v2259_v54  ;;  %v13029_v54 = vld [vmem:[#allocation187_spill] sm:$0xff] }
 0x604   : > { %6201 = vmatmul.msk.f32.vlgmr.msra.gmra.mxu3 %vm857_vm0, %v13021_v55  ;;  %v13030_v55 = vld [vmem:[#allocation190_spill] sm:$0xff] }
 0x605   : > { %6289 = vmatpush.xpose.msk.msra.mxu3 %vm857_vm0, %v9562_v6  ;;  %v10268_v6 = vld [vmem:[#allocation10 + $0x68] sm:$0xff] }
 0x609   : > { %6290 = vmatpush.xpose.msk.msra.mxu3 %vm857_vm0, %v9566_v7  ;;  %v1923_v7 = vpop.f32.mrf.mxu0 }
 0x60a   : > { %v10279_v61 = vadd.f32 %v1923_v7, %v10268_v6 }
 0x60c   : > { %6202 = vmatmul.msk.f32.gmra.mxu3 %vm857_vm0, %v13022_v1  ;;  %v1485_v1 = vsel %vm1214_vm1, %v10124_v42, 0.0 }
 0x60d   : > { %6291 = vmatpush.xpose.msk.msra.mxu3 %vm857_vm0, %v9588_v31  ;;  %v10272_v31 = vpop.f32.mrf.mxu1 }
 0x60e   : > { %13026 = vst [vmem:[#allocation21_spill] sm:$0xff] %v10272_v31 }
 0x611   : > { %6292 = vmatpush.xpose.msk.msra.mxu3 %vm857_vm0, %v9457_v37  ;;  %4430 = vrot.lane.b32.xlu0 %v13023_v3, %s7819_s3  ;;  %v10274_v37 = vpop.xlane.xlu2 %1453  ;;  %v10293_v3 = vld [vmem:[#allocation10 + $0x58] sm:$0xff] }
 0x612   : > { %13027 = vst [vmem:[#allocation17_spill] sm:$0xff] %v10274_v37 }
 0x614   : > { %6203 = vmatmul.msk.f32.gmra.mxu3 %vm857_vm0, %v13025_v47  ;;  %v13032_v47 = vld [vmem:[#allocation105_spill] sm:$0xff] }
 0x615   : > { %6293 = vmatpush.xpose.msk.msra.mxu3 %vm857_vm0, %v9538_v45  ;;  %v2262_v45 = vsel %vm1214_vm1, %v10279_v61, -inf }
 0x619   : > { %6294 = vmatpush.xpose.msk.msra.mxu3 %vm857_vm0, %v9491_v10  ;;  %v10289_v10 = vpop.f32.mrf.mxu1  ;;  %v10297_v7 = vpop.permute.xlu2 %4331 }
 0x61a   : > { %13031 = vst [vmem:[#allocation24_spill] sm:$0xff] %v10289_v10 }
 0x61b   : > { %13033 = vst [vmem:[#allocation119_spill] sm:$0xff] %v10297_v7 }
 0x61c   : > { %6204 = vmatmul.msk.f32.gmra.mxu3 %vm857_vm0, %v13028_v22  ;;  %v10299_v22 = vpop.permute.xlu0 %4345 }
 0x61d   : > { %6295 = vmatpush.xpose.msk.msra.mxu3 %vm857_vm0, %v13029_v54  ;;  %v10302_v54 = vadd.f32 %v1917_v2, %v10293_v3  ;;  %v10318_v2 = vpop.f32.mrf.mxu0 }
 0x61f   : > { %v2256_v42 = vsel %vm1214_vm1, %v10302_v54, -inf }
 0x621   : > { %6296 = vmatpush.xpose.msk.msra.mxu3 %vm857_vm0, %v13030_v55  ;;  %2263 = vmax.xlane.f32.xlu2 %v2262_v45  ;;  %v1497_v45 = vsel %vm1214_vm1, %v10204_v0, 0.0  ;;  %v10306_v55 = vpop.permute.xlu1 %4351  ;;  %v10316_v53 = vpop.permute.xlu2 %4347  ;;  %v13038_v0 = vld [vmem:[#allocation113_spill] sm:$0xff] }
 0x623   : > { %1486 = vadd.xlane.f32.xlu1 %v1485_v1  ;;  %v10310_v1 = vpop.f32.mrf.mxu1 }
 0x624   : > { %6205 = vmatmul.msk.f32.gmra.mxu3 %vm857_vm0, %v13032_v47  ;;  %13034 = vst [vmem:[#allocation42_spill] sm:$0xff] %v10310_v1  ;;  %v13035_v47 = vld [vmem:[#allocation109_spill] sm:$0xff]  ;;  %v10314_v37 = vpop.xlane.xlu0 %1456  ;;  %v1500_v1 = vsel %vm1214_vm1, %v7117_v34, 0.0  ;;  %v13046_v34 = vld [vmem:[#allocation20_spill] sm:$0xff] }
 0x625   : > { %13036 = vst [vmem:[#allocation186_spill] sm:$0xff] %v10314_v37  ;;  %v1929_v37 = vpop.f32.mrf.mxu0 }
 0x629   : > { %1498 = vadd.xlane.f32.xlu2 %v1497_v45  ;;  %v10320_v10 = vpop.permute.xlu1 %4333  ;;  %v10326_v31 = vpop.xlane.xlu2 %1462 }
 0x62a   : > { %13037 = vst [vmem:[#allocation43_spill] sm:$0xff] %v10320_v10 }
 0x62b   : > { %2257 = vmax.xlane.f32.xlu1 %v2256_v42  ;;  %v10324_v45 = vpop.f32.mrf.mxu1  ;;  %13040 = vst [vmem:[#allocation184_spill] sm:$0xff] %v10326_v31 }
 0x62c   : > { %6206 = vmatmul.msk.f32.gmra.mxu3 %vm857_vm0, %v13035_v47  ;;  %13039 = vst [vmem:[#allocation179_spill] sm:$0xff] %v10324_v45  ;;  %v10328_v42 = vpop.xlane.xlu0 %1465  ;;  %v10331_v47 = vld [vmem:[#allocation10 + $0x78] sm:$0xff] }
 0x62d   : > { %13041 = vst [vmem:[#allocation73_spill] sm:$0xff] %v10328_v42  ;;  %v10338_v8 = vadd.f32 %v1929_v37, %v10331_v47 }
 0x62f   : > { %v2268_v42 = vsel %vm1214_vm1, %v10338_v8, -inf }
 0x631   : > { %v10342_v45 = vpop.permute.xlu2 %4343 }
 0x634   : > { %6207 = vmatmul.msk.f32.gmra.mxu3 %vm857_vm0, %v13038_v0  ;;  %v10340_v0 = vpop.f32.mrf.mxu1  ;;  %v10344_v31 = vpop.xlane.xlu0 %1474 }
 0x635   : > { %13044 = vst [vmem:[#allocation173_spill] sm:$0xff] %v10340_v0 }
 0x636   : > { %13045 = vst [vmem:[#allocation82_spill] sm:$0xff] %v10344_v31 }
 0x63b   : > { %v10333_v62 = vpop.xlane.xlu1 %1459  ;;  %1501 = vadd.xlane.f32.xlu0 %v1500_v1  ;;  %v10356_v1 = vpop.xlane.xlu2 %1471 }
 0x63c   : > { %13042 = vst [vmem:[#allocation180_spill] sm:$0xff] %v10333_v62  ;;  %6208 = vmatmul.msk.f32.gmra.mxu3 %vm857_vm0, %v13043_v50  ;;  %v13048_v50 = vld [vmem:[#allocation70_spill] sm:$0xff]  ;;  %v10354_v37 = vpop.f32.mrf.mxu1  ;;  %v10358_v0 = vpop.xlane.xlu0 %1483 }
 0x63d   : > { %13049 = vst [vmem:[#allocation172_spill] sm:$0xff] %v10354_v37 }
 0x63e   : > { %13050 = vst [vmem:[#allocation118_spill] sm:$0xff] %v10356_v1 }
 0x63f   : > { %13051 = vst [vmem:[#allocation84_spill] sm:$0xff] %v10358_v0 }
 0x641   : > { %4432 = vrot.lane.b32.xlu2 %v13046_v34, %s7819_s3 }
 0x643   : > { %v10350_v62 = vpop.xlane.xlu1 %1468  ;;  %2269 = vmax.xlane.f32.xlu0 %v2268_v42  ;;  %v10364_v34 = vpop.xlane.xlu2 %1480 }
 0x644   : > { %13047 = vst [vmem:[#allocation174_spill] sm:$0xff] %v10350_v62  ;;  %4339 = vrot.lane.b32.xlu1 %v13048_v50, %s7819_s3  ;;  %v10362_v31 = vpop.f32.mrf.mxu1  ;;  %v2252_v62 = vpop.xlane.xlu0 %2251 }
 0x645   : > { %13053 = vst [vmem:[#allocation26_spill] sm:$0xff] %v10362_v31  ;;  %v2344_v1 = vsub.f32 %v10185_v35, %v2252_v62  ;;  %v13057_v31 = vld [vmem:[#allocation170_spill] sm:$0xff]  ;;  %v13059_v62 = vld [vmem:[#allocation168_spill] sm:$0xff] }
 0x646   : > { %13054 = vst [vmem:[#allocation120_spill] sm:$0xff] %v10364_v34  ;;  %v6657_v38 = vunpack.i.h.bf16 %v13057_v31  ;;  %v6652_v35 = vunpack.i.h.bf16 %v13059_v62 }
 0x647   : > { %v2377_v0 = vmul.f32 1.442695, %v2344_v1  ;;  %v6651_v1 = vunpack.i.l.bf16 %v13059_v62  ;;  %v10400_v62 = vld [vmem:[#allocation10 + $0x70] sm:$0xff] }
 0x64b   : > { %v10360_v17 = vpop.xlane.xlu1 %1477  ;;  %v2255_v37 = vpop.xlane.xlu2 %2254 }
 0x64c   : > { %13052 = vst [vmem:[#allocation111_spill] sm:$0xff] %v10360_v17  ;;  %v10369_v50 = vpop.f32.mrf.mxu1 }
 0x64d   : > { %13056 = vst [vmem:[#allocation132_spill] sm:$0xff] %v10369_v50 }
 0x653   : > { %v2249_v12 = vpop.xlane.xlu1 %2248 }
 0x654   : > { %v2343_v25 = vsub.f32 %v10224_v21, %v2249_v12  ;;  %v13058_v12 = vld [vmem:[#allocation61_spill] sm:$0xff]  ;;  %v2013_v21 = vpop.f32.mrf.mxu1 }
 0x655   : > { %v10384_v34 = vadd.f32 %v2013_v21, %v10221_v49 }
 0x656   : > { %v2375_v42 = vmul.f32 1.442695, %v2343_v25  ;;  %v6656_v25 = vunpack.i.l.bf16 %v13057_v31  ;;  %v13061_v31 = vld [vmem:[#allocation146_spill] sm:$0xff] }
 0x657   : > { %4436 = vrot.lane.b32.xlu0 %v13055_v43, %s7819_s3  ;;  %v2345_v43 = vsub.f32 %v10215_v29, %v2255_v37  ;;  %v2271_v29 = vsel %vm1214_vm1, %v10384_v34, -inf  ;;  %v6611_v37 = vunpack.i.l.bf16 %v13061_v31 }
 0x658   : > { %7118 = vpow2.f32 %v2375_v42 }
 0x659   : > { %7120 = vpow2.f32 %v2377_v0  ;;  %v2379_v42 = vmul.f32 1.442695, %v2345_v43  ;;  %v6612_v0 = vunpack.i.h.bf16 %v13061_v31  ;;  %v13065_v31 = vld [vmem:[#allocation22_spill] sm:$0xff] }
 0x65b   : > { %7122 = vpow2.f32 %v2379_v42 }
 0x65c   : > { %v2016_v21 = vpop.f32.mrf.mxu1 }
 0x65e   : > { %v10372_v17 = vpop.eup %7118 }
 0x65f   : > { %6209 = vmatmul.msk.f32.vlgmr.msrb.gmra.mxu0 %vm1214_vm1, %v10372_v17  ;;  %4442 = vrot.lane.b32.xlu0 %v13058_v12, %s7819_s3  ;;  %v10386_v50 = vpop.eup %7120  ;;  %v13060_v12 = vld [vmem:[#allocation169_spill] sm:$0xff] }
 0x660   : > { %3751 = vmatpush.msrb.mxu0 %v6657_v38  ;;  %v6647_v10 = vunpack.i.h.bf16 %v13060_v12  ;;  %v6646_v38 = vunpack.i.l.bf16 %v13060_v12 }
 0x661   : > { %v10398_v43 = vpop.eup %7122 }
 0x662   : > { %3752 = vmatpush.msrb.mxu0 %v6656_v25  ;;  %v1494_v25 = vsel %vm1214_vm1, %v10191_v63, 0.0  ;;  %v13062_v63 = vld [vmem:[#allocation30_spill] sm:$0xff] }
 0x664   : > { %3753 = vmatpush.msrb.mxu0 %v6652_v35 }
 0x666   : > { %3754 = vmatpush.msrb.mxu0 %v6651_v1  ;;  %v2019_v1 = vpop.f32.mrf.mxu1 }
 0x667   : > { %6210 = vmatmul.msk.f32.gmra.mxu0 %vm1214_vm1, %v10386_v50  ;;  %v10413_v42 = vadd.f32 %v2019_v1, %v10210_v4  ;;  %v13070_v1 = vld [vmem:[#allocation156_spill] sm:$0xff] }
 0x668   : > { %3755 = vmatpush.msrb.mxu0 %v6647_v10  ;;  %v10406_v10 = vadd.f32 %v10318_v2, %v10400_v62  ;;  %v10419_v2 = vpop.permute.xlu0 %4335 }
 0x669   : > { %v2277_v12 = vsel %vm1214_vm1, %v10413_v42, -inf  ;;  %13064 = vst [vmem:[#allocation122_spill] sm:$0xff] %v10419_v2 }
 0x66a   : > { %3756 = vmatpush.msrb.mxu0 %v6646_v38  ;;  %2272 = vmax.xlane.f32.xlu2 %v2271_v29  ;;  %v2265_v35 = vsel %vm1214_vm1, %v10406_v10, -inf  ;;  %v13063_v38 = vld [vmem:[#allocation69_spill] sm:$0xff] }
 0x66b   : > { %v10421_v29 = vpop.permute.xlu1 %4341 }
 0x66c   : > { %3757 = vmatpush.msrb.mxu0 %v6612_v0  ;;  %v10425_v0 = vpop.xlane.xlu2 %1489 }
 0x66d   : > { %13066 = vst [vmem:[#allocation128_spill] sm:$0xff] %v10425_v0 }
 0x66e   : > { %3758 = vmatpush.msrb.mxu0 %v6611_v37  ;;  %1495 = vadd.xlane.f32.xlu1 %v1494_v25 }
 0x66f   : > { %6211 = vmatmul.msk.f32.gmra.mxu0 %vm1214_vm1, %v10398_v43 }
 0x670   : > { %v10427_v37 = vpop.xlane.xlu0 %1492 }
 0x671   : > { %13067 = vst [vmem:[#allocation137_spill] sm:$0xff] %v10427_v37  ;;  %v13072_v37 = vld [vmem:[#allocation151_spill] sm:$0xff] }
 0x676   : > { %2266 = vmax.xlane.f32.xlu1 %v2265_v35  ;;  %v13069_v35 = vld [vmem:[#allocation34_spill] sm:$0xff] }
 0x678   : > { %v2261_v2 = vpop.xlane.xlu0 %2260 }
 0x682   : > { %4438 = vrot.lane.b32.xlu2 %v13062_v63, %s7819_s3 }
 0x689   : > { %2278 = vmax.xlane.f32.xlu0 %v2277_v12 }
 0x68a   : > { %4444 = vrot.lane.b32.xlu2 %v13063_v38, %s7819_s3  ;;  %v10436_v38 = vpop.permute.xlu2 %4337 }
 0x68b   : > { %13071 = vst [vmem:[#allocation31_spill] sm:$0xff] %v10436_v38 }
 0x68f   : > { %4434 = vrot.lane.b32.xlu1 %v13065_v31, %s7819_s3  ;;  %v2347_v31 = vsub.f32 %v10239_v5, %v2261_v2 }
 0x691   : > { %v2383_v0 = vmul.f32 1.442695, %v2347_v31 }
 0x696   : > { %v10429_v25 = vpop.xlane.xlu1 %1486 }
 0x697   : > { %13068 = vst [vmem:[#allocation121_spill] sm:$0xff] %v10429_v25  ;;  %4440 = vrot.lane.b32.xlu1 %v13069_v35, %s7819_s3  ;;  %v2264_v25 = vpop.xlane.xlu2 %2263  ;;  %v2022_v35 = vpop.f32.mrf.mxu1 }
 0x69d   : > { %4446 = vrot.lane.b32.xlu0 %v13070_v1, %s7819_s3  ;;  %v10447_v1 = vadd.f32 %v2022_v35, %v10293_v3 }
 0x69e   : > { %v2258_v63 = vpop.xlane.xlu1 %2257 }
 0x69f   : > { %v2346_v12 = vsub.f32 %v10302_v54, %v2258_v63  ;;  %v2348_v54 = vsub.f32 %v10279_v61, %v2264_v25  ;;  %v2280_v2 = vsel %vm1214_vm1, %v10447_v1, -inf  ;;  %v10462_v61 = vadd.f32 %v2016_v21, %v10181_v48  ;;  %v10466_v25 = vpop.f32.mrf.mxu1 }
 0x6a1   : > { %v2381_v7 = vmul.f32 1.442695, %v2346_v12  ;;  %v2385_v63 = vmul.f32 1.442695, %v2348_v54  ;;  %v2274_v12 = vsel %vm1214_vm1, %v10462_v61, -inf }
 0x6a3   : > { %7124 = vpow2.f32 %v2381_v7  ;;  %v10451_v7 = vpop.f32.mrf.mxu2 }
 0x6a4   : > { %7126 = vpow2.f32 %v2383_v0  ;;  %13073 = vst [vmem:[#allocation139_spill] sm:$0xff] %v10451_v7  ;;  %v13079_v7 = vld [vmem:[#allocation154_spill] sm:$0xff] }
 0x6a5   : > { %4454 = vrot.lane.b32.xlu0 %v13072_v37, %s7819_s3  ;;  %7128 = vpow2.f32 %v2385_v63  ;;  %v10475_v63 = vpop.xlane.xlu2 %1498 }
 0x6a6   : > { %13076 = vst [vmem:[#allocation141_spill] sm:$0xff] %v10475_v63  ;;  %v13084_v63 = vld [vmem:[#allocation148_spill] sm:$0xff] }
 0x6a7   : > { %v2028_v35 = vpop.f32.mrf.mxu1 }
 0x6a8   : > { %v10473_v54 = vadd.f32 %v2028_v35, %v10268_v6  ;;  %v10489_v35 = vpop.permute.xlu0 %4430 }
 0x6a9   : > { %v10441_v24 = vpop.eup %7124  ;;  %13082 = vst [vmem:[#allocation71_spill] sm:$0xff] %v10489_v35  ;;  %v13090_v35 = vld [vmem:[#allocation47_spill] sm:$0xff] }
 0x6aa   : > { %6212 = vmatmul.msk.f32.gmra.mxu0 %vm1214_vm1, %v10441_v24  ;;  %v10449_v5 = vpop.eup %7126 }
 0x6ab   : > { %v10457_v37 = vpop.eup %7128  ;;  %v10464_v0 = vpop.f32.mrf.mxu2 }
 0x6ac   : > { %13074 = vst [vmem:[#allocation36_spill] sm:$0xff] %v10464_v0  ;;  %v2286_v0 = vsel %vm1214_vm1, %v10473_v54, -inf }
 0x6b0   : > { %v10498_v41 = vpop.xlane.xlu0 %1501 }
 0x6b1   : > { %13086 = vst [vmem:[#allocation190_spill] sm:$0xff] %v10498_v41  ;;  %v13094_v41 = vld [vmem:[#allocation50_spill] sm:$0xff] }
 0x6b2   : > { %6213 = vmatmul.msk.f32.gmra.mxu0 %vm1214_vm1, %v10449_v5 }
 0x6b3   : > { %2281 = vmax.xlane.f32.xlu2 %v2280_v2  ;;  %v10470_v31 = vpop.f32.mrf.mxu2  ;;  %v13077_v2 = vld [vmem:[#allocation149_spill] sm:$0xff] }
 0x6b4   : > { %13075 = vst [vmem:[#allocation54_spill] sm:$0xff] %v10470_v31 }
 0x6b6   : > { %v10491_v38 = vpop.permute.xlu1 %4339 }
 0x6b7   : > { %13083 = vst [vmem:[#allocation75_spill] sm:$0xff] %v10491_v38 }
 0x6ba   : > { %6214 = vmatmul.msk.f32.gmra.mxu0 %vm1214_vm1, %v10457_v37 }
 0x6bb   : > { %v10479_v21 = vpop.f32.mrf.mxu2 }
 0x6bc   : > { %13078 = vst [vmem:[#allocation32_spill] sm:$0xff] %v10479_v21 }
 0x6c1   : > { %2275 = vmax.xlane.f32.xlu1 %v2274_v12  ;;  %v10485_v12 = vpop.permute.xlu2 %4432 }
 0x6c2   : > { %13080 = vst [vmem:[#allocation65_spill] sm:$0xff] %v10485_v12  ;;  %v13089_v12 = vld [vmem:[#allocation48_spill] sm:$0xff] }
 0x6c3   : > { %v10487_v31 = vpop.f32.mrf.mxu2  ;;  %v13091_v38 = vpack.i.bf16 %v13089_v12, %v13090_v35  ;;  %v13095_v12 = vld [vmem:[#allocation49_spill] sm:$0xff] }
 0x6c4   : > { %13081 = vst [vmem:[#allocation18_spill] sm:$0xff] %v10487_v31  ;;  %v13088_v31 = vld [vmem:[#allocation150_spill] sm:$0xff]  ;;  %v13097_v35 = vld [vmem:[#allocation177_spill] sm:$0xff] }
 0x6c5   : > { %v6681_v20 = vunpack.i.l.bf16 %v13097_v35 }
 0x6cb   : > { %4458 = vrot.lane.b32.xlu2 %v13077_v2, %s7819_s3  ;;  %v10495_v21 = vpop.f32.mrf.mxu2 }
 0x6cc   : > { %13085 = vst [vmem:[#allocation187_spill] sm:$0xff] %v10495_v21  ;;  %v13093_v21 = vld [vmem:[#allocation178_spill] sm:$0xff] }
 0x6cf   : > { %2287 = vmax.xlane.f32.xlu0 %v2286_v0 }
 0x6d3   : > { %4448 = vrot.lane.b32.xlu2 %v13079_v7, %s7819_s3 }
 0x6da   : > { %4460 = vrot.lane.b32.xlu1 %v13084_v63, %s7819_s3  ;;  %v10508_v63 = vpop.f32.mrf.mxu2 }
 0x6db   : > { %13092 = vst [vmem:[#allocation109_spill] sm:$0xff] %v10508_v63 }
 0x6dd   : > { %v2273_v2 = vpop.xlane.xlu2 %2272 }
 0x6de   : > { %v2351_v58 = vsub.f32 %v10384_v34, %v2273_v2  ;;  %v6687_v34 = vunpack.i.h.bf16 %v13093_v21  ;;  %v6686_v2 = vunpack.i.l.bf16 %v13093_v21  ;;  %v13098_v21 = vld [vmem:[#allocation175_spill] sm:$0xff] }
 0x6df   : > { %v6677_v27 = vunpack.i.h.bf16 %v13098_v21 }
 0x6e0   : > { %v2391_v0 = vmul.f32 1.442695, %v2351_v58 }
 0x6e1   : > { %v10500_v7 = vpop.xlane.xlu1 %1495 }
 0x6e2   : > { %13087 = vst [vmem:[#allocation105_spill] sm:$0xff] %v10500_v7  ;;  %7130 = vpow2.f32 %v2391_v0  ;;  %4456 = vrot.lane.b32.xlu1 %v13088_v31, %s7819_s3  ;;  %v2270_v31 = vpop.xlane.xlu0 %2269  ;;  %v6682_v7 = vunpack.i.h.bf16 %v13097_v35  ;;  %v10551_v35 = vadd.f32 %v10466_v25, %v10236_v59  ;;  %v2448_v25 = vsel %vm1214_vm1, %v10441_v24, 0.0  ;;  %v13106_v24 = vld [vmem:[#allocation72_spill] sm:$0xff] }
 0x6e3   : > { %6764 = vrot.lane.b32.xlu0 %v13091_v38, %s7819_s3  ;;  %v13096_v38 = vpack.i.bf16 %v13094_v41, %v13095_v12  ;;  %v2350_v14 = vsub.f32 %v10338_v8, %v2270_v31  ;;  %v13100_v12 = vld [vmem:[#allocation171_spill] sm:$0xff] }
 0x6e4   : > { %v6661_v8 = vunpack.i.l.bf16 %v13100_v12 }
 0x6e8   : > { %v10510_v28 = vpop.eup %7130 }
 0x6e9   : > { %v2267_v58 = vpop.xlane.xlu1 %2266  ;;  %6217 = vmatmul.msk.f32.vlgmr.msra.gmra.mxu1 %vm1214_vm1, %v10510_v28 }
 0x6ea   : > { %v2349_v0 = vsub.f32 %v10406_v10, %v2267_v58  ;;  %3840 = vmatpush.msra.mxu1 %v6687_v34  ;;  %v10525_v10 = vpop.f32.mrf.mxu2  ;;  %v6676_v34 = vunpack.i.l.bf16 %v13098_v21  ;;  %v2389_v58 = vmul.f32 1.442695, %v2350_v14 }
 0x6eb   : > { %6769 = vrot.lane.b32.xlu0 %v13096_v38, %s7819_s3  ;;  %13099 = vst [vmem:[#allocation113_spill] sm:$0xff] %v10525_v10  ;;  %v13101_v38 = vld [vmem:[#allocation29_spill] sm:$0xff] }
 0x6ec   : > { %v2387_v63 = vmul.f32 1.442695, %v2349_v0  ;;  %3841 = vmatpush.msra.mxu1 %v6686_v2  ;;  %v6662_v0 = vunpack.i.h.bf16 %v13100_v12  ;;  %v2031_v2 = vpop.f32.mrf.mxu1 }
 0x6ee   : > { %7132 = vpow2.f32 %v2387_v63  ;;  %3842 = vmatpush.msra.mxu1 %v6682_v7  ;;  %v10535_v7 = vadd.f32 %v2031_v2, %v10400_v62  ;;  %v2439_v63 = vsel %vm1214_vm1, %v10372_v17, 0.0  ;;  %v2283_v17 = vsel %vm1214_vm1, %v10551_v35, -inf }
 0x6ef   : > { %7134 = vpow2.f32 %v2389_v58  ;;  %v13102_v58 = vld [vmem:[#allocation57_spill] sm:$0xff] }
 0x6f0   : > { %3843 = vmatpush.msra.mxu1 %v6681_v20 }
 0x6f2   : > { %3844 = vmatpush.msra.mxu1 %v6677_v27  ;;  %v2118_v20 = vpop.f32.mrf.mxu2  ;;  %v2289_v27 = vsel %vm1214_vm1, %v10535_v7, -inf }
 0x6f4   : > { %v10528_v41 = vpop.eup %7132  ;;  %3845 = vmatpush.msra.mxu1 %v6676_v34 }
 0x6f5   : > { %6215 = vmatmul.msk.f32.gmra.mxu0 %vm1214_vm1, %v10528_v41  ;;  %v10539_v14 = vpop.eup %7134 }
 0x6f6   : > { %3846 = vmatpush.msra.mxu1 %v6662_v0  ;;  %v13104_v0 = vld [vmem:[#allocation68_spill] sm:$0xff] }
 0x6f8   : > { %3847 = vmatpush.msra.mxu1 %v6661_v8  ;;  %v13110_v8 = vld [vmem:[#allocation152_spill] sm:$0xff] }
 0x6fa   : > { %v2121_v31 = vpop.f32.mrf.mxu2 }
 0x6fb   : > { %v10554_v21 = vadd.f32 %v2121_v31, %v10181_v48  ;;  %v13115_v31 = vld [vmem:[#allocation87_spill] sm:$0xff] }
 0x6fc   : > { %2290 = vmax.xlane.f32.xlu2 %v2289_v27  ;;  %v10605_v27 = vpop.permute.xlu2 %4438 }
 0x6fd   : > { %6216 = vmatmul.msk.f32.gmra.mxu0 %vm1214_vm1, %v10539_v14  ;;  %v2298_v34 = vsel %vm1214_vm1, %v10554_v21, -inf  ;;  %13112 = vst [vmem:[#allocation61_spill] sm:$0xff] %v10605_v27 }
 0x701   : > { %v10591_v2 = vpop.permute.xlu1 %4434 }
 0x702   : > { %13107 = vst [vmem:[#allocation70_spill] sm:$0xff] %v10591_v2 }
 0x704   : > { %2440 = vadd.xlane.f32.xlu2 %v2439_v63  ;;  %v13114_v63 = vld [vmem:[#allocation86_spill] sm:$0xff] }
 0x705   : > { %6249 = vmatmul.msk.f32.vlgmr.msra.gmra.mxu0 %vm857_vm0, %v13101_v38 }
 0x706   : > { %6337 = vmatpush.xpose.msk.msra.mxu0 %vm857_vm0, %v9570_v26  ;;  %v10567_v26 = vadd.f32 %v2118_v20, %v10221_v49  ;;  %v10603_v20 = vpop.f32.mrf.mxu2 }
 0x708   : > { %v2295_v12 = vsel %vm1214_vm1, %v10567_v26, -inf }
 0x70a   : > { %6338 = vmatpush.xpose.msk.msra.mxu0 %vm857_vm0, %v9650_v46  ;;  %v10571_v46 = vpop.f32.mrf.mxu3 }
 0x70b   : > { %13103 = vst [vmem:[#allocation143_spill] sm:$0xff] %v10571_v46 }
 0x70c   : > { %2284 = vmax.xlane.f32.xlu1 %v2283_v17  ;;  %2299 = vmax.xlane.f32.xlu2 %v2298_v34  ;;  %v13118_v17 = vld [vmem:[#allocation153_spill] sm:$0xff]  ;;  %v13119_v34 = vld [vmem:[#allocation108_spill] sm:$0xff] }
 0x70d   : > { %6250 = vmatmul.msk.f32.gmra.mxu0 %vm857_vm0, %v13102_v58 }
 0x70e   : > { %6339 = vmatpush.xpose.msk.msra.mxu0 %vm857_vm0, %v9608_v32 }
 0x712   : > { %6340 = vmatpush.xpose.msk.msra.mxu0 %vm857_vm0, %v9668_v52  ;;  %v10583_v32 = vpop.f32.mrf.mxu3  ;;  %v2445_v52 = vsel %vm1214_vm1, %v10398_v43, 0.0  ;;  %v13111_v43 = vld [vmem:[#allocation98_spill] sm:$0xff] }
 0x713   : > { %13105 = vst [vmem:[#allocation20_spill] sm:$0xff] %v10583_v32 }
 0x714   : > { %2449 = vadd.xlane.f32.xlu2 %v2448_v25  ;;  %v13121_v25 = vld [vmem:[#allocation90_spill] sm:$0xff] }
 0x715   : > { %6251 = vmatmul.msk.f32.gmra.mxu0 %vm857_vm0, %v13104_v0  ;;  %2296 = vmax.xlane.f32.xlu0 %v2295_v12  ;;  %v13122_v12 = vld [vmem:[#allocation89_spill] sm:$0xff] }
 0x716   : > { %6341 = vmatpush.xpose.msk.msra.mxu0 %vm857_vm0, %v9661_v56  ;;  %v10595_v56 = vpop.permute.xlu0 %4436  ;;  %v13123_v0 = vpack.i.bf16 %v13121_v25, %v13122_v12 }
 0x717   : > { %13108 = vst [vmem:[#allocation28_spill] sm:$0xff] %v10595_v56 }
 0x71a   : > { %6342 = vmatpush.xpose.msk.msra.mxu0 %vm857_vm0, %v9622_v18  ;;  %v10597_v18 = vpop.f32.mrf.mxu3 }
 0x71b   : > { %13109 = vst [vmem:[#allocation170_spill] sm:$0xff] %v10597_v18  ;;  %v13127_v18 = vld [vmem:[#allocation138_spill] sm:$0xff] }
 0x71d   : > { %6252 = vmatmul.msk.f32.gmra.mxu0 %vm857_vm0, %v13106_v24  ;;  %2446 = vadd.xlane.f32.xlu0 %v2445_v52  ;;  %v2127_v24 = vpop.f32.mrf.mxu2 }
 0x71e   : > { %6343 = vmatpush.xpose.msk.msra.mxu0 %vm857_vm0, %v9676_v51  ;;  %v10607_v51 = vpop.permute.xlu1 %4440  ;;  %v10619_v58 = vpop.permute.xlu0 %4442 }
 0x71f   : > { %13113 = vst [vmem:[#allocation168_spill] sm:$0xff] %v10607_v51 }
 0x720   : > { %13120 = vst [vmem:[#allocation146_spill] sm:$0xff] %v10619_v58  ;;  %v13136_v58 = vld [vmem:[#allocation55_spill] sm:$0xff] }
 0x722   : > { %6344 = vmatpush.xpose.msk.msra.mxu0 %vm857_vm0, %v9743_v57  ;;  %v13116_v57 = vpack.i.bf16 %v13114_v63, %v13115_v31  ;;  %v10613_v38 = vpop.f32.mrf.mxu3  ;;  %v13125_v63 = vld [vmem:[#allocation110_spill] sm:$0xff]  ;;  %v10630_v31 = vpop.permute.xlu2 %4444 }
 0x723   : > { %13117 = vst [vmem:[#allocation169_spill] sm:$0xff] %v10613_v38 }
 0x724   : > { %13126 = vst [vmem:[#allocation69_spill] sm:$0xff] %v10630_v31 }
 0x725   : > { %4452 = vrot.lane.b32.xlu1 %v13110_v8, %s7819_s3  ;;  %6253 = vmatmul.msk.f32.gmra.mxu0 %vm857_vm0, %v13111_v43 }
 0x72a   : > { %v10625_v8 = vpop.f32.mrf.mxu3  ;;  %v2282_v25 = vpop.xlane.xlu2 %2281 }
 0x72b   : > { %13124 = vst [vmem:[#allocation30_spill] sm:$0xff] %v10625_v8 }
 0x72c   : > { %6784 = vrot.lane.b32.xlu2 %v13116_v57, %s7819_s3  ;;  %v2279_v57 = vpop.xlane.xlu0 %2278 }
 0x72d   : > { %4450 = vrot.lane.b32.xlu1 %v13118_v17, %s7819_s3  ;;  %6254 = vmatmul.msk.f32.gmra.mxu0 %vm857_vm0, %v13119_v34  ;;  %v2353_v34 = vsub.f32 %v10413_v42, %v2279_v57  ;;  %v2034_v57 = vpop.f32.mrf.mxu1 }
 0x72f   : > { %v2395_v38 = vmul.f32 1.442695, %v2353_v34 }
 0x731   : > { %6789 = vrot.lane.b32.xlu0 %v13123_v0, %s7819_s3  ;;  %v2130_v0 = vpop.f32.mrf.mxu2 }
 0x732   : > { %v10635_v8 = vpop.f32.mrf.mxu3  ;;  %v10650_v34 = vadd.f32 %v2130_v0, %v10236_v59  ;;  %v10676_v32 = vpop.permute.xlu2 %4458 }
 0x733   : > { %13128 = vst [vmem:[#allocation22_spill] sm:$0xff] %v10635_v8 }
 0x734   : > { %v2276_v52 = vpop.xlane.xlu1 %2275  ;;  %13132 = vst [vmem:[#allocation149_spill] sm:$0xff] %v10676_v32 }
 0x735   : > { %v2352_v43 = vsub.f32 %v10462_v61, %v2276_v52  ;;  %6255 = vmatmul.msk.f32.gmra.mxu0 %vm857_vm0, %v13125_v63  ;;  %v2354_v61 = vsub.f32 %v10447_v1, %v2282_v25  ;;  %v10654_v1 = vadd.f32 %v2034_v57, %v10331_v47  ;;  %v2307_v25 = vsel %vm1214_vm1, %v10650_v34, -inf  ;;  %v10667_v57 = vpop.permute.xlu0 %4446 }
 0x736   : > { %13131 = vst [vmem:[#allocation151_spill] sm:$0xff] %v10667_v57 }
 0x737   : > { %v2393_v17 = vmul.f32 1.442695, %v2352_v43  ;;  %v2397_v52 = vmul.f32 1.442695, %v2354_v61  ;;  %v10659_v61 = vadd.f32 %v2127_v24, %v10293_v3 }
 0x739   : > { %7136 = vpow2.f32 %v2393_v17  ;;  %v10645_v42 = vpop.f32.mrf.mxu2  ;;  %v2304_v0 = vsel %vm1214_vm1, %v10659_v61, -inf }
 0x73a   : > { %7138 = vpow2.f32 %v2395_v38  ;;  %v10641_v43 = vpop.f32.mrf.mxu3 }
 0x73b   : > { %13129 = vst [vmem:[#allocation34_spill] sm:$0xff] %v10641_v43  ;;  %7140 = vpow2.f32 %v2397_v52  ;;  %v2292_v52 = vsel %vm1214_vm1, %v10654_v1, -inf  ;;  %v2457_v43 = vsel %vm1214_vm1, %v10528_v41, 0.0 }
 0x73d   : > { %6256 = vmatmul.msk.f32.gmra.mxu0 %vm857_vm0, %v13127_v18  ;;  %v10683_v41 = vpop.permute.xlu0 %4454 }
 0x73e   : > { %13133 = vst [vmem:[#allocation154_spill] sm:$0xff] %v10683_v41 }
 0x73f   : > { %v7137_v12 = vpop.eup %7136 }
 0x740   : > { %6218 = vmatmul.msk.f32.gmra.mxu1 %vm1214_vm1, %v7137_v12  ;;  %v10639_v63 = vpop.eup %7138 }
 0x741   : > { %v7141_v18 = vpop.eup %7140  ;;  %v2136_v38 = vpop.f32.mrf.mxu2 }
 0x742   : > { %v10647_v17 = vpop.f32.mrf.mxu3  ;;  %v10681_v46 = vadd.f32 %v2136_v38, %v10400_v62  ;;  %v13135_v38 = vld [vmem:[#allocation56_spill] sm:$0xff] }
 0x743   : > { %13130 = vst [vmem:[#allocation156_spill] sm:$0xff] %v10647_v17  ;;  %v13137_v51 = vpack.i.bf16 %v13135_v38, %v13136_v58 }
 0x745   : > { %v2288_v31 = vpop.xlane.xlu0 %2287 }
 0x746   : > { %v2356_v16 = vsub.f32 %v10473_v54, %v2288_v31 }
 0x748   : > { %6219 = vmatmul.msk.f32.gmra.mxu1 %vm1214_vm1, %v10639_v63 }
 0x749   : > { %v2139_v8 = vpop.f32.mrf.mxu2 }
 0x74a   : > { %v10663_v17 = vpop.f32.mrf.mxu3  ;;  %v10672_v24 = vadd.f32 %v2139_v8, %v10331_v47  ;;  %v2313_v8 = vsel %vm1214_vm1, %v10681_v46, -inf }
 0x74c   : > { %v10688_v10 = vpop.permute.xlu1 %4460 }
 0x750   : > { %6220 = vmatmul.msk.f32.gmra.mxu1 %vm1214_vm1, %v7141_v18 }
 0x754   : > { %v10708_v56 = vpop.permute.xlu1 %4456 }
 0x755   : > { %2308 = vmax.xlane.f32.xlu2 %v2307_v25  ;;  %v2454_v25 = vsel %vm1214_vm1, %v10457_v37, 0.0  ;;  %v10706_v27 = vpop.permute.xlu0 %6764  ;;  %13138 = vst [vmem:[#allocation150_spill] sm:$0xff] %v10708_v56 }
 0x757   : > { %2293 = vmax.xlane.f32.xlu1 %v2292_v52  ;;  %v2226_v52 = vpop.f32.mrf.mxu3 }
 0x75b   : > { %2305 = vmax.xlane.f32.xlu0 %v2304_v0  ;;  %v2316_v0 = vsel %vm1214_vm1, %v10672_v24, -inf }
 0x75d   : > { %2458 = vadd.xlane.f32.xlu2 %v2457_v43  ;;  %v2466_v43 = vsel %vm1214_vm1, %v7137_v12, 0.0  ;;  %v10714_v58 = vpop.permute.xlu0 %6769 }
 0x75f   : > { %v2229_v37 = vpop.f32.mrf.mxu3 }
 0x763   : > { %2455 = vadd.xlane.f32.xlu0 %v2454_v25  ;;  %v10690_v25 = vpop.permute.xlu2 %4448 }
 0x764   : > { %13134 = vst [vmem:[#allocation148_spill] sm:$0xff] %v10690_v25  ;;  %v2401_v25 = vmul.f32 1.442695, %v2356_v16 }
 0x765   : > { %2317 = vmax.xlane.f32.xlu2 %v2316_v0  ;;  %v10693_v0 = vadd.f32 %v2229_v37, %v10210_v4 }
 0x767   : > { %v2325_v12 = vsel %vm1214_vm1, %v10693_v0, -inf  ;;  %v10710_v2 = vpop.f32.mrf.mxu3 }
 0x76b   : > { %2314 = vmax.xlane.f32.xlu0 %v2313_v8  ;;  %v2463_v8 = vsel %vm1214_vm1, %v10510_v28, 0.0 }
 0x76d   : > { %2467 = vadd.xlane.f32.xlu2 %v2466_v43  ;;  %v10704_v43 = vadd.f32 %v2226_v52, %v10181_v48 }
 0x76f   : > { %v2291_v37 = vpop.xlane.xlu2 %2290  ;;  %v2235_v48 = vpop.f32.mrf.mxu3 }
 0x770   : > { %6774 = vrot.lane.b32.xlu1 %v13137_v51, %s7819_s3  ;;  %v2322_v51 = vsel %vm1214_vm1, %v10704_v43, -inf  ;;  %v10722_v57 = vadd.f32 %v2235_v48, %v10236_v59  ;;  %v2357_v59 = vsub.f32 %v10535_v7, %v2291_v37 }
 0x772   : > { %v2403_v31 = vmul.f32 1.442695, %v2357_v59  ;;  %v10756_v59 = vadd.f32 %v10603_v20, %v10210_v4 }
 0x773   : > { %2464 = vadd.xlane.f32.xlu0 %v2463_v8 }
 0x775   : > { %2326 = vmax.xlane.f32.xlu2 %v2325_v12  ;;  %v2472_v12 = vsel %vm1214_vm1, %v7141_v18, 0.0 }
 0x777   : > { %v10716_v38 = vpop.xlane.xlu2 %2440  ;;  %v2238_v54 = vpop.f32.mrf.mxu3 }
 0x77b   : > { %2323 = vmax.xlane.f32.xlu0 %v2322_v51 }
 0x77f   : > { %v2285_v28 = vpop.xlane.xlu1 %2284  ;;  %v2300_v32 = vpop.xlane.xlu2 %2299 }
 0x780   : > { %v2355_v8 = vsub.f32 %v10551_v35, %v2285_v28  ;;  %v2331_v35 = vsel %vm1214_vm1, %v10722_v57, -inf  ;;  %v2360_v16 = vsub.f32 %v10554_v21, %v2300_v32  ;;  %v13140_v32 = vld [vmem:[#allocation185_spill] sm:$0xff] }
 0x781   : > { %v6711_v37 = vunpack.i.l.bf16 %v13140_v32 }
 0x782   : > { %v2399_v52 = vmul.f32 1.442695, %v2355_v8  ;;  %v2409_v8 = vmul.f32 1.442695, %v2360_v16  ;;  %v10758_v16 = vpop.f32.mrf.mxu0 }
 0x783   : > { %2473 = vadd.xlane.f32.xlu0 %v2472_v12  ;;  %v2442_v12 = vsel %vm1214_vm1, %v10386_v50, 0.0  ;;  %v13142_v50 = vld [vmem:[#allocation183_spill] sm:$0xff] }
 0x784   : > { %7142 = vpow2.f32 %v2399_v52  ;;  %v13139_v52 = vld [vmem:[#allocation189_spill] sm:$0xff] }
 0x785   : > { %7144 = vpow2.f32 %v2401_v25  ;;  %v6731_v21 = vunpack.i.l.bf16 %v13139_v52  ;;  %v6712_v25 = vunpack.i.h.bf16 %v13140_v32 }
 0x787   : > { %v10772_v32 = vpop.xlane.xlu2 %2449 }
 0x788   : > { %v2297_v51 = vpop.xlane.xlu0 %2296  ;;  %13147 = vst [vmem:[#allocation47_spill] sm:$0xff] %v10772_v32 }
 0x789   : > { %v2359_v41 = vsub.f32 %v10567_v26, %v2297_v51  ;;  %v10732_v26 = vadd.f32 %v2238_v54, %v10268_v6 }
 0x78a   : > { %v7143_v56 = vpop.eup %7142  ;;  %v10768_v4 = vpop.f32.mrf.mxu0 }
 0x78b   : > { %v2407_v28 = vmul.f32 1.442695, %v2359_v41  ;;  %6221 = vmatmul.msk.f32.gmra.mxu1 %vm1214_vm1, %v7143_v56  ;;  %v2475_v18 = vsel %vm1214_vm1, %v7143_v56, 0.0  ;;  %2332 = vmax.xlane.f32.xlu0 %v2331_v35  ;;  %v10734_v48 = vpop.eup %7144  ;;  %v6732_v56 = vunpack.i.h.bf16 %v13139_v52  ;;  %v2334_v7 = vsel %vm1214_vm1, %v10732_v26, -inf  ;;  %v13144_v52 = vld [vmem:[#allocation81_spill] sm:$0xff] }
 0x78c   : > { %2476 = vadd.xlane.f32.xlu2 %v2475_v18 }
 0x78d   : > { %7146 = vpow2.f32 %v2407_v28  ;;  %v13141_v28 = vld [vmem:[#allocation188_spill] sm:$0xff] }
 0x78e   : > { %7148 = vpow2.f32 %v2403_v31  ;;  %v6707_v18 = vunpack.i.h.bf16 %v13141_v28  ;;  %v6706_v54 = vunpack.i.l.bf16 %v13141_v28  ;;  %v6702_v31 = vunpack.i.h.bf16 %v13142_v50  ;;  %v13150_v28 = vld [vmem:[#allocation41_spill] sm:$0xff] }
 0x78f   : > { %7150 = vpow2.f32 %v2409_v8  ;;  %v13143_v8 = vld [vmem:[#allocation78_spill] sm:$0xff] }
 0x792   : > { %v10770_v20 = vpop.f32.mrf.mxu0 }
 0x793   : > { %v10736_v41 = vpop.eup %7146  ;;  %6222 = vmatmul.msk.f32.gmra.mxu1 %vm1214_vm1, %v10734_v48  ;;  %13146 = vst [vmem:[#allocation48_spill] sm:$0xff] %v10770_v20 }
 0x794   : > { %2335 = vmax.xlane.f32.xlu2 %v2334_v7  ;;  %6225 = vmatmul.msk.f32.vlgmr.msra.gmra.mxu2 %vm1214_vm1, %v10736_v41  ;;  %v7149_v51 = vpop.eup %7148  ;;  %v6701_v7 = vunpack.i.l.bf16 %v13142_v50  ;;  %v10784_v50 = vpop.permute.xlu2 %6784 }
 0x795   : > { %3929 = vmatpush.msra.mxu2 %v6732_v56  ;;  %v7151_v35 = vpop.eup %7150  ;;  %v13145_v56 = vpack.i.bf16 %v13143_v8, %v13144_v52  ;;  %13152 = vst [vmem:[#allocation50_spill] sm:$0xff] %v10784_v50 }
 0x797   : > { %3930 = vmatpush.msra.mxu2 %v6731_v21  ;;  %v2301_v21 = vsel %vm1214_vm1, %v10756_v59, -inf }
 0x799   : > { %3931 = vmatpush.msra.mxu2 %v6712_v25  ;;  %v10774_v25 = vpop.permute.xlu1 %4452 }
 0x79a   : > { %2443 = vadd.xlane.f32.xlu1 %v2442_v12  ;;  %v13149_v12 = vld [vmem:[#allocation40_spill] sm:$0xff] }
 0x79b   : > { %6223 = vmatmul.msk.f32.gmra.mxu1 %vm1214_vm1, %v7149_v51  ;;  %3932 = vmatpush.msra.mxu2 %v6711_v37  ;;  %v10776_v37 = vpop.f32.mrf.mxu0 }
 0x79c   : > { %6226 = vmatmul.msk.f32.gmra.mxu2 %vm1214_vm1, %v7151_v35  ;;  %13148 = vst [vmem:[#allocation178_spill] sm:$0xff] %v10776_v37 }
 0x79d   : > { %3933 = vmatpush.msra.mxu2 %v6707_v18  ;;  %v13151_v18 = vpack.i.bf16 %v13149_v12, %v13150_v28 }
 0x79f   : > { %3934 = vmatpush.msra.mxu2 %v6706_v54  ;;  %6799 = vrot.lane.b32.xlu0 %v13145_v56, %s7819_s3  ;;  %v10782_v54 = vpop.f32.mrf.mxu3  ;;  %v2481_v56 = vsel %vm1214_vm1, %v7149_v51, 0.0 }
 0x7a1   : > { %3935 = vmatpush.msra.mxu2 %v6702_v31  ;;  %v10786_v31 = vpop.permute.xlu1 %4450 }
 0x7a2   : > { %2302 = vmax.xlane.f32.xlu1 %v2301_v21 }
 0x7a3   : > { %3936 = vmatpush.msra.mxu2 %v6701_v7  ;;  %v10788_v8 = vpop.f32.mrf.mxu0 }
 0x7a4   : > { %13153 = vst [vmem:[#allocation49_spill] sm:$0xff] %v10788_v8 }
 0x7a7   : > { %v2244_v7 = vpop.f32.mrf.mxu3 }
 0x7a8   : > { %v10793_v37 = vadd.f32 %v2244_v7, %v10331_v47 }
 0x7aa   : > { %v2340_v8 = vsel %vm1214_vm1, %v10793_v37, -inf }
 0x7ab   : > { %v10795_v12 = vpop.f32.mrf.mxu0 }
 0x7b3   : > { %v10802_v32 = vpop.f32.mrf.mxu0 }
 0x7bb   : > { %6779 = vrot.lane.b32.xlu1 %v13151_v18, %s7819_s3 }
 0x7c8   : > { %v2309_v52 = vpop.xlane.xlu2 %2308 }
 0x7c9   : > { %2482 = vadd.xlane.f32.xlu0 %v2481_v56  ;;  %v2363_v18 = vsub.f32 %v10650_v34, %v2309_v52  ;;  %v2490_v34 = vsel %vm1214_vm1, %v7151_v35, 0.0 }
 0x7ca   : > { %v2294_v21 = vpop.xlane.xlu1 %2293 }
 0x7cb   : > { %v2358_v20 = vsub.f32 %v10654_v1, %v2294_v21  ;;  %v2415_v51 = vmul.f32 1.442695, %v2363_v18  ;;  %v10812_v21 = vpop.f32.mrf.mxu0 }
 0x7cd   : > { %v2405_v28 = vmul.f32 1.442695, %v2358_v20 }
 0x7cf   : > { %7152 = vpow2.f32 %v2405_v28  ;;  %v10816_v28 = vpop.xlane.xlu0 %2446 }
 0x7d0   : > { %v10798_v50 = vpop.xlane.xlu2 %2458  ;;  %7154 = vpow2.f32 %v2415_v51  ;;  %v13155_v51 = vld [vmem:[#allocation59_spill] sm:$0xff] }
 0x7d1   : > { %2341 = vmax.xlane.f32.xlu0 %v2340_v8  ;;  %v13154_v8 = vld [vmem:[#allocation37_spill] sm:$0xff] }
 0x7d5   : > { %v7153_v56 = vpop.eup %7152 }
 0x7d6   : > { %6224 = vmatmul.msk.f32.gmra.mxu1 %vm1214_vm1, %v7153_v56  ;;  %v2484_v47 = vsel %vm1214_vm1, %v7153_v56, 0.0  ;;  %v10808_v7 = vpop.eup %7154 }
 0x7d7   : > { %2485 = vadd.xlane.f32.xlu2 %v2484_v47  ;;  %v2499_v35 = vsel %vm1214_vm1, %v10808_v7, 0.0  ;;  %v10834_v56 = vpop.permute.xlu0 %6789  ;;  %v10838_v47 = vld [vmem:[#allocation10 + $0x80] sm:$0xff] }
 0x7d8   : > { %v2318_v1 = vpop.xlane.xlu2 %2317  ;;  %13156 = vst [vmem:[#allocation177_spill] sm:$0xff] %v10834_v56  ;;  %v10999_v56 = vld [vmem:[#allocation10 + $0x88] sm:$0xff] }
 0x7d9   : > { %v2366_v20 = vsub.f32 %v10672_v24, %v2318_v1  ;;  %2491 = vadd.xlane.f32.xlu0 %v2490_v34  ;;  %v2451_v24 = vsel %vm1214_vm1, %v10449_v5, 0.0  ;;  %v3068_v5 = vpop.f32.mrf.mxu0 }
 0x7da   : > { %v10843_v1 = vadd.f32 %v3068_v5, %v10838_v47 }
 0x7db   : > { %v2421_v52 = vmul.f32 1.442695, %v2366_v20  ;;  %v13158_v20 = vld [vmem:[#allocation77_spill] sm:$0xff] }
 0x7dc   : > { %v3407_v34 = vsel %vm1214_vm1, %v10843_v1, -inf }
 0x7dd   : > { %7156 = vpow2.f32 %v2421_v52 }
 0x7de   : > { %6265 = vmatmul.msk.f32.vlgmr.msrb.gmra.mxu1 %vm857_vm0, %v13154_v8 }
 0x7df   : > { %6353 = vmatpush.xpose.msk.msrb.mxu1 %vm857_vm0, %v9795_v39  ;;  %v10832_v39 = vadd.f32 %v10645_v42, %v10268_v6  ;;  %v13157_v6 = vld [vmem:[#allocation64_spill] sm:$0xff]  ;;  %v2306_v42 = vpop.xlane.xlu0 %2305 }
 0x7e1   : > { %2500 = vadd.xlane.f32.xlu0 %v2499_v35  ;;  %v10891_v5 = vpop.f32.mrf.mxu0 }
 0x7e2   : > { %v10877_v35 = vpop.permute.xlu1 %6774 }
 0x7e3   : > { %6354 = vmatpush.xpose.msk.msrb.mxu1 %vm857_vm0, %v9850_v36  ;;  %v10824_v18 = vpop.eup %7156 }
 0x7e4   : > { %v2508_v36 = vsel %vm1214_vm1, %v10824_v18, 0.0 }
 0x7e5   : > { %2452 = vadd.xlane.f32.xlu1 %v2451_v24 }
 0x7e6   : > { %6266 = vmatmul.msk.f32.gmra.mxu1 %vm857_vm0, %v13155_v51  ;;  %v10887_v51 = vadd.f32 %v10710_v2, %v10293_v3  ;;  %v2478_v3 = vsel %vm1214_vm1, %v10734_v48, 0.0 }
 0x7e7   : > { %6355 = vmatpush.xpose.msk.msrb.mxu1 %vm857_vm0, %v9860_v11  ;;  %v2310_v11 = vsel %vm1214_vm1, %v10832_v39, -inf  ;;  %v10865_v52 = vpop.xlane.xlu0 %2455 }
 0x7e9   : > { %2509 = vadd.xlane.f32.xlu0 %v2508_v36  ;;  %v2328_v36 = vsel %vm1214_vm1, %v10887_v51, -inf }
 0x7eb   : > { %6356 = vmatpush.xpose.msk.msrb.mxu1 %vm857_vm0, %v9945_v19  ;;  %v2460_v19 = vsel %vm1214_vm1, %v10539_v14, 0.0  ;;  %v13159_v14 = vld [vmem:[#allocation101_spill] sm:$0xff] }
 0x7ed   : > { %2311 = vmax.xlane.f32.xlu1 %v2310_v11  ;;  %v10895_v11 = vpop.xlane.xlu2 %2467 }
 0x7ee   : > { %6267 = vmatmul.msk.f32.gmra.mxu1 %vm857_vm0, %v13157_v6  ;;  %13164 = vst [vmem:[#allocation175_spill] sm:$0xff] %v10895_v11 }
 0x7ef   : > { %6357 = vmatpush.xpose.msk.msrb.mxu1 %vm857_vm0, %v9947_v9  ;;  %v10863_v9 = vadd.f32 %v10663_v17, %v10221_v49  ;;  %v10873_v8 = vpop.xlane.xlu0 %2314  ;;  %v13160_v49 = vld [vmem:[#allocation136_spill] sm:$0xff]  ;;  %v13161_v17 = vld [vmem:[#allocation135_spill] sm:$0xff] }
 0x7f0   : > { %v13162_v24 = vpack.i.bf16 %v13160_v49, %v13161_v17 }
 0x7f1   : > { %3408 = vmax.xlane.f32.xlu0 %v3407_v34  ;;  %v13166_v34 = vld [vmem:[#allocation115_spill] sm:$0xff] }
 0x7f3   : > { %6358 = vmatpush.xpose.msk.msrb.mxu1 %vm857_vm0, %v9927_v60  ;;  %v2319_v60 = vsel %vm1214_vm1, %v10863_v9, -inf }
 0x7f5   : > { %2461 = vadd.xlane.f32.xlu1 %v2460_v19  ;;  %v10901_v19 = vpop.f32.mrf.mxu1 }
 0x7f6   : > { %6268 = vmatmul.msk.f32.gmra.mxu1 %vm857_vm0, %v13158_v20  ;;  %13167 = vst [vmem:[#allocation29_spill] sm:$0xff] %v10901_v19 }
 0x7f7   : > { %6359 = vmatpush.xpose.msk.msrb.mxu1 %vm857_vm0, %v10005_v44  ;;  %v2469_v44 = vsel %vm1214_vm1, %v10639_v63, 0.0  ;;  %v10897_v6 = vpop.xlane.xlu0 %2464 }
 0x7f8   : > { %13165 = vst [vmem:[#allocation171_spill] sm:$0xff] %v10897_v6 }
 0x7fb   : > { %6360 = vmatpush.xpose.msk.msrb.mxu1 %vm857_vm0, %v9985_v13  ;;  %v13163_v13 = vld [vmem:[#allocation104_spill] sm:$0xff] }
 0x7fd   : > { %2320 = vmax.xlane.f32.xlu1 %v2319_v60  ;;  %v13168_v60 = vld [vmem:[#allocation140_spill] sm:$0xff] }
 0x7fe   : > { %6269 = vmatmul.msk.f32.gmra.mxu1 %vm857_vm0, %v13159_v14  ;;  %v10908_v14 = vpop.f32.mrf.mxu0 }
 0x7ff   : > { %v10910_v49 = vpop.xlane.xlu0 %2323 }
 0x805   : > { %2470 = vadd.xlane.f32.xlu1 %v2469_v44  ;;  %6814 = vrot.lane.b32.xlu0 %v13162_v24, %s7819_s3  ;;  %v2327_v44 = vpop.xlane.xlu2 %2326  ;;  %v2362_v24 = vsub.f32 %v10659_v61, %v2306_v42 }
 0x806   : > { %6270 = vmatmul.msk.f32.gmra.mxu1 %vm857_vm0, %v13163_v13  ;;  %v10913_v13 = vpop.f32.mrf.mxu1  ;;  %v2369_v48 = vsub.f32 %v10693_v0, %v2327_v44 }
 0x807   : > { %13169 = vst [vmem:[#allocation57_spill] sm:$0xff] %v10913_v13  ;;  %v10920_v19 = vpop.xlane.xlu0 %2473 }
 0x808   : > { %13171 = vst [vmem:[#allocation72_spill] sm:$0xff] %v10920_v19 }
 0x80d   : > { %v10893_v63 = vpop.xlane.xlu1 %2443  ;;  %2329 = vmax.xlane.f32.xlu1 %v2328_v36  ;;  %v2413_v36 = vmul.f32 1.442695, %v2362_v24 }
 0x80e   : > { %6271 = vmatmul.msk.f32.gmra.mxu1 %vm857_vm0, %v13166_v34  ;;  %v10922_v61 = vpop.f32.mrf.mxu1 }
 0x80f   : > { %13172 = vst [vmem:[#allocation152_spill] sm:$0xff] %v10922_v61 }
 0x815   : > { %v2303_v2 = vpop.xlane.xlu1 %2302  ;;  %2479 = vadd.xlane.f32.xlu1 %v2478_v3  ;;  %v10916_v3 = vpop.xlane.xlu2 %2476 }
 0x816   : > { %v2361_v20 = vsub.f32 %v10756_v59, %v2303_v2  ;;  %6272 = vmatmul.msk.f32.gmra.mxu1 %vm857_vm0, %v13168_v60  ;;  %13170 = vst [vmem:[#allocation68_spill] sm:$0xff] %v10916_v3  ;;  %v3077_v59 = vpop.f32.mrf.mxu0  ;;  %v2427_v2 = vmul.f32 1.442695, %v2369_v48  ;;  %v13173_v48 = vld [vmem:[#allocation96_spill] sm:$0xff]  ;;  %v10940_v3 = vpop.f32.mrf.mxu1 }
 0x817   : > { %13177 = vst [vmem:[#allocation86_spill] sm:$0xff] %v10940_v3 }
 0x818   : > { %v2411_v17 = vmul.f32 1.442695, %v2361_v20 }
 0x81a   : > { %7158 = vpow2.f32 %v2411_v17  ;;  %v10929_v17 = vpop.xlane.xlu0 %2332 }
 0x81b   : > { %7160 = vpow2.f32 %v2413_v36  ;;  %v13174_v36 = vld [vmem:[#allocation95_spill] sm:$0xff] }
 0x81c   : > { %7162 = vpow2.f32 %v2427_v2 }
 0x81d   : > { %v2336_v0 = vpop.xlane.xlu2 %2335 }
 0x81e   : > { %v10927_v44 = vpop.f32.mrf.mxu0  ;;  %v2372_v24 = vsub.f32 %v10732_v26, %v2336_v0 }
 0x820   : > { %v7159_v34 = vpop.eup %7158  ;;  %v2433_v61 = vmul.f32 1.442695, %v2372_v24 }
 0x821   : > { %6227 = vmatmul.msk.f32.gmra.mxu2 %vm1214_vm1, %v7159_v34  ;;  %v2493_v60 = vsel %vm1214_vm1, %v7159_v34, 0.0  ;;  %v7161_v42 = vpop.eup %7160  ;;  %v13175_v34 = vpack.i.bf16 %v13173_v48, %v13174_v36  ;;  %v10953_v36 = vpop.f32.mrf.mxu1 }
 0x822   : > { %2494 = vadd.xlane.f32.xlu2 %v2493_v60  ;;  %v10925_v20 = vpop.eup %7162  ;;  %v10938_v60 = vld [vmem:[#allocation10 + $0x98] sm:$0xff]  ;;  %v10947_v26 = vpop.permute.xlu0 %6799  ;;  %7164 = vpow2.f32 %v2433_v61  ;;  %13179 = vst [vmem:[#allocation153_spill] sm:$0xff] %v10953_v36 }
 0x823   : > { %v2517_v2 = vsel %vm1214_vm1, %v10925_v20, 0.0  ;;  %13176 = vst [vmem:[#allocation98_spill] sm:$0xff] %v10938_v60  ;;  %v10945_v19 = vadd.f32 %v3077_v59, %v10938_v60  ;;  %v10961_v59 = vld [vmem:[#allocation10 + $0xb0] sm:$0xff] }
 0x824   : > { %13178 = vst [vmem:[#allocation87_spill] sm:$0xff] %v10947_v26 }
 0x825   : > { %v3416_v48 = vsel %vm1214_vm1, %v10945_v19, -inf  ;;  %13181 = vst [vmem:[#allocation90_spill] sm:$0xff] %v10961_v59 }
 0x826   : > { %v10949_v0 = vpop.f32.mrf.mxu0 }
 0x829   : > { %6228 = vmatmul.msk.f32.gmra.mxu2 %vm1214_vm1, %v7161_v42  ;;  %v10963_v3 = vpop.f32.mrf.mxu1 }
 0x82a   : > { %13182 = vst [vmem:[#allocation89_spill] sm:$0xff] %v10963_v3 }
 0x82d   : > { %v10976_v11 = vpop.permute.xlu1 %6779 }
 0x82e   : > { %6794 = vrot.lane.b32.xlu1 %v13175_v34, %s7819_s3  ;;  %v10955_v34 = vpop.eup %7164 }
 0x82f   : > { %2518 = vadd.xlane.f32.xlu0 %v2517_v2  ;;  %v3086_v2 = vpop.f32.mrf.mxu0 }
 0x830   : > { %v10966_v61 = vadd.f32 %v3086_v2, %v10961_v59 }
 0x831   : > { %6229 = vmatmul.msk.f32.gmra.mxu2 %vm1214_vm1, %v10808_v7  ;;  %v2526_v7 = vsel %vm1214_vm1, %v10955_v34, 0.0  ;;  %v10972_v36 = vpop.f32.mrf.mxu1 }
 0x832   : > { %13183 = vst [vmem:[#allocation110_spill] sm:$0xff] %v10966_v61 }
 0x833   : > { %13184 = vst [vmem:[#allocation138_spill] sm:$0xff] %v10972_v36 }
 0x837   : > { %3417 = vmax.xlane.f32.xlu0 %v3416_v48  ;;  %v3425_v48 = vsel %vm1214_vm1, %v10966_v61, -inf }
 0x83c   : > { %v10957_v24 = vpop.xlane.xlu0 %2482 }
 0x83d   : > { %13180 = vst [vmem:[#allocation108_spill] sm:$0xff] %v10957_v24 }
 0x83f   : > { %2527 = vadd.xlane.f32.xlu0 %v2526_v7  ;;  %v10980_v7 = vadd.f32 %v10782_v54, %v10400_v62  ;;  %v2487_v62 = vsel %vm1214_vm1, %v10736_v41, 0.0 }
 0x841   : > { %v2337_v6 = vsel %vm1214_vm1, %v10980_v7, -inf }
 0x844   : > { %v10968_v13 = vpop.xlane.xlu0 %2341 }
 0x847   : > { %3426 = vmax.xlane.f32.xlu0 %v3425_v48 }
 0x84c   : > { %v10974_v24 = vpop.xlane.xlu0 %2491 }
 0x84d   : > { %13185 = vst [vmem:[#allocation56_spill] sm:$0xff] %v10974_v24  ;;  %v2365_v24 = vsub.f32 %v10681_v46, %v10873_v8 }
 0x853   : > { %v10982_v3 = vpop.f32.mrf.mxu1 }
 0x854   : > { %13186 = vst [vmem:[#allocation55_spill] sm:$0xff] %v10982_v3  ;;  %v10984_v2 = vpop.xlane.xlu0 %2500  ;;  %v2419_v3 = vmul.f32 1.442695, %v2365_v24 }
 0x855   : > { %13187 = vst [vmem:[#allocation189_spill] sm:$0xff] %v10984_v2 }
 0x858   : > { %v10988_v26 = vpop.xlane.xlu1 %2452  ;;  %2338 = vmax.xlane.f32.xlu1 %v2337_v6 }
 0x85b   : > { %v10990_v48 = vpop.f32.mrf.mxu1 }
 0x85c   : > { %v10992_v36 = vpop.xlane.xlu0 %2509 }
 0x85d   : > { %13188 = vst [vmem:[#allocation185_spill] sm:$0xff] %v10992_v36 }
 0x860   : > { %v2312_v54 = vpop.xlane.xlu1 %2311  ;;  %2488 = vadd.xlane.f32.xlu1 %v2487_v62 }
 0x861   : > { %v2364_v2 = vsub.f32 %v10832_v39, %v2312_v54  ;;  %v2496_v39 = vsel %vm1214_vm1, %v7161_v42, 0.0  ;;  %v6766_v42 = vunpack.i.l.bf16 %v10706_v27 }
 0x863   : > { %v2417_v59 = vmul.f32 1.442695, %v2364_v2  ;;  %v3176_v60 = vpop.f32.mrf.mxu1 }
 0x864   : > { %v11002_v6 = vadd.f32 %v3176_v60, %v10999_v56  ;;  %v3409_v61 = vpop.xlane.xlu0 %3408 }
 0x865   : > { %7166 = vpow2.f32 %v2417_v59  ;;  %v3503_v36 = vsub.f32 %v10843_v1, %v3409_v61  ;;  %v2368_v1 = vsub.f32 %v10704_v43, %v10910_v49  ;;  %v6767_v61 = vunpack.i.h.bf16 %v10706_v27 }
 0x866   : > { %7168 = vpow2.f32 %v2419_v3  ;;  %v3434_v46 = vsel %vm1214_vm1, %v11002_v6, -inf  ;;  %v6771_v43 = vunpack.i.l.bf16 %v10714_v58  ;;  %v11024_v49 = vadd.f32 %v10891_v5, %v10999_v56 }
 0x867   : > { %v3535_v41 = vmul.f32 1.442695, %v3503_v36  ;;  %3435 = vmax.xlane.f32.xlu0 %v3434_v46  ;;  %v2425_v54 = vmul.f32 1.442695, %v2368_v1  ;;  %v6772_v27 = vunpack.i.h.bf16 %v10714_v58 }
 0x868   : > { %v2462_v8 = vpop.xlane.xlu1 %2461  ;;  %2497 = vadd.xlane.f32.xlu1 %v2496_v39  ;;  %v3410_v5 = vsel %vm1214_vm1, %v11024_v49, -inf }
 0x869   : > { %7170 = vpow2.f32 %v3535_v41 }
 0x86a   : > { %7172 = vrcp.f32 %v2462_v8 }
 0x86b   : > { %v7167_v24 = vpop.eup %7166  ;;  %7174 = vrcp.f32 %v10798_v50  ;;  %v11026_v46 = vpop.f32.mrf.mxu1 }
 0x86c   : > { %v7169_v2 = vpop.eup %7168  ;;  %6230 = vmatmul.msk.f32.gmra.mxu2 %vm1214_vm1, %v7167_v24  ;;  %v2502_v60 = vsel %vm1214_vm1, %v7167_v24, 0.0  ;;  %v6776_v24 = vunpack.i.l.bf16 %v10877_v35 }
 0x86d   : > { %2503 = vadd.xlane.f32.xlu2 %v2502_v60  ;;  %v2505_v36 = vsel %vm1214_vm1, %v7169_v2, 0.0 }
 0x86f   : > { %v11013_v3 = vpop.eup %7170 }
 0x870   : > { %v2321_v59 = vpop.xlane.xlu1 %2320  ;;  %2506 = vadd.xlane.f32.xlu1 %v2505_v36  ;;  %6305 = vmatmul.msk.f32.vlgmr.msrb.gmra.mxu0 %vm1214_vm1, %v11013_v3  ;;  %v7173_v50 = vpop.eup %7172 }
 0x871   : > { %v2367_v62 = vsub.f32 %v10863_v9, %v2321_v59  ;;  %4879 = vmatpush.msrb.mxu0 %v6766_v42  ;;  %v7175_v39 = vpop.eup %7174  ;;  %v2962_v9 = vmul.f32 %v7173_v50, %v10812_v21  ;;  %v6762_v21 = vunpack.i.h.bf16 %v9674_v33  ;;  %v6781_v42 = vunpack.i.l.bf16 %v10976_v11 }
 0x872   : > { %v2961_v8 = vmul.f32 %v7175_v39, %v10802_v32 }
 0x873   : > { %v2423_v41 = vmul.f32 1.442695, %v2367_v62  ;;  %4880 = vmatpush.msrb.mxu0 %v6767_v61  ;;  %v11046_v59 = vpop.f32.mrf.mxu1  ;;  %v6782_v61 = vunpack.i.h.bf16 %v10976_v11  ;;  %v6752_v62 = vunpack.i.h.bf16 %v9641_v15 }
 0x874   : > { %6231 = vmatmul.msk.f32.gmra.mxu2 %vm1214_vm1, %v7169_v2  ;;  %v6777_v2 = vunpack.i.h.bf16 %v10877_v35  ;;  %v6858_v58 = vpack.i.bf16 %v2962_v9, %v2961_v8  ;;  %v6761_v35 = vunpack.i.l.bf16 %v9674_v33 }
 0x875   : > { %7176 = vpow2.f32 %v2423_v41  ;;  %4881 = vmatpush.msrb.mxu0 %v6771_v43  ;;  %v13189_v43 = vld [vmem:[#allocation192_spill] sm:$0xff]  ;;  %v13190_v41 = vld [vmem:[#allocation53_spill] sm:$0xff] }
 0x876   : > { %7178 = vpow2.f32 %v2425_v54  ;;  %v6742_v33 = vunpack.i.h.bf16 %v13189_v43  ;;  %v6741_v11 = vunpack.i.l.bf16 %v13189_v43  ;;  %v13205_v43 = vld [vmem:[#allocation112_spill] sm:$0xff] }
 0x877   : > { %4882 = vmatpush.msrb.mxu0 %v6772_v27  ;;  %v13191_v27 = vld [vmem:[#allocation191_spill] sm:$0xff] }
 0x878   : > { %v11035_v60 = vpop.xlane.xlu1 %2470  ;;  %3411 = vmax.xlane.f32.xlu1 %v3410_v5  ;;  %v6736_v8 = vunpack.i.l.bf16 %v13191_v27 }
 0x879   : > { %4883 = vmatpush.msrb.mxu0 %v6776_v24 }
 0x87b   : > { %v7177_v1 = vpop.eup %7176  ;;  %6859 = vrot.lane.b32.xlu0 %v6858_v58, %s7819_s3  ;;  %4884 = vmatpush.msrb.mxu0 %v6777_v2  ;;  %v3185_v9 = vpop.f32.mrf.mxu1  ;;  %v13198_v58 = vld [vmem:[#allocation127_spill] sm:$0xff] }
 0x87c   : > { %v7179_v32 = vpop.eup %7178  ;;  %6232 = vmatmul.msk.f32.gmra.mxu2 %vm1214_vm1, %v10824_v18  ;;  %6233 = vmatmul.msk.f32.vlgmr.msrb.gmra.mxu3 %vm1214_vm1, %v7177_v1  ;;  %v2511_v36 = vsel %vm1214_vm1, %v7177_v1, 0.0  ;;  %v6751_v18 = vunpack.i.l.bf16 %v9641_v15  ;;  %v6737_v15 = vunpack.i.h.bf16 %v13191_v27 }
 0x87d   : > { %4018 = vmatpush.msrb.mxu3 %v6762_v21  ;;  %2512 = vadd.xlane.f32.xlu2 %v2511_v36  ;;  %v2514_v50 = vsel %vm1214_vm1, %v7179_v32, 0.0  ;;  %v13202_v36 = vld [vmem:[#allocation125_spill] sm:$0xff] }
 0x87e   : > { %4885 = vmatpush.msrb.mxu0 %v6781_v42  ;;  %v13200_v42 = vld [vmem:[#allocation85_spill] sm:$0xff] }
 0x87f   : > { %4019 = vmatpush.msrb.mxu3 %v6761_v35  ;;  %v11105_v35 = vld [vmem:[#allocation10 + $0xa0] sm:$0xff] }
 0x880   : > { %2515 = vadd.xlane.f32.xlu1 %v2514_v50  ;;  %4886 = vmatpush.msrb.mxu0 %v6782_v61  ;;  %v2330_v54 = vpop.xlane.xlu1 %2329  ;;  %v11108_v61 = vadd.f32 %v3185_v9, %v11105_v35 }
 0x881   : > { %4020 = vmatpush.msrb.mxu3 %v6752_v62  ;;  %v2370_v39 = vsub.f32 %v10887_v51, %v2330_v54  ;;  %v13192_v51 = vld [vmem:[#allocation52_spill] sm:$0xff]  ;;  %v13204_v62 = vld [vmem:[#allocation93_spill] sm:$0xff] }
 0x883   : > { %4021 = vmatpush.msrb.mxu3 %v6751_v18  ;;  %v2429_v24 = vmul.f32 1.442695, %v2370_v39  ;;  %v11072_v2 = vpop.f32.mrf.mxu1  ;;  %v11118_v18 = vld [vmem:[#allocation10 + $0xb8] sm:$0xff]  ;;  %v11137_v39 = vadd.f32 %v10927_v44, %v11105_v35 }
 0x884   : > { %6234 = vmatmul.msk.f32.gmra.mxu3 %vm1214_vm1, %v7179_v32  ;;  %6281 = vmatmul.msk.f32.vlgmr.msrb.gmra.mxu2 %vm857_vm0, %v13190_v41  ;;  %v13207_v41 = vld [vmem:[#allocation133_spill] sm:$0xff] }
 0x885   : > { %4022 = vmatpush.msrb.mxu3 %v6742_v33  ;;  %6369 = vmatpush.xpose.msk.msrb.mxu2 %vm857_vm0, %v10230_v40  ;;  %v2371_v40 = vsub.f32 %v10722_v57, %v10929_v17  ;;  %7180 = vpow2.f32 %v2429_v24  ;;  %v13195_v57 = vld [vmem:[#allocation129_spill] sm:$0xff]  ;;  %v13206_v33 = vld [vmem:[#allocation123_spill] sm:$0xff]  ;;  %v3419_v9 = vsel %vm1214_vm1, %v11137_v39, -inf }
 0x887   : > { %4023 = vmatpush.msrb.mxu3 %v6741_v11  ;;  %v2431_v5 = vmul.f32 1.442695, %v2371_v40  ;;  %v11133_v11 = vld [vmem:[#allocation10 + $0x90] sm:$0xff] }
 0x888   : > { %v11141_v27 = vadd.f32 %v10908_v14, %v11133_v11 }
 0x889   : > { %4024 = vmatpush.msrb.mxu3 %v6737_v15  ;;  %6370 = vmatpush.xpose.msk.msrb.mxu2 %vm857_vm0, %v10187_v30  ;;  %7182 = vpow2.f32 %v2431_v5  ;;  %v11143_v15 = vpop.f32.mrf.mxu2 }
 0x88a   : > { %13208 = vst [vmem:[#allocation188_spill] sm:$0xff] %v11143_v15  ;;  %v3413_v24 = vsel %vm1214_vm1, %v11141_v27, -inf  ;;  %7184 = vrcp.f32 %v10716_v38  ;;  %v13213_v38 = vld [vmem:[#allocation157_spill] sm:$0xff] }
 0x88b   : > { %4025 = vmatpush.msrb.mxu3 %v6736_v8  ;;  %v11076_v30 = vpop.eup %7180  ;;  %v11094_v32 = vpop.f32.mrf.mxu1 }
 0x88c   : > { %6235 = vmatmul.msk.f32.gmra.mxu3 %vm1214_vm1, %v10925_v20  ;;  %6282 = vmatmul.msk.f32.gmra.mxu2 %vm857_vm0, %v13192_v51  ;;  %v13193_v20 = vld [vmem:[#allocation74_spill] sm:$0xff] }
 0x88d   : > { %6371 = vmatpush.xpose.msk.msrb.mxu2 %vm857_vm0, %v10306_v55  ;;  %v13194_v55 = vld [vmem:[#allocation130_spill] sm:$0xff] }
 0x88e   : > { %v13196_v17 = vpack.i.bf16 %v13194_v55, %v13195_v57 }
 0x88f   : > { %v7183_v21 = vpop.eup %7182 }
 0x890   : > { %v2523_v51 = vsel %vm1214_vm1, %v7183_v21, 0.0 }
 0x891   : > { %6372 = vmatpush.xpose.msk.msrb.mxu2 %vm857_vm0, %v10276_v23  ;;  %v13197_v23 = vld [vmem:[#allocation126_spill] sm:$0xff]  ;;  %v11152_v44 = vpop.f32.mrf.mxu2 }
 0x892   : > { %v13199_v1 = vpack.i.bf16 %v13197_v23, %v13198_v58  ;;  %13209 = vst [vmem:[#allocation183_spill] sm:$0xff] %v11152_v44  ;;  %v7185_v23 = vpop.eup %7184 }
 0x893   : > { %v3194_v50 = vpop.f32.mrf.mxu1 }
 0x894   : > { %6236 = vmatmul.msk.f32.gmra.mxu3 %vm1214_vm1, %v11076_v30  ;;  %6283 = vmatmul.msk.f32.gmra.mxu2 %vm857_vm0, %v13193_v20  ;;  %v11121_v54 = vadd.f32 %v3194_v50, %v11118_v18  ;;  %v2374_v20 = vsub.f32 %v10793_v37, %v10968_v13 }
 0x895   : > { %6373 = vmatpush.xpose.msk.msrb.mxu2 %vm857_vm0, %v10316_v53  ;;  %6809 = vrot.lane.b32.xlu2 %v13196_v17, %s7819_s3  ;;  %v13201_v53 = vld [vmem:[#allocation124_spill] sm:$0xff] }
 0x896   : > { %v2437_v17 = vmul.f32 1.442695, %v2374_v20  ;;  %v13229_v20 = vld [vmem:[#allocation148_spill] sm:$0xff] }
 0x899   : > { %6374 = vmatpush.xpose.msk.msrb.mxu2 %vm857_vm0, %v10299_v22  ;;  %6804 = vrot.lane.b32.xlu1 %v13199_v1, %s7819_s3  ;;  %v13203_v22 = vpack.i.bf16 %v13201_v53, %v13202_v36  ;;  %v13216_v53 = vld [vmem:[#allocation161_spill] sm:$0xff] }
 0x89c   : > { %6237 = vmatmul.msk.f32.gmra.mxu3 %vm1214_vm1, %v7183_v21  ;;  %6284 = vmatmul.msk.f32.gmra.mxu2 %vm857_vm0, %v13200_v42  ;;  %v13215_v42 = vld [vmem:[#allocation160_spill] sm:$0xff] }
 0x89d   : > { %6375 = vmatpush.xpose.msk.msrb.mxu2 %vm857_vm0, %v10342_v45  ;;  %6819 = vrot.lane.b32.xlu2 %v13203_v22, %s7819_s3  ;;  %v3443_v45 = vsel %vm1214_vm1, %v11108_v61, -inf  ;;  %v6833_v36 = vpack.i.bf16 %v13216_v53, %v13215_v42 }
 0x8a1   : > { %6376 = vmatpush.xpose.msk.msrb.mxu2 %vm857_vm0, %v10421_v29  ;;  %v3452_v29 = vsel %vm1214_vm1, %v11121_v54, -inf }
 0x8a4   : > { %6285 = vmatmul.msk.f32.gmra.mxu2 %vm857_vm0, %v13204_v62  ;;  %6238 = vmatmul.msk.f32.gmra.mxu3 %vm1214_vm1, %v10955_v34  ;;  %v11129_v34 = vpop.xlane.xlu1 %2479  ;;  %v11158_v55 = vpop.f32.mrf.mxu2  ;;  %v13219_v62 = vld [vmem:[#allocation33_spill] sm:$0xff] }
 0x8a5   : > { %3444 = vmax.xlane.f32.xlu0 %v3443_v45  ;;  %13210 = vst [vmem:[#allocation78_spill] sm:$0xff] %v11158_v55 }
 0x8ac   : > { %6286 = vmatmul.msk.f32.gmra.mxu2 %vm857_vm0, %v13205_v43  ;;  %v11147_v8 = vpop.permute.xlu1 %6794  ;;  %v11170_v37 = vpop.f32.mrf.mxu2  ;;  %v13220_v43 = vld [vmem:[#allocation149_spill] sm:$0xff] }
 0x8ad   : > { %3453 = vmax.xlane.f32.xlu0 %v3452_v29  ;;  %13214 = vst [vmem:[#allocation41_spill] sm:$0xff] %v11170_v37 }
 0x8b4   : > { %6287 = vmatmul.msk.f32.gmra.mxu2 %vm857_vm0, %v13206_v33 }
 0x8bc   : > { %6288 = vmatmul.msk.f32.gmra.mxu2 %vm857_vm0, %v13207_v41  ;;  %v13222_v41 = vld [vmem:[#allocation63_spill] sm:$0xff] }
 0x8c3   : > { %3420 = vmax.xlane.f32.xlu1 %v3419_v9  ;;  %v13223_v9 = vld [vmem:[#allocation150_spill] sm:$0xff] }
 0x8c6   : > { %3414 = vmax.xlane.f32.xlu2 %v3413_v24  ;;  %v13224_v24 = vld [vmem:[#allocation154_spill] sm:$0xff] }
 0x8cb   : > { %v2339_v40 = vpop.xlane.xlu1 %2338  ;;  %2524 = vadd.xlane.f32.xlu1 %v2523_v51 }
 0x8cc   : > { %v2373_v14 = vsub.f32 %v10980_v7, %v2339_v40  ;;  %v2955_v7 = vmul.f32 %v7185_v23, %v10758_v16  ;;  %v11179_v16 = vpop.f32.mrf.mxu2  ;;  %v11214_v23 = vpop.xlane.xlu2 %2485 }
 0x8cd   : > { %13218 = vst [vmem:[#allocation59_spill] sm:$0xff] %v11179_v16 }
 0x8ce   : > { %v2435_v5 = vmul.f32 1.442695, %v2373_v14  ;;  %v6823_v21 = vpack.i.bf16 %v13213_v38, %v2955_v7  ;;  %v3089_v7 = vpop.f32.mrf.mxu0  ;;  %v11218_v38 = vld [vmem:[#allocation10 + $0xa8] sm:$0xff] }
 0x8cf   : > { %v11225_v42 = vadd.f32 %v3089_v7, %v11118_v18  ;;  %v11229_v53 = vadd.f32 %v10949_v0, %v11218_v38  ;;  %v11263_v7 = vpop.permute.xlu0 %6814 }
 0x8d0   : > { %7186 = vpow2.f32 %v2435_v5  ;;  %v13228_v5 = vld [vmem:[#allocation79_spill] sm:$0xff] }
 0x8d1   : > { %7188 = vpow2.f32 %v2437_v17  ;;  %v13230_v17 = vld [vmem:[#allocation151_spill] sm:$0xff] }
 0x8d3   : > { %v11160_v57 = vpop.xlane.xlu1 %2488 }
 0x8d4   : > { %13211 = vst [vmem:[#allocation81_spill] sm:$0xff] %v11160_v57 }
 0x8d6   : > { %v11162_v58 = vpop.eup %7186 }
 0x8d7   : > { %6239 = vmatmul.msk.f32.gmra.mxu3 %vm1214_vm1, %v11162_v58  ;;  %v7189_v13 = vpop.eup %7188 }
 0x8d8   : > { %v2532_v0 = vsel %vm1214_vm1, %v7189_v13, 0.0 }
 0x8db   : > { %v11167_v1 = vpop.xlane.xlu1 %2497 }
 0x8dc   : > { %13212 = vst [vmem:[#allocation40_spill] sm:$0xff] %v11167_v1  ;;  %v13302_v1 = vld [vmem:[#allocation61_spill] sm:$0xff] }
 0x8de   : > { %6824 = vrot.lane.b32.xlu2 %v6823_v21, %s7819_s3  ;;  %v13231_v21 = vld [vmem:[#allocation103_spill] sm:$0xff] }
 0x8df   : > { %6240 = vmatmul.msk.f32.gmra.mxu3 %vm1214_vm1, %v7189_v13 }
 0x8e3   : > { %v11176_v22 = vpop.xlane.xlu1 %2506 }
 0x8e4   : > { %13217 = vst [vmem:[#allocation37_spill] sm:$0xff] %v11176_v22  ;;  %6834 = vrot.lane.b32.xlu1 %v6833_v36, %s7819_s3  ;;  %v11231_v36 = vpop.xlane.xlu2 %2494 }
 0x8e5   : > { %13232 = vst [vmem:[#allocation136_spill] sm:$0xff] %v11231_v36 }
 0x8e7   : > { %6297 = vmatmul.msk.f32.vlgmr.msra.gmra.mxu3 %vm857_vm0, %v13219_v62  ;;  %v3422_v62 = vsel %vm1214_vm1, %v11229_v53, -inf }
 0x8e8   : > { %6385 = vmatpush.xpose.msk.msra.mxu3 %vm857_vm0, %v10688_v10 }
 0x8eb   : > { %v3412_v45 = vpop.xlane.xlu1 %3411 }
 0x8ec   : > { %v3504_v50 = vsub.f32 %v11024_v49, %v3412_v45  ;;  %6386 = vmatpush.xpose.msk.msra.mxu3 %vm857_vm0, %v13220_v43  ;;  %v13226_v49 = vld [vmem:[#allocation76_spill] sm:$0xff]  ;;  %v11241_v43 = vpop.xlane.xlu2 %2503 }
 0x8ed   : > { %13234 = vst [vmem:[#allocation135_spill] sm:$0xff] %v11241_v43 }
 0x8ee   : > { %v3537_v29 = vmul.f32 1.442695, %v3504_v50  ;;  %v13233_v50 = vld [vmem:[#allocation114_spill] sm:$0xff] }
 0x8ef   : > { %v11188_v33 = vpop.f32.mrf.mxu2  ;;  %6298 = vmatmul.msk.f32.gmra.mxu3 %vm857_vm0, %v13222_v41  ;;  %v13235_v41 = vld [vmem:[#allocation116_spill] sm:$0xff] }
 0x8f0   : > { %13221 = vst [vmem:[#allocation64_spill] sm:$0xff] %v11188_v33  ;;  %7190 = vpow2.f32 %v3537_v29  ;;  %6387 = vmatpush.xpose.msk.msra.mxu3 %vm857_vm0, %v13223_v9 }
 0x8f1   : > { %7192 = vrcp.f32 %v10893_v63 }
 0x8f4   : > { %6388 = vmatpush.xpose.msk.msra.mxu3 %vm857_vm0, %v13224_v24 }
 0x8f6   : > { %v7191_v10 = vpop.eup %7190 }
 0x8f7   : > { %v11196_v51 = vpop.f32.mrf.mxu2  ;;  %6299 = vmatmul.msk.f32.gmra.mxu3 %vm857_vm0, %v13226_v49  ;;  %6306 = vmatmul.msk.f32.gmra.mxu0 %vm1214_vm1, %v7191_v10  ;;  %v3602_v40 = vsel %vm1214_vm1, %v7191_v10, 0.0  ;;  %v11252_v10 = vpop.xlane.xlu2 %2512 }
 0x8f8   : > { %13225 = vst [vmem:[#allocation77_spill] sm:$0xff] %v11196_v51  ;;  %6389 = vmatpush.xpose.msk.msra.mxu3 %vm857_vm0, %v10774_v25  ;;  %3603 = vadd.xlane.f32.xlu0 %v3602_v40  ;;  %v2520_v25 = vsel %vm1214_vm1, %v11076_v30, 0.0  ;;  %v3428_v30 = vsel %vm1214_vm1, %v11225_v42, -inf  ;;  %v7193_v49 = vpop.eup %7192  ;;  %v13237_v40 = vld [vmem:[#allocation144_spill] sm:$0xff] }
 0x8f9   : > { %13236 = vst [vmem:[#allocation104_spill] sm:$0xff] %v11252_v10  ;;  %v2956_v13 = vmul.f32 %v7193_v49, %v10768_v4  ;;  %v11272_v4 = vpop.xlane.xlu0 %2518 }
 0x8fa   : > { %13242 = vst [vmem:[#allocation140_spill] sm:$0xff] %v11272_v4 }
 0x8fc   : > { %6390 = vmatpush.xpose.msk.msra.mxu3 %vm857_vm0, %v10786_v31 }
 0x8ff   : > { %v11206_v14 = vpop.f32.mrf.mxu2  ;;  %6300 = vmatmul.msk.f32.gmra.mxu3 %vm857_vm0, %v13228_v5  ;;  %v13238_v5 = vld [vmem:[#allocation159_spill] sm:$0xff]  ;;  %v11260_v63 = vpop.permute.xlu2 %6809 }
 0x900   : > { %13227 = vst [vmem:[#allocation101_spill] sm:$0xff] %v11206_v14  ;;  %6391 = vmatpush.xpose.msk.msra.mxu3 %vm857_vm0, %v13229_v20  ;;  %v6828_v20 = vpack.i.bf16 %v2956_v13, %v13238_v5 }
 0x901   : > { %v3418_v5 = vpop.xlane.xlu0 %3417 }
 0x904   : > { %6392 = vmatpush.xpose.msk.msra.mxu3 %vm857_vm0, %v13230_v17  ;;  %v11258_v17 = vpop.xlane.xlu1 %2515 }
 0x905   : > { %13239 = vst [vmem:[#allocation115_spill] sm:$0xff] %v11258_v17 }
 0x907   : > { %2521 = vadd.xlane.f32.xlu2 %v2520_v25  ;;  %v11220_v31 = vpop.f32.mrf.mxu2  ;;  %6301 = vmatmul.msk.f32.gmra.mxu3 %vm857_vm0, %v13231_v21  ;;  %v13240_v25 = vld [vmem:[#allocation162_spill] sm:$0xff]  ;;  %v13241_v21 = vld [vmem:[#allocation163_spill] sm:$0xff] }
 0x90e   : > { %3429 = vmax.xlane.f32.xlu1 %v3428_v30  ;;  %v6838_v30 = vpack.i.bf16 %v13241_v21, %v13240_v25  ;;  %v3506_v25 = vsub.f32 %v10945_v19, %v3418_v5  ;;  %v11281_v21 = vpop.f32.mrf.mxu3 }
 0x90f   : > { %3423 = vmax.xlane.f32.xlu2 %v3422_v62  ;;  %v11237_v45 = vpop.f32.mrf.mxu2  ;;  %6302 = vmatmul.msk.f32.gmra.mxu3 %vm857_vm0, %v13233_v50  ;;  %v11267_v62 = vpop.permute.xlu1 %6804  ;;  %13243 = vst [vmem:[#allocation96_spill] sm:$0xff] %v11281_v21 }
 0x910   : > { %v3541_v4 = vmul.f32 1.442695, %v3506_v25  ;;  %v13249_v25 = vld [vmem:[#allocation178_spill] sm:$0xff] }
 0x916   : > { %2533 = vadd.xlane.f32.xlu1 %v2532_v0  ;;  %v11274_v0 = vpop.permute.xlu2 %6819 }
 0x917   : > { %v3284_v29 = vpop.f32.mrf.mxu2  ;;  %6303 = vmatmul.msk.f32.gmra.mxu3 %vm857_vm0, %v13235_v41 }
 0x918   : > { %v11248_v9 = vadd.f32 %v3284_v29, %v11133_v11 }
 0x91a   : > { %v3461_v24 = vsel %vm1214_vm1, %v11248_v9, -inf }
 0x91b   : > { %3462 = vmax.xlane.f32.xlu0 %v3461_v24 }
 0x91f   : > { %6304 = vmatmul.msk.f32.gmra.mxu3 %vm857_vm0, %v13237_v40  ;;  %v11269_v50 = vpop.f32.mrf.mxu2 }
 0x927   : > { %6829 = vrot.lane.b32.xlu2 %v6828_v20, %s7819_s3  ;;  %v11277_v24 = vpop.f32.mrf.mxu2 }
 0x92f   : > { %6839 = vrot.lane.b32.xlu1 %v6838_v30, %s7819_s3  ;;  %v3293_v17 = vpop.f32.mrf.mxu2 }
 0x936   : > { %v3421_v29 = vpop.xlane.xlu1 %3420 }
 0x937   : > { %v3507_v41 = vsub.f32 %v11137_v39, %v3421_v29  ;;  %v11291_v29 = vpop.f32.mrf.mxu3 }
 0x938   : > { %13244 = vst [vmem:[#allocation95_spill] sm:$0xff] %v11291_v29 }
 0x939   : > { %v3543_v49 = vmul.f32 1.442695, %v3507_v41  ;;  %v3415_v40 = vpop.xlane.xlu2 %3414 }
 0x93a   : > { %v3505_v13 = vsub.f32 %v11141_v27, %v3415_v40  ;;  %v11289_v27 = vadd.f32 %v3293_v17, %v11218_v38  ;;  %v11307_v17 = vadd.f32 %v11026_v46, %v11133_v11 }
 0x93b   : > { %7194 = vpow2.f32 %v3543_v49 }
 0x93c   : > { %v3539_v20 = vmul.f32 1.442695, %v3505_v13  ;;  %v3470_v19 = vsel %vm1214_vm1, %v11289_v27, -inf }
 0x93e   : > { %7196 = vpow2.f32 %v3539_v20  ;;  %v11329_v21 = vpop.xlane.xlu1 %2524 }
 0x93f   : > { %7198 = vpow2.f32 %v3541_v4  ;;  %v11303_v4 = vadd.f32 %v10990_v48, %v10838_v47  ;;  %v11309_v49 = vpop.f32.mrf.mxu3  ;;  %v13247_v48 = vld [vmem:[#allocation47_spill] sm:$0xff]  ;;  %13253 = vst [vmem:[#allocation52_spill] sm:$0xff] %v11329_v21 }
 0x940   : > { %13245 = vst [vmem:[#allocation192_spill] sm:$0xff] %v11309_v49  ;;  %7200 = vrcp.f32 %v13247_v48  ;;  %v13252_v48 = vld [vmem:[#allocation165_spill] sm:$0xff] }
 0x941   : > { %v7195_v30 = vpop.eup %7194  ;;  %v3431_v40 = vsel %vm1214_vm1, %v11303_v4, -inf  ;;  %7202 = vrcp.f32 %v10816_v28 }
 0x942   : > { %v3611_v10 = vsel %vm1214_vm1, %v7195_v30, 0.0  ;;  %7204 = vrcp.f32 %v10988_v26  ;;  %v11334_v26 = vpop.permute.xlu2 %6824 }
 0x943   : > { %3612 = vadd.xlane.f32.xlu0 %v3611_v10  ;;  %v2529_v10 = vsel %vm1214_vm1, %v11162_v58, 0.0  ;;  %v3437_v58 = vsel %vm1214_vm1, %v11307_v17, -inf  ;;  %7206 = vrcp.f32 %v10865_v52 }
 0x944   : > { %v11284_v39 = vpop.eup %7196 }
 0x945   : > { %6307 = vmatmul.msk.f32.gmra.mxu0 %vm1214_vm1, %v11284_v39  ;;  %v11295_v41 = vpop.eup %7198 }
 0x946   : > { %v7201_v46 = vpop.eup %7200 }
 0x947   : > { %v11316_v13 = vpop.f32.mrf.mxu3  ;;  %v7203_v20 = vpop.eup %7202 }
 0x948   : > { %13246 = vst [vmem:[#allocation53_spill] sm:$0xff] %v11316_v13  ;;  %v7205_v49 = vpop.eup %7204 }
 0x949   : > { %v7207_v28 = vpop.eup %7206 }
 0x94a   : > { %v2960_v52 = vmul.f32 %v7207_v28, %v10795_v12 }
 0x94b   : > { %3471 = vmax.xlane.f32.xlu0 %v3470_v19  ;;  %v13250_v19 = vld [vmem:[#allocation48_spill] sm:$0xff] }
 0x94d   : > { %6308 = vmatmul.msk.f32.gmra.mxu0 %vm1214_vm1, %v11295_v41 }
 0x94f   : > { %v11320_v5 = vpop.f32.mrf.mxu3 }
 0x950   : > { %2530 = vadd.xlane.f32.xlu2 %v2529_v10  ;;  %13248 = vst [vmem:[#allocation191_spill] sm:$0xff] %v11320_v5  ;;  %v2957_v10 = vmul.f32 %v7203_v20, %v13250_v19  ;;  %v13254_v5 = vld [vmem:[#allocation49_spill] sm:$0xff]  ;;  %v11339_v20 = vpop.xlane.xlu0 %2527 }
 0x951   : > { %v2959_v29 = vmul.f32 %v7205_v49, %v13254_v5  ;;  %13256 = vst [vmem:[#allocation130_spill] sm:$0xff] %v11339_v20 }
 0x952   : > { %v6843_v13 = vpack.i.bf16 %v13252_v48, %v2957_v10  ;;  %v13260_v48 = vld [vmem:[#allocation110_spill] sm:$0xff] }
 0x955   : > { %6309 = vmatmul.msk.f32.gmra.mxu0 %vm1214_vm1, %v7195_v30  ;;  %v2958_v30 = vmul.f32 %v7201_v46, %v13249_v25  ;;  %v6853_v46 = vpack.i.bf16 %v2960_v52, %v2959_v29 }
 0x956   : > { %v11341_v25 = vpop.permute.xlu1 %6834 }
 0x957   : > { %v11332_v51 = vpop.f32.mrf.mxu3 }
 0x958   : > { %3432 = vmax.xlane.f32.xlu2 %v3431_v40  ;;  %v13251_v40 = vld [vmem:[#allocation166_spill] sm:$0xff]  ;;  %13255 = vst [vmem:[#allocation74_spill] sm:$0xff] %v11332_v51 }
 0x959   : > { %3438 = vmax.xlane.f32.xlu1 %v3437_v58  ;;  %v6848_v58 = vpack.i.bf16 %v2958_v30, %v13251_v40 }
 0x95f   : > { %v11343_v30 = vpop.f32.mrf.mxu3 }
 0x960   : > { %13257 = vst [vmem:[#allocation129_spill] sm:$0xff] %v11343_v30 }
 0x970   : > { %6849 = vrot.lane.b32.xlu2 %v6848_v58, %s7819_s3  ;;  %v11349_v58 = vpop.f32.mrf.mxu3 }
 0x971   : > { %13259 = vst [vmem:[#allocation127_spill] sm:$0xff] %v11349_v58  ;;  %v13271_v58 = vld [vmem:[#allocation23_spill] sm:$0xff] }
 0x972   : > { %6844 = vrot.lane.b32.xlu1 %v6843_v13, %s7819_s3  ;;  %v3427_v13 = vpop.xlane.xlu0 %3426 }
 0x973   : > { %v3509_v28 = vsub.f32 %v13260_v48, %v3427_v13 }
 0x975   : > { %v3547_v52 = vmul.f32 1.442695, %v3509_v28 }
 0x978   : > { %6854 = vrot.lane.b32.xlu2 %v6853_v46, %s7819_s3  ;;  %v3383_v20 = vpop.f32.mrf.mxu3 }
 0x97a   : > { %v11345_v19 = vpop.xlane.xlu2 %2521 }
 0x97b   : > { %13258 = vst [vmem:[#allocation126_spill] sm:$0xff] %v11345_v19 }
 0x981   : > { %v3430_v49 = vpop.xlane.xlu1 %3429 }
 0x982   : > { %v3510_v5 = vsub.f32 %v11225_v42, %v3430_v49  ;;  %v3424_v10 = vpop.xlane.xlu2 %3423  ;;  %v11355_v42 = vadd.f32 %v3383_v20, %v10838_v47  ;;  %v11373_v20 = vadd.f32 %v11220_v31, %v10838_v47  ;;  %v3605_v47 = vsel %vm1214_vm1, %v11284_v39, 0.0  ;;  %v13264_v31 = vld [vmem:[#allocation16_spill] sm:$0xff]  ;;  %v13265_v39 = vld [vmem:[#allocation39_spill] sm:$0xff] }
 0x983   : > { %v3508_v40 = vsub.f32 %v11229_v53, %v3424_v10  ;;  %v13261_v10 = vld [vmem:[#allocation98_spill] sm:$0xff] }
 0x984   : > { %v3549_v12 = vmul.f32 1.442695, %v3510_v5  ;;  %v3479_v49 = vsel %vm1214_vm1, %v11355_v42, -inf  ;;  %v11362_v5 = vadd.f32 %v11072_v2, %v11218_v38  ;;  %v3455_v2 = vsel %vm1214_vm1, %v11373_v20, -inf }
 0x985   : > { %v3545_v29 = vmul.f32 1.442695, %v3508_v40  ;;  %v11368_v40 = vadd.f32 %v11046_v59, %v13261_v10  ;;  %v13263_v59 = vld [vmem:[#allocation60_spill] sm:$0xff]  ;;  %v11393_v28 = vadd.f32 %v11269_v50, %v13261_v10 }
 0x986   : > { %7208 = vpow2.f32 %v3549_v12  ;;  %v13262_v12 = vld [vmem:[#allocation90_spill] sm:$0xff] }
 0x987   : > { %7210 = vpow2.f32 %v3545_v29  ;;  %v3440_v13 = vsel %vm1214_vm1, %v11368_v40, -inf  ;;  %v11381_v29 = vadd.f32 %v11094_v32, %v13262_v12  ;;  %v3599_v32 = vsel %vm1214_vm1, %v11013_v3, 0.0 }
 0x988   : > { %7212 = vpow2.f32 %v3547_v52  ;;  %v3464_v52 = vsel %vm1214_vm1, %v11393_v28, -inf }
 0x989   : > { %v3449_v48 = vsel %vm1214_vm1, %v11381_v29, -inf }
 0x98a   : > { %v11407_v50 = vpop.permute.xlu2 %6829 }
 0x98c   : > { %v7209_v46 = vpop.eup %7208 }
 0x98d   : > { %v7211_v30 = vpop.eup %7210  ;;  %v3620_v51 = vsel %vm1214_vm1, %v7209_v46, 0.0 }
 0x98e   : > { %3621 = vadd.xlane.f32.xlu0 %v3620_v51  ;;  %6310 = vmatmul.msk.f32.gmra.mxu0 %vm1214_vm1, %v7211_v30  ;;  %v7213_v53 = vpop.eup %7212  ;;  %v3446_v51 = vsel %vm1214_vm1, %v11362_v5, -inf  ;;  %v3614_v3 = vsel %vm1214_vm1, %v7211_v30, 0.0 }
 0x996   : > { %6311 = vmatmul.msk.f32.gmra.mxu0 %vm1214_vm1, %v7213_v53  ;;  %3480 = vmax.xlane.f32.xlu0 %v3479_v49 }
 0x99c   : > { %3447 = vmax.xlane.f32.xlu1 %v3446_v51  ;;  %v3296_v51 = vpop.f32.mrf.mxu2 }
 0x99e   : > { %6312 = vmatmul.msk.f32.gmra.mxu0 %vm1214_vm1, %v7209_v46  ;;  %v11401_v46 = vadd.f32 %v11237_v45, %v10999_v56  ;;  %v11415_v45 = vadd.f32 %v3296_v51, %v13262_v12  ;;  %v3386_v12 = vpop.f32.mrf.mxu3 }
 0x9a0   : > { %v3458_v49 = vsel %vm1214_vm1, %v11401_v46, -inf  ;;  %v3473_v30 = vsel %vm1214_vm1, %v11415_v45, -inf }
 0x9a1   : > { %3441 = vmax.xlane.f32.xlu2 %v3440_v13  ;;  %v11410_v13 = vpop.xlane.xlu1 %2533 }
 0x9a2   : > { %13266 = vst [vmem:[#allocation85_spill] sm:$0xff] %v11410_v13 }
 0x9a4   : > { %3456 = vmax.xlane.f32.xlu1 %v3455_v2  ;;  %v3436_v2 = vpop.xlane.xlu0 %3435  ;;  %v3299_v21 = vpop.f32.mrf.mxu2 }
 0x9a6   : > { %6345 = vmatmul.msk.f32.vlgmr.msra.gmra.mxu0 %vm857_vm0, %v13263_v59  ;;  %v13267_v59 = vld [vmem:[#allocation19_spill] sm:$0xff]  ;;  %v3389_v13 = vpop.f32.mrf.mxu3 }
 0x9a9   : > { %3450 = vmax.xlane.f32.xlu2 %v3449_v48  ;;  %v3608_v48 = vsel %vm1214_vm1, %v11295_v41, 0.0 }
 0x9ac   : > { %3606 = vadd.xlane.f32.xlu1 %v3605_v47 }
 0x9ae   : > { %6346 = vmatmul.msk.f32.gmra.mxu0 %vm857_vm0, %v13264_v31  ;;  %v11425_v31 = vadd.f32 %v11277_v24, %v11105_v35 }
 0x9b0   : > { %v3467_v41 = vsel %vm1214_vm1, %v11425_v31, -inf }
 0x9b1   : > { %3600 = vadd.xlane.f32.xlu2 %v3599_v32  ;;  %v11427_v32 = vpop.permute.xlu1 %6839 }
 0x9b2   : > { %v6841_v16 = vunpack.i.l.bf16 %v11427_v32  ;;  %v6842_v33 = vunpack.i.h.bf16 %v11427_v32 }
 0x9b4   : > { %3465 = vmax.xlane.f32.xlu1 %v3464_v52  ;;  %v11429_v52 = vpop.permute.xlu0 %6859 }
 0x9b5   : > { %13269 = vst [vmem:[#allocation125_spill] sm:$0xff] %v11429_v52 }
 0x9b6   : > { %6347 = vmatmul.msk.f32.gmra.mxu0 %vm857_vm0, %v13265_v39  ;;  %v13270_v39 = vld [vmem:[#allocation46_spill] sm:$0xff] }
 0x9b9   : > { %3459 = vmax.xlane.f32.xlu2 %v3458_v49 }
 0x9bc   : > { %3615 = vadd.xlane.f32.xlu1 %v3614_v3 }
 0x9be   : > { %6348 = vmatmul.msk.f32.gmra.mxu0 %vm857_vm0, %v13267_v59  ;;  %v3445_v59 = vpop.xlane.xlu0 %3444 }
 0x9c1   : > { %3609 = vadd.xlane.f32.xlu2 %v3608_v48 }
 0x9c3   : > { %v11419_v47 = vpop.xlane.xlu2 %2530 }
 0x9c4   : > { %13268 = vst [vmem:[#allocation124_spill] sm:$0xff] %v11419_v47  ;;  %3474 = vmax.xlane.f32.xlu1 %v3473_v30  ;;  %v3512_v30 = vsub.f32 %v11002_v6, %v3436_v2 }
 0x9c6   : > { %6349 = vmatmul.msk.f32.gmra.mxu0 %vm857_vm0, %v13270_v39  ;;  %v3617_v39 = vsel %vm1214_vm1, %v7213_v53, 0.0  ;;  %v3454_v6 = vpop.xlane.xlu0 %3453 }
 0x9c9   : > { %3468 = vmax.xlane.f32.xlu2 %v3467_v41  ;;  %v3553_v41 = vmul.f32 1.442695, %v3512_v30 }
 0x9cb   : > { %v3433_v49 = vpop.xlane.xlu2 %3432 }
 0x9cc   : > { %v3511_v3 = vsub.f32 %v11303_v4, %v3433_v49  ;;  %v3439_v51 = vpop.xlane.xlu1 %3438  ;;  %v11442_v4 = vadd.f32 %v3299_v21, %v11118_v18 }
 0x9cd   : > { %v3513_v24 = vsub.f32 %v11307_v17, %v3439_v51  ;;  %v13272_v17 = vld [vmem:[#allocation50_spill] sm:$0xff] }
 0x9ce   : > { %v3551_v48 = vmul.f32 1.442695, %v3511_v3  ;;  %6350 = vmatmul.msk.f32.gmra.mxu0 %vm857_vm0, %v13271_v58  ;;  %v6786_v3 = vunpack.i.l.bf16 %v13272_v17  ;;  %v13273_v51 = vld [vmem:[#allocation66_spill] sm:$0xff]  ;;  %v6787_v2 = vunpack.i.h.bf16 %v13272_v17  ;;  %v3476_v21 = vsel %vm1214_vm1, %v11442_v4, -inf }
 0x9cf   : > { %v3555_v47 = vmul.f32 1.442695, %v3513_v24  ;;  %v3392_v24 = vpop.f32.mrf.mxu3 }
 0x9d0   : > { %7214 = vpow2.f32 %v3551_v48  ;;  %v13274_v48 = vld [vmem:[#allocation177_spill] sm:$0xff] }
 0x9d1   : > { %7216 = vpow2.f32 %v3555_v47  ;;  %3618 = vadd.xlane.f32.xlu2 %v3617_v39  ;;  %v6791_v30 = vunpack.i.l.bf16 %v13274_v48  ;;  %v11455_v39 = vadd.f32 %v3386_v12, %v10999_v56 }
 0x9d2   : > { %7218 = vpow2.f32 %v3553_v41  ;;  %v6792_v41 = vunpack.i.h.bf16 %v13274_v48  ;;  %v11477_v48 = vadd.f32 %v3389_v13, %v11133_v11 }
 0x9d3   : > { %v3482_v56 = vsel %vm1214_vm1, %v11455_v39, -inf }
 0x9d6   : > { %v7215_v49 = vpop.eup %7214  ;;  %6351 = vmatmul.msk.f32.gmra.mxu0 %vm857_vm0, %v13273_v51  ;;  %v13275_v51 = vld [vmem:[#allocation38_spill] sm:$0xff] }
 0x9d7   : > { %v7217_v58 = vpop.eup %7216  ;;  %6313 = vmatmul.msk.f32.vlgmr.msra.gmra.mxu1 %vm1214_vm1, %v7215_v49  ;;  %v3623_v53 = vsel %vm1214_vm1, %v7215_v49, 0.0  ;;  %v11459_v49 = vadd.f32 %v3392_v24, %v13261_v10  ;;  %v6797_v10 = vunpack.i.h.bf16 %v11147_v8 }
 0x9d8   : > { %4968 = vmatpush.msra.mxu1 %v6786_v3  ;;  %3624 = vadd.xlane.f32.xlu1 %v3623_v53  ;;  %v3629_v47 = vsel %vm1214_vm1, %v7217_v58, 0.0  ;;  %v7219_v17 = vpop.eup %7218  ;;  %v6796_v3 = vunpack.i.l.bf16 %v11147_v8  ;;  %v3515_v53 = vsub.f32 %v11108_v61, %v3445_v59  ;;  %v11479_v8 = vpop.f32.mrf.mxu3 }
 0x9d9   : > { %3477 = vmax.xlane.f32.xlu2 %v3476_v21  ;;  %3630 = vadd.xlane.f32.xlu0 %v3629_v47  ;;  %v11465_v21 = vpop.xlane.xlu0 %3603  ;;  %v3626_v12 = vsel %vm1214_vm1, %v7219_v17, 0.0  ;;  %v13276_v47 = vld [vmem:[#allocation87_spill] sm:$0xff] }
 0x9da   : > { %4969 = vmatpush.msra.mxu1 %v6787_v2  ;;  %v3488_v2 = vsel %vm1214_vm1, %v11459_v49, -inf  ;;  %v6801_v61 = vunpack.i.l.bf16 %v13276_v47  ;;  %v3559_v59 = vmul.f32 1.442695, %v3515_v53  ;;  %v6802_v24 = vunpack.i.h.bf16 %v13276_v47  ;;  %v11508_v47 = vpop.f32.mrf.mxu0 }
 0x9dc   : > { %4970 = vmatpush.msra.mxu1 %v6791_v30  ;;  %7220 = vpow2.f32 %v3559_v59 }
 0x9de   : > { %4971 = vmatpush.msra.mxu1 %v6792_v41  ;;  %6352 = vmatmul.msk.f32.gmra.mxu0 %vm857_vm0, %v13275_v51  ;;  %v3485_v41 = vsel %vm1214_vm1, %v11477_v48, -inf }
 0x9df   : > { %6314 = vmatmul.msk.f32.gmra.mxu1 %vm1214_vm1, %v7219_v17 }
 0x9e0   : > { %4972 = vmatpush.msra.mxu1 %v6796_v3  ;;  %3483 = vmax.xlane.f32.xlu1 %v3482_v56  ;;  %v3518_v3 = vsub.f32 %v11121_v54, %v3454_v6  ;;  %v3398_v13 = vpop.f32.mrf.mxu3 }
 0x9e1   : > { %3627 = vadd.xlane.f32.xlu2 %v3626_v12  ;;  %3489 = vmax.xlane.f32.xlu0 %v3488_v2  ;;  %v11481_v30 = vpop.xlane.xlu0 %3462  ;;  %v11494_v56 = vadd.f32 %v3398_v13, %v11218_v38  ;;  %v11506_v2 = vpop.permute.xlu2 %6849 }
 0x9e2   : > { %4973 = vmatpush.msra.mxu1 %v6797_v10  ;;  %v11486_v17 = vpop.eup %7220  ;;  %v3565_v53 = vmul.f32 1.442695, %v3518_v3  ;;  %v11515_v3 = vpop.f32.mrf.mxu0  ;;  %v6851_v32 = vunpack.i.l.bf16 %v11506_v2 }
 0x9e3   : > { %v3635_v11 = vsel %vm1214_vm1, %v11486_v17, 0.0 }
 0x9e4   : > { %4974 = vmatpush.msra.mxu1 %v6801_v61  ;;  %7222 = vpow2.f32 %v3565_v53  ;;  %v11510_v38 = vpop.permute.xlu1 %6844 }
 0x9e6   : > { %4975 = vmatpush.msra.mxu1 %v6802_v24 }
 0x9e7   : > { %6315 = vmatmul.msk.f32.gmra.mxu1 %vm1214_vm1, %v7217_v58  ;;  %v3494_v58 = vsel %vm1214_vm1, %v11494_v56, -inf }
 0x9e9   : > { %3486 = vmax.xlane.f32.xlu2 %v3485_v41  ;;  %v11489_v51 = vpop.xlane.xlu0 %3612  ;;  %v11513_v24 = vpop.permute.xlu2 %6854 }
 0x9ea   : > { %v11500_v12 = vpop.eup %7222  ;;  %13277 = vst [vmem:[#allocation93_spill] sm:$0xff] %v11513_v24  ;;  %v13308_v24 = vld [vmem:[#allocation69_spill] sm:$0xff] }
 0x9eb   : > { %v3644_v54 = vsel %vm1214_vm1, %v11500_v12, 0.0 }
 0x9f1   : > { %3636 = vadd.xlane.f32.xlu2 %v3635_v11  ;;  %v11498_v10 = vpop.xlane.xlu0 %3471 }
 0x9f9   : > { %3495 = vmax.xlane.f32.xlu2 %v3494_v58 }
 0xa01   : > { %v11504_v6 = vpop.xlane.xlu0 %3621  ;;  %3645 = vadd.xlane.f32.xlu2 %v3644_v54  ;;  %v6827_v54 = vunpack.i.h.bf16 %v11334_v26 }
 0xa09   : > { %v3481_v61 = vpop.xlane.xlu0 %3480 }
 0xa0a   : > { %v3527_v59 = vsub.f32 %v11355_v42, %v3481_v61  ;;  %v6831_v42 = vunpack.i.l.bf16 %v11407_v50  ;;  %v11525_v61 = vpop.f32.mrf.mxu0 }
 0xa0c   : > { %v3583_v41 = vmul.f32 1.442695, %v3527_v59 }
 0xa0e   : > { %7224 = vpow2.f32 %v3583_v41 }
 0xa0f   : > { %v3448_v11 = vpop.xlane.xlu1 %3447 }
 0xa10   : > { %v3516_v13 = vsub.f32 %v11362_v5, %v3448_v11  ;;  %v6836_v5 = vunpack.i.l.bf16 %v11341_v25 }
 0xa12   : > { %v3561_v53 = vmul.f32 1.442695, %v3516_v13 }
 0xa14   : > { %v11518_v58 = vpop.eup %7224  ;;  %7226 = vpow2.f32 %v3561_v53  ;;  %v3442_v19 = vpop.xlane.xlu2 %3441  ;;  %v6837_v53 = vunpack.i.h.bf16 %v11341_v25  ;;  %v6847_v25 = vunpack.i.h.bf16 %v11510_v38 }
 0xa15   : > { %v3514_v14 = vsub.f32 %v11368_v40, %v3442_v19  ;;  %6329 = vmatmul.msk.f32.vlgmr.msrb.gmra.mxu3 %vm1214_vm1, %v11518_v58 }
 0xa16   : > { %5146 = vmatpush.msrb.mxu3 %v6827_v54 }
 0xa17   : > { %v3557_v59 = vmul.f32 1.442695, %v3514_v14  ;;  %v3457_v41 = vpop.xlane.xlu1 %3456  ;;  %v3401_v14 = vpop.f32.mrf.mxu3 }
 0xa18   : > { %v3519_v11 = vsub.f32 %v11373_v20, %v3457_v41  ;;  %5147 = vmatpush.msrb.mxu3 %v6831_v42 }
 0xa19   : > { %7228 = vpow2.f32 %v3557_v59  ;;  %v7566_v59 = vld [vmem:[#allocation10 + $0xb0] sm:$0xff] }
 0xa1a   : > { %v7227_v13 = vpop.eup %7226  ;;  %v3567_v19 = vmul.f32 1.442695, %v3519_v11  ;;  %5148 = vmatpush.msrb.mxu3 %v6836_v5  ;;  %v11534_v41 = vadd.f32 %v7566_v59, %v3401_v14  ;;  %v11539_v11 = vpop.f32.mrf.mxu0  ;;  %v6817_v59 = vunpack.i.h.bf16 %v11263_v7 }
 0xa1b   : > { %v3638_v40 = vsel %vm1214_vm1, %v7227_v13, 0.0 }
 0xa1c   : > { %7230 = vpow2.f32 %v3567_v19  ;;  %5149 = vmatpush.msrb.mxu3 %v6837_v53  ;;  %v3451_v54 = vpop.xlane.xlu2 %3450  ;;  %3639 = vadd.xlane.f32.xlu0 %v3638_v40  ;;  %v11550_v19 = vadd.f32 %v11479_v8, %v11105_v35 }
 0xa1d   : > { %v3517_v42 = vsub.f32 %v11381_v29, %v3451_v54  ;;  %v3497_v54 = vsel %vm1214_vm1, %v11534_v41, -inf }
 0xa1e   : > { %5150 = vmatpush.msrb.mxu3 %v6841_v16  ;;  %v6806_v16 = vunpack.i.l.bf16 %v11267_v62  ;;  %v3491_v35 = vsel %vm1214_vm1, %v11550_v19, -inf }
 0xa1f   : > { %v7229_v20 = vpop.eup %7228  ;;  %v3563_v29 = vmul.f32 1.442695, %v3517_v42  ;;  %v3607_v14 = vpop.xlane.xlu1 %3606  ;;  %v6812_v42 = vunpack.i.h.bf16 %v11260_v63 }
 0xa20   : > { %5151 = vmatpush.msrb.mxu3 %v6842_v33  ;;  %6316 = vmatmul.msk.f32.gmra.mxu1 %vm1214_vm1, %v7229_v20  ;;  %v3632_v5 = vsel %vm1214_vm1, %v7229_v20, 0.0  ;;  %v6807_v33 = vunpack.i.h.bf16 %v11267_v62  ;;  %v6811_v20 = vunpack.i.l.bf16 %v11260_v63  ;;  %v6816_v62 = vunpack.i.l.bf16 %v11263_v7 }
 0xa21   : > { %3633 = vadd.xlane.f32.xlu1 %v3632_v5  ;;  %7232 = vpow2.f32 %v3563_v29 }
 0xa22   : > { %v11541_v53 = vpop.eup %7230  ;;  %5152 = vmatpush.msrb.mxu3 %v6847_v25  ;;  %v11561_v8 = vpop.f32.mrf.mxu0 }
 0xa23   : > { %6321 = vmatmul.msk.f32.vlgmr.msra.gmra.mxu2 %vm1214_vm1, %v11541_v53 }
 0xa24   : > { %5057 = vmatpush.msra.mxu2 %v6806_v16  ;;  %5153 = vmatpush.msrb.mxu3 %v6851_v32  ;;  %v3601_v40 = vpop.xlane.xlu2 %3600  ;;  %v6821_v16 = vunpack.i.l.bf16 %v11274_v0 }
 0xa25   : > { %3498 = vmax.xlane.f32.xlu0 %v3497_v54  ;;  %7234 = vrcp.f32 %v3601_v40  ;;  %v3521_v40 = vsub.f32 %v11248_v9, %v11481_v30  ;;  %v3404_v54 = vpop.f32.mrf.mxu3 }
 0xa26   : > { %5058 = vmatpush.msra.mxu2 %v6807_v33  ;;  %7236 = vrcp.f32 %v11465_v21  ;;  %v6822_v33 = vunpack.i.h.bf16 %v11274_v0 }
 0xa27   : > { %v7233_v5 = vpop.eup %7232 }
 0xa28   : > { %5059 = vmatpush.msra.mxu2 %v6811_v20  ;;  %6317 = vmatmul.msk.f32.gmra.mxu1 %vm1214_vm1, %v11486_v17  ;;  %v3466_v17 = vpop.xlane.xlu1 %3465  ;;  %v3641_v7 = vsel %vm1214_vm1, %v7233_v5, 0.0 }
 0xa29   : > { %3492 = vmax.xlane.f32.xlu1 %v3491_v35  ;;  %v3571_v35 = vmul.f32 1.442695, %v3521_v40 }
 0xa2a   : > { %5060 = vmatpush.msra.mxu2 %v6812_v42  ;;  %v11574_v42 = vadd.f32 %v3404_v54, %v11118_v18 }
 0xa2b   : > { %v7235_v29 = vpop.eup %7234 }
 0xa2c   : > { %5061 = vmatpush.msra.mxu2 %v6816_v62  ;;  %v3460_v25 = vpop.xlane.xlu2 %3459  ;;  %v4083_v21 = vmul.f32 %v7235_v29, %v11508_v47  ;;  %v7237_v20 = vpop.eup %7236  ;;  %v3500_v9 = vsel %vm1214_vm1, %v11574_v42, -inf  ;;  %v3522_v47 = vsub.f32 %v11393_v28, %v3466_v17 }
 0xa2d   : > { %v3520_v63 = vsub.f32 %v11401_v46, %v3460_v25  ;;  %v3775_v46 = vpop.f32.mrf.mxu0 }
 0xa2e   : > { %5062 = vmatpush.msra.mxu2 %v6817_v59 }
 0xa2f   : > { %v3569_v32 = vmul.f32 1.442695, %v3520_v63 }
 0xa30   : > { %5063 = vmatpush.msra.mxu2 %v6821_v16  ;;  %6318 = vmatmul.msk.f32.gmra.mxu1 %vm1214_vm1, %v7227_v13  ;;  %v4084_v13 = vmul.f32 %v7237_v20, %v11515_v3  ;;  %v3616_v18 = vpop.xlane.xlu1 %3615  ;;  %v3573_v16 = vmul.f32 1.442695, %v3522_v47 }
 0xa31   : > { %7238 = vpow2.f32 %v3569_v32  ;;  %3642 = vadd.xlane.f32.xlu1 %v3641_v7 }
 0xa32   : > { %5064 = vmatpush.msra.mxu2 %v6822_v33  ;;  %7240 = vrcp.f32 %v3607_v14  ;;  %v6863_v59 = vpack.i.bf16 %v4084_v13, %v4083_v21  ;;  %v13279_v13 = vld [vmem:[#allocation147_spill] sm:$0xff] }
 0xa34   : > { %v3610_v0 = vpop.xlane.xlu2 %3609 }
 0xa35   : > { %7242 = vrcp.f32 %v3610_v0 }
 0xa36   : > { %7244 = vpow2.f32 %v3571_v35 }
 0xa37   : > { %v7239_v62 = vpop.eup %7238  ;;  %7246 = vpow2.f32 %v3573_v16 }
 0xa38   : > { %6319 = vmatmul.msk.f32.gmra.mxu1 %vm1214_vm1, %v7233_v5  ;;  %6322 = vmatmul.msk.f32.gmra.mxu2 %vm1214_vm1, %v7239_v62  ;;  %v7241_v30 = vpop.eup %7240  ;;  %v11585_v5 = vpop.f32.mrf.mxu0  ;;  %v3650_v28 = vsel %vm1214_vm1, %v7239_v62, 0.0 }
 0xa39   : > { %6864 = vrot.lane.b32.xlu0 %v6863_v59, %s7817_s1  ;;  %3501 = vmax.xlane.f32.xlu1 %v3500_v9  ;;  %v4085_v14 = vmul.f32 %v7241_v30, %v11525_v61 }
 0xa3b   : > { %v7243_v3 = vpop.eup %7242 }
 0xa3c   : > { %v4086_v25 = vmul.f32 %v7243_v3, %v11539_v11  ;;  %v3469_v63 = vpop.xlane.xlu2 %3468  ;;  %v11587_v29 = vpop.eup %7244 }
 0xa3d   : > { %v3523_v61 = vsub.f32 %v11425_v31, %v3469_v63  ;;  %v3475_v11 = vpop.xlane.xlu1 %3474  ;;  %v11598_v7 = vpop.eup %7246  ;;  %v3524_v31 = vsub.f32 %v11289_v27, %v11498_v10 }
 0xa3e   : > { %v6868_v32 = vpack.i.bf16 %v4086_v25, %v4085_v14  ;;  %v3525_v27 = vsub.f32 %v11415_v45, %v3475_v11 }
 0xa3f   : > { %v3575_v33 = vmul.f32 1.442695, %v3523_v61  ;;  %v3577_v20 = vmul.f32 1.442695, %v3524_v31 }
 0xa40   : > { %6320 = vmatmul.msk.f32.gmra.mxu1 %vm1214_vm1, %v11500_v12  ;;  %6323 = vmatmul.msk.f32.gmra.mxu2 %vm1214_vm1, %v11587_v29  ;;  %v11600_v40 = vpop.f32.mrf.mxu0  ;;  %v13278_v12 = vld [vmem:[#allocation67_spill] sm:$0xff]  ;;  %v3579_v14 = vmul.f32 1.442695, %v3525_v27 }
 0xa41   : > { %6869 = vrot.lane.b32.xlu2 %v6868_v32, %s7817_s1  ;;  %3651 = vadd.xlane.f32.xlu1 %v3650_v28  ;;  %7248 = vpow2.f32 %v3575_v33  ;;  %v13280_v28 = vld [vmem:[#allocation142_spill] sm:$0xff] }
 0xa42   : > { %7250 = vrcp.f32 %v3616_v18 }
 0xa44   : > { %v11596_v17 = vpop.xlane.xlu2 %3618 }
 0xa47   : > { %v11608_v0 = vpop.eup %7248 }
 0xa48   : > { %6324 = vmatmul.msk.f32.gmra.mxu2 %vm1214_vm1, %v11598_v7  ;;  %6361 = vmatmul.msk.f32.vlgmr.msrb.gmra.mxu1 %vm857_vm0, %v13278_v12  ;;  %v7251_v35 = vpop.eup %7250  ;;  %v11615_v62 = vpop.f32.mrf.mxu0 }
 0xa49   : > { %v4088_v30 = vmul.f32 %v7251_v35, %v3775_v46  ;;  %v13281_v35 = vld [vmem:[#allocation134_spill] sm:$0xff] }
 0xa4b   : > { %v3625_v54 = vpop.xlane.xlu1 %3624 }
 0xa4c   : > { %v3478_v21 = vpop.xlane.xlu2 %3477  ;;  %7252 = vrcp.f32 %v3625_v54  ;;  %v11618_v10 = vpop.xlane.xlu0 %3630 }
 0xa4d   : > { %7254 = vrcp.f32 %v11489_v51  ;;  %v3526_v45 = vsub.f32 %v11442_v4, %v3478_v21 }
 0xa4e   : > { %7256 = vpow2.f32 %v3577_v20 }
 0xa4f   : > { %v3581_v11 = vmul.f32 1.442695, %v3526_v45  ;;  %v11658_v45 = vld [vmem:[#allocation10 + $0xc0] sm:$0xff] }
 0xa50   : > { %6325 = vmatmul.msk.f32.gmra.mxu2 %vm1214_vm1, %v11608_v0  ;;  %6362 = vmatmul.msk.f32.gmra.mxu1 %vm857_vm0, %v13279_v13  ;;  %v4199_v61 = vpop.f32.mrf.mxu0 }
 0xa52   : > { %v7253_v9 = vpop.eup %7252 }
 0xa53   : > { %v3484_v59 = vpop.xlane.xlu1 %3483  ;;  %v7255_v3 = vpop.eup %7254 }
 0xa54   : > { %v3528_v47 = vsub.f32 %v11455_v39, %v3484_v59  ;;  %v3849_v51 = vpop.f32.mrf.mxu1  ;;  %v3628_v18 = vpop.xlane.xlu2 %3627  ;;  %v4087_v63 = vmul.f32 %v7255_v3, %v11561_v8 }
 0xa55   : > { %v11621_v25 = vmul.f32 %v7253_v9, %v3849_v51  ;;  %7258 = vrcp.f32 %v3628_v18  ;;  %v7257_v32 = vpop.eup %7256  ;;  %v3490_v54 = vpop.xlane.xlu0 %3489  ;;  %v13282_v51 = vld [vmem:[#allocation102_spill] sm:$0xff] }
 0xa56   : > { %v3585_v16 = vmul.f32 1.442695, %v3528_v47  ;;  %v6873_v39 = vpack.i.bf16 %v4088_v30, %v4087_v63  ;;  %v3530_v27 = vsub.f32 %v11459_v49, %v3490_v54  ;;  %v3653_v49 = vsel %vm1214_vm1, %v11587_v29, 0.0  ;;  %v13284_v63 = vld [vmem:[#allocation99_spill] sm:$0xff] }
 0xa57   : > { %v11684_v54 = vld [vmem:[#allocation10 + $0xd8] sm:$0xff] }
 0xa58   : > { %7260 = vpow2.f32 %v3585_v16  ;;  %6326 = vmatmul.msk.f32.gmra.mxu2 %vm1214_vm1, %v7257_v32  ;;  %6363 = vmatmul.msk.f32.gmra.mxu1 %vm857_vm0, %v13280_v28  ;;  %v4202_v59 = vpop.f32.mrf.mxu0  ;;  %v3589_v9 = vmul.f32 1.442695, %v3530_v27  ;;  %v3662_v16 = vsel %vm1214_vm1, %v7257_v32, 0.0  ;;  %v11661_v28 = vld [vmem:[#allocation10 + $0xc8] sm:$0xff]  ;;  %v13286_v32 = vld [vmem:[#allocation92_spill] sm:$0xff]  ;;  %v3659_v27 = vsel %vm1214_vm1, %v11608_v0, 0.0 }
 0xa59   : > { %7262 = vpow2.f32 %v3579_v14  ;;  %v13283_v14 = vld [vmem:[#allocation155_spill] sm:$0xff] }
 0xa5a   : > { %6874 = vrot.lane.b32.xlu1 %v6873_v39, %s7817_s1  ;;  %7264 = vpow2.f32 %v3581_v11  ;;  %v11668_v39 = vadd.f32 %v4199_v61, %v11661_v28  ;;  %v13288_v61 = vld [vmem:[#allocation45_spill] sm:$0xff] }
 0xa5b   : > { %v7259_v46 = vpop.eup %7258 }
 0xa5c   : > { %v3852_v33 = vpop.f32.mrf.mxu1  ;;  %v3487_v12 = vpop.xlane.xlu2 %3486 }
 0xa5d   : > { %v11629_v8 = vmul.f32 %v7259_v46, %v3852_v33  ;;  %v3529_v31 = vsub.f32 %v11477_v48, %v3487_v12  ;;  %v3647_v48 = vsel %vm1214_vm1, %v11541_v53, 0.0  ;;  %v3656_v53 = vsel %vm1214_vm1, %v11598_v7, 0.0  ;;  %v13285_v46 = vld [vmem:[#allocation167_spill] sm:$0xff] }
 0xa5e   : > { %v7261_v4 = vpop.eup %7260  ;;  %v11665_v7 = vadd.f32 %v11615_v62, %v11658_v45  ;;  %v4538_v12 = vsel %vm1214_vm1, %v11668_v39, -inf  ;;  %v13287_v62 = vld [vmem:[#allocation62_spill] sm:$0xff] }
 0xa5f   : > { %v7263_v21 = vpop.eup %7262  ;;  %v3587_v13 = vmul.f32 1.442695, %v3529_v31  ;;  %6330 = vmatmul.msk.f32.gmra.mxu3 %vm1214_vm1, %v7261_v4  ;;  %v3671_v31 = vsel %vm1214_vm1, %v11518_v58, 0.0  ;;  %v13289_v58 = vld [vmem:[#allocation119_spill] sm:$0xff] }
 0xa60   : > { %6327 = vmatmul.msk.f32.gmra.mxu2 %vm1214_vm1, %v7263_v21  ;;  %6364 = vmatmul.msk.f32.gmra.mxu1 %vm857_vm0, %v13281_v35  ;;  %v7265_v30 = vpop.eup %7264  ;;  %v4205_v3 = vpop.f32.mrf.mxu0  ;;  %v3665_v29 = vsel %vm1214_vm1, %v7263_v21, 0.0  ;;  %v4535_v33 = vsel %vm1214_vm1, %v11665_v7, -inf  ;;  %v3674_v21 = vsel %vm1214_vm1, %v7261_v4, 0.0 }
 0xa61   : > { %7266 = vpow2.f32 %v3587_v13  ;;  %v11687_v13 = vld [vmem:[#allocation10 + $0xe8] sm:$0xff] }
 0xa62   : > { %7268 = vpow2.f32 %v3589_v9 }
 0xa63   : > { %3648 = vadd.xlane.f32.xlu0 %v3647_v48  ;;  %v11692_v48 = vadd.f32 %v4205_v3, %v11684_v54  ;;  %v11706_v3 = vld [vmem:[#allocation10 + $0xd0] sm:$0xff]  ;;  %7270 = vrcp.f32 %v11618_v10 }
 0xa64   : > { %v3637_v9 = vpop.xlane.xlu2 %3636 }
 0xa65   : > { %v4544_v4 = vsel %vm1214_vm1, %v11692_v48, -inf }
 0xa67   : > { %v11641_v47 = vpop.eup %7266 }
 0xa68   : > { %6328 = vmatmul.msk.f32.gmra.mxu2 %vm1214_vm1, %v7265_v30  ;;  %6331 = vmatmul.msk.f32.gmra.mxu3 %vm1214_vm1, %v11641_v47  ;;  %v7269_v18 = vpop.eup %7268  ;;  %v4208_v11 = vpop.f32.mrf.mxu0 }
 0xa69   : > { %6365 = vmatmul.msk.f32.gmra.mxu1 %vm857_vm0, %v13282_v51 }
 0xa6a   : > { %3654 = vadd.xlane.f32.xlu2 %v3653_v49  ;;  %v11701_v49 = vld [vmem:[#allocation10 + $0xe0] sm:$0xff] }
 0xa6b   : > { %3657 = vadd.xlane.f32.xlu0 %v3656_v53  ;;  %v3668_v53 = vsel %vm1214_vm1, %v7265_v30, 0.0 }
 0xa70   : > { %6332 = vmatmul.msk.f32.gmra.mxu3 %vm1214_vm1, %v7269_v18  ;;  %6377 = vmatmul.msk.f32.vlgmr.msrb.gmra.mxu2 %vm857_vm0, %v13283_v14  ;;  %v4211_v35 = vpop.f32.mrf.mxu0  ;;  %v11709_v14 = vadd.f32 %v4208_v11, %v11701_v49 }
 0xa71   : > { %6366 = vmatmul.msk.f32.gmra.mxu1 %vm857_vm0, %v13284_v63  ;;  %v11695_v51 = vadd.f32 %v4211_v35, %v11687_v13  ;;  %v11712_v63 = vadd.f32 %v4202_v59, %v11706_v3 }
 0xa72   : > { %3663 = vadd.xlane.f32.xlu2 %v3662_v16  ;;  %v3496_v16 = vpop.xlane.xlu2 %3495 }
 0xa73   : > { %3666 = vadd.xlane.f32.xlu0 %v3665_v29  ;;  %v4550_v0 = vsel %vm1214_vm1, %v11695_v51, -inf  ;;  %v4541_v30 = vsel %vm1214_vm1, %v11712_v63, -inf }
 0xa78   : > { %6378 = vmatmul.msk.f32.gmra.mxu2 %vm857_vm0, %v13285_v46  ;;  %v13290_v46 = vld [vmem:[#allocation43_spill] sm:$0xff]  ;;  %v4214_v35 = vpop.f32.mrf.mxu0 }
 0xa79   : > { %6367 = vmatmul.msk.f32.gmra.mxu1 %vm857_vm0, %v13286_v32  ;;  %v4547_v32 = vsel %vm1214_vm1, %v11709_v14, -inf }
 0xa7a   : > { %4536 = vmax.xlane.f32.xlu2 %v4535_v33  ;;  %v3532_v33 = vsub.f32 %v11494_v56, %v3496_v16  ;;  %v11726_v56 = vld [vmem:[#allocation10 + $0xf0] sm:$0xff] }
 0xa7b   : > { %4539 = vmax.xlane.f32.xlu0 %v4538_v12  ;;  %v3855_v12 = vpop.f32.mrf.mxu1 }
 0xa7c   : > { %v3593_v59 = vmul.f32 1.442695, %v3532_v33 }
 0xa80   : > { %6379 = vmatmul.msk.f32.gmra.mxu2 %vm857_vm0, %v13287_v62 }
 0xa81   : > { %6368 = vmatmul.msk.f32.gmra.mxu1 %vm857_vm0, %v13288_v61  ;;  %v13291_v61 = vld [vmem:[#allocation122_spill] sm:$0xff] }
 0xa82   : > { %3672 = vadd.xlane.f32.xlu2 %v3671_v31 }
 0xa83   : > { %3675 = vadd.xlane.f32.xlu0 %v3674_v21  ;;  %v3680_v21 = vsel %vm1214_vm1, %v7269_v18, 0.0 }
 0xa84   : > { %3660 = vadd.xlane.f32.xlu1 %v3659_v27  ;;  %v3677_v27 = vsel %vm1214_vm1, %v11641_v47, 0.0 }
 0xa88   : > { %6380 = vmatmul.msk.f32.gmra.mxu2 %vm857_vm0, %v13289_v58  ;;  %v7271_v58 = vpop.eup %7270 }
 0xa89   : > { %v11734_v18 = vmul.f32 %v7271_v58, %v3855_v12  ;;  %v4217_v58 = vpop.f32.mrf.mxu0 }
 0xa8a   : > { %4545 = vmax.xlane.f32.xlu2 %v4544_v4 }
 0xa8b   : > { %4551 = vmax.xlane.f32.xlu0 %v4550_v0 }
 0xa8c   : > { %3669 = vadd.xlane.f32.xlu1 %v3668_v53  ;;  %v11731_v53 = vadd.f32 %v4214_v35, %v11726_v56 }
 0xa8f   : > { %v3640_v29 = vpop.xlane.xlu0 %3639 }
 0xa90   : > { %6381 = vmatmul.msk.f32.gmra.mxu2 %vm857_vm0, %v13290_v46 }
 0xa92   : > { %4548 = vmax.xlane.f32.xlu2 %v4547_v32 }
 0xa94   : > { %4542 = vmax.xlane.f32.xlu1 %v4541_v30  ;;  %v3634_v11 = vpop.xlane.xlu1 %3633  ;;  %v13292_v30 = vld [vmem:[#allocation31_spill] sm:$0xff] }
 0xa95   : > { %7272 = vrcp.f32 %v3634_v11  ;;  %v4553_v11 = vsel %vm1214_vm1, %v11731_v53, -inf }
 0xa96   : > { %7274 = vpow2.f32 %v3593_v59 }
 0xa97   : > { %7276 = vrcp.f32 %v3637_v9 }
 0xa98   : > { %v3499_v62 = vpop.xlane.xlu0 %3498  ;;  %6382 = vmatmul.msk.f32.gmra.mxu2 %vm857_vm0, %v13291_v61 }
 0xa99   : > { %v3533_v31 = vsub.f32 %v11534_v41, %v3499_v62 }
 0xa9a   : > { %3681 = vadd.xlane.f32.xlu2 %v3680_v21  ;;  %v13293_v21 = vld [vmem:[#allocation75_spill] sm:$0xff] }
 0xa9b   : > { %v3595_v10 = vmul.f32 1.442695, %v3533_v31  ;;  %v7273_v0 = vpop.eup %7272 }
 0xa9c   : > { %3678 = vadd.xlane.f32.xlu1 %v3677_v27  ;;  %v3493_v4 = vpop.xlane.xlu1 %3492  ;;  %v7275_v33 = vpop.eup %7274  ;;  %v11751_v27 = vld [vmem:[#allocation10 + $0xf8] sm:$0xff] }
 0xa9d   : > { %v3531_v41 = vsub.f32 %v11550_v19, %v3493_v4  ;;  %v3858_v16 = vpop.f32.mrf.mxu1  ;;  %7278 = vpow2.f32 %v3595_v10  ;;  %v3686_v19 = vsel %vm1214_vm1, %v7275_v33, 0.0  ;;  %v7277_v59 = vpop.eup %7276  ;;  %v11755_v4 = vadd.f32 %v4217_v58, %v11751_v27 }
 0xa9e   : > { %v11736_v46 = vmul.f32 %v7273_v0, %v3858_v16 }
 0xa9f   : > { %v3591_v32 = vmul.f32 1.442695, %v3531_v41 }
 0xaa0   : > { %6383 = vmatmul.msk.f32.gmra.mxu2 %vm857_vm0, %v13292_v30 }
 0xaa1   : > { %7280 = vpow2.f32 %v3591_v32 }
 0xaa2   : > { %4554 = vmax.xlane.f32.xlu2 %v4553_v11  ;;  %7282 = vrcp.f32 %v3640_v29  ;;  %v13297_v11 = vld [vmem:[#allocation70_spill] sm:$0xff] }
 0xaa3   : > { %v7279_v62 = vpop.eup %7278 }
 0xaa4   : > { %3687 = vadd.xlane.f32.xlu1 %v3686_v19  ;;  %v3643_v12 = vpop.xlane.xlu1 %3642  ;;  %v3689_v10 = vsel %vm1214_vm1, %v7279_v62, 0.0  ;;  %v4556_v19 = vsel %vm1214_vm1, %v11755_v4, -inf }
 0xaa5   : > { %v3861_v9 = vpop.f32.mrf.mxu1  ;;  %7284 = vrcp.f32 %v3643_v12 }
 0xaa6   : > { %v11745_v61 = vmul.f32 %v7277_v59, %v3861_v9  ;;  %v3938_v59 = vpop.f32.mrf.mxu2  ;;  %v3646_v9 = vpop.xlane.xlu2 %3645 }
 0xaa7   : > { %v7281_v31 = vpop.eup %7280 }
 0xaa8   : > { %6333 = vmatmul.msk.f32.gmra.mxu3 %vm1214_vm1, %v7281_v31  ;;  %6384 = vmatmul.msk.f32.gmra.mxu2 %vm857_vm0, %v13293_v21  ;;  %v3683_v35 = vsel %vm1214_vm1, %v7281_v31, 0.0  ;;  %v7283_v41 = vpop.eup %7282 }
 0xaa9   : > { %3684 = vadd.xlane.f32.xlu0 %v3683_v35 }
 0xaaa   : > { %3690 = vadd.xlane.f32.xlu2 %v3689_v10 }
 0xaab   : > { %v7285_v21 = vpop.eup %7284 }
 0xaac   : > { %v3502_v0 = vpop.xlane.xlu1 %3501 }
 0xaad   : > { %v3534_v29 = vsub.f32 %v11574_v42, %v3502_v0  ;;  %v3864_v16 = vpop.f32.mrf.mxu1 }
 0xaae   : > { %v11758_v32 = vmul.f32 %v7283_v41, %v3864_v16 }
 0xaaf   : > { %v3597_v30 = vmul.f32 1.442695, %v3534_v29 }
 0xab0   : > { %6334 = vmatmul.msk.f32.gmra.mxu3 %vm1214_vm1, %v7275_v33 }
 0xab1   : > { %7286 = vpow2.f32 %v3597_v30  ;;  %4557 = vmax.xlane.f32.xlu0 %v4556_v19 }
 0xab4   : > { %v3652_v31 = vpop.xlane.xlu1 %3651 }
 0xab5   : > { %7288 = vrcp.f32 %v3652_v31  ;;  %v3867_v42 = vpop.f32.mrf.mxu1  ;;  %v13295_v31 = vld [vmem:[#allocation71_spill] sm:$0xff] }
 0xab6   : > { %v11765_v35 = vmul.f32 %v7285_v21, %v3867_v42  ;;  %7290 = vrcp.f32 %v3646_v9 }
 0xab7   : > { %v7287_v12 = vpop.eup %7286 }
 0xab8   : > { %6335 = vmatmul.msk.f32.gmra.mxu3 %vm1214_vm1, %v7279_v62  ;;  %v3692_v58 = vsel %vm1214_vm1, %v7287_v12, 0.0 }
 0xab9   : > { %3693 = vadd.xlane.f32.xlu0 %v3692_v58 }
 0xabb   : > { %v7289_v33 = vpop.eup %7288  ;;  %v3941_v10 = vpop.f32.mrf.mxu2 }
 0xabc   : > { %v11769_v0 = vmul.f32 %v7289_v33, %v3941_v10  ;;  %v7291_v41 = vpop.eup %7290  ;;  %v11783_v33 = vpop.permute.xlu0 %6864 }
 0xabd   : > { %v3870_v29 = vpop.f32.mrf.mxu1 }
 0xabe   : > { %13294 = vst [vmem:[#allocation112_spill] sm:$0xff] %v11769_v0  ;;  %v11771_v16 = vmul.f32 %v7291_v41, %v3870_v29 }
 0xac0   : > { %6336 = vmatmul.msk.f32.gmra.mxu3 %vm1214_vm1, %v7287_v12  ;;  %v13296_v12 = vld [vmem:[#allocation65_spill] sm:$0xff] }
 0xac3   : > { %v3944_v19 = vpop.f32.mrf.mxu2 }
 0xac5   : > { %v4301_v9 = vpop.f32.mrf.mxu1 }
 0xac6   : > { %v11777_v62 = vadd.f32 %v4301_v9, %v11658_v45  ;;  %v11794_v9 = vpop.permute.xlu2 %6869 }
 0xac8   : > { %6393 = vmatmul.msk.f32.vlgmr.msra.gmra.mxu3 %vm857_vm0, %v13295_v31  ;;  %v4559_v21 = vsel %vm1214_vm1, %v11777_v62, -inf }
 0xac9   : > { %4560 = vmax.xlane.f32.xlu1 %v4559_v21 }
 0xacb   : > { %v3947_v42 = vpop.f32.mrf.mxu2 }
 0xacc   : > { %v11834_v0 = vpop.permute.xlu1 %6874 }
 0xacd   : > { %v4304_v58 = vpop.f32.mrf.mxu1  ;;  %13303 = vst [vmem:[#allocation160_spill] sm:$0xff] %v11834_v0 }
 0xace   : > { %v11786_v10 = vadd.f32 %v4304_v58, %v11661_v28 }
 0xad0   : > { %6394 = vmatmul.msk.f32.gmra.mxu3 %vm857_vm0, %v13296_v12  ;;  %v4562_v41 = vsel %vm1214_vm1, %v11786_v10, -inf }
 0xad1   : > { %4563 = vmax.xlane.f32.xlu2 %v4562_v41 }
 0xad3   : > { %v11792_v29 = vpop.f32.mrf.mxu2 }
 0xad5   : > { %v4307_v31 = vpop.f32.mrf.mxu1 }
 0xad6   : > { %v11797_v21 = vadd.f32 %v4307_v31, %v11706_v3  ;;  %v3649_v30 = vpop.xlane.xlu0 %3648 }
 0xad7   : > { %7292 = vrcp.f32 %v3649_v30  ;;  %v13299_v30 = vld [vmem:[#allocation28_spill] sm:$0xff] }
 0xad8   : > { %6395 = vmatmul.msk.f32.gmra.mxu3 %vm857_vm0, %v13297_v11  ;;  %v4565_v58 = vsel %vm1214_vm1, %v11797_v21, -inf }
 0xad9   : > { %4566 = vmax.xlane.f32.xlu0 %v4565_v58 }
 0xadb   : > { %v3953_v12 = vpop.f32.mrf.mxu2 }
 0xadd   : > { %v7293_v47 = vpop.eup %7292  ;;  %v3655_v41 = vpop.xlane.xlu2 %3654 }
 0xade   : > { %v4310_v20 = vpop.f32.mrf.mxu1  ;;  %v11803_v22 = vmul.f32 %v7293_v47, %v3938_v59  ;;  %7294 = vrcp.f32 %v3655_v41  ;;  %v3658_v31 = vpop.xlane.xlu0 %3657 }
 0xadf   : > { %v11806_v43 = vadd.f32 %v4310_v20, %v11684_v54  ;;  %7296 = vrcp.f32 %v3658_v31 }
 0xae0   : > { %13298 = vst [vmem:[#allocation123_spill] sm:$0xff] %v11803_v22  ;;  %6396 = vmatmul.msk.f32.gmra.mxu3 %vm857_vm0, %v13299_v30 }
 0xae1   : > { %v4568_v11 = vsel %vm1214_vm1, %v11806_v43, -inf }
 0xae2   : > { %4569 = vmax.xlane.f32.xlu1 %v4568_v11 }
 0xae3   : > { %v3956_v55 = vpop.f32.mrf.mxu2 }
 0xae4   : > { %v7295_v37 = vpop.eup %7294 }
 0xae5   : > { %v7297_v47 = vpop.eup %7296  ;;  %v11814_v59 = vmul.f32 %v7295_v37, %v3944_v19  ;;  %v3664_v41 = vpop.xlane.xlu2 %3663 }
 0xae6   : > { %v11816_v20 = vmul.f32 %v7297_v47, %v3947_v42  ;;  %7298 = vrcp.f32 %v3664_v41  ;;  %v4313_v31 = vpop.f32.mrf.mxu1  ;;  %v3667_v36 = vpop.xlane.xlu0 %3666 }
 0xae7   : > { %13300 = vst [vmem:[#allocation133_spill] sm:$0xff] %v11814_v59  ;;  %v11819_v30 = vadd.f32 %v4313_v31, %v11701_v49  ;;  %7300 = vrcp.f32 %v3667_v36 }
 0xae8   : > { %13301 = vst [vmem:[#allocation157_spill] sm:$0xff] %v11816_v20  ;;  %6397 = vmatmul.msk.f32.gmra.mxu3 %vm857_vm0, %v13302_v1  ;;  %v13304_v20 = vld [vmem:[#allocation168_spill] sm:$0xff] }
 0xae9   : > { %v4571_v37 = vsel %vm1214_vm1, %v11819_v30, -inf }
 0xaea   : > { %4572 = vmax.xlane.f32.xlu2 %v4571_v37 }
 0xaeb   : > { %v11827_v19 = vpop.f32.mrf.mxu2 }
 0xaec   : > { %v7299_v42 = vpop.eup %7298 }
 0xaed   : > { %v7301_v47 = vpop.eup %7300  ;;  %v11829_v41 = vmul.f32 %v7299_v42, %v3953_v12  ;;  %v4537_v58 = vpop.xlane.xlu2 %4536 }
 0xaee   : > { %v11831_v31 = vmul.f32 %v7301_v47, %v3956_v55  ;;  %v4631_v36 = vsub.f32 %v11665_v7, %v4537_v58  ;;  %v4316_v22 = vpop.f32.mrf.mxu1  ;;  %v4540_v1 = vpop.xlane.xlu0 %4539 }
 0xaef   : > { %v11837_v11 = vadd.f32 %v4316_v22, %v11687_v13  ;;  %v4632_v37 = vsub.f32 %v11668_v39, %v4540_v1  ;;  %v4027_v58 = vpop.f32.mrf.mxu3 }
 0xaf0   : > { %v4663_v59 = vmul.f32 1.442695, %v4631_v36  ;;  %6398 = vmatmul.msk.f32.gmra.mxu3 %vm857_vm0, %v13304_v20  ;;  %v13305_v20 = vld [vmem:[#allocation146_spill] sm:$0xff] }
 0xaf1   : > { %v4665_v12 = vmul.f32 1.442695, %v4632_v37  ;;  %v4574_v55 = vsel %vm1214_vm1, %v11837_v11, -inf }
 0xaf2   : > { %7302 = vpow2.f32 %v4663_v59  ;;  %4575 = vmax.xlane.f32.xlu2 %v4574_v55 }
 0xaf3   : > { %7304 = vpow2.f32 %v4665_v12  ;;  %v4406_v7 = vpop.f32.mrf.mxu2 }
 0xaf5   : > { %v3673_v42 = vpop.xlane.xlu2 %3672 }
 0xaf6   : > { %7306 = vrcp.f32 %v3673_v42  ;;  %v4319_v47 = vpop.f32.mrf.mxu1  ;;  %v3676_v22 = vpop.xlane.xlu0 %3675 }
 0xaf7   : > { %v11845_v52 = vadd.f32 %v4319_v47, %v11726_v56  ;;  %7308 = vrcp.f32 %v3676_v22  ;;  %v3661_v39 = vpop.xlane.xlu1 %3660  ;;  %v4030_v47 = vpop.f32.mrf.mxu3 }
 0xaf8   : > { %v7303_v36 = vpop.eup %7302  ;;  %7310 = vrcp.f32 %v3661_v39  ;;  %6399 = vmatmul.msk.f32.gmra.mxu3 %vm857_vm0, %v13305_v20 }
 0xaf9   : > { %v7305_v1 = vpop.eup %7304  ;;  %6401 = vmatmul.msk.f32.vlgmr.msrb.gmra.mxu0 %vm1214_vm1, %v7303_v36  ;;  %v4577_v59 = vsel %vm1214_vm1, %v11845_v52, -inf }
 0xafa   : > { %4578 = vmax.xlane.f32.xlu0 %v4577_v59  ;;  %v4730_v37 = vsel %vm1214_vm1, %v7305_v1, 0.0 }
 0xafb   : > { %4731 = vadd.xlane.f32.xlu1 %v4730_v37  ;;  %v11853_v55 = vpop.f32.mrf.mxu2 }
 0xafc   : > { %v7307_v12 = vpop.eup %7306 }
 0xafd   : > { %v7309_v42 = vpop.eup %7308  ;;  %v11855_v22 = vmul.f32 %v7307_v12, %v4027_v58  ;;  %v4546_v39 = vpop.xlane.xlu2 %4545  ;;  %v4727_v12 = vsel %vm1214_vm1, %v7303_v36, 0.0 }
 0xafe   : > { %v7311_v44 = vpop.eup %7310  ;;  %v11857_v20 = vmul.f32 %v7309_v42, %v4030_v47  ;;  %v4322_v15 = vpop.f32.mrf.mxu1  ;;  %v4634_v37 = vsub.f32 %v11692_v48, %v4546_v39 }
 0xaff   : > { %13306 = vst [vmem:[#allocation161_spill] sm:$0xff] %v11855_v22  ;;  %v11860_v57 = vmul.f32 %v7311_v44, %v11792_v29  ;;  %v11863_v59 = vadd.f32 %v4322_v15, %v11751_v27  ;;  %v3670_v0 = vpop.xlane.xlu1 %3669 }
 0xb00   : > { %13307 = vst [vmem:[#allocation33_spill] sm:$0xff] %v11857_v20  ;;  %7312 = vrcp.f32 %v3670_v0  ;;  %6400 = vmatmul.msk.f32.gmra.mxu3 %vm857_vm0, %v13308_v24  ;;  %v4669_v48 = vmul.f32 1.442695, %v4634_v37  ;;  %v11877_v0 = vadd.f32 %v4406_v7, %v11658_v45  ;;  %v4033_v37 = vpop.f32.mrf.mxu3 }
 0xb01   : > { %6402 = vmatmul.msk.f32.gmra.mxu0 %vm1214_vm1, %v7305_v1  ;;  %v4580_v44 = vsel %vm1214_vm1, %v11863_v59, -inf }
 0xb02   : > { %4728 = vadd.xlane.f32.xlu0 %v4727_v12  ;;  %4581 = vmax.xlane.f32.xlu2 %v4580_v44  ;;  %7314 = vpow2.f32 %v4669_v48  ;;  %v4583_v12 = vsel %vm1214_vm1, %v11877_v0, -inf }
 0xb03   : > { %v4412_v42 = vpop.f32.mrf.mxu2 }
 0xb05   : > { %v4549_v24 = vpop.xlane.xlu2 %4548 }
 0xb06   : > { %v7313_v29 = vpop.eup %7312  ;;  %v4635_v47 = vsub.f32 %v11709_v14, %v4549_v24 }
 0xb07   : > { %v11881_v1 = vmul.f32 %v7313_v29, %v11827_v19  ;;  %v4543_v36 = vpop.xlane.xlu1 %4542  ;;  %v4552_v19 = vpop.xlane.xlu0 %4551 }
 0xb08   : > { %v4671_v39 = vmul.f32 1.442695, %v4635_v47  ;;  %v4633_v58 = vsub.f32 %v11712_v63, %v4543_v36  ;;  %v7315_v24 = vpop.eup %7314  ;;  %v4636_v7 = vsub.f32 %v11695_v51, %v4552_v19  ;;  %v11903_v51 = vadd.f32 %v11853_v55, %v11661_v28 }
 0xb09   : > { %v4736_v63 = vsel %vm1214_vm1, %v7315_v24, 0.0 }
 0xb0a   : > { %7316 = vpow2.f32 %v4671_v39  ;;  %v4667_v44 = vmul.f32 1.442695, %v4633_v58  ;;  %4584 = vmax.xlane.f32.xlu0 %v4583_v12  ;;  %v4036_v12 = vpop.f32.mrf.mxu3  ;;  %v4673_v20 = vmul.f32 1.442695, %v4636_v7  ;;  %v4586_v55 = vsel %vm1214_vm1, %v11903_v51, -inf }
 0xb0b   : > { %v4415_v47 = vpop.f32.mrf.mxu2 }
 0xb0c   : > { %7318 = vpow2.f32 %v4667_v44  ;;  %v11894_v44 = vadd.f32 %v4412_v42, %v11706_v3 }
 0xb0d   : > { %v3682_v14 = vpop.xlane.xlu2 %3681 }
 0xb0e   : > { %7320 = vrcp.f32 %v3682_v14  ;;  %v11897_v14 = vadd.f32 %v4415_v47, %v11684_v54  ;;  %v4589_v42 = vsel %vm1214_vm1, %v11894_v44, -inf }
 0xb0f   : > { %v3679_v29 = vpop.xlane.xlu1 %3678 }
 0xb10   : > { %v7317_v48 = vpop.eup %7316  ;;  %7322 = vrcp.f32 %v3679_v29 }
 0xb11   : > { %v4739_v36 = vsel %vm1214_vm1, %v7317_v48, 0.0  ;;  %7324 = vpow2.f32 %v4673_v20 }
 0xb12   : > { %v7319_v15 = vpop.eup %7318  ;;  %4737 = vadd.xlane.f32.xlu0 %v4736_v63  ;;  %4740 = vadd.xlane.f32.xlu2 %v4739_v36  ;;  %v4592_v63 = vsel %vm1214_vm1, %v11897_v14, -inf }
 0xb13   : > { %6403 = vmatmul.msk.f32.gmra.mxu0 %vm1214_vm1, %v7319_v15  ;;  %v4733_v58 = vsel %vm1214_vm1, %v7319_v15, 0.0  ;;  %v4418_v36 = vpop.f32.mrf.mxu2 }
 0xb14   : > { %v7321_v39 = vpop.eup %7320  ;;  %4734 = vadd.xlane.f32.xlu1 %v4733_v58 }
 0xb15   : > { %v11899_v29 = vmul.f32 %v7321_v39, %v4036_v12  ;;  %v4555_v15 = vpop.xlane.xlu2 %4554 }
 0xb16   : > { %v7323_v22 = vpop.eup %7322  ;;  %v4637_v7 = vsub.f32 %v11731_v53, %v4555_v15 }
 0xb17   : > { %v11905_v19 = vmul.f32 %v7323_v22, %v4033_v37  ;;  %v11918_v37 = vadd.f32 %v4418_v36, %v11701_v49  ;;  %v7325_v39 = vpop.eup %7324 }
 0xb18   : > { %v4675_v58 = vmul.f32 1.442695, %v4637_v7  ;;  %v4742_v53 = vsel %vm1214_vm1, %v7325_v39, 0.0 }
 0xb19   : > { %13309 = vst [vmem:[#allocation149_spill] sm:$0xff] %v11905_v19  ;;  %v4595_v20 = vsel %vm1214_vm1, %v11918_v37, -inf }
 0xb1a   : > { %4593 = vmax.xlane.f32.xlu0 %v4592_v63  ;;  %4590 = vmax.xlane.f32.xlu2 %v4589_v42  ;;  %7326 = vpow2.f32 %v4675_v58  ;;  %v3688_v42 = vpop.xlane.xlu1 %3687 }
 0xb1b   : > { %6404 = vmatmul.msk.f32.gmra.mxu0 %vm1214_vm1, %v7315_v24  ;;  %v4421_v58 = vpop.f32.mrf.mxu2 }
 0xb1c   : > { %4587 = vmax.xlane.f32.xlu1 %v4586_v55  ;;  %v3685_v22 = vpop.xlane.xlu0 %3684 }
 0xb1d   : > { %7328 = vrcp.f32 %v3685_v22  ;;  %v11930_v22 = vadd.f32 %v4421_v58, %v11687_v13 }
 0xb20   : > { %v7327_v63 = vpop.eup %7326 }
 0xb21   : > { %v4745_v55 = vsel %vm1214_vm1, %v7327_v63, 0.0 }
 0xb22   : > { %4596 = vmax.xlane.f32.xlu2 %v4595_v20 }
 0xb23   : > { %6405 = vmatmul.msk.f32.gmra.mxu0 %vm1214_vm1, %v7317_v48  ;;  %v7329_v36 = vpop.eup %7328 }
 0xb24   : > { %4743 = vadd.xlane.f32.xlu1 %v4742_v53  ;;  %v4558_v24 = vpop.xlane.xlu0 %4557  ;;  %v3691_v53 = vpop.xlane.xlu2 %3690 }
 0xb25   : > { %v4638_v12 = vsub.f32 %v11755_v4, %v4558_v24 }
 0xb27   : > { %v4677_v15 = vmul.f32 1.442695, %v4638_v12 }
 0xb29   : > { %7330 = vpow2.f32 %v4677_v15 }
 0xb2a   : > { %7332 = vrcp.f32 %v3688_v42 }
 0xb2b   : > { %v4039_v7 = vpop.f32.mrf.mxu3  ;;  %6406 = vmatmul.msk.f32.gmra.mxu0 %vm1214_vm1, %v7325_v39  ;;  %v4598_v39 = vsel %vm1214_vm1, %v11930_v22, -inf  ;;  %7334 = vrcp.f32 %v3691_v53 }
 0xb2c   : > { %v11927_v20 = vmul.f32 %v7329_v36, %v4039_v7  ;;  %4746 = vadd.xlane.f32.xlu1 %v4745_v55  ;;  %v3694_v42 = vpop.xlane.xlu0 %3693 }
 0xb2d   : > { %7336 = vrcp.f32 %v3694_v42 }
 0xb2e   : > { %13310 = vst [vmem:[#allocation63_spill] sm:$0xff] %v11927_v20 }
 0xb2f   : > { %v7331_v48 = vpop.eup %7330 }
 0xb30   : > { %v4748_v4 = vsel %vm1214_vm1, %v7331_v48, 0.0  ;;  %v7333_v24 = vpop.eup %7332 }
 0xb31   : > { %4749 = vadd.xlane.f32.xlu2 %v4748_v4  ;;  %v7335_v36 = vpop.eup %7334 }
 0xb33   : > { %v4042_v12 = vpop.f32.mrf.mxu3  ;;  %6407 = vmatmul.msk.f32.gmra.mxu0 %vm1214_vm1, %v7327_v63  ;;  %v7337_v63 = vpop.eup %7336 }
 0xb34   : > { %v11936_v15 = vmul.f32 %v7333_v24, %v4042_v12  ;;  %4599 = vmax.xlane.f32.xlu1 %v4598_v39  ;;  %v4424_v39 = vpop.f32.mrf.mxu2 }
 0xb36   : > { %13311 = vst [vmem:[#allocation150_spill] sm:$0xff] %v11936_v15 }
 0xb3b   : > { %v4045_v7 = vpop.f32.mrf.mxu3  ;;  %6408 = vmatmul.msk.f32.gmra.mxu0 %vm1214_vm1, %v7331_v48 }
 0xb3c   : > { %v11939_v55 = vmul.f32 %v7335_v36, %v4045_v7  ;;  %v4561_v58 = vpop.xlane.xlu1 %4560 }
 0xb3d   : > { %v4639_v4 = vsub.f32 %v11777_v62, %v4561_v58  ;;  %v11948_v62 = vadd.f32 %v4424_v39, %v11726_v56 }
 0xb3f   : > { %v4679_v47 = vmul.f32 1.442695, %v4639_v4  ;;  %v4427_v4 = vpop.f32.mrf.mxu2 }
 0xb41   : > { %7338 = vpow2.f32 %v4679_v47 }
 0xb43   : > { %v4048_v20 = vpop.f32.mrf.mxu3 }
 0xb44   : > { %v11942_v19 = vmul.f32 %v7337_v63, %v4048_v20  ;;  %v4564_v24 = vpop.xlane.xlu2 %4563  ;;  %v11956_v63 = vadd.f32 %v4427_v4, %v11751_v27 }
 0xb45   : > { %v4640_v53 = vsub.f32 %v11786_v10, %v4564_v24  ;;  %v4601_v10 = vsel %vm1214_vm1, %v11948_v62, -inf }
 0xb47   : > { %v7339_v12 = vpop.eup %7338  ;;  %v4681_v15 = vmul.f32 1.442695, %v4640_v53 }
 0xb48   : > { %6409 = vmatmul.msk.f32.vlgmr.msra.gmra.mxu1 %vm1214_vm1, %v7339_v12  ;;  %v4751_v48 = vsel %vm1214_vm1, %v7339_v12, 0.0 }
 0xb49   : > { %7340 = vpow2.f32 %v4681_v15  ;;  %4752 = vadd.xlane.f32.xlu0 %v4751_v48  ;;  %v4604_v48 = vsel %vm1214_vm1, %v11956_v63, -inf }
 0xb4b   : > { %v4511_v42 = vpop.f32.mrf.mxu3 }
 0xb4c   : > { %v4567_v47 = vpop.xlane.xlu0 %4566 }
 0xb4d   : > { %v4641_v20 = vsub.f32 %v11797_v21, %v4567_v47 }
 0xb4f   : > { %v7341_v36 = vpop.eup %7340  ;;  %v4683_v7 = vmul.f32 1.442695, %v4641_v20 }
 0xb50   : > { %6410 = vmatmul.msk.f32.gmra.mxu1 %vm1214_vm1, %v7341_v36  ;;  %v4754_v58 = vsel %vm1214_vm1, %v7341_v36, 0.0  ;;  %v11969_v36 = vadd.f32 %v4511_v42, %v11658_v45 }
 0xb51   : > { %7342 = vpow2.f32 %v4683_v7  ;;  %4602 = vmax.xlane.f32.xlu0 %v4601_v10  ;;  %4755 = vadd.xlane.f32.xlu1 %v4754_v58 }
 0xb53   : > { %v4514_v15 = vpop.f32.mrf.mxu3 }
 0xb54   : > { %v11959_v21 = vadd.f32 %v4514_v15, %v11661_v28  ;;  %v4607_v15 = vsel %vm1214_vm1, %v11969_v36, -inf }
 0xb55   : > { %v4570_v24 = vpop.xlane.xlu1 %4569 }
 0xb56   : > { %v4642_v53 = vsub.f32 %v11806_v43, %v4570_v24  ;;  %v4610_v20 = vsel %vm1214_vm1, %v11959_v21, -inf }
 0xb57   : > { %v7343_v12 = vpop.eup %7342 }
 0xb58   : > { %v4685_v39 = vmul.f32 1.442695, %v4642_v53  ;;  %6411 = vmatmul.msk.f32.gmra.mxu1 %vm1214_vm1, %v7343_v12  ;;  %v4757_v47 = vsel %vm1214_vm1, %v7343_v12, 0.0 }
 0xb59   : > { %4605 = vmax.xlane.f32.xlu0 %v4604_v48  ;;  %4758 = vadd.xlane.f32.xlu2 %v4757_v47 }
 0xb5a   : > { %7344 = vpow2.f32 %v4685_v39  ;;  %4611 = vmax.xlane.f32.xlu1 %v4610_v20 }
 0xb5b   : > { %v4517_v28 = vpop.f32.mrf.mxu3 }
 0xb5d   : > { %v4573_v43 = vpop.xlane.xlu2 %4572 }
 0xb5e   : > { %v4643_v7 = vsub.f32 %v11819_v30, %v4573_v43 }
 0xb60   : > { %v7345_v10 = vpop.eup %7344  ;;  %v4687_v58 = vmul.f32 1.442695, %v4643_v7 }
 0xb61   : > { %6412 = vmatmul.msk.f32.gmra.mxu1 %vm1214_vm1, %v7345_v10  ;;  %v4760_v4 = vsel %vm1214_vm1, %v7345_v10, 0.0  ;;  %4608 = vmax.xlane.f32.xlu0 %v4607_v15 }
 0xb62   : > { %4761 = vadd.xlane.f32.xlu2 %v4760_v4  ;;  %7346 = vpow2.f32 %v4687_v58 }
 0xb63   : > { %v4520_v24 = vpop.f32.mrf.mxu3  ;;  %7348 = vrcp.f32 %v11596_v17 }
 0xb64   : > { %v11977_v53 = vadd.f32 %v4520_v24, %v11684_v54 }
 0xb65   : > { %v4576_v45 = vpop.xlane.xlu2 %4575 }
 0xb66   : > { %v4644_v42 = vsub.f32 %v11837_v11, %v4576_v45  ;;  %v4616_v30 = vsel %vm1214_vm1, %v11977_v53, -inf  ;;  %v11989_v11 = vadd.f32 %v4517_v28, %v11706_v3 }
 0xb67   : > { %4617 = vmax.xlane.f32.xlu1 %v4616_v30 }
 0xb68   : > { %v7347_v12 = vpop.eup %7346  ;;  %v4689_v39 = vmul.f32 1.442695, %v4644_v42  ;;  %v13312_v42 = vld [vmem:[#allocation171_spill] sm:$0xff] }
 0xb69   : > { %6413 = vmatmul.msk.f32.gmra.mxu1 %vm1214_vm1, %v7347_v12  ;;  %v4763_v48 = vsel %vm1214_vm1, %v7347_v12, 0.0  ;;  %v7349_v7 = vpop.eup %7348 }
 0xb6a   : > { %7350 = vpow2.f32 %v4689_v39  ;;  %4764 = vadd.xlane.f32.xlu0 %v4763_v48  ;;  %v13313_v39 = vld [vmem:[#allocation175_spill] sm:$0xff] }
 0xb6b   : > { %v4523_v47 = vpop.f32.mrf.mxu3  ;;  %7352 = vrcp.f32 %v11504_v6  ;;  %v4089_v6 = vmul.f32 %v7349_v7, %v11585_v5  ;;  %v13314_v7 = vld [vmem:[#allocation29_spill] sm:$0xff] }
 0xb6c   : > { %v11986_v54 = vadd.f32 %v4523_v47, %v11701_v49  ;;  %v4613_v49 = vsel %vm1214_vm1, %v11989_v11, -inf }
 0xb6d   : > { %v4579_v20 = vpop.xlane.xlu0 %4578 }
 0xb6e   : > { %v4645_v43 = vsub.f32 %v11845_v52, %v4579_v20  ;;  %v4619_v17 = vsel %vm1214_vm1, %v11986_v54, -inf  ;;  %v4732_v15 = vpop.xlane.xlu1 %4731 }
 0xb6f   : > { %4620 = vmax.xlane.f32.xlu1 %v4619_v17 }
 0xb70   : > { %v11995_v10 = vpop.eup %7350  ;;  %v4691_v58 = vmul.f32 1.442695, %v4645_v43 }
 0xb71   : > { %6414 = vmatmul.msk.f32.gmra.mxu1 %vm1214_vm1, %v11995_v10  ;;  %v7353_v3 = vpop.eup %7352 }
 0xb72   : > { %7354 = vpow2.f32 %v4691_v58  ;;  %4614 = vmax.xlane.f32.xlu0 %v4613_v49  ;;  %v4090_v52 = vmul.f32 %v7353_v3, %v11600_v40  ;;  %v13315_v3 = vld [vmem:[#allocation57_spill] sm:$0xff] }
 0xb73   : > { %7356 = vrcp.f32 %v13312_v42 }
 0xb74   : > { %v6878_v30 = vpack.i.bf16 %v4090_v52, %v4089_v6  ;;  %7358 = vrcp.f32 %v13313_v39 }
 0xb75   : > { %v4582_v28 = vpop.xlane.xlu2 %4581  ;;  %v4729_v4 = vpop.xlane.xlu0 %4728  ;;  %7360 = vrcp.f32 %v4732_v15 }
 0xb76   : > { %v4646_v24 = vsub.f32 %v11863_v59, %v4582_v28  ;;  %v4888_v45 = vpop.f32.mrf.mxu0 }
 0xb78   : > { %v12005_v12 = vpop.eup %7354  ;;  %v4693_v48 = vmul.f32 1.442695, %v4646_v24 }
 0xb79   : > { %6415 = vmatmul.msk.f32.gmra.mxu1 %vm1214_vm1, %v12005_v12  ;;  %v7357_v5 = vpop.eup %7356 }
 0xb7a   : > { %6879 = vrot.lane.b32.xlu2 %v6878_v30, %s7817_s1  ;;  %7362 = vpow2.f32 %v4693_v48  ;;  %v7359_v59 = vpop.eup %7358  ;;  %v2963_v58 = vmul.f32 %v7357_v5, %v13314_v7 }
 0xb7b   : > { %7364 = vrcp.f32 %v4729_v4  ;;  %v7361_v20 = vpop.eup %7360  ;;  %v2964_v52 = vmul.f32 %v7359_v59, %v13315_v3 }
 0xb7d   : > { %v4585_v40 = vpop.xlane.xlu0 %4584  ;;  %v6888_v15 = vpack.i.bf16 %v2964_v52, %v2963_v58  ;;  %v4526_v58 = vpop.f32.mrf.mxu3 }
 0xb7e   : > { %v4647_v47 = vsub.f32 %v11877_v0, %v4585_v40  ;;  %v4891_v43 = vpop.f32.mrf.mxu0 }
 0xb7f   : > { %v5212_v28 = vmul.f32 %v7361_v20, %v4891_v43 }
 0xb80   : > { %v12012_v17 = vpop.eup %7362  ;;  %v4695_v49 = vmul.f32 1.442695, %v4647_v47 }
 0xb81   : > { %v7365_v6 = vpop.eup %7364  ;;  %6416 = vmatmul.msk.f32.gmra.mxu1 %vm1214_vm1, %v12012_v17 }
 0xb82   : > { %7366 = vpow2.f32 %v4695_v49  ;;  %v5211_v4 = vmul.f32 %v7365_v6, %v4888_v45 }
 0xb84   : > { %v6883_v24 = vpack.i.bf16 %v5212_v28, %v5211_v4 }
 0xb85   : > { %v4741_v0 = vpop.xlane.xlu2 %4740  ;;  %v4738_v39 = vpop.xlane.xlu0 %4737 }
 0xb86   : > { %6889 = vrot.lane.b32.xlu0 %v6888_v15, %s7819_s3  ;;  %7368 = vrcp.f32 %v4738_v39 }
 0xb87   : > { %v4735_v42 = vpop.xlane.xlu1 %4734 }
 0xb88   : > { %v12019_v30 = vpop.eup %7366  ;;  %6884 = vrot.lane.b32.xlu1 %v6883_v24, %s7818_s2  ;;  %7370 = vrcp.f32 %v4735_v42 }
 0xb89   : > { %6417 = vmatmul.msk.f32.vlgmr.msra.gmra.mxu2 %vm1214_vm1, %v12019_v30 }
 0xb8c   : > { %v7369_v20 = vpop.eup %7368 }
 0xb8d   : > { %v4591_v45 = vpop.xlane.xlu2 %4590  ;;  %v4594_v3 = vpop.xlane.xlu0 %4593 }
 0xb8e   : > { %v4649_v47 = vsub.f32 %v11894_v44, %v4591_v45  ;;  %v7371_v7 = vpop.eup %7370  ;;  %v4650_v15 = vsub.f32 %v11897_v14, %v4594_v3  ;;  %v12032_v44 = vadd.f32 %v4526_v58, %v11687_v13  ;;  %v4529_v45 = vpop.f32.mrf.mxu3 }
 0xb8f   : > { %v4588_v48 = vpop.xlane.xlu1 %4587  ;;  %v12043_v14 = vadd.f32 %v4529_v45, %v11726_v56 }
 0xb90   : > { %v4648_v5 = vsub.f32 %v11903_v51, %v4588_v48  ;;  %v4894_v40 = vpop.f32.mrf.mxu0  ;;  %v4699_v49 = vmul.f32 1.442695, %v4649_v47  ;;  %v4701_v42 = vmul.f32 1.442695, %v4650_v15 }
 0xb91   : > { %v5213_v52 = vmul.f32 %v7371_v7, %v4894_v40 }
 0xb92   : > { %v4697_v59 = vmul.f32 1.442695, %v4648_v5  ;;  %v4622_v5 = vsel %vm1214_vm1, %v12032_v44, -inf }
 0xb94   : > { %7372 = vpow2.f32 %v4697_v59 }
 0xb95   : > { %7374 = vpow2.f32 %v4699_v49  ;;  %v4597_v48 = vpop.xlane.xlu2 %4596 }
 0xb96   : > { %7376 = vrcp.f32 %v4741_v0  ;;  %v4651_v13 = vsub.f32 %v11918_v37, %v4597_v48 }
 0xb97   : > { %v4744_v43 = vpop.xlane.xlu1 %4743 }
 0xb98   : > { %v4897_v6 = vpop.f32.mrf.mxu0  ;;  %7378 = vrcp.f32 %v4744_v43  ;;  %v4703_v47 = vmul.f32 1.442695, %v4651_v13  ;;  %v4625_v43 = vsel %vm1214_vm1, %v12043_v14, -inf }
 0xb99   : > { %v5214_v28 = vmul.f32 %v7369_v20, %v4897_v6  ;;  %7380 = vpow2.f32 %v4701_v42 }
 0xb9a   : > { %v12026_v4 = vpop.eup %7372  ;;  %7382 = vpow2.f32 %v4703_v47 }
 0xb9b   : > { %v6893_v51 = vpack.i.bf16 %v5214_v28, %v5213_v52  ;;  %6418 = vmatmul.msk.f32.gmra.mxu2 %vm1214_vm1, %v12026_v4  ;;  %v12037_v40 = vpop.eup %7374  ;;  %v4769_v52 = vsel %vm1214_vm1, %v12005_v12, 0.0  ;;  %v4766_v28 = vsel %vm1214_vm1, %v11995_v10, 0.0  ;;  %v5739_v12 = vld [vmem:[#allocation8 + $0x78] sm:$0xff]  ;;  %v5738_v10 = vld [vmem:[#allocation8 + $0x70] sm:$0xff] }
 0xb9c   : > { %v7377_v59 = vpop.eup %7376  ;;  %5744 = vmatpush.msra.mxu0 %v5739_v12 }
 0xb9d   : > { %6894 = vrot.lane.b32.xlu0 %v6893_v51, %s7818_s2 }
 0xb9e   : > { %v7379_v0 = vpop.eup %7378  ;;  %5745 = vmatpush.msra.mxu0 %v5738_v10 }
 0xb9f   : > { %v4747_v24 = vpop.xlane.xlu1 %4746  ;;  %v12047_v6 = vpop.eup %7380 }
 0xba0   : > { %v4900_v39 = vpop.f32.mrf.mxu0  ;;  %v12057_v51 = vpop.eup %7382 }
 0xba1   : > { %v5215_v7 = vmul.f32 %v7377_v59, %v4900_v39  ;;  %v5737_v59 = vld [vmem:[#allocation8 + $0x68] sm:$0xff] }
 0xba2   : > { %5746 = vmatpush.msra.mxu0 %v5737_v59  ;;  %v5730_v59 = vld [vmem:[#allocation8 + $0x30] sm:$0xff] }
 0xba3   : > { %4623 = vmax.xlane.f32.xlu2 %v4622_v5  ;;  %6419 = vmatmul.msk.f32.gmra.mxu2 %vm1214_vm1, %v12037_v40 }
 0xba7   : > { %v4600_v58 = vpop.xlane.xlu1 %4599 }
 0xba8   : > { %v4903_v20 = vpop.f32.mrf.mxu0  ;;  %v4652_v56 = vsub.f32 %v11930_v22, %v4600_v58  ;;  %v4750_v22 = vpop.xlane.xlu2 %4749  ;;  %v5736_v58 = vld [vmem:[#allocation8 + $0x60] sm:$0xff] }
 0xba9   : > { %v5216_v49 = vmul.f32 %v7379_v0, %v4903_v20  ;;  %5747 = vmatpush.msra.mxu0 %v5736_v58 }
 0xbaa   : > { %v4705_v37 = vmul.f32 1.442695, %v4652_v56  ;;  %v13316_v56 = vpack.i.bf16 %v11629_v8, %v11621_v25  ;;  %v4532_v25 = vpop.f32.mrf.mxu3 }
 0xbab   : > { %4626 = vmax.xlane.f32.xlu2 %v4625_v43  ;;  %v6898_v3 = vpack.i.bf16 %v5216_v49, %v5215_v7  ;;  %6420 = vmatmul.msk.f32.gmra.mxu2 %vm1214_vm1, %v12047_v6  ;;  %v5735_v43 = vld [vmem:[#allocation8 + $0x58] sm:$0xff] }
 0xbac   : > { %7384 = vpow2.f32 %v4705_v37  ;;  %5748 = vmatpush.msra.mxu0 %v5735_v43  ;;  %v5734_v37 = vld [vmem:[#allocation8 + $0x50] sm:$0xff] }
 0xbad   : > { %6899 = vrot.lane.b32.xlu0 %v6898_v3, %s7818_s2  ;;  %7386 = vrcp.f32 %v4750_v22 }
 0xbae   : > { %7388 = vrcp.f32 %v4747_v24  ;;  %5749 = vmatpush.msra.mxu0 %v5734_v37 }
 0xbb0   : > { %v4906_v15 = vpop.f32.mrf.mxu0 }
 0xbb2   : > { %4767 = vadd.xlane.f32.xlu1 %v4766_v28  ;;  %v12061_v42 = vpop.eup %7384 }
 0xbb3   : > { %4770 = vadd.xlane.f32.xlu2 %v4769_v52  ;;  %6421 = vmatmul.msk.f32.gmra.mxu2 %vm1214_vm1, %v12057_v51  ;;  %v7387_v5 = vpop.eup %7386 }
 0xbb4   : > { %v7389_v7 = vpop.eup %7388 }
 0xbb5   : > { %v5217_v49 = vmul.f32 %v7389_v7, %v4906_v15 }
 0xbb8   : > { %v4909_v48 = vpop.f32.mrf.mxu0 }
 0xbb9   : > { %v5218_v0 = vmul.f32 %v7387_v5, %v4909_v48  ;;  %v5732_v48 = vld [vmem:[#allocation8 + $0x40] sm:$0xff]  ;;  %v5731_v5 = vld [vmem:[#allocation8 + $0x38] sm:$0xff] }
 0xbbb   : > { %6422 = vmatmul.msk.f32.gmra.mxu2 %vm1214_vm1, %v12061_v42  ;;  %v6913_v3 = vpack.i.bf16 %v5218_v0, %v5217_v49  ;;  %v5729_v0 = vld [vmem:[#allocation8 + $0x28] sm:$0xff]  ;;  %v5728_v49 = vld [vmem:[#allocation8 + $0x20] sm:$0xff] }
 0xbbc   : > { %v4753_v39 = vpop.xlane.xlu0 %4752 }
 0xbbd   : > { %7390 = vrcp.f32 %v4753_v39 }
 0xbc3   : > { %v7391_v52 = vpop.eup %7390 }
 0xbc4   : > { %v4756_v45 = vpop.xlane.xlu1 %4755  ;;  %v4603_v13 = vpop.xlane.xlu0 %4602 }
 0xbc5   : > { %v4653_v47 = vsub.f32 %v11948_v62, %v4603_v13  ;;  %v4977_v20 = vpop.f32.mrf.mxu1  ;;  %7392 = vrcp.f32 %v4756_v45  ;;  %v5733_v62 = vld [vmem:[#allocation8 + $0x48] sm:$0xff] }
 0xbc6   : > { %5750 = vmatpush.msra.mxu0 %v5733_v62  ;;  %v5219_v12 = vmul.f32 %v7391_v52, %v4977_v20  ;;  %v13317_v52 = vld [vmem:[#allocation72_spill] sm:$0xff] }
 0xbc7   : > { %v4707_v24 = vmul.f32 1.442695, %v4653_v47 }
 0xbc8   : > { %5751 = vmatpush.msra.mxu0 %v5732_v48 }
 0xbc9   : > { %7394 = vpow2.f32 %v4707_v24  ;;  %v5727_v24 = vld [vmem:[#allocation8 + $0x18] sm:$0xff] }
 0xbca   : > { %5752 = vmatpush.msra.mxu0 %v5731_v5 }
 0xbcb   : > { %6904 = vrot.lane.b32.xlu2 %v13316_v56, %s7817_s1  ;;  %6914 = vrot.lane.b32.xlu1 %v6913_v3, %s7818_s2  ;;  %v7393_v15 = vpop.eup %7392  ;;  %v5725_v56 = vld [vmem:[#allocation8 + $0x8] sm:$0xff] }
 0xbcc   : > { %v4606_v28 = vpop.xlane.xlu0 %4605  ;;  %5753 = vmatpush.msra.mxu0 %v5730_v59 }
 0xbcd   : > { %v4654_v22 = vsub.f32 %v11956_v63, %v4606_v28  ;;  %v4980_v39 = vpop.f32.mrf.mxu1  ;;  %v12077_v63 = vadd.f32 %v4532_v25, %v11751_v27  ;;  %v4612_v7 = vpop.xlane.xlu1 %4611  ;;  %v5724_v28 = vld [vmem:[#allocation8] sm:$0xff] }
 0xbce   : > { %v5220_v10 = vmul.f32 %v7393_v15, %v4980_v39  ;;  %5754 = vmatpush.msra.mxu0 %v5729_v0  ;;  %v4656_v27 = vsub.f32 %v11959_v21, %v4612_v7  ;;  %v4759_v21 = vpop.xlane.xlu2 %4758 }
 0xbcf   : > { %v12072_v45 = vpop.eup %7394  ;;  %v4709_v8 = vmul.f32 1.442695, %v4654_v22  ;;  %v4628_v58 = vsel %vm1214_vm1, %v12077_v63, -inf }
 0xbd0   : > { %v6918_v13 = vpack.i.bf16 %v5220_v10, %v5219_v12  ;;  %6423 = vmatmul.msk.f32.gmra.mxu2 %vm1214_vm1, %v12072_v45  ;;  %5755 = vmatpush.msra.mxu0 %v5728_v49  ;;  %v4713_v37 = vmul.f32 1.442695, %v4656_v27  ;;  %v13318_v12 = vld [vmem:[#allocation152_spill] sm:$0xff]  ;;  %v13320_v49 = vld [vmem:[#allocation145_spill] sm:$0xff] }
 0xbd1   : > { %7396 = vpow2.f32 %v4709_v8  ;;  %v13319_v8 = vld [vmem:[#allocation86_spill] sm:$0xff] }
 0xbd2   : > { %5756 = vmatpush.msra.mxu0 %v5727_v24 }
 0xbd3   : > { %6919 = vrot.lane.b32.xlu1 %v6918_v13, %s7818_s2 }
 0xbd4   : > { %v4609_v47 = vpop.xlane.xlu0 %4608 }
 0xbd5   : > { %v4655_v20 = vsub.f32 %v11969_v36, %v4609_v47  ;;  %v5726_v36 = vld [vmem:[#allocation8 + $0x10] sm:$0xff]  ;;  %v4983_v59 = vpop.f32.mrf.mxu1 }
 0xbd6   : > { %5757 = vmatpush.msra.mxu0 %v5726_v36  ;;  %v4762_v7 = vpop.xlane.xlu2 %4761  ;;  %v13321_v36 = vpack.i.bf16 %v11736_v46, %v11734_v18  ;;  %v13324_v18 = vld [vmem:[#allocation27_spill] sm:$0xff] }
 0xbd7   : > { %v12083_v43 = vpop.eup %7396  ;;  %v4711_v3 = vmul.f32 1.442695, %v4655_v20  ;;  %4629 = vmax.xlane.f32.xlu0 %v4628_v58 }
 0xbd8   : > { %6424 = vmatmul.msk.f32.gmra.mxu2 %vm1214_vm1, %v12083_v43  ;;  %5758 = vmatpush.msra.mxu0 %v5725_v56 }
 0xbd9   : > { %7398 = vpow2.f32 %v4711_v3 }
 0xbda   : > { %7400 = vrcp.f32 %v11035_v60  ;;  %5759 = vmatpush.msra.mxu0 %v5724_v28  ;;  %v4618_v60 = vpop.xlane.xlu1 %4617 }
 0xbdb   : > { %7402 = vrcp.f32 %v13317_v52  ;;  %v4658_v20 = vsub.f32 %v11977_v53, %v4618_v60  ;;  %v4772_v53 = vsel %vm1214_vm1, %v12012_v17, 0.0  ;;  %v13323_v17 = vld [vmem:[#allocation68_spill] sm:$0xff] }
 0xbdc   : > { %7404 = vpow2.f32 %v4713_v37 }
 0xbdd   : > { %v12089_v62 = vpop.xlane.xlu0 %4764  ;;  %v4717_v58 = vmul.f32 1.442695, %v4658_v20 }
 0xbde   : > { %v4986_v3 = vpop.f32.mrf.mxu1 }
 0xbdf   : > { %v12092_v15 = vpop.eup %7398 }
 0xbe0   : > { %6425 = vmatmul.msk.f32.vlgmr.msrb.gmra.mxu3 %vm1214_vm1, %v12092_v15  ;;  %v7401_v22 = vpop.eup %7400 }
 0xbe1   : > { %v7403_v39 = vpop.eup %7402  ;;  %v2965_v10 = vmul.f32 %v7401_v22, %v13318_v12  ;;  %v13322_v22 = vld [vmem:[#allocation94_spill] sm:$0xff] }
 0xbe2   : > { %v12098_v25 = vpop.eup %7404  ;;  %v2966_v13 = vmul.f32 %v7403_v39, %v13319_v8 }
 0xbe4   : > { %v6908_v47 = vpack.i.bf16 %v2966_v13, %v2965_v10  ;;  %v6866_v10 = vunpack.i.l.bf16 %v11783_v33 }
 0xbe5   : > { %v4615_v48 = vpop.xlane.xlu0 %4614 }
 0xbe6   : > { %v4657_v5 = vsub.f32 %v11989_v11, %v4615_v48  ;;  %v4621_v11 = vpop.xlane.xlu1 %4620 }
 0xbe7   : > { %v4659_v27 = vsub.f32 %v11986_v54, %v4621_v11  ;;  %v6826_v54 = vunpack.i.l.bf16 %v11334_v26  ;;  %v6832_v11 = vunpack.i.h.bf16 %v11407_v50  ;;  %v13328_v50 = vld [vmem:[#allocation106_spill] sm:$0xff] }
 0xbe8   : > { %v4715_v0 = vmul.f32 1.442695, %v4657_v5  ;;  %6426 = vmatmul.msk.f32.gmra.mxu3 %vm1214_vm1, %v12098_v25  ;;  %v4778_v5 = vsel %vm1214_vm1, %v12026_v4, 0.0  ;;  %v13326_v4 = vld [vmem:[#allocation153_spill] sm:$0xff] }
 0xbea   : > { %7406 = vpow2.f32 %v4715_v0 }
 0xbeb   : > { %6909 = vrot.lane.b32.xlu0 %v6908_v47, %s7819_s3  ;;  %7408 = vrcp.f32 %v4762_v7  ;;  %v13325_v47 = vld [vmem:[#allocation89_spill] sm:$0xff] }
 0xbec   : > { %7410 = vrcp.f32 %v13320_v49 }
 0xbed   : > { %7412 = vrcp.f32 %v4759_v21  ;;  %v4719_v21 = vmul.f32 1.442695, %v4659_v27  ;;  %v6867_v27 = vunpack.i.h.bf16 %v11783_v33  ;;  %v13329_v33 = vld [vmem:[#allocation108_spill] sm:$0xff] }
 0xbee   : > { %7414 = vpow2.f32 %v4717_v58 }
 0xbef   : > { %7416 = vrcp.f32 %v11129_v34 }
 0xbf0   : > { %v12106_v24 = vpop.eup %7406  ;;  %7418 = vrcp.f32 %v13322_v22 }
 0xbf1   : > { %6427 = vmatmul.msk.f32.gmra.mxu3 %vm1214_vm1, %v12106_v24  ;;  %v7409_v56 = vpop.eup %7408  ;;  %7420 = vrcp.f32 %v13323_v17  ;;  %v13330_v17 = vpack.i.bf16 %v11758_v32, %v11745_v61 }
 0xbf2   : > { %v7411_v37 = vpop.eup %7410  ;;  %v5222_v52 = vmul.f32 %v7409_v56, %v4986_v3  ;;  %7422 = vpow2.f32 %v4719_v21 }
 0xbf3   : > { %6924 = vrot.lane.b32.xlu0 %v13321_v36, %s7817_s1  ;;  %v7413_v28 = vpop.eup %7412  ;;  %v1795_v46 = vmul.f32 %v7411_v37, %v13324_v18  ;;  %v4781_v37 = vsel %vm1214_vm1, %v12037_v40, 0.0  ;;  %7424 = vrcp.f32 %v13328_v50  ;;  %v4784_v40 = vsel %vm1214_vm1, %v12047_v6, 0.0 }
 0xbf4   : > { %4773 = vadd.xlane.f32.xlu2 %v4772_v53  ;;  %v5221_v39 = vmul.f32 %v7413_v28, %v4983_v59  ;;  %v12120_v12 = vpop.eup %7414  ;;  %v4775_v59 = vsel %vm1214_vm1, %v12019_v30, 0.0  ;;  %v13327_v53 = vld [vmem:[#allocation181_spill] sm:$0xff]  ;;  %7426 = vrcp.f32 %v13329_v33  ;;  %v6846_v18 = vunpack.i.l.bf16 %v11510_v38 }
 0xbf5   : > { %v7417_v34 = vpop.eup %7416  ;;  %v5627_v26 = vsel %vm857_vm0, %v1795_v46, %v6826_v54  ;;  %7428 = vrcp.f32 %v11214_v23  ;;  %v13331_v46 = vld [vmem:[#allocation55_spill] sm:$0xff]  ;;  %v6871_v23 = vunpack.i.l.bf16 %v11794_v9  ;;  %v4787_v38 = vsel %vm1214_vm1, %v12057_v51, 0.0 }
 0xbf6   : > { %v6928_v60 = vpack.i.bf16 %v5222_v52, %v5221_v39  ;;  %v5659_v13 = vsel %vm1214_vm1, %v5627_v26, %v6866_v10  ;;  %v7419_v0 = vpop.eup %7418  ;;  %v2968_v20 = vmul.f32 %v7417_v34, %v13325_v47  ;;  %v12164_v34 = vpop.permute.xlu2 %6879  ;;  %v13334_v26 = vld [vmem:[#allocation138_spill] sm:$0xff] }
 0xbf7   : > { %v7421_v58 = vpop.eup %7420  ;;  %v1796_v36 = vmul.f32 %v7419_v0, %v13327_v53 }
 0xbf8   : > { %v2967_v49 = vmul.f32 %v7421_v58, %v13326_v4  ;;  %v12138_v3 = vpop.eup %7422  ;;  %v12153_v22 = vpop.permute.xlu0 %6889  ;;  %v6852_v58 = vunpack.i.h.bf16 %v11506_v2 }
 0xbf9   : > { %6428 = vmatmul.msk.f32.gmra.mxu3 %vm1214_vm1, %v12120_v12  ;;  %v5628_v52 = vsel %vm857_vm0, %v1796_v36, %v6832_v11  ;;  %v7425_v54 = vpop.eup %7424 }
 0xbfa   : > { %v6885_v48 = vpop.permute.xlu1 %6884  ;;  %v6933_v30 = vpack.i.bf16 %v2968_v20, %v2967_v49  ;;  %v5660_v28 = vsel %vm1214_vm1, %v5628_v52, %v6867_v27  ;;  %v7427_v39 = vpop.eup %7426  ;;  %v6872_v49 = vunpack.i.h.bf16 %v11794_v9  ;;  %v13336_v27 = vld [vmem:[#allocation182_spill] sm:$0xff]  ;;  %v13337_v52 = vpack.i.bf16 %v11771_v16, %v11765_v35  ;;  %v13338_v9 = vld [vmem:[#allocation93_spill] sm:$0xff] }
 0xbfb   : > { %v6886_v8 = vunpack.i.l.bf16 %v6885_v48  ;;  %6929 = vrot.lane.b32.xlu0 %v6928_v60, %s7818_s2  ;;  %v6887_v56 = vunpack.i.h.bf16 %v6885_v48  ;;  %v7429_v10 = vpop.eup %7428  ;;  %v13332_v48 = vld [vmem:[#allocation83_spill] sm:$0xff]  ;;  %v6856_v50 = vunpack.i.l.bf16 %v13338_v9 }
 0xbfc   : > { %4779 = vadd.xlane.f32.xlu2 %v4778_v5  ;;  %v2970_v60 = vmul.f32 %v7429_v10, %v13331_v46  ;;  %7430 = vrcp.f32 %v13332_v48  ;;  %v13333_v5 = vld [vmem:[#allocation58_spill] sm:$0xff] }
 0xbfd   : > { %4776 = vadd.xlane.f32.xlu1 %v4775_v59  ;;  %v5692_v7 = vsel %vm5691_vm2, %v5659_v13, %v6886_v8  ;;  %v5693_v21 = vsel %vm5691_vm2, %v5660_v28, %v6887_v56  ;;  %v1797_v6 = vmul.f32 %v7425_v54, %v13333_v5  ;;  %v2969_v8 = vmul.f32 %v7427_v39, %v13334_v26  ;;  %v13342_v26 = vld [vmem:[#allocation80_spill] sm:$0xff] }
 0xbfe   : > { %5760 = vmatmul.f32.vlgmr.msra.gmra.mxu0 %v5692_v7  ;;  %v13335_v7 = vld [vmem:[#allocation107_spill] sm:$0xff] }
 0xbff   : > { %v5629_v61 = vsel %vm857_vm0, %v1797_v6, %v6846_v18  ;;  %v6948_v32 = vpack.i.bf16 %v2970_v60, %v2969_v8  ;;  %7432 = vrcp.f32 %v13335_v7 }
 0xc00   : > { %v5661_v0 = vsel %vm1214_vm1, %v5629_v61, %v6871_v23  ;;  %v4989_v23 = vpop.f32.mrf.mxu1 }
 0xc01   : > { %6429 = vmatmul.msk.f32.gmra.mxu3 %vm1214_vm1, %v12138_v3 }
 0xc02   : > { %v7431_v20 = vpop.eup %7430 }
 0xc03   : > { %6934 = vrot.lane.b32.xlu0 %v6933_v30, %s7819_s3  ;;  %v1798_v53 = vmul.f32 %v7431_v20, %v13336_v27  ;;  %v13344_v20 = vld [vmem:[#allocation56_spill] sm:$0xff] }
 0xc04   : > { %4782 = vadd.xlane.f32.xlu2 %v4781_v37 }
 0xc05   : > { %v5630_v56 = vsel %vm857_vm0, %v1798_v53, %v6852_v58  ;;  %v7433_v37 = vpop.eup %7432  ;;  %v13345_v53 = vld [vmem:[#allocation88_spill] sm:$0xff] }
 0xc06   : > { %5763 = vmatmul.f32.gmra.mxu0 %v5693_v21  ;;  %v5662_v30 = vsel %vm1214_vm1, %v5630_v56, %v6872_v49  ;;  %v13340_v21 = vld [vmem:[#allocation176_spill] sm:$0xff]  ;;  %v13347_v56 = vld [vmem:[#allocation183_spill] sm:$0xff] }
 0xc07   : > { %v1799_v54 = vmul.f32 %v7433_v37, %v13340_v21 }
 0xc08   : > { %v4992_v7 = vpop.f32.mrf.mxu1 }
 0xc09   : > { %v5631_v16 = vsel %vm857_vm0, %v1799_v54, %v6856_v50  ;;  %v13349_v50 = vld [vmem:[#allocation25_spill] sm:$0xff] }
 0xc0b   : > { %6939 = vrot.lane.b32.xlu0 %v13330_v17, %s7817_s1 }
 0xc0c   : > { %4785 = vadd.xlane.f32.xlu2 %v4784_v40  ;;  %v13341_v40 = vld [vmem:[#allocation97_spill] sm:$0xff] }
 0xc0f   : > { %v6895_v13 = vpop.permute.xlu0 %6894 }
 0xc10   : > { %v6896_v59 = vunpack.i.l.bf16 %v6895_v13  ;;  %v6897_v36 = vunpack.i.h.bf16 %v6895_v13 }
 0xc12   : > { %v5694_v47 = vsel %vm5691_vm2, %v5661_v0, %v6896_v59  ;;  %v5695_v2 = vsel %vm5691_vm2, %v5662_v30, %v6897_v36  ;;  %v13343_v0 = vld [vmem:[#allocation81_spill] sm:$0xff]  ;;  %v13346_v36 = vld [vmem:[#allocation188_spill] sm:$0xff] }
 0xc13   : > { %6949 = vrot.lane.b32.xlu0 %v6948_v32, %s7819_s3  ;;  %5766 = vmatmul.f32.gmra.mxu0 %v5694_v47 }
 0xc14   : > { %4788 = vadd.xlane.f32.xlu2 %v4787_v38 }
 0xc16   : > { %v4624_v4 = vpop.xlane.xlu2 %4623 }
 0xc17   : > { %v4660_v11 = vsub.f32 %v12032_v44, %v4624_v4  ;;  %v13339_v44 = vld [vmem:[#allocation160_spill] sm:$0xff] }
 0xc18   : > { %v6876_v28 = vunpack.i.l.bf16 %v13339_v44  ;;  %v6877_v6 = vunpack.i.h.bf16 %v13339_v44  ;;  %v6881_v44 = vunpack.i.l.bf16 %v12164_v34 }
 0xc19   : > { %v4721_v51 = vmul.f32 1.442695, %v4660_v11 }
 0xc1a   : > { %v5663_v46 = vsel %vm1214_vm1, %v5631_v16, %v6876_v28  ;;  %v13350_v28 = vld [vmem:[#allocation158_spill] sm:$0xff] }
 0xc1b   : > { %7434 = vpow2.f32 %v4721_v51  ;;  %6954 = vrot.lane.b32.xlu0 %v13337_v52, %s7817_s1  ;;  %5769 = vmatmul.f32.gmra.mxu0 %v5695_v2  ;;  %v13348_v2 = vld [vmem:[#allocation125_spill] sm:$0xff] }
 0xc1c   : > { %7436 = vrcp.f32 %v13341_v40  ;;  %v6862_v16 = vunpack.i.h.bf16 %v13348_v2 }
 0xc1e   : > { %v4627_v33 = vpop.xlane.xlu2 %4626 }
 0xc1f   : > { %v4661_v39 = vsub.f32 %v12043_v14, %v4627_v33  ;;  %v6900_v17 = vpop.permute.xlu0 %6899  ;;  %v6857_v14 = vunpack.i.h.bf16 %v13338_v9  ;;  %v6861_v9 = vunpack.i.l.bf16 %v13348_v2  ;;  %v13358_v2 = vld [vmem:[#allocation24_spill] sm:$0xff] }
 0xc20   : > { %v6901_v35 = vunpack.i.l.bf16 %v6900_v17  ;;  %v6902_v13 = vunpack.i.h.bf16 %v6900_v17 }
 0xc21   : > { %v12192_v10 = vpop.eup %7434  ;;  %v4723_v18 = vmul.f32 1.442695, %v4661_v39 }
 0xc22   : > { %6430 = vmatmul.msk.f32.gmra.mxu3 %vm1214_vm1, %v12192_v10  ;;  %v5696_v60 = vsel %vm5691_vm2, %v5663_v46, %v6901_v35  ;;  %v7437_v48 = vpop.eup %7436  ;;  %v13351_v46 = vld [vmem:[#allocation51_spill] sm:$0xff] }
 0xc23   : > { %7438 = vpow2.f32 %v4723_v18  ;;  %5772 = vmatmul.f32.gmra.mxu0 %v5696_v60  ;;  %v1800_v8 = vmul.f32 %v7437_v48, %v13342_v26  ;;  %v6882_v60 = vunpack.i.h.bf16 %v12164_v34  ;;  %v6891_v34 = vunpack.i.l.bf16 %v12153_v22 }
 0xc24   : > { %7440 = vrcp.f32 %v12089_v62 }
 0xc25   : > { %v4768_v5 = vpop.xlane.xlu1 %4767  ;;  %v5632_v61 = vsel %vm857_vm0, %v1800_v8, %v6857_v14 }
 0xc26   : > { %7442 = vrcp.f32 %v4768_v5  ;;  %v5664_v32 = vsel %vm1214_vm1, %v5632_v61, %v6877_v6  ;;  %v4771_v54 = vpop.xlane.xlu2 %4770  ;;  %v4790_v5 = vsel %vm1214_vm1, %v12061_v42, 0.0 }
 0xc27   : > { %7444 = vrcp.f32 %v13343_v0  ;;  %v5697_v38 = vsel %vm5691_vm2, %v5664_v32, %v6902_v13  ;;  %v13353_v0 = vld [vmem:[#allocation40_spill] sm:$0xff] }
 0xc28   : > { %7446 = vrcp.f32 %v13344_v20  ;;  %v13355_v20 = vld [vmem:[#allocation21_spill] sm:$0xff] }
 0xc29   : > { %v12203_v59 = vpop.eup %7438  ;;  %7448 = vrcp.f32 %v13345_v53 }
 0xc2a   : > { %6431 = vmatmul.msk.f32.gmra.mxu3 %vm1214_vm1, %v12203_v59  ;;  %v7441_v47 = vpop.eup %7440  ;;  %7450 = vrcp.f32 %v13349_v50 }
 0xc2b   : > { %5775 = vmatmul.f32.gmra.mxu0 %v5697_v38  ;;  %v5223_v58 = vmul.f32 %v7441_v47, %v4989_v23  ;;  %7452 = vrcp.f32 %v13351_v46  ;;  %v13352_v23 = vld [vmem:[#allocation91_spill] sm:$0xff]  ;;  %v13354_v47 = vld [vmem:[#allocation44_spill] sm:$0xff] }
 0xc2c   : > { %v7443_v62 = vpop.eup %7442  ;;  %7454 = vrcp.f32 %v13353_v0 }
 0xc2d   : > { %v5224_v4 = vmul.f32 %v7443_v62, %v4992_v7  ;;  %v7445_v11 = vpop.eup %7444  ;;  %7456 = vrcp.f32 %v13354_v47 }
 0xc2e   : > { %v7447_v27 = vpop.eup %7446  ;;  %v2971_v51 = vmul.f32 %v7445_v11, %v13346_v36  ;;  %v6905_v8 = vpop.permute.xlu2 %6904 }
 0xc2f   : > { %v6943_v49 = vpack.i.bf16 %v5224_v4, %v5223_v58  ;;  %v2972_v30 = vmul.f32 %v7447_v27, %v13347_v56  ;;  %v7449_v52 = vpop.eup %7448  ;;  %v6906_v62 = vunpack.i.l.bf16 %v6905_v8  ;;  %v6892_v56 = vunpack.i.h.bf16 %v12153_v22 }
 0xc30   : > { %v1801_v33 = vmul.f32 %v7449_v52, %v13350_v28  ;;  %v7451_v35 = vpop.eup %7450  ;;  %v13359_v28 = vld [vmem:[#allocation78_spill] sm:$0xff] }
 0xc31   : > { %6944 = vrot.lane.b32.xlu1 %v6943_v49, %s7818_s2  ;;  %v6963_v37 = vpack.i.bf16 %v2972_v30, %v2971_v51  ;;  %v1802_v48 = vmul.f32 %v7451_v35, %v13352_v23  ;;  %v7453_v61 = vpop.eup %7452  ;;  %v13356_v49 = vld [vmem:[#allocation136_spill] sm:$0xff]  ;;  %v13357_v30 = vld [vmem:[#allocation41_spill] sm:$0xff]  ;;  %v4995_v35 = vpop.f32.mrf.mxu1 }
 0xc32   : > { %v5633_v39 = vsel %vm857_vm0, %v1801_v33, %v6861_v9  ;;  %v1803_v7 = vmul.f32 %v7453_v61, %v13355_v20  ;;  %7458 = vrcp.f32 %v13356_v49  ;;  %v7455_v53 = vpop.eup %7454 }
 0xc33   : > { %v5665_v17 = vsel %vm1214_vm1, %v5633_v39, %v6881_v44  ;;  %v5634_v6 = vsel %vm857_vm0, %v1802_v48, %v6862_v16  ;;  %v7457_v51 = vpop.eup %7456  ;;  %v4793_v16 = vsel %vm1214_vm1, %v12072_v45, 0.0  ;;  %v5066_v48 = vpop.f32.mrf.mxu2 }
 0xc34   : > { %v5666_v26 = vsel %vm1214_vm1, %v5634_v6, %v6882_v60  ;;  %v5635_v11 = vsel %vm857_vm0, %v1803_v7, %v6891_v34  ;;  %v1804_v9 = vmul.f32 %v7457_v51, %v13358_v2  ;;  %v13361_v6 = vld [vmem:[#allocation117_spill] sm:$0xff]  ;;  %v13364_v2 = vld [vmem:[#allocation112_spill] sm:$0xff] }
 0xc35   : > { %v5667_v27 = vsel %vm1214_vm1, %v5635_v11, %v6906_v62 }
 0xc38   : > { %v7459_v52 = vpop.eup %7458 }
 0xc39   : > { %6964 = vrot.lane.b32.xlu1 %v6963_v37, %s7819_s3  ;;  %v6907_v37 = vunpack.i.h.bf16 %v6905_v8  ;;  %v2973_v33 = vmul.f32 %v7459_v52, %v13359_v28  ;;  %v4799_v8 = vsel %vm1214_vm1, %v12092_v15, 0.0  ;;  %v4998_v45 = vpop.f32.mrf.mxu1 }
 0xc3b   : > { %v5069_v15 = vpop.f32.mrf.mxu2 }
 0xc3d   : > { %v6915_v21 = vpop.permute.xlu1 %6914 }
 0xc3e   : > { %v6916_v40 = vunpack.i.l.bf16 %v6915_v21  ;;  %v6917_v14 = vunpack.i.h.bf16 %v6915_v21  ;;  %v5636_v21 = vsel %vm857_vm0, %v1804_v9, %v6892_v56  ;;  %v13365_v9 = vld [vmem:[#allocation123_spill] sm:$0xff] }
 0xc3f   : > { %v5668_v39 = vsel %vm1214_vm1, %v5636_v21, %v6907_v37  ;;  %v12272_v37 = vld [vmem:[%s12583_s4] ss:$0 sm:$0xff] }
 0xc40   : > { %v5698_v18 = vsel %vm5691_vm2, %v5665_v17, %v6916_v40  ;;  %v5699_v13 = vsel %vm5691_vm2, %v5666_v26, %v6917_v14 }
 0xc41   : > { %5778 = vmatmul.f32.gmra.mxu0 %v5698_v18  ;;  %v13360_v18 = vld [vmem:[#allocation164_spill] sm:$0xff] }
 0xc45   : > { %4791 = vadd.xlane.f32.xlu0 %v4790_v5  ;;  %v6920_v32 = vpop.permute.xlu1 %6919 }
 0xc46   : > { %v6921_v58 = vunpack.i.l.bf16 %v6920_v32  ;;  %v6922_v50 = vunpack.i.h.bf16 %v6920_v32 }
 0xc48   : > { %v5700_v36 = vsel %vm5691_vm2, %v5667_v27, %v6921_v58  ;;  %v5701_v22 = vsel %vm5691_vm2, %v5668_v39, %v6922_v50  ;;  %v13363_v27 = vld [vmem:[#allocation179_spill] sm:$0xff]  ;;  %v13366_v50 = vpack.i.bf16 %v13364_v2, %v13365_v9  ;;  %v4796_v2 = vsel %vm1214_vm1, %v12083_v43, 0.0  ;;  %v13373_v9 = vld [vmem:[#allocation172_spill] sm:$0xff] }
 0xc49   : > { %5781 = vmatmul.f32.gmra.mxu0 %v5699_v13  ;;  %v13362_v13 = vld [vmem:[#allocation42_spill] sm:$0xff]  ;;  %v4802_v43 = vsel %vm1214_vm1, %v12098_v25, 0.0 }
 0xc4a   : > { %v4630_v38 = vpop.xlane.xlu0 %4629 }
 0xc4b   : > { %v4662_v42 = vsub.f32 %v12077_v63, %v4630_v38  ;;  %v2974_v63 = vmul.f32 %v7455_v53, %v13357_v30 }
 0xc4d   : > { %v4725_v4 = vmul.f32 1.442695, %v4662_v42  ;;  %v6978_v40 = vpack.i.bf16 %v2974_v63, %v2973_v33  ;;  %v5072_v33 = vpop.f32.mrf.mxu2 }
 0xc4f   : > { %7460 = vpow2.f32 %v4725_v4 }
 0xc50   : > { %7462 = vrcp.f32 %v13360_v18 }
 0xc51   : > { %5784 = vmatmul.f32.gmra.mxu0 %v5700_v36  ;;  %7464 = vrcp.f32 %v4771_v54 }
 0xc55   : > { %v12245_v44 = vpop.eup %7460 }
 0xc56   : > { %6432 = vmatmul.msk.f32.gmra.mxu3 %vm1214_vm1, %v12245_v44  ;;  %v7463_v23 = vpop.eup %7462 }
 0xc57   : > { %v7465_v5 = vpop.eup %7464  ;;  %v1805_v61 = vmul.f32 %v7463_v23, %v13362_v13  ;;  %v5075_v23 = vpop.f32.mrf.mxu2 }
 0xc58   : > { %v5225_v54 = vmul.f32 %v7465_v5, %v4995_v35 }
 0xc59   : > { %6979 = vrot.lane.b32.xlu0 %v6978_v40, %s7819_s3  ;;  %5787 = vmatmul.f32.gmra.mxu0 %v5701_v22 }
 0xc5d   : > { %v6910_v17 = vpop.permute.xlu0 %6909 }
 0xc5e   : > { %v6911_v14 = vunpack.i.l.bf16 %v6910_v17  ;;  %v6912_v49 = vunpack.i.h.bf16 %v6910_v17 }
 0xc60   : > { %v5637_v62 = vsel %vm857_vm0, %v1805_v61, %v6911_v14  ;;  %v13368_v14 = vld [vmem:[#allocation133_spill] sm:$0xff] }
 0xc63   : > { %4794 = vadd.xlane.f32.xlu1 %v4793_v16 }
 0xc65   : > { %v6925_v46 = vpop.permute.xlu0 %6924 }
 0xc66   : > { %v6926_v26 = vunpack.i.l.bf16 %v6925_v46  ;;  %v6927_v11 = vunpack.i.h.bf16 %v6925_v46 }
 0xc67   : > { %v4774_v60 = vpop.xlane.xlu2 %4773 }
 0xc68   : > { %7466 = vrcp.f32 %v4774_v60  ;;  %v5669_v42 = vsel %vm1214_vm1, %v5637_v62, %v6926_v26 }
 0xc69   : > { %7468 = vrcp.f32 %v13361_v6 }
 0xc6b   : > { %4800 = vadd.xlane.f32.xlu1 %v4799_v8 }
 0xc6d   : > { %v6930_v0 = vpop.permute.xlu0 %6929 }
 0xc6e   : > { %v7467_v32 = vpop.eup %7466  ;;  %v6931_v38 = vunpack.i.l.bf16 %v6930_v0  ;;  %v6932_v36 = vunpack.i.h.bf16 %v6930_v0  ;;  %v13370_v0 = vld [vmem:[#allocation100_spill] sm:$0xff] }
 0xc6f   : > { %v5226_v34 = vmul.f32 %v7467_v32, %v4998_v45  ;;  %v4780_v47 = vpop.xlane.xlu2 %4779  ;;  %v7469_v4 = vpop.eup %7468 }
 0xc70   : > { %v4777_v20 = vpop.xlane.xlu1 %4776  ;;  %v5702_v7 = vsel %vm5691_vm2, %v5669_v42, %v6931_v38  ;;  %v1806_v53 = vmul.f32 %v7469_v4, %v13363_v27  ;;  %v13371_v42 = vld [vmem:[#allocation131_spill] sm:$0xff] }
 0xc71   : > { %v6958_v58 = vpack.i.bf16 %v5226_v34, %v5225_v54  ;;  %5790 = vmatmul.f32.gmra.mxu0 %v5702_v7  ;;  %7470 = vrcp.f32 %v4777_v20 }
 0xc72   : > { %7472 = vrcp.f32 %v4780_v47  ;;  %v5638_v56 = vsel %vm857_vm0, %v1806_v53, %v6912_v49 }
 0xc73   : > { %6959 = vrot.lane.b32.xlu2 %v6958_v58, %s7818_s2  ;;  %v5670_v30 = vsel %vm1214_vm1, %v5638_v56, %v6927_v11  ;;  %v13372_v58 = vld [vmem:[#allocation173_spill] sm:$0xff] }
 0xc74   : > { %v5703_v63 = vsel %vm5691_vm2, %v5670_v30, %v6932_v36 }
 0xc75   : > { %v6935_v61 = vpop.permute.xlu0 %6934 }
 0xc76   : > { %v6936_v47 = vunpack.i.l.bf16 %v6935_v61  ;;  %v6937_v56 = vunpack.i.h.bf16 %v6935_v61 }
 0xc77   : > { %v4783_v51 = vpop.xlane.xlu2 %4782  ;;  %v7471_v52 = vpop.eup %7470 }
 0xc78   : > { %v7473_v28 = vpop.eup %7472  ;;  %v5227_v40 = vmul.f32 %v7471_v52, %v5066_v48  ;;  %7474 = vrcp.f32 %v4783_v51  ;;  %v13367_v48 = vld [vmem:[#allocation157_spill] sm:$0xff] }
 0xc79   : > { %5793 = vmatmul.f32.gmra.mxu0 %v5703_v63  ;;  %v5228_v22 = vmul.f32 %v7473_v28, %v5069_v15  ;;  %v13369_v5 = vpack.i.bf16 %v13367_v48, %v13368_v14  ;;  %v13378_v48 = vld [vmem:[#allocation64_spill] sm:$0xff] }
 0xc7b   : > { %6969 = vrot.lane.b32.xlu2 %v13366_v50, %s7817_s1  ;;  %v5761_v21 = vpop.f32.mrf.mxu0  ;;  %v6973_v18 = vpack.i.bf16 %v5228_v22, %v5227_v40 }
 0xc7c   : > { %v5762_v39 = vadd.f32 %v12272_v37, %v5761_v21  ;;  %v4805_v21 = vsel %vm1214_vm1, %v12106_v24, 0.0  ;;  %v13376_v24 = vld [vmem:[#allocation185_spill] sm:$0xff] }
 0xc7d   : > { %v6940_v34 = vpop.permute.xlu0 %6939 }
 0xc7e   : > { %5857 = vst [vmem:[%s12281_s11] sm:$0xff] %v5762_v39  ;;  %v7475_v35 = vpop.eup %7474  ;;  %v6941_v20 = vunpack.i.l.bf16 %v6940_v34  ;;  %v6942_v63 = vunpack.i.h.bf16 %v6940_v34  ;;  %v13381_v34 = vld [vmem:[#allocation101_spill] sm:$0xff] }
 0xc7f   : > { %v4786_v17 = vpop.xlane.xlu2 %4785  ;;  %v5229_v6 = vmul.f32 %v7475_v35, %v5072_v33  ;;  %v13375_v35 = vld [vmem:[#allocation189_spill] sm:$0xff] }
 0xc80   : > { %7476 = vrcp.f32 %v4786_v17  ;;  %v13374_v17 = vld [vmem:[#allocation135_spill] sm:$0xff] }
 0xc81   : > { %7478 = vrcp.f32 %v13370_v0 }
 0xc82   : > { %7480 = vrcp.f32 %v13371_v42  ;;  %v13382_v42 = vld [vmem:[#allocation77_spill] sm:$0xff] }
 0xc83   : > { %6974 = vrot.lane.b32.xlu2 %v6973_v18, %s7818_s2  ;;  %v5764_v16 = vpop.f32.mrf.mxu0  ;;  %7482 = vrcp.f32 %v13374_v17  ;;  %v5078_v18 = vpop.f32.mrf.mxu2  ;;  %v13388_v17 = vld [vmem:[#allocation132_spill] sm:$0xff] }
 0xc84   : > { %v5765_v46 = vadd.f32 %v12272_v37, %v5764_v16  ;;  %6984 = vrot.lane.b32.xlu1 %v13369_v5, %s7817_s1  ;;  %7484 = vrcp.f32 %v13375_v35 }
 0xc85   : > { %v12302_v27 = vpop.permute.xlu0 %6949 }
 0xc86   : > { %v7477_v60 = vpop.eup %7476  ;;  %5858 = vst [vmem:[%s12281_s11 + $0x8] sm:$0xff] %v5765_v46 }
 0xc87   : > { %v5230_v26 = vmul.f32 %v7477_v60, %v5075_v23  ;;  %v7479_v38 = vpop.eup %7478  ;;  %v4789_v16 = vpop.xlane.xlu2 %4788  ;;  %v13377_v23 = vld [vmem:[#allocation37_spill] sm:$0xff] }
 0xc88   : > { %v1807_v4 = vmul.f32 %v7479_v38, %v13372_v58  ;;  %v7481_v51 = vpop.eup %7480 }
 0xc89   : > { %v6988_v8 = vpack.i.bf16 %v5230_v26, %v5229_v6  ;;  %v1808_v50 = vmul.f32 %v7481_v51, %v13373_v9  ;;  %v7483_v60 = vpop.eup %7482  ;;  %v13379_v26 = vld [vmem:[#allocation59_spill] sm:$0xff] }
 0xc8a   : > { %v5639_v11 = vsel %vm857_vm0, %v1807_v4, %v6936_v47  ;;  %v2976_v14 = vmul.f32 %v7483_v60, %v13378_v48  ;;  %v7485_v5 = vpop.eup %7484 }
 0xc8b   : > { %6989 = vrot.lane.b32.xlu0 %v6988_v8, %s7818_s2  ;;  %v5671_v53 = vsel %vm1214_vm1, %v5639_v11, %v6941_v20  ;;  %v5640_v33 = vsel %vm857_vm0, %v1808_v50, %v6937_v56  ;;  %v2975_v8 = vmul.f32 %v7485_v5, %v13379_v26  ;;  %v5081_v0 = vpop.f32.mrf.mxu2  ;;  %v13384_v56 = vld [vmem:[#allocation26_spill] sm:$0xff]  ;;  %v13390_v5 = vld [vmem:[#allocation139_spill] sm:$0xff] }
 0xc8c   : > { %v5672_v40 = vsel %vm1214_vm1, %v5640_v33, %v6942_v63  ;;  %v13385_v63 = vpack.i.bf16 %v11829_v41, %v11860_v57  ;;  %v6952_v57 = vunpack.i.h.bf16 %v12302_v27  ;;  %v13387_v41 = vld [vmem:[#allocation186_spill] sm:$0xff] }
 0xc8d   : > { %v12316_v22 = vpop.permute.xlu0 %6954 }
 0xc8e   : > { %v6956_v51 = vunpack.i.l.bf16 %v12316_v22 }
 0xc90   : > { %v5767_v13 = vpop.f32.mrf.mxu0 }
 0xc91   : > { %v5768_v32 = vadd.f32 %v12272_v37, %v5767_v13 }
 0xc93   : > { %5859 = vst [vmem:[%s12281_s11 + $0x10] sm:$0xff] %v5768_v32 }
 0xc98   : > { %v5770_v45 = vpop.f32.mrf.mxu0 }
 0xc99   : > { %v5771_v54 = vadd.f32 %v12272_v37, %v5770_v45  ;;  %v6993_v45 = vpack.i.bf16 %v2976_v14, %v2975_v8  ;;  %v13389_v14 = vld [vmem:[#allocation180_spill] sm:$0xff] }
 0xc9b   : > { %5860 = vst [vmem:[%s12281_s11 + $0x18] sm:$0xff] %v5771_v54  ;;  %v13380_v54 = vld [vmem:[#allocation35_spill] sm:$0xff] }
 0xca0   : > { %v5773_v62 = vpop.f32.mrf.mxu0 }
 0xca1   : > { %v5774_v7 = vadd.f32 %v12272_v37, %v5773_v62 }
 0xca3   : > { %5861 = vst [vmem:[%s12281_s11 + $0x20] sm:$0xff] %v5774_v7  ;;  %v6945_v15 = vpop.permute.xlu1 %6944 }
 0xca4   : > { %v6946_v49 = vunpack.i.l.bf16 %v6945_v15  ;;  %v6947_v28 = vunpack.i.h.bf16 %v6945_v15 }
 0xca6   : > { %v5704_v36 = vsel %vm5691_vm2, %v5671_v53, %v6946_v49  ;;  %v5705_v39 = vsel %vm5691_vm2, %v5672_v40, %v6947_v28  ;;  %v6951_v53 = vunpack.i.l.bf16 %v12302_v27 }
 0xca7   : > { %5796 = vmatmul.f32.gmra.mxu0 %v5704_v36  ;;  %v13383_v36 = vld [vmem:[#allocation17_spill] sm:$0xff] }
 0xca8   : > { %v5776_v30 = vpop.f32.mrf.mxu0 }
 0xca9   : > { %v5777_v52 = vadd.f32 %v12272_v37, %v5776_v30 }
 0xcab   : > { %5862 = vst [vmem:[%s12281_s11 + $0x28] sm:$0xff] %v5777_v52 }
 0xcac   : > { %4797 = vadd.xlane.f32.xlu2 %v4796_v2 }
 0xcae   : > { %4806 = vadd.xlane.f32.xlu1 %v4805_v21 }
 0xcaf   : > { %5799 = vmatmul.f32.gmra.mxu0 %v5705_v39  ;;  %v13386_v39 = vpack.i.bf16 %v11881_v1, %v11831_v31 }
 0xcb5   : > { %4803 = vadd.xlane.f32.xlu0 %v4802_v43  ;;  %v6957_v43 = vunpack.i.h.bf16 %v12316_v22 }
 0xcb8   : > { %v4792_v46 = vpop.xlane.xlu0 %4791 }
 0xcb9   : > { %7486 = vrcp.f32 %v4792_v46 }
 0xcba   : > { %7488 = vrcp.f32 %v13376_v24  ;;  %v6965_v24 = vpop.permute.xlu1 %6964 }
 0xcbb   : > { %7490 = vrcp.f32 %v4789_v16  ;;  %v6966_v48 = vunpack.i.l.bf16 %v6965_v24 }
 0xcbc   : > { %7492 = vrcp.f32 %v13377_v23 }
 0xcbd   : > { %7494 = vrcp.f32 %v13380_v54  ;;  %v13391_v54 = vld [vmem:[#allocation36_spill] sm:$0xff] }
 0xcbe   : > { %v5779_v25 = vpop.f32.mrf.mxu0  ;;  %7496 = vrcp.f32 %v13383_v36 }
 0xcbf   : > { %v7487_v6 = vpop.eup %7486  ;;  %v5780_v13 = vadd.f32 %v12272_v37, %v5779_v25  ;;  %7498 = vrcp.f32 %v13387_v41 }
 0xcc0   : > { %v7489_v61 = vpop.eup %7488  ;;  %v5232_v47 = vmul.f32 %v7487_v6, %v5081_v0  ;;  %7500 = vrcp.f32 %v13389_v14 }
 0xcc1   : > { %v7491_v32 = vpop.eup %7490  ;;  %5863 = vst [vmem:[%s12281_s11 + $0x30] sm:$0xff] %v5780_v13  ;;  %v2978_v38 = vmul.f32 %v7489_v61, %v13381_v34 }
 0xcc2   : > { %v7493_v62 = vpop.eup %7492  ;;  %v5231_v7 = vmul.f32 %v7491_v32, %v5078_v18 }
 0xcc3   : > { %v2977_v20 = vmul.f32 %v7493_v62, %v13382_v42  ;;  %v7495_v11 = vpop.eup %7494 }
 0xcc4   : > { %6994 = vrot.lane.b32.xlu2 %v6993_v45, %s7819_s3  ;;  %v7003_v15 = vpack.i.bf16 %v5232_v47, %v5231_v7  ;;  %v1809_v30 = vmul.f32 %v7495_v11, %v13384_v56  ;;  %v7497_v40 = vpop.eup %7496  ;;  %v6967_v45 = vunpack.i.h.bf16 %v6965_v24  ;;  %v4808_v11 = vsel %vm1214_vm1, %v12120_v12, 0.0 }
 0xcc5   : > { %v7008_v58 = vpack.i.bf16 %v2978_v38, %v2977_v20  ;;  %v1810_v18 = vmul.f32 %v7497_v40, %v13388_v17  ;;  %v7499_v23 = vpop.eup %7498  ;;  %v13397_v17 = vld [vmem:[#allocation95_spill] sm:$0xff] }
 0xcc6   : > { %v5782_v4 = vpop.f32.mrf.mxu0  ;;  %v5641_v9 = vsel %vm857_vm0, %v1809_v30, %v6951_v53  ;;  %v1811_v25 = vmul.f32 %v7499_v23, %v13390_v5  ;;  %v7501_v32 = vpop.eup %7500  ;;  %v13400_v5 = vld [vmem:[#allocation33_spill] sm:$0xff] }
 0xcc7   : > { %v5783_v49 = vadd.f32 %v12272_v37, %v5782_v4  ;;  %7009 = vrot.lane.b32.xlu1 %v7008_v58, %s7819_s3  ;;  %v5673_v28 = vsel %vm1214_vm1, %v5641_v9, %v6956_v51  ;;  %v5642_v46 = vsel %vm857_vm0, %v1810_v18, %v6952_v57  ;;  %v1812_v34 = vmul.f32 %v7501_v32, %v13391_v54  ;;  %v5155_v32 = vpop.f32.mrf.mxu3 }
 0xcc8   : > { %v5674_v31 = vsel %vm1214_vm1, %v5642_v46, %v6957_v43  ;;  %v5643_v8 = vsel %vm857_vm0, %v1811_v25, %v6966_v48  ;;  %v13398_v46 = vld [vmem:[#allocation96_spill] sm:$0xff] }
 0xcc9   : > { %7004 = vrot.lane.b32.xlu0 %v7003_v15, %s7818_s2  ;;  %5864 = vst [vmem:[%s12281_s11 + $0x38] sm:$0xff] %v5783_v49  ;;  %v5644_v62 = vsel %vm857_vm0, %v1812_v34, %v6967_v45  ;;  %v4811_v15 = vsel %vm1214_vm1, %v12138_v3, 0.0  ;;  %v13392_v49 = vld [vmem:[#allocation184_spill] sm:$0xff]  ;;  %v4814_v3 = vsel %vm1214_vm1, %v12192_v10, 0.0 }
 0xcca   : > { %7502 = vrcp.f32 %v13392_v49 }
 0xccb   : > { %v6980_v53 = vpop.permute.xlu0 %6979 }
 0xccc   : > { %6999 = vrot.lane.b32.xlu2 %v13385_v63, %s7817_s1  ;;  %v13393_v63 = vld [vmem:[#allocation115_spill] sm:$0xff] }
 0xccd   : > { %v6960_v52 = vpop.permute.xlu2 %6959  ;;  %7504 = vrcp.f32 %v13393_v63 }
 0xcce   : > { %v6961_v2 = vunpack.i.l.bf16 %v6960_v52  ;;  %v5785_v50 = vpop.f32.mrf.mxu0  ;;  %v6962_v35 = vunpack.i.h.bf16 %v6960_v52  ;;  %v6981_v52 = vunpack.i.l.bf16 %v6980_v53 }
 0xccf   : > { %v5786_v33 = vadd.f32 %v12272_v37, %v5785_v50  ;;  %7014 = vrot.lane.b32.xlu1 %v13386_v39, %s7817_s1  ;;  %v13395_v50 = vld [vmem:[#allocation54_spill] sm:$0xff]  ;;  %v5158_v49 = vpop.f32.mrf.mxu3 }
 0xcd0   : > { %v5706_v21 = vsel %vm5691_vm2, %v5673_v28, %v6961_v2  ;;  %v5707_v27 = vsel %vm5691_vm2, %v5674_v31, %v6962_v35  ;;  %v7503_v30 = vpop.eup %7502  ;;  %v13394_v2 = vld [vmem:[#allocation73_spill] sm:$0xff]  ;;  %v13396_v28 = vld [vmem:[#allocation104_spill] sm:$0xff]  ;;  %v6982_v35 = vunpack.i.h.bf16 %v6980_v53 }
 0xcd1   : > { %5802 = vmatmul.f32.gmra.mxu0 %v5706_v21  ;;  %5865 = vst [vmem:[%s12281_s11 + $0x40] sm:$0xff] %v5786_v33  ;;  %7506 = vrcp.f32 %v13394_v2  ;;  %v1813_v12 = vmul.f32 %v7503_v30, %v13395_v50  ;;  %v13399_v31 = vld [vmem:[#allocation32_spill] sm:$0xff] }
 0xcd2   : > { %7508 = vrcp.f32 %v13396_v28  ;;  %v13410_v28 = vld [vmem:[#allocation192_spill] sm:$0xff] }
 0xcd3   : > { %v5645_v40 = vsel %vm857_vm0, %v1813_v12, %v6981_v52  ;;  %v7505_v57 = vpop.eup %7504  ;;  %v13408_v52 = vld [vmem:[#allocation53_spill] sm:$0xff]  ;;  %v13409_v12 = vld [vmem:[#allocation118_spill] sm:$0xff] }
 0xcd4   : > { %v2980_v10 = vmul.f32 %v7505_v57, %v13397_v17 }
 0xcd5   : > { %v6970_v16 = vpop.permute.xlu2 %6969 }
 0xcd6   : > { %v5788_v60 = vpop.f32.mrf.mxu0  ;;  %v6971_v22 = vunpack.i.l.bf16 %v6970_v16  ;;  %v6972_v0 = vunpack.i.h.bf16 %v6970_v16  ;;  %v4795_v47 = vpop.xlane.xlu1 %4794  ;;  %v4820_v16 = vsel %vm1214_vm1, %v12245_v44, 0.0  ;;  %v13401_v44 = vld [vmem:[#allocation161_spill] sm:$0xff] }
 0xcd7   : > { %v5789_v1 = vadd.f32 %v12272_v37, %v5788_v60  ;;  %v7507_v43 = vpop.eup %7506  ;;  %v13402_v25 = vpack.i.bf16 %v13400_v5, %v13401_v44  ;;  %7510 = vrcp.f32 %v4795_v47 }
 0xcd8   : > { %v5675_v13 = vsel %vm1214_vm1, %v5643_v8, %v6971_v22  ;;  %v5676_v42 = vsel %vm1214_vm1, %v5644_v62, %v6972_v0  ;;  %v7509_v18 = vpop.eup %7508 }
 0xcd9   : > { %5805 = vmatmul.f32.gmra.mxu0 %v5707_v27  ;;  %5866 = vst [vmem:[%s12281_s11 + $0x48] sm:$0xff] %v5789_v1  ;;  %v2979_v24 = vmul.f32 %v7509_v18, %v13398_v46  ;;  %v1814_v1 = vmul.f32 %v7507_v43, %v13399_v31  ;;  %v13412_v18 = vld [vmem:[#allocation52_spill] sm:$0xff]  ;;  %v13413_v31 = vld [vmem:[#allocation130_spill] sm:$0xff] }
 0xcdb   : > { %v7023_v23 = vpack.i.bf16 %v2980_v10, %v2979_v24  ;;  %v5646_v48 = vsel %vm857_vm0, %v1814_v1, %v6982_v35  ;;  %v5161_v1 = vpop.f32.mrf.mxu3 }
 0xcdd   : > { %v6975_v6 = vpop.permute.xlu2 %6974 }
 0xcde   : > { %v6976_v26 = vunpack.i.l.bf16 %v6975_v6  ;;  %v6977_v38 = vunpack.i.h.bf16 %v6975_v6  ;;  %v4801_v58 = vpop.xlane.xlu1 %4800  ;;  %v5084_v6 = vpop.f32.mrf.mxu2 }
 0xce0   : > { %v5708_v61 = vsel %vm5691_vm2, %v5675_v13, %v6976_v26  ;;  %v5709_v20 = vsel %vm5691_vm2, %v5676_v42, %v6977_v38  ;;  %v13403_v26 = vld [vmem:[#allocation149_spill] sm:$0xff] }
 0xce1   : > { %5808 = vmatmul.f32.gmra.mxu0 %v5708_v61  ;;  %v13404_v8 = vpack.i.bf16 %v11899_v29, %v13403_v26  ;;  %v7511_v61 = vpop.eup %7510 }
 0xce2   : > { %v5233_v34 = vmul.f32 %v7511_v61, %v5084_v6  ;;  %v13415_v6 = vld [vmem:[#allocation191_spill] sm:$0xff]  ;;  %v13416_v61 = vld [vmem:[#allocation74_spill] sm:$0xff] }
 0xce6   : > { %v5087_v0 = vpop.f32.mrf.mxu2 }
 0xce9   : > { %5811 = vmatmul.f32.gmra.mxu0 %v5709_v20 }
 0xcee   : > { %v5791_v7 = vpop.f32.mrf.mxu0 }
 0xcef   : > { %v5792_v4 = vadd.f32 %v12272_v37, %v5791_v7  ;;  %v13405_v7 = vld [vmem:[#allocation126_spill] sm:$0xff] }
 0xcf1   : > { %5867 = vst [vmem:[%s12281_s11 + $0x50] sm:$0xff] %v5792_v4 }
 0xcf3   : > { %4812 = vadd.xlane.f32.xlu0 %v4811_v15 }
 0xcf5   : > { %4809 = vadd.xlane.f32.xlu2 %v4808_v11 }
 0xcf6   : > { %v5794_v36 = vpop.f32.mrf.mxu0  ;;  %v6985_v51 = vpop.permute.xlu1 %6984 }
 0xcf7   : > { %v5795_v56 = vadd.f32 %v12272_v37, %v5794_v36  ;;  %v6986_v9 = vunpack.i.l.bf16 %v6985_v51  ;;  %v6987_v60 = vunpack.i.h.bf16 %v6985_v51  ;;  %v13407_v51 = vld [vmem:[#allocation140_spill] sm:$0xff] }
 0xcf9   : > { %5868 = vst [vmem:[%s12281_s11 + $0x58] sm:$0xff] %v5795_v56  ;;  %4815 = vadd.xlane.f32.xlu1 %v4814_v3  ;;  %v5677_v39 = vsel %vm1214_vm1, %v5645_v40, %v6986_v9  ;;  %v5678_v14 = vsel %vm1214_vm1, %v5646_v48, %v6987_v60 }
 0xcfd   : > { %v6990_v33 = vpop.permute.xlu0 %6989 }
 0xcfe   : > { %v6991_v21 = vunpack.i.l.bf16 %v6990_v33  ;;  %v6992_v27 = vunpack.i.h.bf16 %v6990_v33 }
 0xd00   : > { %v5710_v41 = vsel %vm5691_vm2, %v5677_v39, %v6991_v21  ;;  %v5711_v22 = vsel %vm5691_vm2, %v5678_v14, %v6992_v27  ;;  %v13411_v39 = vld [vmem:[#allocation18_spill] sm:$0xff] }
 0xd01   : > { %5814 = vmatmul.f32.gmra.mxu0 %v5710_v41  ;;  %4821 = vadd.xlane.f32.xlu1 %v4820_v16 }
 0xd07   : > { %7024 = vrot.lane.b32.xlu0 %v7023_v23, %s7819_s3  ;;  %v13414_v23 = vld [vmem:[#allocation187_spill] sm:$0xff] }
 0xd09   : > { %5817 = vmatmul.f32.gmra.mxu0 %v5711_v22 }
 0xd0f   : > { %7029 = vrot.lane.b32.xlu0 %v13402_v25, %s7817_s1 }
 0xd1a   : > { %7044 = vrot.lane.b32.xlu1 %v13404_v8, %s7817_s1 }
 0xd1f   : > { %v4798_v13 = vpop.xlane.xlu2 %4797 }
 0xd20   : > { %7512 = vrcp.f32 %v4798_v13 }
 0xd21   : > { %7514 = vrcp.f32 %v4801_v58  ;;  %v13406_v58 = vld [vmem:[#allocation174_spill] sm:$0xff]  ;;  %v4807_v2 = vpop.xlane.xlu1 %4806 }
 0xd24   : > { %v5797_v54 = vpop.f32.mrf.mxu0 }
 0xd25   : > { %v5798_v62 = vadd.f32 %v12272_v37, %v5797_v54 }
 0xd26   : > { %v7513_v45 = vpop.eup %7512 }
 0xd27   : > { %v5234_v38 = vmul.f32 %v7513_v45, %v5087_v0  ;;  %5869 = vst [vmem:[%s12281_s11 + $0x60] sm:$0xff] %v5798_v62  ;;  %v6995_v29 = vpop.permute.xlu2 %6994  ;;  %v7515_v47 = vpop.eup %7514 }
 0xd28   : > { %v4804_v42 = vpop.xlane.xlu0 %4803  ;;  %v5235_v53 = vmul.f32 %v7515_v47, %v5155_v32  ;;  %v6996_v21 = vunpack.i.l.bf16 %v6995_v29  ;;  %v6997_v60 = vunpack.i.h.bf16 %v6995_v29  ;;  %v13418_v29 = vld [vmem:[#allocation150_spill] sm:$0xff] }
 0xd29   : > { %7516 = vrcp.f32 %v4804_v42  ;;  %v7018_v20 = vpack.i.bf16 %v5234_v38, %v5233_v34  ;;  %v4817_v34 = vsel %vm1214_vm1, %v12203_v59, 0.0  ;;  %v13417_v38 = vld [vmem:[#allocation63_spill] sm:$0xff] }
 0xd2a   : > { %7518 = vrcp.f32 %v13405_v7 }
 0xd2b   : > { %7019 = vrot.lane.b32.xlu2 %v7018_v20, %s7818_s2  ;;  %7520 = vrcp.f32 %v13406_v58 }
 0xd2c   : > { %v5800_v4 = vpop.f32.mrf.mxu0  ;;  %7522 = vrcp.f32 %v13407_v51 }
 0xd2d   : > { %v5801_v11 = vadd.f32 %v12272_v37, %v5800_v4  ;;  %7524 = vrcp.f32 %v13409_v12  ;;  %v5164_v4 = vpop.f32.mrf.mxu3 }
 0xd2e   : > { %7526 = vrcp.f32 %v4807_v2  ;;  %v13420_v2 = vld [vmem:[#allocation85_spill] sm:$0xff] }
 0xd2f   : > { %v7517_v15 = vpop.eup %7516  ;;  %5870 = vst [vmem:[%s12281_s11 + $0x68] sm:$0xff] %v5801_v11  ;;  %v7000_v9 = vpop.permute.xlu2 %6999  ;;  %7528 = vrcp.f32 %v13412_v18  ;;  %v13425_v18 = vld [vmem:[#allocation109_spill] sm:$0xff] }
 0xd30   : > { %v5236_v36 = vmul.f32 %v7517_v15, %v5158_v49  ;;  %v7519_v30 = vpop.eup %7518  ;;  %v7001_v40 = vunpack.i.l.bf16 %v7000_v9  ;;  %7530 = vrcp.f32 %v13413_v31  ;;  %v7002_v27 = vunpack.i.h.bf16 %v7000_v9  ;;  %v13421_v9 = vld [vmem:[#allocation129_spill] sm:$0xff] }
 0xd31   : > { %v7521_v63 = vpop.eup %7520  ;;  %v2982_v3 = vmul.f32 %v7519_v30, %v13408_v52 }
 0xd32   : > { %v7033_v56 = vpack.i.bf16 %v5236_v36, %v5235_v53  ;;  %v7523_v50 = vpop.eup %7522  ;;  %v1815_v57 = vmul.f32 %v7521_v63, %v13411_v39  ;;  %v13419_v36 = vld [vmem:[#allocation124_spill] sm:$0xff] }
 0xd33   : > { %v2981_v33 = vmul.f32 %v7523_v50, %v13410_v28  ;;  %v7525_v16 = vpop.eup %7524 }
 0xd34   : > { %7034 = vrot.lane.b32.xlu0 %v7033_v56, %s7818_s2  ;;  %v5647_v10 = vsel %vm857_vm0, %v1815_v57, %v6996_v21  ;;  %v7527_v24 = vpop.eup %7526  ;;  %v1816_v48 = vmul.f32 %v7525_v16, %v13414_v23 }
 0xd35   : > { %v7038_v41 = vpack.i.bf16 %v2982_v3, %v2981_v33  ;;  %v5679_v35 = vsel %vm1214_vm1, %v5647_v10, %v7001_v40  ;;  %v5237_v22 = vmul.f32 %v7527_v24, %v5161_v1  ;;  %v7529_v5 = vpop.eup %7528  ;;  %v5167_v51 = vpop.f32.mrf.mxu3  ;;  %v13422_v33 = vld [vmem:[#allocation82_spill] sm:$0xff]  ;;  %v13423_v40 = vld [vmem:[#allocation127_spill] sm:$0xff] }
 0xd36   : > { %v5648_v44 = vsel %vm857_vm0, %v1816_v48, %v6997_v60  ;;  %v2983_v26 = vmul.f32 %v7529_v5, %v13415_v6  ;;  %v7531_v13 = vpop.eup %7530 }
 0xd37   : > { %v5680_v25 = vsel %vm1214_vm1, %v5648_v44, %v7002_v27  ;;  %v2984_v32 = vmul.f32 %v7531_v13, %v13416_v61  ;;  %v13427_v13 = vld [vmem:[#allocation120_spill] sm:$0xff] }
 0xd39   : > { %v7048_v45 = vpack.i.bf16 %v2984_v32, %v2983_v26  ;;  %v7010_v20 = vpop.permute.xlu1 %7009 }
 0xd3a   : > { %v7012_v48 = vunpack.i.h.bf16 %v7010_v20 }
 0xd3b   : > { %v7005_v43 = vpop.permute.xlu0 %7004 }
 0xd3c   : > { %v7006_v17 = vunpack.i.l.bf16 %v7005_v43  ;;  %7039 = vrot.lane.b32.xlu0 %v7038_v41, %s7819_s3  ;;  %v7007_v14 = vunpack.i.h.bf16 %v7005_v43  ;;  %v7011_v43 = vunpack.i.l.bf16 %v7010_v20 }
 0xd3d   : > { %v5170_v50 = vpop.f32.mrf.mxu3 }
 0xd3e   : > { %v5712_v46 = vsel %vm5691_vm2, %v5679_v35, %v7006_v17  ;;  %v5713_v8 = vsel %vm5691_vm2, %v5680_v25, %v7007_v14  ;;  %v13424_v17 = vld [vmem:[#allocation111_spill] sm:$0xff] }
 0xd3f   : > { %5820 = vmatmul.f32.gmra.mxu0 %v5712_v46 }
 0xd41   : > { %v7015_v59 = vpop.permute.xlu1 %7014 }
 0xd42   : > { %v7016_v10 = vunpack.i.l.bf16 %v7015_v59  ;;  %v7017_v14 = vunpack.i.h.bf16 %v7015_v59 }
 0xd44   : > { %5583 = vrot.lane.b32.xlu0 %v5237_v22, %s7818_s2  ;;  %v13426_v22 = vld [vmem:[#allocation113_spill] sm:$0xff] }
 0xd47   : > { %5823 = vmatmul.f32.gmra.mxu0 %v5713_v8 }
 0xd4c   : > { %7049 = vrot.lane.b32.xlu0 %v7048_v45, %s7819_s3 }
 0xd4e   : > { %v5803_v0 = vpop.f32.mrf.mxu0 }
 0xd4f   : > { %v5804_v54 = vadd.f32 %v12272_v37, %v5803_v0  ;;  %v13428_v0 = vld [vmem:[#allocation84_spill] sm:$0xff] }
 0xd51   : > { %5871 = vst [vmem:[%s12281_s11 + $0x70] sm:$0xff] %v5804_v54 }
 0xd54   : > { %4818 = vadd.xlane.f32.xlu2 %v4817_v34  ;;  %5459 = vrot.lane.b32.xlu0 %v13417_v38, %s7817_s1  ;;  %v13429_v34 = vld [vmem:[#allocation143_spill] sm:$0xff] }
 0xd56   : > { %v5806_v62 = vpop.f32.mrf.mxu0 }
 0xd57   : > { %v5807_v42 = vadd.f32 %v12272_v37, %v5806_v62 }
 0xd59   : > { %5872 = vst [vmem:[%s12281_s11 + $0x78] sm:$0xff] %v5807_v42 }
 0xd5c   : > { %5461 = vrot.lane.b32.xlu0 %v13418_v29, %s7817_s1 }
 0xd5e   : > { %v5809_v47 = vpop.f32.mrf.mxu0 }
 0xd5f   : > { %v5810_v7 = vadd.f32 %v12272_v37, %v5809_v47 }
 0xd61   : > { %5873 = vst [vmem:[%s12281_s11 + $0x80] sm:$0xff] %v5810_v7 }
 0xd64   : > { %5463 = vrot.lane.b32.xlu0 %v11939_v55, %s7817_s1 }
 0xd66   : > { %v4813_v15 = vpop.xlane.xlu0 %4812  ;;  %v5812_v49 = vpop.f32.mrf.mxu0 }
 0xd67   : > { %7532 = vrcp.f32 %v4813_v15  ;;  %v5813_v11 = vadd.f32 %v12272_v37, %v5812_v49 }
 0xd68   : > { %v4810_v58 = vpop.xlane.xlu2 %4809 }
 0xd69   : > { %5874 = vst [vmem:[%s12281_s11 + $0x88] sm:$0xff] %v5813_v11  ;;  %7534 = vrcp.f32 %v4810_v58  ;;  %v13431_v11 = vld [vmem:[#allocation20_spill] sm:$0xff] }
 0xd6a   : > { %7536 = vrcp.f32 %v13419_v36 }
 0xd6c   : > { %5465 = vrot.lane.b32.xlu0 %v11942_v19, %s7817_s1  ;;  %v4816_v56 = vpop.xlane.xlu1 %4815  ;;  %s7737_s1 = scalar_lea.hbm %s12585_s6, 512 }
 0xd6d   : > { %v7533_v53 = vpop.eup %7532  ;;  %7538 = vrcp.f32 %v4816_v56  ;;  %p7739_p12 = scmp.lt.s32.totalorder %s7737_s1, %s7733_s24 }
 0xd6e   : > { %v5239_v30 = vmul.f32 %v7533_v53, %v5167_v51  ;;  %7540 = vrcp.f32 %v13420_v2 }
 0xd6f   : > { %v7535_v63 = vpop.eup %7534  ;;  %7542 = vrcp.f32 %v13422_v33  ;;  %p7740_p13 = por %p7739_p12, %p7738_p11 }
 0xd70   : > { %5587 = vrot.lane.b32.xlu1 %v5239_v30, %s7818_s2  ;;  %v5238_v55 = vmul.f32 %v7535_v63, %v5164_v4  ;;  %v7537_v52 = vpop.eup %7536  ;;  %7544 = vrcp.f32 %v13424_v17  ;;  %v13430_v4 = vld [vmem:[#allocation121_spill] sm:$0xff] }
 0xd71   : > { %v2985_v19 = vmul.f32 %v7537_v52, %v13421_v9  ;;  %7546 = vrcp.f32 %v13427_v13  ;;  %v13432_v52 = vld [vmem:[#allocation170_spill] sm:$0xff]  ;;  %p7741_p0 = pnand %p7740_p13, %p7736_p7 }
 0xd72   : > { %5585 = vrot.lane.b32.xlu2 %v5238_v55, %s7818_s2  ;;  %7548 = vrcp.f32 %v13428_v0 }
 0xd73   : > { %v7539_v3 = vpop.eup %7538  ;;  %7550 = vrcp.f32 %v13430_v4 }
 0xd74   : > { %v5240_v12 = vmul.f32 %v7539_v3, %v5170_v50  ;;  %v7541_v28 = vpop.eup %7540  ;;  %v4822_v59 = vpop.xlane.xlu1 %4821 }
 0xd75   : > { %v2986_v39 = vmul.f32 %v7541_v28, %v13423_v40  ;;  %v7543_v41 = vpop.eup %7542  ;;  %v13433_v40 = vld [vmem:[#allocation128_spill] sm:$0xff] }
 0xd76   : > { %v1817_v35 = vmul.f32 %v7543_v41, %v13425_v18  ;;  %v7545_v23 = vpop.eup %7544  ;;  %7552 = vrcp.f32 %v13433_v40 }
 0xd77   : > { %v1818_v5 = vmul.f32 %v7545_v23, %v13426_v22  ;;  %v7547_v32 = vpop.eup %7546 }
 0xd78   : > { %5335 = vrot.lane.b32.xlu1 %v2985_v19, %s7819_s3  ;;  %v5649_v60 = vsel %vm857_vm0, %v1817_v35, %v7011_v43  ;;  %v1819_v38 = vmul.f32 %v7547_v32, %v13429_v34  ;;  %v7549_v7 = vpop.eup %7548 }
 0xd79   : > { %v5681_v1 = vsel %vm1214_vm1, %v5649_v60, %v7016_v10  ;;  %v5650_v25 = vsel %vm857_vm0, %v1818_v5, %v7012_v48  ;;  %v7025_v8 = vpop.permute.xlu0 %7024  ;;  %v1820_v58 = vmul.f32 %v7549_v7, %v13431_v11  ;;  %v7551_v56 = vpop.eup %7550  ;;  %v13434_v10 = vld [vmem:[#allocation169_spill] sm:$0xff] }
 0xd7a   : > { %5589 = vrot.lane.b32.xlu2 %v5240_v12, %s7818_s2  ;;  %v5682_v6 = vsel %vm1214_vm1, %v5650_v25, %v7017_v14  ;;  %v7026_v45 = vunpack.i.l.bf16 %v7025_v8  ;;  %v7027_v15 = vunpack.i.h.bf16 %v7025_v8  ;;  %v1821_v3 = vmul.f32 %v7551_v56, %v13432_v52  ;;  %v13435_v14 = vld [vmem:[#allocation137_spill] sm:$0xff]  ;;  %v13437_v8 = vld [vmem:[#allocation30_spill] sm:$0xff] }
 0xd7b   : > { %v13439_v11 = vld [vmem:[#allocation141_spill] sm:$0xff] }
 0xd7c   : > { %v5651_v20 = vsel %vm857_vm0, %v1819_v38, %v7026_v45  ;;  %v5652_v51 = vsel %vm857_vm0, %v1820_v58, %v7027_v15  ;;  %v7553_v41 = vpop.eup %7552  ;;  %v13438_v38 = vld [vmem:[#allocation22_spill] sm:$0xff] }
 0xd7d   : > { %v1822_v18 = vmul.f32 %v7553_v41, %v13434_v10 }
 0xd7e   : > { %v5815_v21 = vpop.f32.mrf.mxu0 }
 0xd7f   : > { %v5816_v57 = vadd.f32 %v12272_v37, %v5815_v21 }
 0xd80   : > { %5337 = vrot.lane.b32.xlu1 %v2986_v39, %s7819_s3 }
 0xd81   : > { %5875 = vst [vmem:[%s12281_s11 + $0x90] sm:$0xff] %v5816_v57  ;;  %v7030_v61 = vpop.permute.xlu0 %7029 }
 0xd82   : > { %v7031_v54 = vunpack.i.l.bf16 %v7030_v61  ;;  %v7032_v49 = vunpack.i.h.bf16 %v7030_v61 }
 0xd84   : > { %v5683_v29 = vsel %vm1214_vm1, %v5651_v20, %v7031_v54  ;;  %v5684_v30 = vsel %vm1214_vm1, %v5652_v51, %v7032_v49  ;;  %v13441_v51 = vld [vmem:[#allocation34_spill] sm:$0xff] }
 0xd85   : > { %v7020_v16 = vpop.permute.xlu2 %7019 }
 0xd86   : > { %v7021_v46 = vunpack.i.l.bf16 %v7020_v16  ;;  %v5818_v24 = vpop.f32.mrf.mxu0  ;;  %v7022_v44 = vunpack.i.h.bf16 %v7020_v16 }
 0xd87   : > { %v5819_v31 = vadd.f32 %v12272_v37, %v5818_v24  ;;  %v5173_v24 = vpop.f32.mrf.mxu3 }
 0xd88   : > { %v5714_v27 = vsel %vm5691_vm2, %v5681_v1, %v7021_v46  ;;  %v5715_v26 = vsel %vm5691_vm2, %v5682_v6, %v7022_v44 }
 0xd89   : > { %5876 = vst [vmem:[%s12281_s11 + $0x98] sm:$0xff] %v5819_v31  ;;  %5826 = vmatmul.f32.gmra.mxu0 %v5714_v27 }
 0xd8c   : > { %v7045_v2 = vpop.permute.xlu1 %7044 }
 0xd8d   : > { %v7046_v19 = vunpack.i.l.bf16 %v7045_v2  ;;  %v7047_v16 = vunpack.i.h.bf16 %v7045_v2 }
 0xd8f   : > { %v5176_v22 = vpop.f32.mrf.mxu3 }
 0xd91   : > { %5829 = vmatmul.f32.gmra.mxu0 %v5715_v26  ;;  %v13436_v26 = vld [vmem:[#allocation105_spill] sm:$0xff] }
 0xda6   : > { %v7035_v62 = vpop.permute.xlu0 %7034 }
 0xda7   : > { %v7036_v42 = vunpack.i.l.bf16 %v7035_v62  ;;  %v7037_v53 = vunpack.i.h.bf16 %v7035_v62 }
 0xda9   : > { %v5716_v47 = vsel %vm5691_vm2, %v5683_v29, %v7036_v42  ;;  %v5717_v55 = vsel %vm5691_vm2, %v5684_v30, %v7037_v53 }
 0xdaa   : > { %5832 = vmatmul.f32.gmra.mxu0 %v5716_v47 }
 0xdae   : > { %v7040_v36 = vpop.permute.xlu0 %7039 }
 0xdaf   : > { %v7041_v63 = vunpack.i.l.bf16 %v7040_v36  ;;  %v7042_v17 = vunpack.i.h.bf16 %v7040_v36  ;;  %v13440_v36 = vld [vmem:[#allocation190_spill] sm:$0xff] }
 0xdb1   : > { %v5653_v9 = vsel %vm857_vm0, %v1821_v3, %v7041_v63  ;;  %v5654_v35 = vsel %vm857_vm0, %v1822_v18, %v7042_v17 }
 0xdb2   : > { %5835 = vmatmul.f32.gmra.mxu0 %v5717_v55  ;;  %v5685_v12 = vsel %vm1214_vm1, %v5653_v9, %v7046_v19  ;;  %v5686_v1 = vsel %vm1214_vm1, %v5654_v35, %v7047_v16 }
 0xdb6   : > { %v5584_v50 = vpop.permute.xlu0 %5583 }
 0xdb7   : > { %v5718_v28 = vsel %vm5691_vm2, %v5685_v12, %v5584_v50  ;;  %v13442_v12 = vld [vmem:[#allocation156_spill] sm:$0xff] }
 0xdba   : > { %5838 = vmatmul.f32.gmra.mxu0 %v5718_v28 }
 0xdbc   : > { %v5821_v33 = vpop.f32.mrf.mxu0 }
 0xdbd   : > { %v5822_v21 = vadd.f32 %v12272_v37, %v5821_v33 }
 0xdbe   : > { %v7050_v23 = vpop.permute.xlu0 %7049 }
 0xdbf   : > { %5877 = vst [vmem:[%s12281_s11 + $0xa0] sm:$0xff] %v5822_v21  ;;  %v7051_v25 = vunpack.i.l.bf16 %v7050_v23  ;;  %v7052_v34 = vunpack.i.h.bf16 %v7050_v23 }
 0xdc4   : > { %v5824_v39 = vpop.f32.mrf.mxu0 }
 0xdc5   : > { %v5825_v57 = vadd.f32 %v12272_v37, %v5824_v39 }
 0xdc6   : > { %v5460_v6 = vpop.permute.xlu0 %5459 }
 0xdc7   : > { %5878 = vst [vmem:[%s12281_s11 + $0xa8] sm:$0xff] %v5825_v57  ;;  %v4819_v43 = vpop.xlane.xlu2 %4818 }
 0xdc8   : > { %7554 = vrcp.f32 %v4819_v43 }
 0xdc9   : > { %7556 = vrcp.f32 %v4822_v59 }
 0xdca   : > { %7558 = vrcp.f32 %v13435_v14 }
 0xdcb   : > { %7560 = vrcp.f32 %v13436_v26 }
 0xdcc   : > { %7562 = vrcp.f32 %v13439_v11 }
 0xdcd   : > { %7564 = vrcp.f32 %v13440_v36 }
 0xdce   : > { %v7555_v46 = vpop.eup %7554  ;;  %v5462_v42 = vpop.permute.xlu0 %5461 }
 0xdcf   : > { %v5586_v60 = vpop.permute.xlu2 %5585  ;;  %v5241_v31 = vmul.f32 %v7555_v46, %v5173_v24  ;;  %v7557_v48 = vpop.eup %7556 }
 0xdd0   : > { %v5719_v27 = vsel %vm5691_vm2, %v5686_v1, %v5586_v60  ;;  %v5242_v5 = vmul.f32 %v7557_v48, %v5176_v22  ;;  %v7559_v44 = vpop.eup %7558 }
 0xdd1   : > { %5591 = vrot.lane.b32.xlu2 %v5241_v31, %s7818_s2  ;;  %5841 = vmatmul.f32.gmra.mxu0 %v5719_v27  ;;  %v1823_v13 = vmul.f32 %v7559_v44, %v13437_v8  ;;  %v7561_v54 = vpop.eup %7560 }
 0xdd2   : > { %v1824_v62 = vmul.f32 %v7561_v54, %v13438_v38  ;;  %v7563_v58 = vpop.eup %7562 }
 0xdd3   : > { %v5655_v61 = vsel %vm857_vm0, %v1823_v13, %v7051_v25  ;;  %v1825_v56 = vmul.f32 %v7563_v58, %v13441_v51  ;;  %v7565_v3 = vpop.eup %7564 }
 0xdd4   : > { %v5687_v32 = vsel %vm1214_vm1, %v5655_v61, %v5460_v6  ;;  %v5656_v29 = vsel %vm857_vm0, %v1824_v62, %v7052_v34  ;;  %v1826_v28 = vmul.f32 %v7565_v3, %v13442_v12 }
 0xdd5   : > { %v5688_v47 = vsel %vm1214_vm1, %v5656_v29, %v5462_v42 }
 0xdd6   : > { %v5464_v63 = vpop.permute.xlu0 %5463 }
 0xdd7   : > { %v5590_v20 = vpop.permute.xlu2 %5589 }
 0xdd8   : > { %v5721_v7 = vsel %vm5691_vm2, %v5688_v47, %v5590_v20 }
 0xdd9   : > { %5593 = vrot.lane.b32.xlu2 %v5242_v5, %s7818_s2 }
 0xdde   : > { %v5466_v39 = vpop.permute.xlu0 %5465 }
 0xde2   : > { %v5588_v45 = vpop.permute.xlu1 %5587 }
 0xde3   : > { %v5720_v0 = vsel %vm5691_vm2, %v5687_v32, %v5588_v45 }
 0xde4   : > { %5844 = vmatmul.f32.gmra.mxu0 %v5720_v0 }
 0xdea   : > { %v5336_v53 = vpop.permute.xlu1 %5335 }
 0xdeb   : > { %v5657_v55 = vsel %vm857_vm0, %v1825_v56, %v5336_v53 }
 0xdec   : > { %5847 = vmatmul.f32.gmra.mxu0 %v5721_v7  ;;  %v5689_v9 = vsel %vm1214_vm1, %v5657_v55, %v5464_v63 }
 0xdf2   : > { %v5338_v50 = vpop.permute.xlu1 %5337 }
 0xdf3   : > { %v5658_v21 = vsel %vm857_vm0, %v1826_v28, %v5338_v50 }
 0xdf4   : > { %v5690_v41 = vsel %vm1214_vm1, %v5658_v21, %v5466_v39 }
 0xe06   : > { %v5827_v4 = vpop.f32.mrf.mxu0 }
 0xe07   : > { %v5828_v59 = vadd.f32 %v12272_v37, %v5827_v4 }
 0xe09   : > { %5879 = vst [vmem:[%s12281_s11 + $0xb0] sm:$0xff] %v5828_v59 }
 0xe0e   : > { %v5830_v15 = vpop.f32.mrf.mxu0 }
 0xe0f   : > { %v5831_v49 = vadd.f32 %v12272_v37, %v5830_v15 }
 0xe11   : > { %5880 = vst [vmem:[%s12281_s11 + $0xb8] sm:$0xff] %v5831_v49 }
 0xe27   : > { %v5833_v30 = vpop.f32.mrf.mxu0 }
 0xe28   : > { %v5834_v52 = vadd.f32 %v12272_v37, %v5833_v30 }
 0xe2a   : > { %5881 = vst [vmem:[%s12281_s11 + $0xc0] sm:$0xff] %v5834_v52 }
 0xe2b   : > { %v5592_v2 = vpop.permute.xlu2 %5591 }
 0xe2c   : > { %v5722_v19 = vsel %vm5691_vm2, %v5689_v9, %v5592_v2 }
 0xe2d   : > { %5850 = vmatmul.f32.gmra.mxu0 %v5722_v19 }
 0xe2f   : > { %v5836_v33 = vpop.f32.mrf.mxu0 }
 0xe30   : > { %v5837_v40 = vadd.f32 %v12272_v37, %v5836_v33 }
 0xe32   : > { %5882 = vst [vmem:[%s12281_s11 + $0xc8] sm:$0xff] %v5837_v40 }
 0xe33   : > { %v5594_v57 = vpop.permute.xlu2 %5593 }
 0xe34   : > { %v5723_v43 = vsel %vm5691_vm2, %v5690_v41, %v5594_v57 }
 0xe35   : > { %5853 = vmatmul.f32.gmra.mxu0 %v5723_v43 }
 0xe37   : > { %v5839_v17 = vpop.f32.mrf.mxu0 }
 0xe38   : > { %v5840_v10 = vadd.f32 %v12272_v37, %v5839_v17 }
 0xe3a   : > { %5883 = vst [vmem:[%s12281_s11 + $0xd0] sm:$0xff] %v5840_v10 }
 0xe4e   : > { %v5842_v18 = vpop.f32.mrf.mxu0 }
 0xe4f   : > { %v5843_v35 = vadd.f32 %v12272_v37, %v5842_v18 }
 0xe51   : > { %5884 = vst [vmem:[%s12281_s11 + $0xd8] sm:$0xff] %v5843_v35 }
 0xe61   : > { %v5845_v16 = vpop.f32.mrf.mxu0 }
 0xe62   : > { %v5846_v46 = vadd.f32 %v12272_v37, %v5845_v16 }
 0xe64   : > { %5885 = vst [vmem:[%s12281_s11 + $0xe0] sm:$0xff] %v5846_v46 }
 0xe69   : > { %v5848_v24 = vpop.f32.mrf.mxu0 }
 0xe6a   : > { %v5849_v60 = vadd.f32 %v12272_v37, %v5848_v24 }
 0xe6c   : > { %5886 = vst [vmem:[%s12281_s11 + $0xe8] sm:$0xff] %v5849_v60 }
 0xeaa   : > { %v5851_v31 = vpop.f32.mrf.mxu0 }
 0xeab   : > { %v5852_v1 = vadd.f32 %v12272_v37, %v5851_v31 }
 0xead   : > { %5887 = vst [vmem:[%s12281_s11 + $0xf0] sm:$0xff] %v5852_v1 }
 0xeb2   : > { %v5854_v27 = vpop.f32.mrf.mxu0 }
 0xeb3   : > { %v5855_v23 = vadd.f32 %v12272_v37, %v5854_v27 }
 0xeb5   : > { %5888 = vst [vmem:[%s12281_s11 + $0xf8] sm:$0xff] %v5855_v23 }
 0xeb6   : > { %7744 = shalt.err (!%p7741_p0)
}
 0xeb7   : > { %s7820_s15 = smov 128   ;;  %s7821_s29 = smov 8  }
 0xeb8   : > { %6509 = dma.vmem_to_hbm [thread:$0]  (%p7957_p2), %s5905_s20, 4096, %s5907_s17, %s5890_s28, %s7820_s15, %s7820_s15, %s7821_s29  }
 0xeb9 PF: > { %s5921_s30 = sand.u32 1, %s7787_s21   ;;  %p6529_p4 = pnand %p6037_p10, %p7904_p5 }
 0xeba   : > { %s5922_s11 = scalar_lea.sflag [#allocation4], %s5921_s30 }
 0xebb   : > { %p6530_p6 = pneg %p6529_p4 }
 0xebd   : > { %7782 = dma.done.wait (%p6530_p6), %s5922_s11, 4096  }
 0xebe   : > { %7784 = vsyncadd (%p6530_p6), %s5922_s11, 4294963200  ;;  %s24_s26 = sadd.s32 1, %s7807_s26   ;;  %s13443_s21 = smov %s7791_s22 }
 0xebf   : > { %p21_p8 = scmp.ge.s32.totalorder %s24_s26, 4   ;;  %s13444_s22 = smov %s7795_s23 }
 0xec0   : > { %s13445_s23 = smov %s7967_s18  ;;  %s13446_s24 = smov %s7803_s25 }
 0xec1   : > { %s13447_s25 = smov %s13449_s12  ;;  %23 = sbr.rel (!%p21_p8) target bundleno = 12 (0xc), region = 106 }
 0xec6   :  { %5928 = vsyncpa [#allocation3], 1 }
 0xec7   :  { %5930 = vsyncpa [#allocation3 + $0x1], 1 }
 0xec8   :  { %5931 = vsyncpa [#allocation6], 1 }
 0xec9   :  { %5932 = vsyncpa [#allocation9], 1 }
 0xeca   :  { %5933 = vsyncpa [#allocation4], 1 }
 0xecb   :  { %5935 = vsyncpa [#allocation4 + $0x1], 1 }

</bundles_post_ra>
